<compile_context>
chip_gen: v5e
topology: v5e:2x2
jax: 0.10.0
libtpu: 0.0.40
codegen_flags: <defaults>
</compile_context>

<pallas_src>
import functools

import jax
import jax.numpy as jnp
from jax.experimental import pallas as pl
from jax.experimental.pallas import tpu as pltpu

_EPS = 1e-8  # torch.nn.functional.cosine_similarity default eps


def _round_up(x, m):
    return (x + m - 1) // m * m


def _pick_tile(dim, preferred, align):
    """Largest divisor of `dim` that is a multiple of `align` and <= preferred,
    falling back to the full dim."""
    if dim <= preferred:
        return dim
    t = (preferred // align) * align
    while t >= align:
        if dim % t == 0:
            return t
        t -= align
    return dim


@functools.lru_cache(maxsize=None)
def _vmem_limit_bytes():
    """Scoped VMEM limit sized from the actual chip (75% of capacity)."""
    cap = None
    try:
        cap = getattr(pltpu.get_tpu_info(), "vmem_capacity_bytes", None)
    except Exception:
        cap = None
    if not cap:
        cap = 64 << 20                      # conservative (v7x-sized) fallback
    lim = int(cap) * 3 // 4
    return max(32 << 20, min(lim, 96 << 20))


# -----------------------------------------------------------------------------
# CDWeights re-weighting — single fused kernel (grid over batch):
#   channel gate  = 1 - sigmoid(cos over H*W)  per (b, c)
#   spatial gate  = 1 - sigmoid(cos over C)    per (b, h, w)
#   out = x * (spatial gate * channel gate), emitted in bf16.
# -----------------------------------------------------------------------------
def _cd_kernel(xa_ref, xb_ref, oa_ref, ob_ref):
    xa = xa_ref[0].astype(jnp.float32)                  # (P, C)
    xb = xb_ref[0].astype(jnp.float32)

    prod = xa * xb
    aa = xa * xa
    bb = xb * xb

    # Channel gate: cosine over the spatial axis (axis 0).
    sab = jnp.sum(prod, axis=0, keepdims=True)          # (1, C)
    na_c = jnp.maximum(jnp.sqrt(jnp.sum(aa, axis=0, keepdims=True)), _EPS)
    nb_c = jnp.maximum(jnp.sqrt(jnp.sum(bb, axis=0, keepdims=True)), _EPS)
    cos_c = sab * pl.reciprocal(na_c * nb_c, approx=True)
    wc = 1.0 - jax.nn.sigmoid(cos_c)                    # (1, C)

    # Spatial gate: cosine over the channel axis (axis 1).
    num = jnp.sum(prod, axis=1, keepdims=True)          # (P, 1)
    na_s = jnp.maximum(jnp.sqrt(jnp.sum(aa, axis=1, keepdims=True)), _EPS)
    nb_s = jnp.maximum(jnp.sqrt(jnp.sum(bb, axis=1, keepdims=True)), _EPS)
    cos_s = num * pl.reciprocal(na_s * nb_s, approx=True)
    ws = 1.0 - jax.nn.sigmoid(cos_s)                    # (P, 1)

    w = ws * wc                                         # (P, C)
    oa_ref[0] = (xa * w).astype(oa_ref.dtype)
    ob_ref[0] = (xb * w).astype(ob_ref.dtype)


def cdweights_reweight(xa_nhwc, xb_nhwc):
    B, H, W, C = xa_nhwc.shape
    P = H * W
    xa = xa_nhwc.reshape(B, P, C)
    xb = xb_nhwc.reshape(B, P, C)

    spec = pl.BlockSpec((1, P, C), lambda b: (b, 0, 0))
    oa, ob = pl.pallas_call(
        _cd_kernel,
        out_shape=(jax.ShapeDtypeStruct((B, P, C), jnp.bfloat16),
                   jax.ShapeDtypeStruct((B, P, C), jnp.bfloat16)),
        grid=(B,),
        in_specs=[spec, spec],
        out_specs=(spec, spec),
        compiler_params=pltpu.CompilerParams(
            dimension_semantics=("parallel",),
            vmem_limit_bytes=_vmem_limit_bytes()),
    )(xa, xb)
    return oa.reshape(B, H, W, C), ob.reshape(B, H, W, C)


# -----------------------------------------------------------------------------
# Fused 3x3 conv + folded-BN + optional residual(s) + optional ReLU.
#   grid = (B, Cout-tiles, Cin-tiles).
#   The padded input is a flattened (Hp*Wp, Cin) slab (Wp = round_up(W+2, 8),
#   Hp = H+3), so tap (kh, kw) is the contiguous slice starting at
#   kh*Wp + kw — one aligned/phase-shifted load feeding a matmul, no strided
#   gather.  Accumulation is f32 in a width-padded (H*Wp, tn) VMEM scratch;
#   valid columns are sliced once in the last-K epilogue, where bias, the
#   pre-ReLU residual (BasicBlock identity), ReLU and the post-ReLU residual
#   (outer CDWeights skip) are fused before the store.
# -----------------------------------------------------------------------------
def _conv3x3_kernel(x_ref, w_ref, b_ref, *rest, H, W, Wp,
                    apply_relu, has_res_pre, has_res_post):
    idx = 0
    res_pre_ref = None
    res_post_ref = None
    if has_res_pre:
        res_pre_ref = rest[idx]; idx += 1
    if has_res_post:
        res_post_ref = rest[idx]; idx += 1
    o_ref = rest[idx]
    acc_ref = rest[idx + 1]

    HWp = H * Wp
    k = pl.program_id(2)

    @pl.when(k == 0)
    def _init():
        acc_ref[...] = jnp.zeros_like(acc_ref)

    acc = acc_ref[...]
    for kh in range(3):
        for kw in range(3):
            # Contiguous slab of H*Wp rows at flattened offset kh*Wp + kw.
            slab = x_ref[0, pl.ds(kh * Wp + kw, HWp), :]          # (HWp, tk)
            acc = acc + jnp.dot(slab, w_ref[kh * 3 + kw],
                                preferred_element_type=jnp.float32)
    acc_ref[...] = acc

    @pl.when(k == pl.num_programs(2) - 1)
    def _fin():
        tn = acc.shape[-1]
        # Drop the junk (padding) columns once, here in the epilogue.
        out = acc.reshape(H, Wp, tn)[:, :W, :].reshape(H * W, tn)
        out = out + b_ref[...]                                    # f32 bias
        if has_res_pre:
            out = out + res_pre_ref[0].astype(jnp.float32)
        if apply_relu:
            out = jnp.maximum(out, 0.0)
        if has_res_post:
            out = out + res_post_ref[0].astype(jnp.float32)
        o_ref[0] = out.astype(o_ref.dtype)


def conv3x3_bn(x_nhwc, w9, bias, *, apply_relu, res_pre=None, res_post=None,
               out_dtype=None):
    """x_nhwc: (B,H,W,Cin); w9: (9,Cin,Cout) bf16 BN-folded; bias: (1,Cout) f32."""
    B, H, W, Cin = x_nhwc.shape
    Cout = w9.shape[-1]
    P = H * W
    Wp = _round_up(W + 2, 8)       # width pad to sublane multiple
    Hp = H + 3                     # top pad 1, bottom pad 2 (keeps tap slices in-bounds)
    if out_dtype is None:
        out_dtype = x_nhwc.dtype

    x_pad = jnp.pad(x_nhwc.astype(jnp.bfloat16),
                    ((0, 0), (1, 2), (1, Wp - W - 1), (0, 0)))
    x_flat = x_pad.reshape(B, Hp * Wp, Cin)

    tk = _pick_tile(Cin, 256, 128)     # K tile (lane dim of the x block)
    tn = _pick_tile(Cout, 256, 128)    # N tile
    grid = (B, Cout // tn, Cin // tk)

    in_specs = [
        pl.BlockSpec((1, Hp * Wp, tk), lambda b, n, k: (b, 0, k)),
        pl.BlockSpec((9, tk, tn), lambda b, n, k: (0, k, n)),
        pl.BlockSpec((1, tn), lambda b, n, k: (0, n)),
    ]
    args = [x_flat, w9, bias]
    if res_pre is not None:
        in_specs.append(pl.BlockSpec((1, P, tn), lambda b, n, k: (b, 0, n)))
        args.append(res_pre.reshape(B, P, Cout).astype(jnp.bfloat16))
    if res_post is not None:
        in_specs.append(pl.BlockSpec((1, P, tn), lambda b, n, k: (b, 0, n)))
        args.append(res_post.reshape(B, P, Cout).astype(jnp.bfloat16))

    out = pl.pallas_call(
        functools.partial(_conv3x3_kernel, H=H, W=W, Wp=Wp,
                          apply_relu=apply_relu,
                          has_res_pre=res_pre is not None,
                          has_res_post=res_post is not None),
        out_shape=jax.ShapeDtypeStruct((B, P, Cout), out_dtype),
        grid=grid,
        in_specs=in_specs,
        out_specs=pl.BlockSpec((1, P, tn), lambda b, n, k: (b, 0, n)),
        scratch_shapes=[pltpu.VMEM((H * Wp, tn), jnp.float32)],
        compiler_params=pltpu.CompilerParams(
            dimension_semantics=("parallel", "parallel", "arbitrary"),
            vmem_limit_bytes=_vmem_limit_bytes()),
    )(*args)
    return out.reshape(B, H, W, Cout)


# -----------------------------------------------------------------------------
# BasicBlock (conv-bn-relu, conv-bn, +identity, relu) with the block identity
# and the outer CDWeights residual fused into the second conv's epilogue.
# Intermediates stay bf16; only the module output returns to the input dtype.
# -----------------------------------------------------------------------------
def basic_block_fused(x_w, x_orig, p, out_dtype):
    y1 = conv3x3_bn(x_w, p["w1"], p["b1"], apply_relu=True,
                    out_dtype=jnp.bfloat16)
    # relu(conv2(y1) + bn2 + x_w) + x_orig — all fused in the conv2 epilogue.
    out = conv3x3_bn(y1, p["w2"], p["b2"], apply_relu=True,
                     res_pre=x_w, res_post=x_orig, out_dtype=out_dtype)
    return out


# -----------------------------------------------------------------------------
# CDWeights.forward — NHWC end-to-end; NCHW wrapper only at the module boundary.
# -----------------------------------------------------------------------------
def cdweights_forward_nhwc(xa, xb, params):
    out_dtype = xa.dtype
    xa16 = xa.astype(jnp.bfloat16)
    xb16 = xb.astype(jnp.bfloat16)
    xa_w, xb_w = cdweights_reweight(xa16, xb16)
    out_a = basic_block_fused(xa_w, xa16, params["convA"], out_dtype)
    out_b = basic_block_fused(xb_w, xb16, params["convB"], out_dtype)
    return out_a, out_b


def cdweights_forward(xa_nchw, xb_nchw, params):
    xa = jnp.transpose(xa_nchw, (0, 2, 3, 1))
    xb = jnp.transpose(xb_nchw, (0, 2, 3, 1))
    oa, ob = cdweights_forward_nhwc(xa, xb, params)
    return (jnp.transpose(oa, (0, 3, 1, 2)),
            jnp.transpose(ob, (0, 3, 1, 2)))


# -----------------------------------------------------------------------------
# Parameter prep: fold eval-mode BN into the conv weight/bias ONCE (not per
# forward call), transpose to (9, Cin, Cout) and cast the MXU operand to bf16.
# -----------------------------------------------------------------------------
def fold_conv_bn(weight_oihw, g, b, m, v, eps=1e-5):
    cout, cin = weight_oihw.shape[0], weight_oihw.shape[1]
    scale = g / jnp.sqrt(v + eps)                                   # (Cout,)
    w = jnp.transpose(weight_oihw, (2, 3, 1, 0)).reshape(9, cin, cout)
    w = (w * scale[None, None, :]).astype(jnp.bfloat16)
    bias = (b - m * scale).reshape(1, cout).astype(jnp.float32)
    return w, bias


def prepare_basic_block(raw):
    w1, b1 = fold_conv_bn(raw["conv1_w"], raw["bn1_g"], raw["bn1_b"],
                          raw["bn1_m"], raw["bn1_v"])
    w2, b2 = fold_conv_bn(raw["conv2_w"], raw["bn2_g"], raw["bn2_b"],
                          raw["bn2_m"], raw["bn2_v"])
    return {"w1": w1, "b1": b1, "w2": w2, "b2": b2}


def prepare_cdweights_params(raw):
    return {"convA": prepare_basic_block(raw["convA"]),
            "convB": prepare_basic_block(raw["convB"])}


# -----------------------------------------------------------------------------
# Deterministic parameter init (bias-free convs; identity eval-mode BN stats).
# -----------------------------------------------------------------------------
def init_basic_block(key, c):
    k1, k2 = jax.random.split(key)
    f32 = jnp.float32
    return {
        "conv1_w": 0.05 * jax.random.normal(k1, (c, c, 3, 3), f32),
        "bn1_g": jnp.ones((c,), f32), "bn1_b": jnp.zeros((c,), f32),
        "bn1_m": jnp.zeros((c,), f32), "bn1_v": jnp.ones((c,), f32),
        "conv2_w": 0.05 * jax.random.normal(k2, (c, c, 3, 3), f32),
        "bn2_g": jnp.ones((c,), f32), "bn2_b": jnp.zeros((c,), f32),
        "bn2_m": jnp.zeros((c,), f32), "bn2_v": jnp.ones((c,), f32),
    }


def init_cdweights(key, c):
    ka, kb = jax.random.split(key)
    return {"convA": init_basic_block(ka, c), "convB": init_basic_block(kb, c)}


if __name__ == "__main__":
    key = jax.random.PRNGKey(0)
    k_data, k_param = jax.random.split(key)

    # Scaled-down stand-ins for the multi-scale features LENet4 feeds through
    # its `rwe` / `re_weight*` CDWeights modules (real model: C=128..1024,
    # spatial 64..8).  Channels kept lane-dense (>=128) per the perf review;
    # NCHW to match the PyTorch module boundary.
    stage_shapes = [(2, 128, 16, 16), (2, 256, 8, 8)]

    fwd = jax.jit(cdweights_forward)

    for i, shp in enumerate(stage_shapes):
        kd = jax.random.fold_in(k_data, i)
        kp = jax.random.fold_in(k_param, i)
        xa = jax.random.normal(kd, shp, jnp.float32)
        xb = jax.random.normal(jax.random.fold_in(kd, 1), shp, jnp.float32)
        params = prepare_cdweights_params(init_cdweights(kp, shp[1]))
        out_a, out_b = fwd(xa, xb, params)
        out_a, out_b = jax.block_until_ready((out_a, out_b))
        assert out_a.shape == shp and out_b.shape == shp
        assert bool(jnp.all(jnp.isfinite(out_a)))
        assert bool(jnp.all(jnp.isfinite(out_b)))

    print("KERNEL_OK")
</pallas_src>

<mosaic_0001>
module attributes {stable_mosaic.version = 11 : i64} {
  func.func @_cd_kernel(%arg0: i32, %arg1: memref<1x256x128xbf16, #tpu.memory_space<vmem>>, %arg2: memref<1x256x128xbf16, #tpu.memory_space<vmem>>, %arg3: memref<1x256x128xbf16, #tpu.memory_space<vmem>>, %arg4: memref<1x256x128xbf16, #tpu.memory_space<vmem>>) attributes {dimension_semantics = [#tpu.dimension_semantics<parallel>], iteration_bounds = array<i64: 2>, scalar_prefetch = 0 : i64, scratch_operands = 0 : i64, tpu.core_type = #tpu.core_type<tc>, window_params = [{transform_indices = @transform_0, window_bounds = array<i64: 1, 256, 128>}, {transform_indices = @transform_1, window_bounds = array<i64: 1, 256, 128>}, {transform_indices = @transform_2, window_bounds = array<i64: 1, 256, 128>}, {transform_indices = @transform_3, window_bounds = array<i64: 1, 256, 128>}]} {
    %c0 = arith.constant 0 : index
    %c0_0 = arith.constant 0 : index
    %c0_1 = arith.constant 0 : index
    %0 = vector.load %arg1[%c0, %c0_0, %c0_1] : memref<1x256x128xbf16, #tpu.memory_space<vmem>>, vector<1x256x128xbf16>
    %1 = vector.shape_cast %0 : vector<1x256x128xbf16> to vector<256x128xbf16>
    %2 = arith.extf %1 : vector<256x128xbf16> to vector<256x128xf32>
    %c0_2 = arith.constant 0 : index
    %c0_3 = arith.constant 0 : index
    %c0_4 = arith.constant 0 : index
    %3 = vector.load %arg2[%c0_2, %c0_3, %c0_4] : memref<1x256x128xbf16, #tpu.memory_space<vmem>>, vector<1x256x128xbf16>
    %4 = vector.shape_cast %3 : vector<1x256x128xbf16> to vector<256x128xbf16>
    %5 = arith.extf %4 : vector<256x128xbf16> to vector<256x128xf32>
    %6 = arith.mulf %2, %5 : vector<256x128xf32>
    %7 = arith.mulf %2, %2 : vector<256x128xf32>
    %8 = arith.mulf %5, %5 : vector<256x128xf32>
    %cst = arith.constant dense<0.000000e+00> : vector<128xf32>
    %9 = vector.multi_reduction <add>, %6, %cst [0] : vector<256x128xf32> to vector<128xf32>
    %10 = vector.shape_cast %9 : vector<128xf32> to vector<1x128xf32>
    %cst_5 = arith.constant dense<0.000000e+00> : vector<128xf32>
    %11 = vector.multi_reduction <add>, %7, %cst_5 [0] : vector<256x128xf32> to vector<128xf32>
    %12 = vector.shape_cast %11 : vector<128xf32> to vector<1x128xf32>
    %13 = math.sqrt %12 : vector<1x128xf32>
    %cst_6 = arith.constant 9.99999993E-9 : f32
    %14 = vector.broadcast %cst_6 : f32 to vector<1x128xf32>
    %15 = arith.maximumf %13, %14 : vector<1x128xf32>
    %cst_7 = arith.constant dense<0.000000e+00> : vector<128xf32>
    %16 = vector.multi_reduction <add>, %8, %cst_7 [0] : vector<256x128xf32> to vector<128xf32>
    %17 = vector.shape_cast %16 : vector<128xf32> to vector<1x128xf32>
    %18 = math.sqrt %17 : vector<1x128xf32>
    %cst_8 = arith.constant 9.99999993E-9 : f32
    %19 = vector.broadcast %cst_8 : f32 to vector<1x128xf32>
    %20 = arith.maximumf %18, %19 : vector<1x128xf32>
    %21 = arith.mulf %15, %20 : vector<1x128xf32>
    %22 = tpu.reciprocal %21 {approx = true} : vector<1x128xf32> -> vector<1x128xf32>
    %23 = arith.mulf %10, %22 : vector<1x128xf32>
    %24 = arith.negf %23 : vector<1x128xf32>
    %25 = math.exp %24 : vector<1x128xf32>
    %cst_9 = arith.constant 1.000000e+00 : f32
    %26 = vector.broadcast %cst_9 : f32 to vector<1x128xf32>
    %27 = arith.addf %26, %25 : vector<1x128xf32>
    %28 = arith.divf %26, %27 : vector<1x128xf32>
    %cst_10 = arith.constant 1.000000e+00 : f32
    %29 = vector.broadcast %cst_10 : f32 to vector<1x128xf32>
    %30 = arith.subf %29, %28 : vector<1x128xf32>
    %cst_11 = arith.constant dense<0.000000e+00> : vector<256xf32>
    %31 = vector.multi_reduction <add>, %6, %cst_11 [1] : vector<256x128xf32> to vector<256xf32>
    %32 = vector.shape_cast %31 : vector<256xf32> to vector<256x1xf32>
    %cst_12 = arith.constant dense<0.000000e+00> : vector<256xf32>
    %33 = vector.multi_reduction <add>, %7, %cst_12 [1] : vector<256x128xf32> to vector<256xf32>
    %34 = vector.shape_cast %33 : vector<256xf32> to vector<256x1xf32>
    %35 = math.sqrt %34 : vector<256x1xf32>
    %cst_13 = arith.constant 9.99999993E-9 : f32
    %36 = vector.broadcast %cst_13 : f32 to vector<256x1xf32>
    %37 = arith.maximumf %35, %36 : vector<256x1xf32>
    %cst_14 = arith.constant dense<0.000000e+00> : vector<256xf32>
    %38 = vector.multi_reduction <add>, %8, %cst_14 [1] : vector<256x128xf32> to vector<256xf32>
    %39 = vector.shape_cast %38 : vector<256xf32> to vector<256x1xf32>
    %40 = math.sqrt %39 : vector<256x1xf32>
    %cst_15 = arith.constant 9.99999993E-9 : f32
    %41 = vector.broadcast %cst_15 : f32 to vector<256x1xf32>
    %42 = arith.maximumf %40, %41 : vector<256x1xf32>
    %43 = arith.mulf %37, %42 : vector<256x1xf32>
    %44 = tpu.reciprocal %43 {approx = true} : vector<256x1xf32> -> vector<256x1xf32>
    %45 = arith.mulf %32, %44 : vector<256x1xf32>
    %46 = arith.negf %45 : vector<256x1xf32>
    %47 = math.exp %46 : vector<256x1xf32>
    %cst_16 = arith.constant 1.000000e+00 : f32
    %48 = vector.broadcast %cst_16 : f32 to vector<256x1xf32>
    %49 = arith.addf %48, %47 : vector<256x1xf32>
    %50 = arith.divf %48, %49 : vector<256x1xf32>
    %cst_17 = arith.constant 1.000000e+00 : f32
    %51 = vector.broadcast %cst_17 : f32 to vector<256x1xf32>
    %52 = arith.subf %51, %50 : vector<256x1xf32>
    %53 = vector.broadcast %52 : vector<256x1xf32> to vector<256x128xf32>
    %54 = vector.broadcast %30 : vector<1x128xf32> to vector<256x128xf32>
    %55 = arith.mulf %53, %54 : vector<256x128xf32>
    %56 = arith.mulf %2, %55 : vector<256x128xf32>
    %57 = arith.truncf %56 : vector<256x128xf32> to vector<256x128xbf16>
    %c0_18 = arith.constant 0 : index
    %c0_19 = arith.constant 0 : index
    %c0_20 = arith.constant 0 : index
    %58 = vector.load %arg3[%c0_18, %c0_19, %c0_20] : memref<1x256x128xbf16, #tpu.memory_space<vmem>>, vector<1x256x128xbf16>
    %59 = vector.shape_cast %58 : vector<1x256x128xbf16> to vector<256x128xbf16>
    %60 = vector.shape_cast %57 : vector<256x128xbf16> to vector<1x256x128xbf16>
    tpu.vector_store %arg3[%c0_18, %c0_19, %c0_20], %60 {strides = array<i32>} : memref<1x256x128xbf16, #tpu.memory_space<vmem>>, vector<1x256x128xbf16>,
    %61 = arith.mulf %5, %55 : vector<256x128xf32>
    %62 = arith.truncf %61 : vector<256x128xf32> to vector<256x128xbf16>
    %c0_21 = arith.constant 0 : index
    %c0_22 = arith.constant 0 : index
    %c0_23 = arith.constant 0 : index
    %63 = vector.load %arg4[%c0_21, %c0_22, %c0_23] : memref<1x256x128xbf16, #tpu.memory_space<vmem>>, vector<1x256x128xbf16>
    %64 = vector.shape_cast %63 : vector<1x256x128xbf16> to vector<256x128xbf16>
    %65 = vector.shape_cast %62 : vector<256x128xbf16> to vector<1x256x128xbf16>
    tpu.vector_store %arg4[%c0_21, %c0_22, %c0_23], %65 {strides = array<i32>} : memref<1x256x128xbf16, #tpu.memory_space<vmem>>, vector<1x256x128xbf16>,
    return
  }
  func.func @transform_0(%arg0: i32) -> (i32, i32, i32) {
    %c0_i32 = arith.constant 0 : i32
    %c0_i32_0 = arith.constant 0 : i32
    %c0_i32_1 = arith.constant 0 : i32
    return %arg0, %c0_i32, %c0_i32_0 : i32, i32, i32
  }
  func.func @transform_1(%arg0: i32) -> (i32, i32, i32) {
    %c0_i32 = arith.constant 0 : i32
    %c0_i32_0 = arith.constant 0 : i32
    %c0_i32_1 = arith.constant 0 : i32
    return %arg0, %c0_i32, %c0_i32_0 : i32, i32, i32
  }
  func.func @transform_2(%arg0: i32) -> (i32, i32, i32) {
    %c0_i32 = arith.constant 0 : i32
    %c0_i32_0 = arith.constant 0 : i32
    %c0_i32_1 = arith.constant 0 : i32
    return %arg0, %c0_i32, %c0_i32_0 : i32, i32, i32
  }
  func.func @transform_3(%arg0: i32) -> (i32, i32, i32) {
    %c0_i32 = arith.constant 0 : i32
    %c0_i32_0 = arith.constant 0 : i32
    %c0_i32_1 = arith.constant 0 : i32
    return %arg0, %c0_i32, %c0_i32_0 : i32, i32, i32
  }
}

module attributes {stable_mosaic.version = 11 : i64} {
  func.func @_conv3x3_kernel(%arg0: i32, %arg1: i32, %arg2: i32, %arg3: memref<1x456x128xbf16, #tpu.memory_space<vmem>>, %arg4: memref<9x128x128xbf16, #tpu.memory_space<vmem>>, %arg5: memref<1x128xf32, #tpu.memory_space<vmem>>, %arg6: memref<1x256x128xbf16, #tpu.memory_space<vmem>>, %arg7: memref<1x256x128xbf16, #tpu.memory_space<vmem>>, %arg8: memref<1x256x128xf32, #tpu.memory_space<vmem>>, %arg9: memref<384x128xf32, #tpu.memory_space<vmem>>) attributes {dimension_semantics = [#tpu.dimension_semantics<parallel>, #tpu.dimension_semantics<parallel>, #tpu.dimension_semantics<arbitrary>], iteration_bounds = array<i64: 2, 1, 1>, scalar_prefetch = 0 : i64, scratch_operands = 1 : i64, tpu.core_type = #tpu.core_type<tc>, window_params = [{transform_indices = @transform_0, window_bounds = array<i64: 1, 456, 128>}, {transform_indices = @transform_1, window_bounds = array<i64: 9, 128, 128>}, {transform_indices = @transform_2, window_bounds = array<i64: 1, 128>}, {transform_indices = @transform_3, window_bounds = array<i64: 1, 256, 128>}, {transform_indices = @transform_4, window_bounds = array<i64: 1, 256, 128>}, {transform_indices = @transform_5, window_bounds = array<i64: 1, 256, 128>}]} {
    %c0_i32 = arith.constant 0 : i32
    %0 = arith.cmpi eq, %arg2, %c0_i32 : i32
    %1 = arith.extui %0 : i1 to i32
    %c0_i32_0 = arith.constant 0 : i32
    %2 = arith.cmpi ne, %1, %c0_i32_0 : i32
    scf.if %2 {
      %cst_54 = arith.constant 0.000000e+00 : f32
      %62 = vector.broadcast %cst_54 : f32 to vector<384x128xf32>
      %c0_55 = arith.constant 0 : index
      %c0_56 = arith.constant 0 : index
      %63 = vector.load %arg9[%c0_55, %c0_56] : memref<384x128xf32, #tpu.memory_space<vmem>>, vector<384x128xf32>
      tpu.vector_store %arg9[%c0_55, %c0_56], %62 {strides = array<i32>} : memref<384x128xf32, #tpu.memory_space<vmem>>, vector<384x128xf32>,
    } else {
    }
    %c0 = arith.constant 0 : index
    %c0_1 = arith.constant 0 : index
    %3 = vector.load %arg9[%c0, %c0_1] : memref<384x128xf32, #tpu.memory_space<vmem>>, vector<384x128xf32>
    %c0_2 = arith.constant 0 : index
    %c0_3 = arith.constant 0 : index
    %c0_4 = arith.constant 0 : index
    %4 = vector.load %arg3[%c0_2, %c0_3, %c0_4] : memref<1x456x128xbf16, #tpu.memory_space<vmem>>, vector<1x384x128xbf16>
    %5 = vector.shape_cast %4 : vector<1x384x128xbf16> to vector<384x128xbf16>
    %c0_5 = arith.constant 0 : index
    %c0_6 = arith.constant 0 : index
    %c0_7 = arith.constant 0 : index
    %6 = vector.load %arg4[%c0_5, %c0_6, %c0_7] : memref<9x128x128xbf16, #tpu.memory_space<vmem>>, vector<1x128x128xbf16>
    %7 = vector.shape_cast %6 : vector<1x128x128xbf16> to vector<128x128xbf16>
    %cst = arith.constant dense<0.000000e+00> : vector<384x128xf32>
    %8 = tpu.matmul %5, %7, %cst {dimension_numbers = #tpu.dot_dimension_numbers<[1], [0], [0], [1], [0, 0, 1, 1], [], []>} : vector<384x128xbf16>, vector<128x128xbf16>, vector<384x128xf32> -> vector<384x128xf32>
    %9 = arith.addf %3, %8 : vector<384x128xf32>
    %c0_8 = arith.constant 0 : index
    %c1 = arith.constant 1 : index
    %c0_9 = arith.constant 0 : index
    %10 = vector.load %arg3[%c0_8, %c1, %c0_9] : memref<1x456x128xbf16, #tpu.memory_space<vmem>>, vector<1x384x128xbf16>
    %11 = vector.shape_cast %10 : vector<1x384x128xbf16> to vector<384x128xbf16>
    %c1_10 = arith.constant 1 : index
    %c0_11 = arith.constant 0 : index
    %c0_12 = arith.constant 0 : index
    %12 = vector.load %arg4[%c1_10, %c0_11, %c0_12] : memref<9x128x128xbf16, #tpu.memory_space<vmem>>, vector<1x128x128xbf16>
    %13 = vector.shape_cast %12 : vector<1x128x128xbf16> to vector<128x128xbf16>
    %cst_13 = arith.constant dense<0.000000e+00> : vector<384x128xf32>
    %14 = tpu.matmul %11, %13, %cst_13 {dimension_numbers = #tpu.dot_dimension_numbers<[1], [0], [0], [1], [0, 0, 1, 1], [], []>} : vector<384x128xbf16>, vector<128x128xbf16>, vector<384x128xf32> -> vector<384x128xf32>
    %15 = arith.addf %9, %14 : vector<384x128xf32>
    %c0_14 = arith.constant 0 : index
    %c2 = arith.constant 2 : index
    %c0_15 = arith.constant 0 : index
    %16 = vector.load %arg3[%c0_14, %c2, %c0_15] : memref<1x456x128xbf16, #tpu.memory_space<vmem>>, vector<1x384x128xbf16>
    %17 = vector.shape_cast %16 : vector<1x384x128xbf16> to vector<384x128xbf16>
    %c2_16 = arith.constant 2 : index
    %c0_17 = arith.constant 0 : index
    %c0_18 = arith.constant 0 : index
    %18 = vector.load %arg4[%c2_16, %c0_17, %c0_18] : memref<9x128x128xbf16, #tpu.memory_space<vmem>>, vector<1x128x128xbf16>
    %19 = vector.shape_cast %18 : vector<1x128x128xbf16> to vector<128x128xbf16>
    %cst_19 = arith.constant dense<0.000000e+00> : vector<384x128xf32>
    %20 = tpu.matmul %17, %19, %cst_19 {dimension_numbers = #tpu.dot_dimension_numbers<[1], [0], [0], [1], [0, 0, 1, 1], [], []>} : vector<384x128xbf16>, vector<128x128xbf16>, vector<384x128xf32> -> vector<384x128xf32>
    %21 = arith.addf %15, %20 : vector<384x128xf32>
    %c0_20 = arith.constant 0 : index
    %c24 = arith.constant 24 : index
    %c0_21 = arith.constant 0 : index
    %22 = vector.load %arg3[%c0_20, %c24, %c0_21] : memref<1x456x128xbf16, #tpu.memory_space<vmem>>, vector<1x384x128xbf16>
    %23 = vector.shape_cast %22 : vector<1x384x128xbf16> to vector<384x128xbf16>
    %c3 = arith.constant 3 : index
    %c0_22 = arith.constant 0 : index
    %c0_23 = arith.constant 0 : index
    %24 = vector.load %arg4[%c3, %c0_22, %c0_23] : memref<9x128x128xbf16, #tpu.memory_space<vmem>>, vector<1x128x128xbf16>
    %25 = vector.shape_cast %24 : vector<1x128x128xbf16> to vector<128x128xbf16>
    %cst_24 = arith.constant dense<0.000000e+00> : vector<384x128xf32>
    %26 = tpu.matmul %23, %25, %cst_24 {dimension_numbers = #tpu.dot_dimension_numbers<[1], [0], [0], [1], [0, 0, 1, 1], [], []>} : vector<384x128xbf16>, vector<128x128xbf16>, vector<384x128xf32> -> vector<384x128xf32>
    %27 = arith.addf %21, %26 : vector<384x128xf32>
    %c0_25 = arith.constant 0 : index
    %c25 = arith.constant 25 : index
    %c0_26 = arith.constant 0 : index
    %28 = vector.load %arg3[%c0_25, %c25, %c0_26] : memref<1x456x128xbf16, #tpu.memory_space<vmem>>, vector<1x384x128xbf16>
    %29 = vector.shape_cast %28 : vector<1x384x128xbf16> to vector<384x128xbf16>
    %c4 = arith.constant 4 : index
    %c0_27 = arith.constant 0 : index
    %c0_28 = arith.constant 0 : index
    %30 = vector.load %arg4[%c4, %c0_27, %c0_28] : memref<9x128x128xbf16, #tpu.memory_space<vmem>>, vector<1x128x128xbf16>
    %31 = vector.shape_cast %30 : vector<1x128x128xbf16> to vector<128x128xbf16>
    %cst_29 = arith.constant dense<0.000000e+00> : vector<384x128xf32>
    %32 = tpu.matmul %29, %31, %cst_29 {dimension_numbers = #tpu.dot_dimension_numbers<[1], [0], [0], [1], [0, 0, 1, 1], [], []>} : vector<384x128xbf16>, vector<128x128xbf16>, vector<384x128xf32> -> vector<384x128xf32>
    %33 = arith.addf %27, %32 : vector<384x128xf32>
    %c0_30 = arith.constant 0 : index
    %c26 = arith.constant 26 : index
    %c0_31 = arith.constant 0 : index
    %34 = vector.load %arg3[%c0_30, %c26, %c0_31] : memref<1x456x128xbf16, #tpu.memory_space<vmem>>, vector<1x384x128xbf16>
    %35 = vector.shape_cast %34 : vector<1x384x128xbf16> to vector<384x128xbf16>
    %c5 = arith.constant 5 : index
    %c0_32 = arith.constant 0 : index
    %c0_33 = arith.constant 0 : index
    %36 = vector.load %arg4[%c5, %c0_32, %c0_33] : memref<9x128x128xbf16, #tpu.memory_space<vmem>>, vector<1x128x128xbf16>
    %37 = vector.shape_cast %36 : vector<1x128x128xbf16> to vector<128x128xbf16>
    %cst_34 = arith.constant dense<0.000000e+00> : vector<384x128xf32>
    %38 = tpu.matmul %35, %37, %cst_34 {dimension_numbers = #tpu.dot_dimension_numbers<[1], [0], [0], [1], [0, 0, 1, 1], [], []>} : vector<384x128xbf16>, vector<128x128xbf16>, vector<384x128xf32> -> vector<384x128xf32>
    %39 = arith.addf %33, %38 : vector<384x128xf32>
    %c0_35 = arith.constant 0 : index
    %c48 = arith.constant 48 : index
    %c0_36 = arith.constant 0 : index
    %40 = vector.load %arg3[%c0_35, %c48, %c0_36] : memref<1x456x128xbf16, #tpu.memory_space<vmem>>, vector<1x384x128xbf16>
    %41 = vector.shape_cast %40 : vector<1x384x128xbf16> to vector<384x128xbf16>
    %c6 = arith.constant 6 : index
    %c0_37 = arith.constant 0 : index
    %c0_38 = arith.constant 0 : index
    %42 = vector.load %arg4[%c6, %c0_37, %c0_38] : memref<9x128x128xbf16, #tpu.memory_space<vmem>>, vector<1x128x128xbf16>
    %43 = vector.shape_cast %42 : vector<1x128x128xbf16> to vector<128x128xbf16>
    %cst_39 = arith.constant dense<0.000000e+00> : vector<384x128xf32>
    %44 = tpu.matmul %41, %43, %cst_39 {dimension_numbers = #tpu.dot_dimension_numbers<[1], [0], [0], [1], [0, 0, 1, 1], [], []>} : vector<384x128xbf16>, vector<128x128xbf16>, vector<384x128xf32> -> vector<384x128xf32>
    %45 = arith.addf %39, %44 : vector<384x128xf32>
    %c0_40 = arith.constant 0 : index
    %c49 = arith.constant 49 : index
    %c0_41 = arith.constant 0 : index
    %46 = vector.load %arg3[%c0_40, %c49, %c0_41] : memref<1x456x128xbf16, #tpu.memory_space<vmem>>, vector<1x384x128xbf16>
    %47 = vector.shape_cast %46 : vector<1x384x128xbf16> to vector<384x128xbf16>
    %c7 = arith.constant 7 : index
    %c0_42 = arith.constant 0 : index
    %c0_43 = arith.constant 0 : index
    %48 = vector.load %arg4[%c7, %c0_42, %c0_43] : memref<9x128x128xbf16, #tpu.memory_space<vmem>>, vector<1x128x128xbf16>
    %49 = vector.shape_cast %48 : vector<1x128x128xbf16> to vector<128x128xbf16>
    %cst_44 = arith.constant dense<0.000000e+00> : vector<384x128xf32>
    %50 = tpu.matmul %47, %49, %cst_44 {dimension_numbers = #tpu.dot_dimension_numbers<[1], [0], [0], [1], [0, 0, 1, 1], [], []>} : vector<384x128xbf16>, vector<128x128xbf16>, vector<384x128xf32> -> vector<384x128xf32>
    %51 = arith.addf %45, %50 : vector<384x128xf32>
    %c0_45 = arith.constant 0 : index
    %c50 = arith.constant 50 : index
    %c0_46 = arith.constant 0 : index
    %52 = vector.load %arg3[%c0_45, %c50, %c0_46] : memref<1x456x128xbf16, #tpu.memory_space<vmem>>, vector<1x384x128xbf16>
    %53 = vector.shape_cast %52 : vector<1x384x128xbf16> to vector<384x128xbf16>
    %c8 = arith.constant 8 : index
    %c0_47 = arith.constant 0 : index
    %c0_48 = arith.constant 0 : index
    %54 = vector.load %arg4[%c8, %c0_47, %c0_48] : memref<9x128x128xbf16, #tpu.memory_space<vmem>>, vector<1x128x128xbf16>
    %55 = vector.shape_cast %54 : vector<1x128x128xbf16> to vector<128x128xbf16>
    %cst_49 = arith.constant dense<0.000000e+00> : vector<384x128xf32>
    %56 = tpu.matmul %53, %55, %cst_49 {dimension_numbers = #tpu.dot_dimension_numbers<[1], [0], [0], [1], [0, 0, 1, 1], [], []>} : vector<384x128xbf16>, vector<128x128xbf16>, vector<384x128xf32> -> vector<384x128xf32>
    %57 = arith.addf %51, %56 : vector<384x128xf32>
    %c0_50 = arith.constant 0 : index
    %c0_51 = arith.constant 0 : index
    %58 = vector.load %arg9[%c0_50, %c0_51] : memref<384x128xf32, #tpu.memory_space<vmem>>, vector<384x128xf32>
    tpu.vector_store %arg9[%c0_50, %c0_51], %57 {strides = array<i32>} : memref<384x128xf32, #tpu.memory_space<vmem>>, vector<384x128xf32>,
    %c0_i32_52 = arith.constant 0 : i32
    %59 = arith.cmpi eq, %arg2, %c0_i32_52 : i32
    %60 = arith.extui %59 : i1 to i32
    %c0_i32_53 = arith.constant 0 : i32
    %61 = arith.cmpi ne, %60, %c0_i32_53 : i32
    scf.if %61 {
      %62 = vector.shape_cast %57 : vector<384x128xf32> to vector<16x24x128xf32>
      %63 = vector.extract_strided_slice %62 {offsets = [0, 0, 0], sizes = [16, 16, 128], strides = [1, 1, 1]} : vector<16x24x128xf32> to vector<16x16x128xf32>
      %64 = vector.shape_cast %63 : vector<16x16x128xf32> to vector<256x128xf32>
      %c0_54 = arith.constant 0 : index
      %c0_55 = arith.constant 0 : index
      %65 = vector.load %arg5[%c0_54, %c0_55] : memref<1x128xf32, #tpu.memory_space<vmem>>, vector<1x128xf32>
      %66 = vector.broadcast %65 : vector<1x128xf32> to vector<256x128xf32>
      %67 = arith.addf %64, %66 : vector<256x128xf32>
      %c0_56 = arith.constant 0 : index
      %c0_57 = arith.constant 0 : index
      %c0_58 = arith.constant 0 : index
      %68 = vector.load %arg6[%c0_56, %c0_57, %c0_58] : memref<1x256x128xbf16, #tpu.memory_space<vmem>>, vector<1x256x128xbf16>
      %69 = vector.shape_cast %68 : vector<1x256x128xbf16> to vector<256x128xbf16>
      %70 = arith.extf %69 : vector<256x128xbf16> to vector<256x128xf32>
      %71 = arith.addf %67, %70 : vector<256x128xf32>
      %cst_59 = arith.constant 0.000000e+00 : f32
      %72 = vector.broadcast %cst_59 : f32 to vector<256x128xf32>
      %73 = arith.maximumf %71, %72 : vector<256x128xf32>
      %c0_60 = arith.constant 0 : index
      %c0_61 = arith.constant 0 : index
      %c0_62 = arith.constant 0 : index
      %74 = vector.load %arg7[%c0_60, %c0_61, %c0_62] : memref<1x256x128xbf16, #tpu.memory_space<vmem>>, vector<1x256x128xbf16>
      %75 = vector.shape_cast %74 : vector<1x256x128xbf16> to vector<256x128xbf16>
      %76 = arith.extf %75 : vector<256x128xbf16> to vector<256x128xf32>
      %77 = arith.addf %73, %76 : vector<256x128xf32>
      %c0_63 = arith.constant 0 : index
      %c0_64 = arith.constant 0 : index
      %c0_65 = arith.constant 0 : index
      %78 = vector.load %arg8[%c0_63, %c0_64, %c0_65] : memref<1x256x128xf32, #tpu.memory_space<vmem>>, vector<1x256x128xf32>
      %79 = vector.shape_cast %78 : vector<1x256x128xf32> to vector<256x128xf32>
      %80 = vector.shape_cast %77 : vector<256x128xf32> to vector<1x256x128xf32>
      tpu.vector_store %arg8[%c0_63, %c0_64, %c0_65], %80 {strides = array<i32>} : memref<1x256x128xf32, #tpu.memory_space<vmem>>, vector<1x256x128xf32>,
    } else {
    }
    return
  }
  func.func @transform_0(%arg0: i32, %arg1: i32, %arg2: i32) -> (i32, i32, i32) {
    %c0_i32 = arith.constant 0 : i32
    %c0_i32_0 = arith.constant 0 : i32
    return %arg0, %c0_i32, %arg2 : i32, i32, i32
  }
  func.func @transform_1(%arg0: i32, %arg1: i32, %arg2: i32) -> (i32, i32, i32) {
    %c0_i32 = arith.constant 0 : i32
    %c0_i32_0 = arith.constant 0 : i32
    return %c0_i32, %arg2, %arg1 : i32, i32, i32
  }
  func.func @transform_2(%arg0: i32, %arg1: i32, %arg2: i32) -> (i32, i32) {
    %c0_i32 = arith.constant 0 : i32
    %c0_i32_0 = arith.constant 0 : i32
    return %c0_i32, %arg1 : i32, i32
  }
  func.func @transform_3(%arg0: i32, %arg1: i32, %arg2: i32) -> (i32, i32, i32) {
    %c0_i32 = arith.constant 0 : i32
    %c0_i32_0 = arith.constant 0 : i32
    return %arg0, %c0_i32, %arg1 : i32, i32, i32
  }
  func.func @transform_4(%arg0: i32, %arg1: i32, %arg2: i32) -> (i32, i32, i32) {
    %c0_i32 = arith.constant 0 : i32
    %c0_i32_0 = arith.constant 0 : i32
    return %arg0, %c0_i32, %arg1 : i32, i32, i32
  }
  func.func @transform_5(%arg0: i32, %arg1: i32, %arg2: i32) -> (i32, i32, i32) {
    %c0_i32 = arith.constant 0 : i32
    %c0_i32_0 = arith.constant 0 : i32
    return %arg0, %c0_i32, %arg1 : i32, i32, i32
  }
}

module attributes {stable_mosaic.version = 11 : i64} {
  func.func @_conv3x3_kernel(%arg0: i32, %arg1: i32, %arg2: i32, %arg3: memref<1x456x128xbf16, #tpu.memory_space<vmem>>, %arg4: memref<9x128x128xbf16, #tpu.memory_space<vmem>>, %arg5: memref<1x128xf32, #tpu.memory_space<vmem>>, %arg6: memref<1x256x128xbf16, #tpu.memory_space<vmem>>, %arg7: memref<384x128xf32, #tpu.memory_space<vmem>>) attributes {dimension_semantics = [#tpu.dimension_semantics<parallel>, #tpu.dimension_semantics<parallel>, #tpu.dimension_semantics<arbitrary>], iteration_bounds = array<i64: 2, 1, 1>, scalar_prefetch = 0 : i64, scratch_operands = 1 : i64, tpu.core_type = #tpu.core_type<tc>, window_params = [{transform_indices = @transform_0, window_bounds = array<i64: 1, 456, 128>}, {transform_indices = @transform_1, window_bounds = array<i64: 9, 128, 128>}, {transform_indices = @transform_2, window_bounds = array<i64: 1, 128>}, {transform_indices = @transform_3, window_bounds = array<i64: 1, 256, 128>}]} {
    %c0_i32 = arith.constant 0 : i32
    %0 = arith.cmpi eq, %arg2, %c0_i32 : i32
    %1 = arith.extui %0 : i1 to i32
    %c0_i32_0 = arith.constant 0 : i32
    %2 = arith.cmpi ne, %1, %c0_i32_0 : i32
    scf.if %2 {
      %cst_54 = arith.constant 0.000000e+00 : f32
      %62 = vector.broadcast %cst_54 : f32 to vector<384x128xf32>
      %c0_55 = arith.constant 0 : index
      %c0_56 = arith.constant 0 : index
      %63 = vector.load %arg7[%c0_55, %c0_56] : memref<384x128xf32, #tpu.memory_space<vmem>>, vector<384x128xf32>
      tpu.vector_store %arg7[%c0_55, %c0_56], %62 {strides = array<i32>} : memref<384x128xf32, #tpu.memory_space<vmem>>, vector<384x128xf32>,
    } else {
    }
    %c0 = arith.constant 0 : index
    %c0_1 = arith.constant 0 : index
    %3 = vector.load %arg7[%c0, %c0_1] : memref<384x128xf32, #tpu.memory_space<vmem>>, vector<384x128xf32>
    %c0_2 = arith.constant 0 : index
    %c0_3 = arith.constant 0 : index
    %c0_4 = arith.constant 0 : index
    %4 = vector.load %arg3[%c0_2, %c0_3, %c0_4] : memref<1x456x128xbf16, #tpu.memory_space<vmem>>, vector<1x384x128xbf16>
    %5 = vector.shape_cast %4 : vector<1x384x128xbf16> to vector<384x128xbf16>
    %c0_5 = arith.constant 0 : index
    %c0_6 = arith.constant 0 : index
    %c0_7 = arith.constant 0 : index
    %6 = vector.load %arg4[%c0_5, %c0_6, %c0_7] : memref<9x128x128xbf16, #tpu.memory_space<vmem>>, vector<1x128x128xbf16>
    %7 = vector.shape_cast %6 : vector<1x128x128xbf16> to vector<128x128xbf16>
    %cst = arith.constant dense<0.000000e+00> : vector<384x128xf32>
    %8 = tpu.matmul %5, %7, %cst {dimension_numbers = #tpu.dot_dimension_numbers<[1], [0], [0], [1], [0, 0, 1, 1], [], []>} : vector<384x128xbf16>, vector<128x128xbf16>, vector<384x128xf32> -> vector<384x128xf32>
    %9 = arith.addf %3, %8 : vector<384x128xf32>
    %c0_8 = arith.constant 0 : index
    %c1 = arith.constant 1 : index
    %c0_9 = arith.constant 0 : index
    %10 = vector.load %arg3[%c0_8, %c1, %c0_9] : memref<1x456x128xbf16, #tpu.memory_space<vmem>>, vector<1x384x128xbf16>
    %11 = vector.shape_cast %10 : vector<1x384x128xbf16> to vector<384x128xbf16>
    %c1_10 = arith.constant 1 : index
    %c0_11 = arith.constant 0 : index
    %c0_12 = arith.constant 0 : index
    %12 = vector.load %arg4[%c1_10, %c0_11, %c0_12] : memref<9x128x128xbf16, #tpu.memory_space<vmem>>, vector<1x128x128xbf16>
    %13 = vector.shape_cast %12 : vector<1x128x128xbf16> to vector<128x128xbf16>
    %cst_13 = arith.constant dense<0.000000e+00> : vector<384x128xf32>
    %14 = tpu.matmul %11, %13, %cst_13 {dimension_numbers = #tpu.dot_dimension_numbers<[1], [0], [0], [1], [0, 0, 1, 1], [], []>} : vector<384x128xbf16>, vector<128x128xbf16>, vector<384x128xf32> -> vector<384x128xf32>
    %15 = arith.addf %9, %14 : vector<384x128xf32>
    %c0_14 = arith.constant 0 : index
    %c2 = arith.constant 2 : index
    %c0_15 = arith.constant 0 : index
    %16 = vector.load %arg3[%c0_14, %c2, %c0_15] : memref<1x456x128xbf16, #tpu.memory_space<vmem>>, vector<1x384x128xbf16>
    %17 = vector.shape_cast %16 : vector<1x384x128xbf16> to vector<384x128xbf16>
    %c2_16 = arith.constant 2 : index
    %c0_17 = arith.constant 0 : index
    %c0_18 = arith.constant 0 : index
    %18 = vector.load %arg4[%c2_16, %c0_17, %c0_18] : memref<9x128x128xbf16, #tpu.memory_space<vmem>>, vector<1x128x128xbf16>
    %19 = vector.shape_cast %18 : vector<1x128x128xbf16> to vector<128x128xbf16>
    %cst_19 = arith.constant dense<0.000000e+00> : vector<384x128xf32>
    %20 = tpu.matmul %17, %19, %cst_19 {dimension_numbers = #tpu.dot_dimension_numbers<[1], [0], [0], [1], [0, 0, 1, 1], [], []>} : vector<384x128xbf16>, vector<128x128xbf16>, vector<384x128xf32> -> vector<384x128xf32>
    %21 = arith.addf %15, %20 : vector<384x128xf32>
    %c0_20 = arith.constant 0 : index
    %c24 = arith.constant 24 : index
    %c0_21 = arith.constant 0 : index
    %22 = vector.load %arg3[%c0_20, %c24, %c0_21] : memref<1x456x128xbf16, #tpu.memory_space<vmem>>, vector<1x384x128xbf16>
    %23 = vector.shape_cast %22 : vector<1x384x128xbf16> to vector<384x128xbf16>
    %c3 = arith.constant 3 : index
    %c0_22 = arith.constant 0 : index
    %c0_23 = arith.constant 0 : index
    %24 = vector.load %arg4[%c3, %c0_22, %c0_23] : memref<9x128x128xbf16, #tpu.memory_space<vmem>>, vector<1x128x128xbf16>
    %25 = vector.shape_cast %24 : vector<1x128x128xbf16> to vector<128x128xbf16>
    %cst_24 = arith.constant dense<0.000000e+00> : vector<384x128xf32>
    %26 = tpu.matmul %23, %25, %cst_24 {dimension_numbers = #tpu.dot_dimension_numbers<[1], [0], [0], [1], [0, 0, 1, 1], [], []>} : vector<384x128xbf16>, vector<128x128xbf16>, vector<384x128xf32> -> vector<384x128xf32>
    %27 = arith.addf %21, %26 : vector<384x128xf32>
    %c0_25 = arith.constant 0 : index
    %c25 = arith.constant 25 : index
    %c0_26 = arith.constant 0 : index
    %28 = vector.load %arg3[%c0_25, %c25, %c0_26] : memref<1x456x128xbf16, #tpu.memory_space<vmem>>, vector<1x384x128xbf16>
    %29 = vector.shape_cast %28 : vector<1x384x128xbf16> to vector<384x128xbf16>
    %c4 = arith.constant 4 : index
    %c0_27 = arith.constant 0 : index
    %c0_28 = arith.constant 0 : index
    %30 = vector.load %arg4[%c4, %c0_27, %c0_28] : memref<9x128x128xbf16, #tpu.memory_space<vmem>>, vector<1x128x128xbf16>
    %31 = vector.shape_cast %30 : vector<1x128x128xbf16> to vector<128x128xbf16>
    %cst_29 = arith.constant dense<0.000000e+00> : vector<384x128xf32>
    %32 = tpu.matmul %29, %31, %cst_29 {dimension_numbers = #tpu.dot_dimension_numbers<[1], [0], [0], [1], [0, 0, 1, 1], [], []>} : vector<384x128xbf16>, vector<128x128xbf16>, vector<384x128xf32> -> vector<384x128xf32>
    %33 = arith.addf %27, %32 : vector<384x128xf32>
    %c0_30 = arith.constant 0 : index
    %c26 = arith.constant 26 : index
    %c0_31 = arith.constant 0 : index
    %34 = vector.load %arg3[%c0_30, %c26, %c0_31] : memref<1x456x128xbf16, #tpu.memory_space<vmem>>, vector<1x384x128xbf16>
    %35 = vector.shape_cast %34 : vector<1x384x128xbf16> to vector<384x128xbf16>
    %c5 = arith.constant 5 : index
    %c0_32 = arith.constant 0 : index
    %c0_33 = arith.constant 0 : index
    %36 = vector.load %arg4[%c5, %c0_32, %c0_33] : memref<9x128x128xbf16, #tpu.memory_space<vmem>>, vector<1x128x128xbf16>
    %37 = vector.shape_cast %36 : vector<1x128x128xbf16> to vector<128x128xbf16>
    %cst_34 = arith.constant dense<0.000000e+00> : vector<384x128xf32>
    %38 = tpu.matmul %35, %37, %cst_34 {dimension_numbers = #tpu.dot_dimension_numbers<[1], [0], [0], [1], [0, 0, 1, 1], [], []>} : vector<384x128xbf16>, vector<128x128xbf16>, vector<384x128xf32> -> vector<384x128xf32>
    %39 = arith.addf %33, %38 : vector<384x128xf32>
    %c0_35 = arith.constant 0 : index
    %c48 = arith.constant 48 : index
    %c0_36 = arith.constant 0 : index
    %40 = vector.load %arg3[%c0_35, %c48, %c0_36] : memref<1x456x128xbf16, #tpu.memory_space<vmem>>, vector<1x384x128xbf16>
    %41 = vector.shape_cast %40 : vector<1x384x128xbf16> to vector<384x128xbf16>
    %c6 = arith.constant 6 : index
    %c0_37 = arith.constant 0 : index
    %c0_38 = arith.constant 0 : index
    %42 = vector.load %arg4[%c6, %c0_37, %c0_38] : memref<9x128x128xbf16, #tpu.memory_space<vmem>>, vector<1x128x128xbf16>
    %43 = vector.shape_cast %42 : vector<1x128x128xbf16> to vector<128x128xbf16>
    %cst_39 = arith.constant dense<0.000000e+00> : vector<384x128xf32>
    %44 = tpu.matmul %41, %43, %cst_39 {dimension_numbers = #tpu.dot_dimension_numbers<[1], [0], [0], [1], [0, 0, 1, 1], [], []>} : vector<384x128xbf16>, vector<128x128xbf16>, vector<384x128xf32> -> vector<384x128xf32>
    %45 = arith.addf %39, %44 : vector<384x128xf32>
    %c0_40 = arith.constant 0 : index
    %c49 = arith.constant 49 : index
    %c0_41 = arith.constant 0 : index
    %46 = vector.load %arg3[%c0_40, %c49, %c0_41] : memref<1x456x128xbf16, #tpu.memory_space<vmem>>, vector<1x384x128xbf16>
    %47 = vector.shape_cast %46 : vector<1x384x128xbf16> to vector<384x128xbf16>
    %c7 = arith.constant 7 : index
    %c0_42 = arith.constant 0 : index
    %c0_43 = arith.constant 0 : index
    %48 = vector.load %arg4[%c7, %c0_42, %c0_43] : memref<9x128x128xbf16, #tpu.memory_space<vmem>>, vector<1x128x128xbf16>
    %49 = vector.shape_cast %48 : vector<1x128x128xbf16> to vector<128x128xbf16>
    %cst_44 = arith.constant dense<0.000000e+00> : vector<384x128xf32>
    %50 = tpu.matmul %47, %49, %cst_44 {dimension_numbers = #tpu.dot_dimension_numbers<[1], [0], [0], [1], [0, 0, 1, 1], [], []>} : vector<384x128xbf16>, vector<128x128xbf16>, vector<384x128xf32> -> vector<384x128xf32>
    %51 = arith.addf %45, %50 : vector<384x128xf32>
    %c0_45 = arith.constant 0 : index
    %c50 = arith.constant 50 : index
    %c0_46 = arith.constant 0 : index
    %52 = vector.load %arg3[%c0_45, %c50, %c0_46] : memref<1x456x128xbf16, #tpu.memory_space<vmem>>, vector<1x384x128xbf16>
    %53 = vector.shape_cast %52 : vector<1x384x128xbf16> to vector<384x128xbf16>
    %c8 = arith.constant 8 : index
    %c0_47 = arith.constant 0 : index
    %c0_48 = arith.constant 0 : index
    %54 = vector.load %arg4[%c8, %c0_47, %c0_48] : memref<9x128x128xbf16, #tpu.memory_space<vmem>>, vector<1x128x128xbf16>
    %55 = vector.shape_cast %54 : vector<1x128x128xbf16> to vector<128x128xbf16>
    %cst_49 = arith.constant dense<0.000000e+00> : vector<384x128xf32>
    %56 = tpu.matmul %53, %55, %cst_49 {dimension_numbers = #tpu.dot_dimension_numbers<[1], [0], [0], [1], [0, 0, 1, 1], [], []>} : vector<384x128xbf16>, vector<128x128xbf16>, vector<384x128xf32> -> vector<384x128xf32>
    %57 = arith.addf %51, %56 : vector<384x128xf32>
    %c0_50 = arith.constant 0 : index
    %c0_51 = arith.constant 0 : index
    %58 = vector.load %arg7[%c0_50, %c0_51] : memref<384x128xf32, #tpu.memory_space<vmem>>, vector<384x128xf32>
    tpu.vector_store %arg7[%c0_50, %c0_51], %57 {strides = array<i32>} : memref<384x128xf32, #tpu.memory_space<vmem>>, vector<384x128xf32>,
    %c0_i32_52 = arith.constant 0 : i32
    %59 = arith.cmpi eq, %arg2, %c0_i32_52 : i32
    %60 = arith.extui %59 : i1 to i32
    %c0_i32_53 = arith.constant 0 : i32
    %61 = arith.cmpi ne, %60, %c0_i32_53 : i32
    scf.if %61 {
      %62 = vector.shape_cast %57 : vector<384x128xf32> to vector<16x24x128xf32>
      %63 = vector.extract_strided_slice %62 {offsets = [0, 0, 0], sizes = [16, 16, 128], strides = [1, 1, 1]} : vector<16x24x128xf32> to vector<16x16x128xf32>
      %64 = vector.shape_cast %63 : vector<16x16x128xf32> to vector<256x128xf32>
      %c0_54 = arith.constant 0 : index
      %c0_55 = arith.constant 0 : index
      %65 = vector.load %arg5[%c0_54, %c0_55] : memref<1x128xf32, #tpu.memory_space<vmem>>, vector<1x128xf32>
      %66 = vector.broadcast %65 : vector<1x128xf32> to vector<256x128xf32>
      %67 = arith.addf %64, %66 : vector<256x128xf32>
      %cst_56 = arith.constant 0.000000e+00 : f32
      %68 = vector.broadcast %cst_56 : f32 to vector<256x128xf32>
      %69 = arith.maximumf %67, %68 : vector<256x128xf32>
      %70 = arith.truncf %69 : vector<256x128xf32> to vector<256x128xbf16>
      %c0_57 = arith.constant 0 : index
      %c0_58 = arith.constant 0 : index
      %c0_59 = arith.constant 0 : index
      %71 = vector.load %arg6[%c0_57, %c0_58, %c0_59] : memref<1x256x128xbf16, #tpu.memory_space<vmem>>, vector<1x256x128xbf16>
      %72 = vector.shape_cast %71 : vector<1x256x128xbf16> to vector<256x128xbf16>
      %73 = vector.shape_cast %70 : vector<256x128xbf16> to vector<1x256x128xbf16>
      tpu.vector_store %arg6[%c0_57, %c0_58, %c0_59], %73 {strides = array<i32>} : memref<1x256x128xbf16, #tpu.memory_space<vmem>>, vector<1x256x128xbf16>,
    } else {
    }
    return
  }
  func.func @transform_0(%arg0: i32, %arg1: i32, %arg2: i32) -> (i32, i32, i32) {
    %c0_i32 = arith.constant 0 : i32
    %c0_i32_0 = arith.constant 0 : i32
    return %arg0, %c0_i32, %arg2 : i32, i32, i32
  }
  func.func @transform_1(%arg0: i32, %arg1: i32, %arg2: i32) -> (i32, i32, i32) {
    %c0_i32 = arith.constant 0 : i32
    %c0_i32_0 = arith.constant 0 : i32
    return %c0_i32, %arg2, %arg1 : i32, i32, i32
  }
  func.func @transform_2(%arg0: i32, %arg1: i32, %arg2: i32) -> (i32, i32) {
    %c0_i32 = arith.constant 0 : i32
    %c0_i32_0 = arith.constant 0 : i32
    return %c0_i32, %arg1 : i32, i32
  }
  func.func @transform_3(%arg0: i32, %arg1: i32, %arg2: i32) -> (i32, i32, i32) {
    %c0_i32 = arith.constant 0 : i32
    %c0_i32_0 = arith.constant 0 : i32
    return %arg0, %c0_i32, %arg1 : i32, i32, i32
  }
}

</mosaic_0001>

<bundles_post_ra>
// kernel: cdweights_forward.5
= control target key start
LH: loop header
LB: loop body
LE: loop exit
PB: predicated region body
PF: predicated region fallthrough
CT: control target
= control target key end

     0   :  { %s3438_s12 = smov 0   ;;  %s5921_s0 = inlined_call_operand.vmem [shape: bf16[2,256,128], index: 0, kind: input, shape index: {}]   ;;  %s5922_s1 = inlined_call_operand.vmem [shape: bf16[2,256,128], index: 1, kind: input, shape index: {}]   ;;  %s5923_s2 = inlined_call_operand.vmem [shape: bf16[2,256,128], index: 2, kind: output, shape index: {0}]   ;;  %s5924_s3 = inlined_call_operand.vmem [shape: bf16[2,256,128], index: 3, kind: output, shape index: {1}]  }
   0x1 LB: > { %s2672_s13 = sadd.s32 4294967295, %s3416_s12   ;;  %p2676_p0 = scmp.ge.s32.totalorder %s3416_s12, 1  ;;  %s3416_s12 = sphi %s3438_s12, %s14_s12  }
   0x2   : > { %p150_p1 = scmp.lt.s32.totalorder %s3416_s12, 3 }
   0x4   : > { %p151_p2 = pnand %p2676_p0, %p150_p1 }
   0x6   : > { %154 = sbr.rel (%p151_p2) target bundleno = 669 (0x29d), region = 28 }
   0xb   : > { %p184_p3 = scmp.lt.s32.totalorder %s2672_s13, 1 }
   0xd   : > { %s6337_s13 = smov (!%p184_p3, %s2672_s13), 1 }
   0xe   : > { %s3446_s14 = sshll.u32 %s6337_s13, 7 }
   0xf   : > { %s3452_s17 = scalar_lea.vmem %s5921_s0, %s3446_s14  ;;  %s3458_s20 = scalar_lea.vmem %s5922_s1, %s3446_s14 }
  0x10   : > { %v3013_v0 = vld [vmem:[%s3452_s17 + $0x10] sm:$0xff]   ;;  %v3012_v2 = vld [vmem:[%s3452_s17 + $0x8] sm:$0xff]   ;;  %v2725_v7 = vld [vmem:[%s3452_s17] sm:$0xff]   ;;  %s4814_s23 = scalar_lea.vmem %s5923_s2, %s3446_s14  ;;  %s4829_s26 = scalar_lea.vmem %s5924_s3, %s3446_s14 }
  0x11   : > { %v3028_v1 = vld [vmem:[%s3458_s20 + $0x10] sm:$0xff]   ;;  %v3463_v3 = vunpack.c.l.bf16 %v3013_v0  ;;  %v3467_v5 = vunpack.c.l.bf16 %v3012_v2  ;;  %v3027_v6 = vld [vmem:[%s3458_s20 + $0x8] sm:$0xff]   ;;  %v2789_v8 = vld [vmem:[%s3458_s20] sm:$0xff]   ;;  %v3474_v10 = vunpack.c.l.bf16 %v2725_v7  ;;  %v3480_v13 = vunpack.c.h.bf16 %v2725_v7 }
  0x12   : > { %v3465_v4 = vunpack.c.l.bf16 %v3028_v1  ;;  %v3472_v9 = vunpack.c.l.bf16 %v3027_v6  ;;  %v3476_v11 = vunpack.c.l.bf16 %v2789_v8  ;;  %v3486_v16 = vunpack.c.h.bf16 %v2789_v8  ;;  %v3014_v24 = vld [vmem:[%s3452_s17 + $0x18] sm:$0xff]   ;;  %v3015_v28 = vld [vmem:[%s3452_s17 + $0x20] sm:$0xff]   ;;  %v3016_v41 = vld [vmem:[%s3452_s17 + $0x28] sm:$0xff]  }
  0x13   : > { %6020 = vst [vmem:[#allocation2_spill] sm:$0xff] %v3463_v3  ;;  %v3488_v17 = vunpack.c.h.bf16 %v3013_v0  ;;  %v3490_v18 = vunpack.c.h.bf16 %v3028_v1  ;;  %v3492_v19 = vunpack.c.h.bf16 %v3012_v2  ;;  %v3494_v20 = vunpack.c.h.bf16 %v3027_v6  ;;  %v3029_v25 = vld [vmem:[%s3458_s20 + $0x18] sm:$0xff]   ;;  %v3030_v29 = vld [vmem:[%s3458_s20 + $0x20] sm:$0xff]   ;;  %v3031_v42 = vld [vmem:[%s3458_s20 + $0x28] sm:$0xff]  }
  0x14   : > { %6021 = vst [vmem:[#allocation3_spill] sm:$0xff] %v3465_v4  ;;  %v336_v12 = vmul.f32 %v3465_v4, %v3463_v3  ;;  %v334_v14 = vmul.f32 %v3472_v9, %v3467_v5  ;;  %v332_v15 = vmul.f32 %v3476_v11, %v3474_v10  ;;  %v333_v21 = vmul.f32 %v3486_v16, %v3480_v13  ;;  %v3017_v52 = vld [vmem:[%s3452_s17 + $0x30] sm:$0xff]   ;;  %v3018_v61 = vld [vmem:[%s3452_s17 + $0x38] sm:$0xff]  }
  0x15   : > { %6022 = vst [vmem:[#allocation4_spill] sm:$0xff] %v3467_v5  ;;  %v337_v23 = vmul.f32 %v3490_v18, %v3488_v17  ;;  %v335_v26 = vmul.f32 %v3494_v20, %v3492_v19  ;;  %v3506_v31 = vunpack.c.l.bf16 %v3014_v24  ;;  %v3508_v32 = vunpack.c.l.bf16 %v3029_v25  ;;  %v3032_v53 = vld [vmem:[%s3458_s20 + $0x30] sm:$0xff]   ;;  %v3033_v62 = vld [vmem:[%s3458_s20 + $0x38] sm:$0xff]  }
  0x16   : > { %6023 = vst [vmem:[#allocation5_spill] sm:$0xff] %v3472_v9  ;;  %596 = vadd.xlane.f32.xlu2 %v336_v12  ;;  %592 = vadd.xlane.f32.xlu1 %v334_v14  ;;  %v428_v22 = vadd.f32 %v333_v21, %v332_v15  ;;  %v3510_v33 = vunpack.c.l.bf16 %v3015_v28  ;;  %v3512_v34 = vunpack.c.l.bf16 %v3030_v29  ;;  %v3514_v35 = vunpack.c.h.bf16 %v3014_v24 }
  0x17   : > { %6024 = vst [vmem:[#allocation6_spill] sm:$0xff] %v3474_v10  ;;  %588 = vadd.xlane.f32.xlu0 %v332_v15  ;;  %v3516_v36 = vunpack.c.h.bf16 %v3029_v25  ;;  %v338_v38 = vmul.f32 %v3508_v32, %v3506_v31  ;;  %v3526_v45 = vunpack.c.h.bf16 %v3015_v28  ;;  %v3528_v46 = vunpack.c.h.bf16 %v3030_v29  ;;  %v3020_v28 = vld [vmem:[%s3452_s17 + $0x48] sm:$0xff]  }
  0x18   : > { %6025 = vst [vmem:[#allocation7_spill] sm:$0xff] %v3480_v13  ;;  %v429_v27 = vadd.f32 %v428_v22, %v334_v14  ;;  %v340_v40 = vmul.f32 %v3512_v34, %v3510_v33  ;;  %v3530_v48 = vunpack.c.l.bf16 %v3016_v41  ;;  %v3532_v49 = vunpack.c.l.bf16 %v3031_v42  ;;  %v3034_v14 = vld [vmem:[%s3458_s20 + $0x40] sm:$0xff]   ;;  %v3035_v29 = vld [vmem:[%s3458_s20 + $0x48] sm:$0xff]  }
  0x19   : > { %6026 = vst [vmem:[#allocation8_spill] sm:$0xff] %v3488_v17  ;;  %v339_v43 = vmul.f32 %v3516_v36, %v3514_v35  ;;  %v3534_v50 = vunpack.c.h.bf16 %v3016_v41  ;;  %v3536_v51 = vunpack.c.h.bf16 %v3031_v42  ;;  %v341_v54 = vmul.f32 %v3528_v46, %v3526_v45 }
  0x1a   : > { %6027 = vst [vmem:[#allocation9_spill] sm:$0xff] %v3490_v18  ;;  %v430_v30 = vadd.f32 %v429_v27, %v335_v26  ;;  %v342_v56 = vmul.f32 %v3532_v49, %v3530_v48  ;;  %v3544_v58 = vunpack.c.l.bf16 %v3017_v52  ;;  %v3546_v59 = vunpack.c.l.bf16 %v3032_v53 }
  0x1b   : > { %6028 = vst [vmem:[#allocation10_spill] sm:$0xff] %v3492_v19  ;;  %v343_v60 = vmul.f32 %v3536_v51, %v3534_v50  ;;  %v3552_v0 = vunpack.c.h.bf16 %v3017_v52  ;;  %v3554_v1 = vunpack.c.h.bf16 %v3032_v53  ;;  %v3556_v2 = vunpack.c.l.bf16 %v3018_v61 }
  0x1c   : > { %6029 = vst [vmem:[#allocation11_spill] sm:$0xff] %v3494_v20  ;;  %v431_v37 = vadd.f32 %v430_v30, %v336_v12  ;;  %v3558_v6 = vunpack.c.l.bf16 %v3033_v62  ;;  %v344_v7 = vmul.f32 %v3546_v59, %v3544_v58  ;;  %v3019_v12 = vld [vmem:[%s3452_s17 + $0x40] sm:$0xff]   ;;  %v3566_v22 = vunpack.c.h.bf16 %v3018_v61 }
  0x1d   : > { %6030 = vst [vmem:[#allocation12_spill] sm:$0xff] %v3506_v31  ;;  %v345_v15 = vmul.f32 %v3554_v1, %v3552_v0  ;;  %v3574_v27 = vunpack.c.l.bf16 %v3034_v14  ;;  %v3578_v30 = vunpack.c.h.bf16 %v3019_v12  ;;  %v3586_v42 = vunpack.c.l.bf16 %v3020_v28 }
  0x1e   : > { %6031 = vst [vmem:[#allocation13_spill] sm:$0xff] %v3508_v32  ;;  %598 = vadd.xlane.f32.xlu2 %v337_v23  ;;  %594 = vadd.xlane.f32.xlu1 %v335_v26  ;;  %v432_v39 = vadd.f32 %v431_v37, %v337_v23  ;;  %v3568_v23 = vunpack.c.h.bf16 %v3033_v62  ;;  %v346_v24 = vmul.f32 %v3558_v6, %v3556_v2  ;;  %v3572_v26 = vunpack.c.l.bf16 %v3019_v12  ;;  %v3022_v62 = vld [vmem:[%s3452_s17 + $0x58] sm:$0xff]  }
  0x1f   : > { %6032 = vst [vmem:[#allocation14_spill] sm:$0xff] %v3510_v33  ;;  %590 = vadd.xlane.f32.xlu0 %v333_v21  ;;  %v3580_v37 = vunpack.c.h.bf16 %v3034_v14 }
  0x20   : > { %6033 = vst [vmem:[#allocation15_spill] sm:$0xff] %v3512_v34  ;;  %v433_v44 = vadd.f32 %v432_v39, %v338_v38 }
  0x21   : > { %6034 = vst [vmem:[#allocation16_spill] sm:$0xff] %v3514_v35  ;;  %v349_v52 = vmul.f32 %v3580_v37, %v3578_v30 }
  0x22   : > { %6035 = vst [vmem:[#allocation17_spill] sm:$0xff] %v3516_v36  ;;  %v434_v47 = vadd.f32 %v433_v44, %v339_v43  ;;  %v3021_v44 = vld [vmem:[%s3452_s17 + $0x50] sm:$0xff]  }
  0x23   : > { %6036 = vst [vmem:[#allocation18_spill] sm:$0xff] %v3526_v45  ;;  %v3608_v12 = vunpack.c.h.bf16 %v3021_v44 }
  0x24   : > { %6037 = vst [vmem:[#allocation19_spill] sm:$0xff] %v3528_v46  ;;  %v435_v55 = vadd.f32 %v434_v47, %v340_v40  ;;  %v3036_v47 = vld [vmem:[%s3458_s20 + $0x50] sm:$0xff]  }
  0x25   : > { %6038 = vst [vmem:[#allocation20_spill] sm:$0xff] %v3530_v48  ;;  %v3610_v14 = vunpack.c.h.bf16 %v3036_v47 }
  0x26   : > { %6039 = vst [vmem:[#allocation21_spill] sm:$0xff] %v3532_v49  ;;  %604 = vadd.xlane.f32.xlu2 %v340_v40  ;;  %602 = vadd.xlane.f32.xlu1 %v339_v43  ;;  %v436_v57 = vadd.f32 %v435_v55, %v341_v54  ;;  %v348_v40 = vmul.f32 %v3574_v27, %v3572_v26  ;;  %v3588_v43 = vunpack.c.l.bf16 %v3035_v29  ;;  %v3596_v55 = vunpack.c.h.bf16 %v3035_v29  ;;  %v3038_v29 = vld [vmem:[%s3458_s20 + $0x60] sm:$0xff]  }
  0x27   : > { %6040 = vst [vmem:[#allocation22_spill] sm:$0xff] %v3534_v50  ;;  %600 = vadd.xlane.f32.xlu0 %v338_v38  ;;  %v347_v38 = vmul.f32 %v3568_v23, %v3566_v22 }
  0x28   : > { %6041 = vst [vmem:[#allocation23_spill] sm:$0xff] %v3536_v51  ;;  %v437_v63 = vadd.f32 %v436_v57, %v342_v56  ;;  %v3600_v57 = vunpack.c.l.bf16 %v3036_v47 }
  0x29   : > { %6042 = vst [vmem:[#allocation24_spill] sm:$0xff] %v3544_v58 }
  0x2a   : > { %6043 = vst [vmem:[#allocation25_spill] sm:$0xff] %v3546_v59  ;;  %v438_v8 = vadd.f32 %v437_v63, %v343_v60  ;;  %v3037_v63 = vld [vmem:[%s3458_s20 + $0x58] sm:$0xff]  }
  0x2b   : > { %6044 = vst [vmem:[#allocation26_spill] sm:$0xff] %v3552_v0 }
  0x2c   : > { %6045 = vst [vmem:[#allocation27_spill] sm:$0xff] %v3554_v1  ;;  %v439_v21 = vadd.f32 %v438_v8, %v344_v7 }
  0x2d   : > { %6046 = vst [vmem:[#allocation28_spill] sm:$0xff] %v3556_v2 }
  0x2e   : > { %6047 = vst [vmem:[#allocation29_spill] sm:$0xff] %v3558_v6  ;;  %610 = vadd.xlane.f32.xlu2 %v343_v60  ;;  %608 = vadd.xlane.f32.xlu1 %v342_v56  ;;  %v440_v25 = vadd.f32 %v439_v21, %v345_v15  ;;  %v3598_v56 = vunpack.c.l.bf16 %v3021_v44  ;;  %v350_v60 = vmul.f32 %v3588_v43, %v3586_v42 }
  0x2f   : > { %606 = vadd.xlane.f32.xlu0 %v341_v54  ;;  %6048 = vst [vmem:[#allocation30_spill] sm:$0xff] %v3566_v22  ;;  %v3594_v54 = vunpack.c.h.bf16 %v3020_v28  ;;  %v3023_v28 = vld [vmem:[%s3452_s17 + $0x60] sm:$0xff]   ;;  %v353_v44 = vmul.f32 %v3610_v14, %v3608_v12 }
  0x30   : > { %6049 = vst [vmem:[#allocation31_spill] sm:$0xff] %v3568_v23  ;;  %v441_v39 = vadd.f32 %v440_v25, %v346_v24  ;;  %v3616_v25 = vunpack.c.l.bf16 %v3037_v63 }
  0x31   : > { %6050 = vst [vmem:[#allocation32_spill] sm:$0xff] %v3572_v26 }
  0x32   : > { %6051 = vst [vmem:[#allocation33_spill] sm:$0xff] %v3574_v27  ;;  %v442_v41 = vadd.f32 %v441_v39, %v347_v38  ;;  %v3620_v39 = vunpack.c.h.bf16 %v3022_v62  ;;  %v3026_v27 = vld [vmem:[%s3452_s17 + $0x78] sm:$0xff]  }
  0x33   : > { %6052 = vst [vmem:[#allocation34_spill] sm:$0xff] %v3578_v30 }
  0x34   : > { %6053 = vst [vmem:[#allocation35_spill] sm:$0xff] %v3580_v37  ;;  %v443_v53 = vadd.f32 %v442_v41, %v348_v40  ;;  %v3622_v41 = vunpack.c.h.bf16 %v3037_v63 }
  0x35   : > { %6054 = vst [vmem:[#allocation36_spill] sm:$0xff] %v3586_v42 }
  0x36   : > { %6055 = vst [vmem:[#allocation37_spill] sm:$0xff] %v3588_v43  ;;  %616 = vadd.xlane.f32.xlu2 %v346_v24  ;;  %614 = vadd.xlane.f32.xlu1 %v345_v15  ;;  %v444_v61 = vadd.f32 %v443_v53, %v349_v52  ;;  %v352_v15 = vmul.f32 %v3600_v57, %v3598_v56  ;;  %v3614_v24 = vunpack.c.l.bf16 %v3022_v62  ;;  %v3025_v43 = vld [vmem:[%s3452_s17 + $0x70] sm:$0xff]  }
  0x37   : > { %612 = vadd.xlane.f32.xlu0 %v344_v7  ;;  %6056 = vst [vmem:[#allocation38_spill] sm:$0xff] %v3594_v54  ;;  %v351_v7 = vmul.f32 %v3596_v55, %v3594_v54  ;;  %v355_v62 = vmul.f32 %v3622_v41, %v3620_v39  ;;  %v3654_v6 = vunpack.c.l.bf16 %v3025_v43 }
  0x38   : > { %6057 = vst [vmem:[#allocation39_spill] sm:$0xff] %v3596_v55  ;;  %v445_v8 = vadd.f32 %v444_v61, %v350_v60  ;;  %v354_v53 = vmul.f32 %v3616_v25, %v3614_v24  ;;  %v3040_v55 = vld [vmem:[%s3458_s20 + $0x70] sm:$0xff]  }
  0x39   : > { %6058 = vst [vmem:[#allocation40_spill] sm:$0xff] %v3598_v56  ;;  %v3656_v23 = vunpack.c.l.bf16 %v3040_v55 }
  0x3a   : > { %6059 = vst [vmem:[#allocation41_spill] sm:$0xff] %v3600_v57  ;;  %v446_v21 = vadd.f32 %v445_v8, %v351_v7  ;;  %v3628_v8 = vunpack.c.l.bf16 %v3023_v28  ;;  %v3636_v57 = vunpack.c.h.bf16 %v3023_v28 }
  0x3b   : > { %6060 = vst [vmem:[#allocation42_spill] sm:$0xff] %v3608_v12 }
  0x3c   : > { %6061 = vst [vmem:[#allocation43_spill] sm:$0xff] %v3610_v14  ;;  %v447_v47 = vadd.f32 %v446_v21, %v352_v15  ;;  %v3638_v14 = vunpack.c.h.bf16 %v3038_v29 }
  0x3d   : > { %6062 = vst [vmem:[#allocation44_spill] sm:$0xff] %v3614_v24 }
  0x3e   : > { %6063 = vst [vmem:[#allocation45_spill] sm:$0xff] %v3616_v25  ;;  %622 = vadd.xlane.f32.xlu2 %v349_v52  ;;  %620 = vadd.xlane.f32.xlu1 %v348_v40  ;;  %v448_v61 = vadd.f32 %v447_v47, %v353_v44  ;;  %v3630_v52 = vunpack.c.l.bf16 %v3038_v29  ;;  %v3024_v40 = vld [vmem:[%s3452_s17 + $0x68] sm:$0xff]   ;;  %v357_v28 = vmul.f32 %v3638_v14, %v3636_v57 }
  0x3f   : > { %618 = vadd.xlane.f32.xlu0 %v347_v38  ;;  %6064 = vst [vmem:[#allocation46_spill] sm:$0xff] %v3620_v39  ;;  %v3039_v38 = vld [vmem:[%s3458_s20 + $0x68] sm:$0xff]   ;;  %v3640_v21 = vunpack.c.l.bf16 %v3024_v40 }
  0x40   : > { %6065 = vst [vmem:[#allocation47_spill] sm:$0xff] %v3622_v41  ;;  %v449_v63 = vadd.f32 %v448_v61, %v354_v53  ;;  %v3642_v37 = vunpack.c.l.bf16 %v3039_v38  ;;  %v356_v47 = vmul.f32 %v3630_v52, %v3628_v8  ;;  %v3650_v61 = vunpack.c.h.bf16 %v3024_v40 }
  0x41   : > { %6066 = vst [vmem:[#allocation48_spill] sm:$0xff] %v3628_v8  ;;  %v3652_v41 = vunpack.c.h.bf16 %v3039_v38  ;;  %v360_v38 = vmul.f32 %v3656_v23, %v3654_v6 }
  0x42   : > { %6067 = vst [vmem:[#allocation49_spill] sm:$0xff] %v3630_v52  ;;  %v450_v25 = vadd.f32 %v449_v63, %v355_v62  ;;  %v358_v63 = vmul.f32 %v3642_v37, %v3640_v21 }
  0x43   : > { %6068 = vst [vmem:[#allocation50_spill] sm:$0xff] %v3636_v57 }
  0x44   : > { %6069 = vst [vmem:[#allocation51_spill] sm:$0xff] %v3638_v14  ;;  %v451_v29 = vadd.f32 %v450_v25, %v356_v47  ;;  %v359_v25 = vmul.f32 %v3652_v41, %v3650_v61  ;;  %v3670_v14 = vunpack.c.l.bf16 %v3026_v27 }
  0x45   : > { %6070 = vst [vmem:[#allocation52_spill] sm:$0xff] %v3640_v21 }
  0x46   : > { %6071 = vst [vmem:[#allocation53_spill] sm:$0xff] %v3642_v37  ;;  %628 = vadd.xlane.f32.xlu2 %v352_v15  ;;  %626 = vadd.xlane.f32.xlu1 %v351_v7  ;;  %v452_v52 = vadd.f32 %v451_v29, %v357_v28  ;;  %v3661_v15 = vunpack.c.h.bf16 %v3025_v43  ;;  %v3041_v7 = vld [vmem:[%s3458_s20 + $0x78] sm:$0xff]   ;;  %v364_v37 = vmul.f32 %v3474_v10, %v3474_v10 }
  0x47   : > { %624 = vadd.xlane.f32.xlu0 %v350_v60  ;;  %6072 = vst [vmem:[#allocation54_spill] sm:$0xff] %v3650_v61  ;;  %v3663_v60 = vunpack.c.h.bf16 %v3040_v55  ;;  %v3674_v29 = vunpack.c.l.bf16 %v3041_v7  ;;  %v365_v43 = vmul.f32 %v3480_v13, %v3480_v13 }
  0x48   : > { %6073 = vst [vmem:[#allocation55_spill] sm:$0xff] %v3652_v41  ;;  %v453_v40 = vadd.f32 %v452_v52, %v358_v63  ;;  %v3680_v41 = vunpack.c.h.bf16 %v3026_v27 }
  0x49   : > { %6074 = vst [vmem:[#allocation56_spill] sm:$0xff] %v3654_v6  ;;  %v361_v55 = vmul.f32 %v3663_v60, %v3661_v15  ;;  %v465_v10 = vadd.f32 %v365_v43, %v364_v37  ;;  %v362_v51 = vmul.f32 %v3674_v29, %v3670_v14 }
  0x4a   : > { %6075 = vst [vmem:[#allocation57_spill] sm:$0xff] %v3656_v23  ;;  %v454_v59 = vadd.f32 %v453_v40, %v359_v25  ;;  %v3682_v23 = vunpack.c.h.bf16 %v3041_v7  ;;  %v366_v40 = vmul.f32 %v3467_v5, %v3467_v5  ;;  %v369_v7 = vmul.f32 %v3488_v17, %v3488_v17 }
  0x4b   : > { %6076 = vst [vmem:[#allocation58_spill] sm:$0xff] %v3661_v15  ;;  %v373_v17 = vmul.f32 %v3526_v45, %v3526_v45 }
  0x4c   : > { %6077 = vst [vmem:[#allocation59_spill] sm:$0xff] %v3663_v60  ;;  %v455_v52 = vadd.f32 %v454_v59, %v360_v38  ;;  %v466_v13 = vadd.f32 %v465_v10, %v366_v40  ;;  %v367_v59 = vmul.f32 %v3492_v19, %v3492_v19 }
  0x4d   : > { %6078 = vst [vmem:[#allocation60_spill] sm:$0xff] %v3670_v14 }
  0x4e   : > { %6079 = vst [vmem:[#allocation61_spill] sm:$0xff] %v3674_v29  ;;  %634 = vadd.xlane.f32.xlu2 %v355_v62  ;;  %632 = vadd.xlane.f32.xlu1 %v354_v53  ;;  %v456_v1 = vadd.f32 %v455_v52, %v361_v55  ;;  %v363_v62 = vmul.f32 %v3682_v23, %v3680_v41 }
  0x4f   : > { %6080 = vst [vmem:[#allocation62_spill] sm:$0xff] %v3680_v41  ;;  %630 = vadd.xlane.f32.xlu0 %v353_v44  ;;  %v368_v44 = vmul.f32 %v3463_v3, %v3463_v3  ;;  %v467_v53 = vadd.f32 %v466_v13, %v367_v59 }
  0x50   : > { %6081 = vst [vmem:[#allocation63_spill] sm:$0xff] %v3682_v23  ;;  %v457_v60 = vadd.f32 %v456_v1, %v362_v51  ;;  %v370_v1 = vmul.f32 %v3506_v31, %v3506_v31 }
  0x51   : > { %v468_v10 = vadd.f32 %v467_v53, %v368_v44 }
  0x52   : > { %v3690_v27 = vadd.f32 %v457_v60, %v363_v62 }
  0x53   : > { %v469_v52 = vadd.f32 %v468_v10, %v369_v7 }
  0x56   : > { %640 = vadd.xlane.f32.xlu2 %v358_v63  ;;  %638 = vadd.xlane.f32.xlu1 %v357_v28  ;;  %v371_v63 = vmul.f32 %v3514_v35, %v3514_v35  ;;  %v470_v28 = vadd.f32 %v469_v52, %v370_v1  ;;  %v376_v52 = vmul.f32 %v3544_v58, %v3544_v58 }
  0x57   : > { %636 = vadd.xlane.f32.xlu0 %v356_v47  ;;  %v372_v47 = vmul.f32 %v3510_v33, %v3510_v33 }
  0x58   : > { %v471_v60 = vadd.f32 %v470_v28, %v371_v63 }
  0x5a   : > { %v472_v13 = vadd.f32 %v471_v60, %v372_v47 }
  0x5e   : > { %646 = vadd.xlane.f32.xlu2 %v361_v55  ;;  %644 = vadd.xlane.f32.xlu1 %v360_v38  ;;  %v374_v55 = vmul.f32 %v3530_v48, %v3530_v48  ;;  %v473_v38 = vadd.f32 %v472_v13, %v373_v17  ;;  %v379_v13 = vmul.f32 %v3566_v22, %v3566_v22 }
  0x5f   : > { %642 = vadd.xlane.f32.xlu0 %v359_v25  ;;  %v375_v25 = vmul.f32 %v3534_v50, %v3534_v50 }
  0x60   : > { %v474_v53 = vadd.f32 %v473_v38, %v374_v55 }
  0x62   : > { %v475_v10 = vadd.f32 %v474_v53, %v375_v25 }
  0x66   : > { %652 = vadd.xlane.f32.xlu2 %v364_v37  ;;  %650 = vadd.xlane.f32.xlu1 %v363_v62  ;;  %v377_v37 = vmul.f32 %v3552_v0, %v3552_v0  ;;  %v476_v62 = vadd.f32 %v475_v10, %v376_v52  ;;  %v382_v10 = vmul.f32 %v3586_v42, %v3586_v42 }
  0x67   : > { %648 = vadd.xlane.f32.xlu0 %v362_v51  ;;  %v378_v51 = vmul.f32 %v3556_v2, %v3556_v2  ;;  %v403_v42 = vmul.f32 %v3516_v36, %v3516_v36 }
  0x68   : > { %v477_v28 = vadd.f32 %v476_v62, %v377_v37 }
  0x6a   : > { %v478_v60 = vadd.f32 %v477_v28, %v378_v51 }
  0x6e   : > { %658 = vadd.xlane.f32.xlu2 %v367_v59  ;;  %656 = vadd.xlane.f32.xlu1 %v366_v40  ;;  %v380_v59 = vmul.f32 %v3572_v26, %v3572_v26  ;;  %v479_v40 = vadd.f32 %v478_v60, %v379_v13  ;;  %v385_v60 = vmul.f32 %v3608_v12, %v3608_v12 }
  0x6f   : > { %654 = vadd.xlane.f32.xlu0 %v365_v43  ;;  %v381_v43 = vmul.f32 %v3578_v30, %v3578_v30  ;;  %v398_v12 = vmul.f32 %v3472_v9, %v3472_v9  ;;  %v400_v30 = vmul.f32 %v3465_v4, %v3465_v4 }
  0x70   : > { %v480_v38 = vadd.f32 %v479_v40, %v380_v59  ;;  %v387_v40 = vmul.f32 %v3620_v39, %v3620_v39 }
  0x72   : > { %v481_v53 = vadd.f32 %v480_v38, %v381_v43 }
  0x76   : > { %664 = vadd.xlane.f32.xlu2 %v370_v1  ;;  %662 = vadd.xlane.f32.xlu1 %v369_v7  ;;  %v383_v1 = vmul.f32 %v3594_v54, %v3594_v54  ;;  %v482_v7 = vadd.f32 %v481_v53, %v382_v10 }
  0x77   : > { %660 = vadd.xlane.f32.xlu0 %v368_v44  ;;  %v384_v44 = vmul.f32 %v3598_v56, %v3598_v56 }
  0x78   : > { %v483_v62 = vadd.f32 %v482_v7, %v383_v1 }
  0x7a   : > { %v484_v28 = vadd.f32 %v483_v62, %v384_v44 }
  0x7e   : > { %670 = vadd.xlane.f32.xlu2 %v373_v17  ;;  %668 = vadd.xlane.f32.xlu1 %v372_v47  ;;  %v386_v17 = vmul.f32 %v3614_v24, %v3614_v24  ;;  %v485_v47 = vadd.f32 %v484_v28, %v385_v60 }
  0x7f   : > { %666 = vadd.xlane.f32.xlu0 %v371_v63 }
  0x80   : > { %v486_v38 = vadd.f32 %v485_v47, %v386_v17  ;;  %v390_v47 = vmul.f32 %v3640_v21, %v3640_v21 }
  0x82   : > { %v487_v62 = vadd.f32 %v486_v38, %v387_v40 }
  0x86   : > { %676 = vadd.xlane.f32.xlu2 %v376_v52  ;;  %674 = vadd.xlane.f32.xlu1 %v375_v25  ;;  %v388_v52 = vmul.f32 %v3628_v8, %v3628_v8 }
  0x87   : > { %672 = vadd.xlane.f32.xlu0 %v374_v55  ;;  %v389_v55 = vmul.f32 %v3636_v57, %v3636_v57 }
  0x88   : > { %v488_v25 = vadd.f32 %v487_v62, %v388_v52 }
  0x89   : > { %v3732_v63 = vpop.xlane.xlu2 %596  ;;  %v3736_v53 = vpop.xlane.xlu1 %592 }
  0x8a   : > { %v3738_v7 = vpop.xlane.xlu0 %588  ;;  %v489_v39 = vadd.f32 %v488_v25, %v389_v55  ;;  %v393_v25 = vmul.f32 %v3661_v15, %v3661_v15 }
  0x8c   : > { %v490_v38 = vadd.f32 %v489_v39, %v390_v47 }
  0x8e   : > { %682 = vadd.xlane.f32.xlu2 %v379_v13  ;;  %680 = vadd.xlane.f32.xlu1 %v378_v51  ;;  %v391_v13 = vmul.f32 %v3650_v61, %v3650_v61 }
  0x8f   : > { %678 = vadd.xlane.f32.xlu0 %v377_v37  ;;  %v392_v37 = vmul.f32 %v3654_v6, %v3654_v6 }
  0x90   : > { %v491_v51 = vadd.f32 %v490_v38, %v391_v13 }
  0x91   : > { %v3744_v28 = vpop.xlane.xlu2 %598  ;;  %v3748_v24 = vpop.xlane.xlu1 %594 }
  0x92   : > { %6082 = vst [vmem:[#allocation64_spill] sm:$0xff] %v3744_v28  ;;  %v3750_v56 = vpop.xlane.xlu0 %590  ;;  %v492_v21 = vadd.f32 %v491_v51, %v392_v37  ;;  %v395_v51 = vmul.f32 %v3680_v41, %v3680_v41 }
  0x94   : > { %v493_v39 = vadd.f32 %v492_v21, %v393_v25 }
  0x96   : > { %688 = vadd.xlane.f32.xlu2 %v382_v10  ;;  %686 = vadd.xlane.f32.xlu1 %v381_v43  ;;  %v394_v10 = vmul.f32 %v3670_v14, %v3670_v14  ;;  %v397_v43 = vmul.f32 %v3486_v16, %v3486_v16 }
  0x97   : > { %684 = vadd.xlane.f32.xlu0 %v380_v59  ;;  %v396_v59 = vmul.f32 %v3476_v11, %v3476_v11 }
  0x98   : > { %v494_v15 = vadd.f32 %v493_v39, %v394_v10 }
  0x99   : > { %v3756_v62 = vpop.xlane.xlu2 %604  ;;  %v3760_v57 = vpop.xlane.xlu1 %602  ;;  %v515_v38 = vadd.f32 %v397_v43, %v396_v59 }
  0x9a   : > { %6083 = vst [vmem:[#allocation65_spill] sm:$0xff] %v3756_v62  ;;  %v3762_v8 = vpop.xlane.xlu0 %600  ;;  %v495_v21 = vadd.f32 %v494_v15, %v395_v51 }
  0x9c   : > { %v496_v22 = vrot.slane %v495_v21, 4 }
  0x9e   : > { %694 = vadd.xlane.f32.xlu2 %v385_v60  ;;  %692 = vadd.xlane.f32.xlu1 %v384_v44  ;;  %v516_v44 = vadd.f32 %v515_v38, %v398_v12 }
  0x9f   : > { %690 = vadd.xlane.f32.xlu0 %v383_v1  ;;  %v399_v1 = vmul.f32 %v3494_v20, %v3494_v20 }
  0xa1   : > { %v3772_v6 = vpop.xlane.xlu2 %610  ;;  %v3774_v61 = vpop.xlane.xlu1 %608  ;;  %v517_v39 = vadd.f32 %v516_v44, %v399_v1  ;;  %v402_v44 = vmul.f32 %v3508_v32, %v3508_v32 }
  0xa2   : > { %6084 = vst [vmem:[#allocation66_spill] sm:$0xff] %v3772_v6  ;;  %v3776_v14 = vpop.xlane.xlu0 %606  ;;  %v6119_v6 = vld [vmem:[#allocation51_spill] sm:$0xff] }
  0xa3   : > { %6085 = vst [vmem:[#allocation67_spill] sm:$0xff] %v3774_v61 }
  0xa4   : > { %6086 = vst [vmem:[#allocation68_spill] sm:$0xff] %v3776_v14 }
  0xa6   : > { %700 = vadd.xlane.f32.xlu2 %v388_v52  ;;  %698 = vadd.xlane.f32.xlu1 %v387_v40  ;;  %v518_v40 = vadd.f32 %v517_v39, %v400_v30 }
  0xa7   : > { %696 = vadd.xlane.f32.xlu0 %v386_v17  ;;  %v401_v17 = vmul.f32 %v3490_v18, %v3490_v18 }
  0xa9   : > { %v3782_v60 = vpop.xlane.xlu2 %616  ;;  %v3784_v41 = vpop.xlane.xlu1 %614  ;;  %v519_v54 = vadd.f32 %v518_v40, %v401_v17 }
  0xaa   : > { %6087 = vst [vmem:[#allocation69_spill] sm:$0xff] %v3782_v60  ;;  %v3786_v15 = vpop.xlane.xlu0 %612 }
  0xab   : > { %6088 = vst [vmem:[#allocation70_spill] sm:$0xff] %v3784_v41 }
  0xac   : > { %6089 = vst [vmem:[#allocation71_spill] sm:$0xff] %v3786_v15 }
  0xae   : > { %706 = vadd.xlane.f32.xlu2 %v391_v13  ;;  %704 = vadd.xlane.f32.xlu1 %v390_v47  ;;  %v520_v13 = vadd.f32 %v519_v54, %v402_v44 }
  0xaf   : > { %702 = vadd.xlane.f32.xlu0 %v389_v55 }
  0xb0   : > { %v521_v55 = vadd.f32 %v520_v13, %v403_v42 }
  0xb1   : > { %v3792_v52 = vpop.xlane.xlu2 %622  ;;  %v3794_v38 = vpop.xlane.xlu1 %620 }
  0xb2   : > { %6090 = vst [vmem:[#allocation72_spill] sm:$0xff] %v3792_v52  ;;  %v3796_v26 = vpop.xlane.xlu0 %618 }
  0xb3   : > { %6091 = vst [vmem:[#allocation73_spill] sm:$0xff] %v3794_v38 }
  0xb4   : > { %6092 = vst [vmem:[#allocation74_spill] sm:$0xff] %v3796_v26 }
  0xb6   : > { %712 = vadd.xlane.f32.xlu2 %v394_v10  ;;  %710 = vadd.xlane.f32.xlu1 %v393_v25  ;;  %v497_v10 = vadd.f32 %v496_v22, %v495_v21 }
  0xb7   : > { %708 = vadd.xlane.f32.xlu0 %v392_v37  ;;  %v404_v37 = vmul.f32 %v3512_v34, %v3512_v34 }
  0xb9   : > { %v3802_v47 = vpop.xlane.xlu2 %628  ;;  %v3804_v39 = vpop.xlane.xlu1 %626  ;;  %v522_v25 = vadd.f32 %v521_v55, %v404_v37 }
  0xba   : > { %6093 = vst [vmem:[#allocation75_spill] sm:$0xff] %v3802_v47  ;;  %v3806_v52 = vpop.xlane.xlu0 %624  ;;  %v498_v47 = vrot.slane %v497_v10, 2 }
  0xbb   : > { %6094 = vst [vmem:[#allocation76_spill] sm:$0xff] %v3804_v39 }
  0xbc   : > { %6095 = vst [vmem:[#allocation77_spill] sm:$0xff] %v3806_v52 }
  0xbe   : > { %1134 = vadd.xlane.f32.xlu2 %v397_v43  ;;  %1132 = vadd.xlane.f32.xlu1 %v396_v59  ;;  %v405_v59 = vmul.f32 %v3528_v46, %v3528_v46 }
  0xbf   : > { %714 = vadd.xlane.f32.xlu0 %v395_v51 }
  0xc1   : > { %v3808_v2 = vpop.xlane.xlu2 %634  ;;  %v3810_v40 = vpop.xlane.xlu1 %632 }
  0xc2   : > { %6096 = vst [vmem:[#allocation78_spill] sm:$0xff] %v3808_v2  ;;  %v3812_v54 = vpop.xlane.xlu0 %630  ;;  %v523_v2 = vadd.f32 %v522_v25, %v405_v59 }
  0xc3   : > { %6097 = vst [vmem:[#allocation79_spill] sm:$0xff] %v3810_v40  ;;  %v406_v40 = vmul.f32 %v3532_v49, %v3532_v49 }
  0xc4   : > { %6098 = vst [vmem:[#allocation80_spill] sm:$0xff] %v3812_v54 }
  0xc6   : > { %1140 = vadd.xlane.f32.xlu2 %v400_v30  ;;  %1138 = vadd.xlane.f32.xlu1 %v399_v1  ;;  %v524_v30 = vadd.f32 %v523_v2, %v406_v40 }
  0xc7   : > { %1136 = vadd.xlane.f32.xlu0 %v398_v12  ;;  %v499_v12 = vadd.f32 %v498_v47, %v497_v10  ;;  %v6108_v47 = vld [vmem:[#allocation25_spill] sm:$0xff] }
  0xc8   : > { %v408_v10 = vmul.f32 %v6108_v47, %v6108_v47  ;;  %v6117_v47 = vld [vmem:[#allocation43_spill] sm:$0xff] }
  0xc9   : > { %v3816_v13 = vpop.xlane.xlu2 %640  ;;  %v3820_v43 = vpop.xlane.xlu1 %638  ;;  %v500_v55 = vrot.slane %v499_v12, 1  ;;  %v3893_v58 = vmul.f32 %v6117_v47, %v6117_v47 }
  0xca   : > { %6099 = vst [vmem:[#allocation81_spill] sm:$0xff] %v3816_v13  ;;  %v3822_v51 = vpop.xlane.xlu0 %636 }
  0xcb   : > { %6100 = vst [vmem:[#allocation82_spill] sm:$0xff] %v3820_v43  ;;  %v3832_v25 = vadd.f32 %v500_v55, %v499_v12  ;;  %v6110_v12 = vld [vmem:[#allocation33_spill] sm:$0xff] }
  0xcc   : > { %6101 = vst [vmem:[#allocation83_spill] sm:$0xff] %v3822_v51  ;;  %v412_v55 = vmul.f32 %v6110_v12, %v6110_v12  ;;  %v6112_v51 = vld [vmem:[#allocation29_spill] sm:$0xff]  ;;  %v6113_v12 = vld [vmem:[#allocation39_spill] sm:$0xff] }
  0xcd   : > { %3080 = vrsqrt.f32 %v3832_v25  ;;  %v410_v54 = vmul.f32 %v6112_v51, %v6112_v51  ;;  %v6114_v51 = vld [vmem:[#allocation37_spill] sm:$0xff]  ;;  %vm509_vm0 = vcmp.eq.f32.partialorder %v3832_v25, inf  ;;  %v512_v62 = vand.u32 2147483648, %v3832_v25 }
  0xce   : > { %1146 = vadd.xlane.f32.xlu2 %v403_v42  ;;  %1144 = vadd.xlane.f32.xlu1 %v402_v44  ;;  %v6106_v42 = vld [vmem:[#allocation27_spill] sm:$0xff]  ;;  %vm511_vm1 = vcmp.eq.f32.partialorder %v3832_v25, 0.0 }
  0xcf   : > { %1142 = vadd.xlane.f32.xlu0 %v401_v17  ;;  %v409_v2 = vmul.f32 %v6106_v42, %v6106_v42  ;;  %v6107_v17 = vld [vmem:[#allocation23_spill] sm:$0xff] }
  0xd0   : > { %v407_v44 = vmul.f32 %v6107_v17, %v6107_v17  ;;  %v414_v17 = vmul.f32 %v6114_v51, %v6114_v51  ;;  %v6116_v51 = vld [vmem:[#allocation45_spill] sm:$0xff] }
  0xd1   : > { %v3826_v22 = vpop.xlane.xlu2 %646  ;;  %v3828_v21 = vpop.xlane.xlu1 %644  ;;  %v3887_v42 = vmul.f32 %v6116_v51, %v6116_v51 }
  0xd2   : > { %6102 = vst [vmem:[#allocation84_spill] sm:$0xff] %v3826_v22  ;;  %v3830_v1 = vpop.xlane.xlu0 %642 }
  0xd3   : > { %6103 = vst [vmem:[#allocation85_spill] sm:$0xff] %v3828_v21  ;;  %v6111_v21 = vld [vmem:[#allocation31_spill] sm:$0xff] }
  0xd4   : > { %6104 = vst [vmem:[#allocation86_spill] sm:$0xff] %v3830_v1  ;;  %v411_v1 = vmul.f32 %v6111_v21, %v6111_v21  ;;  %v415_v21 = vmul.f32 %v6113_v12, %v6113_v12 }
  0xd6   : > { %1152 = vadd.xlane.f32.xlu2 %v406_v40  ;;  %1150 = vadd.xlane.f32.xlu1 %v405_v59  ;;  %v525_v40 = vadd.f32 %v524_v30, %v407_v44 }
  0xd7   : > { %1148 = vadd.xlane.f32.xlu0 %v404_v37 }
  0xd8   : > { %v526_v37 = vadd.f32 %v525_v40, %v408_v10 }
  0xd9   : > { %v3834_v13 = vpop.xlane.xlu1 %650  ;;  %v3836_v43 = vpop.xlane.xlu2 %652 }
  0xda   : > { %6105 = vst [vmem:[#allocation87_spill] sm:$0xff] %v3834_v13  ;;  %v3844_v22 = vpop.xlane.xlu0 %648  ;;  %v3081_v13 = vpop.eup %3080  ;;  %v527_v30 = vadd.f32 %v526_v37, %v409_v2  ;;  %3082 = vrsqrt.f32 %v3836_v43  ;;  %vm723_vm2 = vcmp.eq.f32.partialorder %v3836_v43, inf  ;;  %vm725_vm3 = vcmp.eq.f32.partialorder %v3836_v43, 0.0 }
  0xdb   : > { %6109 = vst [vmem:[#allocation88_spill] sm:$0xff] %v3844_v22  ;;  %v503_v39 = vmul.f32 %v3081_v13, %v3832_v25 }
  0xde   : > { %1158 = vadd.xlane.f32.xlu2 %v409_v2  ;;  %1156 = vadd.xlane.f32.xlu1 %v408_v10  ;;  %v504_v10 = vmul.f32 %v3081_v13, %v503_v39  ;;  %v6115_v2 = vld [vmem:[#allocation35_spill] sm:$0xff] }
  0xdf   : > { %1154 = vadd.xlane.f32.xlu0 %v407_v44  ;;  %v528_v44 = vadd.f32 %v527_v30, %v410_v54  ;;  %v413_v37 = vmul.f32 %v6115_v2, %v6115_v2  ;;  %v459_v30 = vrot.slane %v3690_v27, 4 }
  0xe0   : > { %v3871_v49 = vpop.eup %3082 }
  0xe1   : > { %v3847_v59 = vpop.xlane.xlu1 %656  ;;  %v3855_v22 = vpop.xlane.xlu2 %658  ;;  %v529_v50 = vadd.f32 %v528_v44, %v411_v1  ;;  %v460_v60 = vadd.f32 %v459_v30, %v3690_v27 }
  0xe2   : > { %v3858_v52 = vpop.xlane.xlu0 %654  ;;  %3084 = vrsqrt.f32 %v3855_v22  ;;  %vm759_vm4 = vcmp.eq.f32.partialorder %v3855_v22, inf  ;;  %vm747_vm5 = vcmp.eq.f32.partialorder %v3847_v59, inf  ;;  %vm749_vm6 = vcmp.eq.f32.partialorder %v3847_v59, 0.0 }
  0xe3   : > { %3086 = vrsqrt.f32 %v3847_v59  ;;  %v530_v2 = vadd.f32 %v529_v50, %v412_v55  ;;  %v6118_v50 = vld [vmem:[#allocation41_spill] sm:$0xff]  ;;  %vm761_vm7 = vcmp.eq.f32.partialorder %v3855_v22, 0.0  ;;  %vm735_vm8 = vcmp.eq.f32.partialorder %v3858_v52, inf }
  0xe4   : > { %3088 = vrsqrt.f32 %v3858_v52  ;;  %vm737_vm11 = vcmp.eq.f32.partialorder %v3858_v52, 0.0 }
  0xe5   : > { %v531_v38 = vadd.f32 %v530_v2, %v413_v37  ;;  %v461_v2 = vrot.slane %v460_v60, 2 }
  0xe6   : > { %1164 = vadd.xlane.f32.xlu2 %v412_v55  ;;  %1162 = vadd.xlane.f32.xlu1 %v411_v1  ;;  %v717_v1 = vmul.f32 %v3871_v49, %v3836_v43  ;;  %v416_v55 = vmul.f32 %v6118_v50, %v6118_v50 }
  0xe7   : > { %1160 = vadd.xlane.f32.xlu0 %v410_v54  ;;  %v505_v54 = vmul.f32 0.5, %v504_v10 }
  0xe8   : > { %v3882_v44 = vpop.eup %3084 }
  0xe9   : > { %v3861_v40 = vpop.xlane.xlu1 %662  ;;  %v3873_v39 = vpop.xlane.xlu2 %664  ;;  %v506_v10 = vsub.f32 1.5, %v505_v54  ;;  %v718_v54 = vmul.f32 %v3871_v49, %v717_v1  ;;  %v753_v51 = vmul.f32 %v3882_v44, %v3855_v22 }
  0xea   : > { %v3877_v12 = vpop.xlane.xlu0 %660  ;;  %3090 = vrsqrt.f32 %v3873_v39  ;;  %v3889_v0 = vpop.eup %3086  ;;  %vm783_vm9 = vcmp.eq.f32.partialorder %v3861_v40, inf  ;;  %vm795_vm10 = vcmp.eq.f32.partialorder %v3873_v39, inf  ;;  %vm785_vm12 = vcmp.eq.f32.partialorder %v3861_v40, 0.0 }
  0xeb   : > { %3092 = vrsqrt.f32 %v3861_v40  ;;  %v3903_v33 = vpop.eup %3088  ;;  %v507_v48 = vmul.f32 %v3081_v13, %v506_v10  ;;  %v741_v47 = vmul.f32 %v3889_v0, %v3847_v59  ;;  %v719_v30 = vmul.f32 0.5, %v718_v54  ;;  %v6120_v54 = vld [vmem:[#allocation49_spill] sm:$0xff] }
  0xec   : > { %v754_v1 = vmul.f32 %v3882_v44, %v753_v51  ;;  %v729_v13 = vmul.f32 %v3903_v33, %v3858_v52  ;;  %3094 = vrsqrt.f32 %v3877_v12  ;;  %v3934_v41 = vmul.f32 %v6120_v54, %v6120_v54 }
  0xed   : > { %v508_v50 = vmul.f32 %v507_v48, %v3832_v25  ;;  %v742_v45 = vmul.f32 %v3889_v0, %v741_v47  ;;  %v6121_v48 = vld [vmem:[#allocation47_spill] sm:$0xff]  ;;  %v462_v47 = vadd.f32 %v461_v2, %v460_v60  ;;  %vm797_vm13 = vcmp.eq.f32.partialorder %v3873_v39, 0.0 }
  0xee   : > { %1170 = vadd.xlane.f32.xlu2 %v415_v21  ;;  %1168 = vadd.xlane.f32.xlu1 %v414_v17  ;;  %v3938_v15 = vmul.f32 %v6121_v48, %v6121_v48  ;;  %v755_v4 = vmul.f32 0.5, %v754_v1  ;;  %v730_v3 = vmul.f32 %v3903_v33, %v729_v13  ;;  %vm771_vm14 = vcmp.eq.f32.partialorder %v3877_v12, inf }
  0xef   : > { %1166 = vadd.xlane.f32.xlu0 %v413_v37  ;;  %v532_v37 = vadd.f32 %v531_v38, %v414_v17  ;;  %v3926_v38 = vmul.f32 %v6119_v6, %v6119_v6  ;;  %v720_v6 = vsub.f32 1.5, %v719_v30  ;;  %v510_v61 = vsel %vm509_vm0, %v3832_v25, %v508_v50 }
  0xf0   : > { %v3908_v46 = vpop.eup %3090  ;;  %v743_v54 = vmul.f32 0.5, %v742_v45  ;;  %v463_v50 = vrot.slane %v462_v47, 1  ;;  %v3955_v25 = vsel %vm511_vm1, %v512_v62, %v510_v61  ;;  %v731_v30 = vmul.f32 0.5, %v730_v3  ;;  %v6123_v61 = vld [vmem:[#allocation55_spill] sm:$0xff] }
  0xf1   : > { %v3898_v34 = vpop.xlane.xlu1 %668  ;;  %v3911_v27 = vpop.eup %3092  ;;  %v789_v17 = vmul.f32 %v3908_v46, %v3873_v39  ;;  %v533_v18 = vadd.f32 %v532_v37, %v415_v21  ;;  %v721_v45 = vmul.f32 %v3871_v49, %v720_v6  ;;  %v756_v37 = vsub.f32 1.5, %v755_v4 }
  0xf2   : > { %v3917_v10 = vpop.xlane.xlu2 %670  ;;  %v3922_v26 = vpop.xlane.xlu0 %666  ;;  %v777_v51 = vmul.f32 %v3911_v27, %v3861_v40  ;;  %v744_v1 = vsub.f32 1.5, %v743_v54  ;;  %v3971_v4 = vmul.f32 %v6123_v61, %v6123_v61  ;;  %v3973_v3 = vadd.f32 %v463_v50, %v462_v47 }
  0xf3   : > { %3096 = vrsqrt.f32 %v3917_v10  ;;  %v3948_v48 = vpop.eup %3094  ;;  %v790_v21 = vmul.f32 %v3908_v46, %v789_v17  ;;  %v534_v2 = vadd.f32 %v533_v18, %v416_v55  ;;  %v722_v54 = vmul.f32 %v721_v45, %v3836_v43 }
  0xf4   : > { %v778_v60 = vmul.f32 %v3911_v27, %v777_v51  ;;  %3098 = vrsqrt.f32 %v3898_v34  ;;  %v765_v13 = vmul.f32 %v3948_v48, %v3877_v12  ;;  %v6122_v51 = vld [vmem:[#allocation57_spill] sm:$0xff]  ;;  %v745_v47 = vmul.f32 %v3889_v0, %v744_v1 }
  0xf5   : > { %v3962_v17 = vmul.f32 %v6122_v51, %v6122_v51  ;;  %v791_v31 = vmul.f32 0.5, %v790_v21  ;;  %3100 = vrsqrt.f32 %v3922_v26  ;;  %v535_v6 = vadd.f32 %v534_v2, %v3893_v58 }
  0xf6   : > { %1176 = vadd.xlane.f32.xlu2 %v3887_v42  ;;  %1174 = vadd.xlane.f32.xlu1 %v3893_v58  ;;  %v779_v32 = vmul.f32 0.5, %v778_v60  ;;  %v757_v60 = vmul.f32 %v3882_v44, %v756_v37  ;;  %v732_v21 = vsub.f32 1.5, %v731_v30  ;;  %v766_v50 = vmul.f32 %v3948_v48, %v765_v13 }
  0xf7   : > { %1172 = vadd.xlane.f32.xlu0 %v416_v55  ;;  %v726_v58 = vand.u32 2147483648, %v3836_v43  ;;  %v792_v45 = vsub.f32 1.5, %v791_v31  ;;  %v762_v0 = vand.u32 2147483648, %v3855_v22  ;;  %v536_v37 = vadd.f32 %v535_v6, %v3887_v42 }
  0xf8   : > { %v780_v2 = vsub.f32 1.5, %v779_v32  ;;  %v750_v32 = vand.u32 2147483648, %v3847_v59  ;;  %v758_v31 = vmul.f32 %v757_v60, %v3855_v22  ;;  %v733_v13 = vmul.f32 %v3903_v33, %v732_v21 }
  0xf9   : > { %v3945_v36 = vpop.xlane.xlu1 %674  ;;  %v3964_v35 = vpop.eup %3096  ;;  %v724_v42 = vsel %vm723_vm2, %v3836_v43, %v722_v54  ;;  %v746_v6 = vmul.f32 %v745_v47, %v3847_v59  ;;  %v767_v61 = vmul.f32 0.5, %v766_v50  ;;  %v793_v60 = vmul.f32 %v3908_v46, %v792_v45 }
  0xfa   : > { %v3967_v18 = vpop.xlane.xlu2 %676  ;;  %v3978_v62 = vpop.xlane.xlu0 %672  ;;  %v825_v49 = vmul.f32 %v3964_v35, %v3917_v10  ;;  %3102 = vrsqrt.f32 %v3945_v36  ;;  %v781_v9 = vmul.f32 %v3911_v27, %v780_v2  ;;  %v537_v47 = vadd.f32 %v536_v37, %v3938_v15 }
  0xfb   : > { %v3980_v55 = vpop.eup %3098  ;;  %3104 = vrsqrt.f32 %v3967_v18  ;;  %v4028_v27 = vsel %vm725_vm3, %v726_v58, %v724_v42  ;;  %v760_v46 = vsel %vm759_vm4, %v3855_v22, %v758_v31  ;;  %v786_v50 = vand.u32 2147483648, %v3861_v40 }
  0xfc   : > { %v813_v44 = vmul.f32 %v3980_v55, %v3898_v34  ;;  %v4001_v1 = vpop.eup %3100  ;;  %v826_v14 = vmul.f32 %v3964_v35, %v825_v49  ;;  %v734_v49 = vmul.f32 %v733_v13, %v3858_v52  ;;  %v768_v43 = vsub.f32 1.5, %v767_v61 }
  0xfd   : > { %v801_v54 = vmul.f32 %v4001_v1, %v3922_v26  ;;  %v782_v31 = vmul.f32 %v781_v9, %v3861_v40  ;;  %v794_v13 = vmul.f32 %v793_v60, %v3873_v39  ;;  %3106 = vrsqrt.f32 %v3978_v62 }
  0xfe   : > { %1182 = vadd.xlane.f32.xlu2 %v3926_v38  ;;  %1180 = vadd.xlane.f32.xlu1 %v3934_v41  ;;  %v814_v21 = vmul.f32 %v3980_v55, %v813_v44  ;;  %v827_v58 = vmul.f32 0.5, %v826_v14  ;;  %v6124_v44 = vld [vmem:[#allocation53_spill] sm:$0xff]  ;;  %v538_v61 = vadd.f32 %v537_v47, %v3934_v41  ;;  %v774_v9 = vand.u32 2147483648, %v3877_v12 }
  0xff   : > { %1178 = vadd.xlane.f32.xlu0 %v3938_v15  ;;  %v748_v15 = vsel %vm747_vm5, %v3847_v59, %v746_v6  ;;  %v422_v37 = vmul.f32 %v6124_v44, %v6124_v44  ;;  %v802_v51 = vmul.f32 %v4001_v1, %v801_v54  ;;  %v798_v44 = vand.u32 2147483648, %v3873_v39 }
 0x100   : > { %v4019_v33 = vpop.eup %3102  ;;  %v815_v6 = vmul.f32 0.5, %v814_v21  ;;  %v4063_v21 = vsel %vm749_vm6, %v750_v32, %v748_v15  ;;  %v4067_v41 = vsel %vm761_vm7, %v762_v0, %v760_v46  ;;  %v769_v54 = vmul.f32 %v3948_v48, %v768_v43 }
 0x101   : > { %v3999_v30 = vpop.xlane.xlu1 %680  ;;  %v849_v42 = vmul.f32 %v4019_v33, %v3945_v36  ;;  %v4059_v60 = vpop.eup %3104  ;;  %v828_v47 = vsub.f32 1.5, %v827_v58  ;;  %v736_v5 = vsel %vm735_vm8, %v3858_v52, %v734_v49  ;;  %v784_v20 = vsel %vm783_vm9, %v3861_v40, %v782_v31 }
 0x102   : > { %v4036_v2 = vpop.xlane.xlu2 %682  ;;  %v4043_v45 = vpop.xlane.xlu0 %678  ;;  %3108 = vrsqrt.f32 %v3999_v30  ;;  %v796_v59 = vsel %vm795_vm10, %v3873_v39, %v794_v13  ;;  %vm773_vm15 = vcmp.eq.f32.partialorder %v3877_v12, 0.0  ;;  %v816_v48 = vsub.f32 1.5, %v815_v6 }
 0x103   : > { %v850_v22 = vmul.f32 %v4019_v33, %v849_v42  ;;  %v803_v0 = vmul.f32 0.5, %v802_v51  ;;  %3110 = vrsqrt.f32 %v4036_v2  ;;  %v539_v32 = vadd.f32 %v538_v61, %v3926_v38  ;;  %v4085_v46 = vpop.eup %3106 }
 0x104   : > { %vm831_vm0 = vcmp.eq.f32.partialorder %v3917_v10, inf  ;;  %v861_v43 = vmul.f32 %v4059_v60, %v3967_v18  ;;  %3112 = vrsqrt.f32 %v4043_v45  ;;  %v6125_v51 = vand.u32 2147483648, %v3858_v52 }
 0x105   : > { %v770_v31 = vmul.f32 %v769_v54, %v3877_v12  ;;  %v829_v13 = vmul.f32 %v3964_v35, %v828_v47  ;;  %v4107_v6 = vsel %vm785_vm12, %v786_v50, %v784_v20  ;;  %v4111_v61 = vsel %vm797_vm13, %v798_v44, %v796_v59 }
 0x106   : > { %1188 = vadd.xlane.f32.xlu2 %v3962_v17  ;;  %1186 = vadd.xlane.f32.xlu1 %v3971_v4  ;;  %v4099_v38 = vsel %vm737_vm11, %v6125_v51, %v736_v5  ;;  %vm819_vm1 = vcmp.eq.f32.partialorder %v3898_v34, inf  ;;  %v851_v5 = vmul.f32 0.5, %v850_v22  ;;  %v817_v54 = vmul.f32 %v3980_v55, %v816_v48 }
 0x107   : > { %1184 = vadd.xlane.f32.xlu0 %v422_v37  ;;  %v804_v35 = vsub.f32 1.5, %v803_v0  ;;  %v837_v47 = vmul.f32 %v4085_v46, %v3978_v62  ;;  %v540_v51 = vadd.f32 %v539_v32, %v422_v37  ;;  %vm833_vm2 = vcmp.eq.f32.partialorder %v3917_v10, 0.0 }
 0x108   : > { %v4093_v58 = vpop.eup %3108  ;;  %v862_v40 = vmul.f32 %v4059_v60, %v861_v43  ;;  %v772_v55 = vsel %vm771_vm14, %v3877_v12, %v770_v31  ;;  %vm821_vm3 = vcmp.eq.f32.partialorder %v3898_v34, 0.0  ;;  %v830_v44 = vmul.f32 %v829_v13, %v3917_v10 }
 0x109   : > { %v4070_v14 = vpop.xlane.xlu1 %686  ;;  %v885_v39 = vmul.f32 %v4093_v58, %v3999_v30  ;;  %v4126_v50 = vpop.eup %3110  ;;  %v834_v37 = vand.u32 2147483648, %v3917_v10  ;;  %vm807_vm4 = vcmp.eq.f32.partialorder %v3922_v26, inf  ;;  %v852_v32 = vsub.f32 1.5, %v851_v5 }
 0x10a   : > { %3114 = vrsqrt.f32 %v4070_v14  ;;  %v4114_v52 = vpop.xlane.xlu2 %688  ;;  %v4119_v42 = vpop.xlane.xlu0 %684  ;;  %v818_v49 = vmul.f32 %v817_v54, %v3898_v34  ;;  %v805_v13 = vmul.f32 %v4001_v1, %v804_v35  ;;  %v838_v20 = vmul.f32 %v4085_v46, %v837_v47  ;;  %v6126_v47 = vld [vmem:[#allocation59_spill] sm:$0xff] }
 0x10b   : > { %v4135_v22 = vpop.eup %3112  ;;  %v541_v59 = vadd.f32 %v540_v51, %v3971_v4  ;;  %v4151_v48 = vsel %vm773_vm15, %v774_v9, %v772_v55  ;;  %v863_v0 = vmul.f32 0.5, %v862_v40  ;;  %v886_v5 = vmul.f32 %v4093_v58, %v885_v39 }
 0x10c   : > { %v897_v43 = vmul.f32 %v4126_v50, %v4036_v2  ;;  %v832_v1 = vsel %vm831_vm0, %v3917_v10, %v830_v44  ;;  %vm809_vm5 = vcmp.eq.f32.partialorder %v3922_v26, 0.0  ;;  %vm855_vm6 = vcmp.eq.f32.partialorder %v3945_v36, inf }
 0x10d   : > { %v873_v4 = vmul.f32 %v4135_v22, %v4043_v45  ;;  %v426_v12 = vmul.f32 %v3674_v29, %v3674_v29  ;;  %v427_v9 = vmul.f32 %v3682_v23, %v3682_v23  ;;  %v853_v54 = vmul.f32 %v4019_v33, %v852_v32 }
 0x10e   : > { %3116 = vrsqrt.f32 %v4114_v52  ;;  %v425_v51 = vmul.f32 %v6126_v47, %v6126_v47  ;;  %v820_v40 = vsel %vm819_vm1, %v3898_v34, %v818_v49  ;;  %v806_v39 = vmul.f32 %v805_v13, %v3922_v26 }
 0x10f   : > { %v839_v55 = vmul.f32 0.5, %v838_v20  ;;  %1192 = vadd.xlane.f32.xlu1 %v426_v12  ;;  %1194 = vadd.xlane.f32.xlu2 %v427_v9  ;;  %v542_v44 = vadd.f32 %v541_v59, %v3962_v17  ;;  %v864_v32 = vsub.f32 1.5, %v863_v0  ;;  %v887_v23 = vmul.f32 0.5, %v886_v5 }
 0x110   : > { %v4141_v31 = vpop.eup %3114  ;;  %v898_v29 = vmul.f32 %v4126_v50, %v897_v43  ;;  %1190 = vadd.xlane.f32.xlu0 %v425_v51  ;;  %v4184_v47 = vsel %vm833_vm2, %v834_v37, %v832_v1  ;;  %v870_v49 = vand.u32 2147483648, %v3967_v18  ;;  %v874_v20 = vmul.f32 %v4135_v22, %v873_v4 }
 0x111   : > { %v4147_v15 = vpop.xlane.xlu1 %692  ;;  %v921_v35 = vmul.f32 %v4141_v31, %v4070_v14  ;;  %v543_v13 = vadd.f32 %v542_v44, %v425_v51  ;;  %v6127_v17 = vand.u32 2147483648, %v3898_v34  ;;  %v854_v0 = vmul.f32 %v853_v54, %v3945_v36 }
 0x112   : > { %v4180_v19 = vpop.xlane.xlu2 %694  ;;  %v4188_v28 = vpop.xlane.xlu0 %690  ;;  %vm857_vm7 = vcmp.eq.f32.partialorder %v3945_v36, 0.0  ;;  %v846_v10 = vand.u32 2147483648, %v3978_v62  ;;  %v808_v43 = vsel %vm807_vm4, %v3922_v26, %v806_v39  ;;  %vm867_vm8 = vcmp.eq.f32.partialorder %v3967_v18, inf }
 0x113   : > { %v4194_v59 = vsel %vm821_vm3, %v6127_v17, %v820_v40  ;;  %v922_v37 = vmul.f32 %v4141_v31, %v921_v35  ;;  %v840_v5 = vsub.f32 1.5, %v839_v55  ;;  %3118 = vrsqrt.f32 %v4119_v42 }
 0x114   : > { %6128 = vst [vmem:[#allocation89_spill] sm:$0xff] %v4194_v59  ;;  %v544_v34 = vadd.f32 %v543_v13, %v426_v12  ;;  %v4205_v1 = vpop.eup %3116  ;;  %v865_v54 = vmul.f32 %v4059_v60, %v864_v32  ;;  %v888_v51 = vsub.f32 1.5, %v887_v23  ;;  %v899_v40 = vmul.f32 0.5, %v898_v29 }
 0x115   : > { %v875_v44 = vmul.f32 0.5, %v874_v20  ;;  %3120 = vrsqrt.f32 %v4147_v15  ;;  %v6129_v55 = vand.u32 2147483648, %v3922_v26  ;;  %v856_v60 = vsel %vm855_vm6, %v3945_v36, %v854_v0 }
 0x116   : > { %v545_v17 = vadd.f32 %v544_v34, %v427_v9  ;;  %vm869_vm9 = vcmp.eq.f32.partialorder %v3967_v18, 0.0  ;;  %vm843_vm10 = vcmp.eq.f32.partialorder %v3978_v62, inf  ;;  %v923_v23 = vmul.f32 0.5, %v922_v37 }
 0x117   : > { %v4217_v12 = vsel %vm809_vm5, %v6129_v55, %v808_v43  ;;  %3122 = vrsqrt.f32 %v4180_v19  ;;  %v841_v29 = vmul.f32 %v4085_v46, %v840_v5  ;;  %v933_v9 = vmul.f32 %v4205_v1, %v4114_v52 }
 0x118   : > { %v546_v32 = vrot.slane %v545_v17, 4  ;;  %3124 = vrsqrt.f32 %v4188_v28  ;;  %v866_v26 = vmul.f32 %v865_v54, %v3967_v18  ;;  %v889_v20 = vmul.f32 %v4093_v58, %v888_v51 }
 0x119   : > { %v4211_v39 = vpop.xlane.xlu1 %698  ;;  %v900_v13 = vsub.f32 1.5, %v899_v40  ;;  %v4232_v0 = vpop.eup %3118  ;;  %vm845_vm11 = vcmp.eq.f32.partialorder %v3978_v62, 0.0  ;;  %vm891_vm12 = vcmp.eq.f32.partialorder %v3999_v30, inf  ;;  %v894_v46 = vand.u32 2147483648, %v3999_v30 }
 0x11a   : > { %3126 = vrsqrt.f32 %v4211_v39  ;;  %v876_v37 = vsub.f32 1.5, %v875_v44  ;;  %v547_v43 = vadd.f32 %v546_v32, %v545_v17  ;;  %vm893_vm13 = vcmp.eq.f32.partialorder %v3999_v30, 0.0  ;;  %v4241_v51 = vpop.xlane.xlu2 %700  ;;  %v4254_v4 = vpop.xlane.xlu0 %696 }
 0x11b   : > { %v924_v54 = vsub.f32 1.5, %v923_v23  ;;  %v4243_v40 = vpop.eup %3120  ;;  %v6130_v55 = vand.u32 2147483648, %v3945_v36  ;;  %v842_v44 = vmul.f32 %v841_v29, %v3978_v62  ;;  %vm903_vm14 = vcmp.eq.f32.partialorder %v4036_v2, inf }
 0x11c   : > { %v934_v17 = vmul.f32 %v4205_v1, %v933_v9  ;;  %v548_v32 = vrot.slane %v547_v43, 2  ;;  %v868_v5 = vsel %vm867_vm8, %v3967_v18, %v866_v26  ;;  %v890_v33 = vmul.f32 %v889_v20, %v3999_v30 }
 0x11d   : > { %v4249_v35 = vsel %vm857_vm7, %v6130_v55, %v856_v60  ;;  %v4256_v23 = vpop.eup %3122  ;;  %v901_v36 = vmul.f32 %v4126_v50, %v900_v13  ;;  %vm879_vm15 = vcmp.eq.f32.partialorder %v4043_v45, inf  ;;  %v909_v60 = vmul.f32 %v4232_v0, %v4119_v42 }
 0x11e   : > { %6131 = vst [vmem:[#allocation90_spill] sm:$0xff] %v4249_v35  ;;  %v4266_v29 = vpop.eup %3124  ;;  %v877_v9 = vmul.f32 %v4135_v22, %v876_v37  ;;  %vm927_vm0 = vcmp.eq.f32.partialorder %v4070_v14, inf  ;;  %v549_v55 = vadd.f32 %v548_v32, %v547_v43  ;;  %3128 = vrsqrt.f32 %v4241_v51 }
 0x11f   : > { %vm905_vm1 = vcmp.eq.f32.partialorder %v4036_v2, 0.0  ;;  %v925_v50 = vmul.f32 %v4141_v31, %v924_v54  ;;  %v957_v20 = vmul.f32 %v4243_v40, %v4147_v15  ;;  %3130 = vrsqrt.f32 %v4254_v4 }
 0x120   : > { %v4271_v58 = vpop.eup %3126  ;;  %v4283_v22 = vsel %vm869_vm9, %v870_v49, %v868_v5  ;;  %v844_v13 = vsel %vm843_vm10, %v3978_v62, %v842_v44  ;;  %vm881_vm2 = vcmp.eq.f32.partialorder %v4043_v45, 0.0  ;;  %v935_v37 = vmul.f32 0.5, %v934_v17 }
 0x121   : > { %6132 = vst [vmem:[#allocation91_spill] sm:$0xff] %v4283_v22  ;;  %v550_v43 = vrot.slane %v549_v55, 1  ;;  %v892_v31 = vsel %vm891_vm12, %v3999_v30, %v890_v33  ;;  %v902_v54 = vmul.f32 %v901_v36, %v4036_v2  ;;  %vm929_vm3 = vcmp.eq.f32.partialorder %v4070_v14, 0.0  ;;  %v4304_v33 = vpop.xlane.xlu1 %704 }
 0x122   : > { %v910_v18 = vmul.f32 %v4232_v0, %v909_v60  ;;  %v969_v49 = vmul.f32 %v4256_v23, %v4180_v19  ;;  %v878_v5 = vmul.f32 %v877_v9, %v4043_v45  ;;  %v945_v17 = vmul.f32 %v4266_v29, %v4188_v28 }
 0x123   : > { %v4298_v44 = vadd.f32 %v550_v43, %v549_v55  ;;  %v993_v32 = vmul.f32 %v4271_v58, %v4211_v39  ;;  %v4310_v36 = vsel %vm845_vm11, %v846_v10, %v844_v13  ;;  %v926_v60 = vmul.f32 %v925_v50, %v4070_v14  ;;  %v4330_v13 = vpop.xlane.xlu2 %706 }
 0x124   : > { %6133 = vst [vmem:[#allocation92_spill] sm:$0xff] %v4310_v36  ;;  %v930_v9 = vand.u32 2147483648, %v4070_v14  ;;  %v958_v55 = vmul.f32 %v4243_v40, %v957_v20  ;;  %v4315_v43 = vpop.eup %3128  ;;  %v4320_v34 = vsel %vm893_vm13, %v894_v46, %v892_v31  ;;  %v936_v35 = vsub.f32 1.5, %v935_v37 }
 0x125   : > { %6134 = vst [vmem:[#allocation93_spill] sm:$0xff] %v4320_v34  ;;  %3132 = vrsqrt.f32 %v4298_v44  ;;  %v4323_v62 = vpop.eup %3130  ;;  %v904_v10 = vsel %vm903_vm14, %v4036_v2, %v902_v54  ;;  %v911_v50 = vmul.f32 0.5, %v910_v18  ;;  %v970_v20 = vmul.f32 %v4256_v23, %v969_v49 }
 0x126   : > { %3134 = vrsqrt.f32 %v4304_v33  ;;  %v880_v46 = vsel %vm879_vm15, %v4043_v45, %v878_v5  ;;  %v946_v37 = vmul.f32 %v4266_v29, %v945_v17  ;;  %v994_v31 = vmul.f32 %v4271_v58, %v993_v32 }
 0x127   : > { %v928_v54 = vsel %vm927_vm0, %v4070_v14, %v926_v60  ;;  %vm939_vm4 = vcmp.eq.f32.partialorder %v4114_v52, inf  ;;  %v942_v18 = vand.u32 2147483648, %v4114_v52  ;;  %v959_v49 = vmul.f32 0.5, %v958_v55 }
 0x128   : > { %v1005_v26 = vmul.f32 %v4315_v43, %v4241_v51  ;;  %v6135_v5 = vand.u32 2147483648, %v4036_v2  ;;  %v937_v32 = vmul.f32 %v4205_v1, %v936_v35  ;;  %v981_v60 = vmul.f32 %v4323_v62, %v4254_v4 }
 0x129   : > { %v6137_v22 = vand.u32 2147483648, %v4043_v45  ;;  %v912_v59 = vsub.f32 1.5, %v911_v50  ;;  %v971_v36 = vmul.f32 0.5, %v970_v20  ;;  %3136 = vrsqrt.f32 %v4330_v13 }
 0x12a   : > { %v4350_v17 = vsel %vm905_vm1, %v6135_v5, %v904_v10  ;;  %v4364_v2 = vsel %vm929_vm3, %v930_v9, %v928_v54  ;;  %vm941_vm5 = vcmp.eq.f32.partialorder %v4114_v52, 0.0  ;;  %v947_v35 = vmul.f32 0.5, %v946_v37  ;;  %v4380_v54 = vpop.xlane.xlu1 %710 }
 0x12b   : > { %6136 = vst [vmem:[#allocation94_spill] sm:$0xff] %v4350_v17  ;;  %v4359_v55 = vsel %vm881_vm2, %v6137_v22, %v880_v46  ;;  %v3133_v30 = vpop.eup %3132  ;;  %v995_v10 = vmul.f32 0.5, %v994_v31  ;;  %v960_v50 = vsub.f32 1.5, %v959_v49  ;;  %v1006_v20 = vmul.f32 %v4315_v43, %v1005_v26  ;;  %v4378_v31 = vpop.xlane.xlu0 %702 }
 0x12c   : > { %6138 = vst [vmem:[#allocation95_spill] sm:$0xff] %v4364_v2  ;;  %v4368_v5 = vpop.eup %3134  ;;  %v553_v22 = vmul.f32 %v3133_v30, %v4298_v44  ;;  %v938_v14 = vmul.f32 %v937_v32, %v4114_v52  ;;  %vm915_vm6 = vcmp.eq.f32.partialorder %v4119_v42, inf  ;;  %v982_v37 = vmul.f32 %v4323_v62, %v981_v60 }
 0x12d   : > { %v913_v49 = vmul.f32 %v4232_v0, %v912_v59  ;;  %v972_v26 = vsub.f32 1.5, %v971_v36  ;;  %vm963_vm7 = vcmp.eq.f32.partialorder %v4147_v15, inf  ;;  %v948_v46 = vsub.f32 1.5, %v947_v35  ;;  %v4393_v36 = vpop.xlane.xlu2 %712 }
 0x12e   : > { %v554_v1 = vmul.f32 %v3133_v30, %v553_v22  ;;  %v996_v34 = vsub.f32 1.5, %v995_v10  ;;  %v1029_v9 = vmul.f32 %v4368_v5, %v4304_v33  ;;  %vm917_vm8 = vcmp.eq.f32.partialorder %v4119_v42, 0.0 }
 0x12f   : > { %v4388_v60 = vpop.eup %3136  ;;  %v961_v45 = vmul.f32 %v4243_v40, %v960_v50  ;;  %v954_v59 = vand.u32 2147483648, %v4188_v28  ;;  %v1007_v0 = vmul.f32 0.5, %v1006_v20  ;;  %v940_v35 = vsel %vm939_vm4, %v4114_v52, %v938_v14 }
 0x130   : > { %v555_v17 = vmul.f32 0.5, %v554_v1  ;;  %vm975_vm9 = vcmp.eq.f32.partialorder %v4180_v19, inf  ;;  %v983_v22 = vmul.f32 0.5, %v982_v37  ;;  %v1041_v32 = vmul.f32 %v4388_v60, %v4330_v13 }
 0x131   : > { %v914_v1 = vmul.f32 %v913_v49, %v4119_v42  ;;  %vm965_vm10 = vcmp.eq.f32.partialorder %v4147_v15, 0.0  ;;  %v973_v50 = vmul.f32 %v4256_v23, %v972_v26  ;;  %vm951_vm11 = vcmp.eq.f32.partialorder %v4188_v28, inf }
 0x132   : > { %v556_v40 = vsub.f32 1.5, %v555_v17  ;;  %vm999_vm12 = vcmp.eq.f32.partialorder %v4211_v39, inf  ;;  %v1014_v20 = vand.u32 2147483648, %v4241_v51  ;;  %v949_v14 = vmul.f32 %v4266_v29, %v948_v46 }
 0x133   : > { %v997_v37 = vmul.f32 %v4271_v58, %v996_v34  ;;  %v1030_v10 = vmul.f32 %v4368_v5, %v1029_v9  ;;  %3138 = vrsqrt.f32 %v4378_v31  ;;  %v4414_v17 = vsel %vm941_vm5, %v942_v18, %v940_v35  ;;  %v4435_v35 = vpop.xlane.xlu1 %1132 }
 0x134   : > { %v557_v49 = vmul.f32 %v3133_v30, %v556_v40  ;;  %v962_v23 = vmul.f32 %v961_v45, %v4147_v15  ;;  %vm977_vm13 = vcmp.eq.f32.partialorder %v4180_v19, 0.0  ;;  %v1008_v26 = vsub.f32 1.5, %v1007_v0  ;;  %v4433_v0 = vpop.xlane.xlu0 %708 }
 0x135   : > { %vm559_vm14 = vcmp.eq.f32.partialorder %v4298_v44, inf  ;;  %v562_v29 = vand.u32 2147483648, %v4298_v44  ;;  %v984_v46 = vsub.f32 1.5, %v983_v22  ;;  %v1042_v34 = vmul.f32 %v4388_v60, %v1041_v32 }
 0x136   : > { %v916_v58 = vsel %vm915_vm6, %v4119_v42, %v914_v1  ;;  %v558_v52 = vmul.f32 %v557_v49, %v4298_v44  ;;  %vm561_vm15 = vcmp.eq.f32.partialorder %v4298_v44, 0.0  ;;  %v974_v30 = vmul.f32 %v973_v50, %v4180_v19 }
 0x137   : > { %vm953_vm0 = vcmp.eq.f32.partialorder %v4188_v28, 0.0  ;;  %vm1001_vm1 = vcmp.eq.f32.partialorder %v4211_v39, 0.0  ;;  %v950_v45 = vmul.f32 %v949_v14, %v4188_v28  ;;  %v998_v9 = vmul.f32 %v997_v37, %v4211_v39 }
 0x138   : > { %vm1011_vm2 = vcmp.eq.f32.partialorder %v4241_v51, inf  ;;  %v1031_v32 = vmul.f32 0.5, %v1030_v10  ;;  %v560_v22 = vsel %vm559_vm14, %v4298_v44, %v558_v52  ;;  %v964_v1 = vsel %vm963_vm7, %v4147_v15, %v962_v23 }
 0x139   : > { %v1009_v40 = vmul.f32 %v4315_v43, %v1008_v26  ;;  %3140 = vrsqrt.f32 %v4380_v54  ;;  %v4445_v50 = vpop.eup %3138  ;;  %v6139_v10 = vand.u32 2147483648, %v4119_v42  ;;  %v563_v37 = vsel %vm561_vm15, %v562_v29, %v560_v22  ;;  %v4462_v42 = vpop.xlane.xlu2 %1134 }
 0x13a   : > { %v985_v49 = vmul.f32 %v4323_v62, %v984_v46  ;;  %v1043_v52 = vmul.f32 0.5, %v1042_v34  ;;  %v564_v18 = vmax.f32 %v563_v37, 1e-08  ;;  %v976_v43 = vsel %vm975_vm9, %v4180_v19, %v974_v30 }
 0x13b   : > { %v4451_v14 = vsel %vm917_vm8, %v6139_v10, %v916_v58  ;;  %vm1013_vm3 = vcmp.eq.f32.partialorder %v4241_v51, 0.0  ;;  %vm987_vm4 = vcmp.eq.f32.partialorder %v4254_v4, inf  ;;  %3142 = vrsqrt.f32 %v4435_v35 }
 0x13c   : > { %v6140_v23 = vand.u32 2147483648, %v4147_v15  ;;  %v952_v62 = vsel %vm951_vm11, %v4188_v28, %v950_v45  ;;  %v1000_v26 = vsel %vm999_vm12, %v4211_v39, %v998_v9  ;;  %v1032_v29 = vsub.f32 1.5, %v1031_v32 }
 0x13d   : > { %v6142_v46 = vmax.f32 %v3955_v25, 1e-08  ;;  %v1010_v58 = vmul.f32 %v1009_v40, %v4241_v51  ;;  %v1017_v30 = vmul.f32 %v4445_v50, %v4378_v31  ;;  %3144 = vrsqrt.f32 %v4393_v36 }
 0x13e   : > { %v4468_v44 = vsel %vm965_vm10, %v6140_v23, %v964_v1  ;;  %v6143_v15 = vand.u32 2147483648, %v4180_v19  ;;  %v986_v22 = vmul.f32 %v985_v49, %v4254_v4  ;;  %v1044_v9 = vsub.f32 1.5, %v1043_v52 }
 0x13f   : > { %6141 = vst [vmem:[#allocation96_spill] sm:$0xff] %v4468_v44  ;;  %v565_v34 = vmul.f32 %v564_v18, %v6142_v46  ;;  %3146 = vrsqrt.f32 %v4462_v42  ;;  %v4490_v25 = vpop.eup %3140  ;;  %vm989_vm5 = vcmp.eq.f32.partialorder %v4254_v4, 0.0  ;;  %v990_v32 = vand.u32 2147483648, %v4254_v4 }
 0x140   : > { %v4486_v45 = vsel %vm977_vm13, %v6143_v15, %v976_v43  ;;  %v4500_v19 = vsel %vm953_vm0, %v954_v59, %v952_v62  ;;  %v6145_v40 = vand.u32 2147483648, %v4211_v39  ;;  %v1033_v37 = vmul.f32 %v4368_v5, %v1032_v29  ;;  %v4523_v62 = vpop.xlane.xlu0 %714 }
 0x141   : > { %6144 = vst [vmem:[#allocation97_spill] sm:$0xff] %v4486_v45  ;;  %3148 = vrcp.f32 %v565_v34  ;;  %v3143_v49 = vpop.eup %3142  ;;  %v1012_v43 = vsel %vm1011_vm2, %v4241_v51, %v1010_v58  ;;  %vm1035_vm6 = vcmp.eq.f32.partialorder %v4304_v33, inf  ;;  %v1018_v28 = vmul.f32 %v4445_v50, %v1017_v30 }
 0x142   : > { %v4506_v10 = vsel %vm1001_vm1, %v6145_v40, %v1000_v26  ;;  %v988_v59 = vsel %vm987_vm4, %v4254_v4, %v986_v22  ;;  %vm1037_vm7 = vcmp.eq.f32.partialorder %v4304_v33, 0.0  ;;  %v1045_v39 = vmul.f32 %v4388_v60, %v1044_v9  ;;  %v4540_v9 = vpop.xlane.xlu1 %1138 }
 0x143   : > { %6146 = vst [vmem:[#allocation98_spill] sm:$0xff] %v4506_v10  ;;  %v1065_v5 = vmul.f32 %v4490_v25, %v4380_v54  ;;  %v1197_v23 = vmul.f32 %v3143_v49, %v4435_v35  ;;  %v4525_v26 = vpop.eup %3144  ;;  %v1038_v34 = vand.u32 2147483648, %v4304_v33  ;;  %vm1047_vm8 = vcmp.eq.f32.partialorder %v4330_v13, inf }
 0x144   : > { %v4535_v60 = vsel %vm1013_vm3, %v1014_v20, %v1012_v43  ;;  %v1034_v30 = vmul.f32 %v1033_v37, %v4304_v33  ;;  %vm1049_vm9 = vcmp.eq.f32.partialorder %v4330_v13, 0.0  ;;  %v1050_v15 = vand.u32 2147483648, %v4330_v13 }
 0x145   : > { %v3147_v58 = vpop.eup %3146  ;;  %6147 = vst [vmem:[#allocation99_spill] sm:$0xff] %v4535_v60  ;;  %v1198_v22 = vmul.f32 %v3143_v49, %v1197_v23  ;;  %v4544_v46 = vsel %vm989_vm5, %v990_v32, %v988_v59  ;;  %v1019_v1 = vmul.f32 0.5, %v1018_v28  ;;  %3150 = vrsqrt.f32 %v4433_v0  ;;  %v4561_v23 = vpop.xlane.xlu2 %1140 }
 0x146   : > { %6148 = vst [vmem:[#allocation100_spill] sm:$0xff] %v4544_v46  ;;  %v1209_v51 = vmul.f32 %v3147_v58, %v4462_v42  ;;  %v1046_v37 = vmul.f32 %v1045_v39, %v4330_v13  ;;  %v1066_v43 = vmul.f32 %v4490_v25, %v1065_v5  ;;  %v1077_v29 = vmul.f32 %v4525_v26, %v4393_v36 }
 0x147   : > { %v3149_v40 = vpop.eup %3148  ;;  %v1199_v52 = vmul.f32 0.5, %v1198_v22  ;;  %3152 = vrsqrt.f32 %v4540_v9  ;;  %v1036_v28 = vsel %vm1035_vm6, %v4304_v33, %v1034_v30  ;;  %v1020_v5 = vsub.f32 1.5, %v1019_v1 }
 0x148   : > { %v567_v20 = vmul.f32 %v3149_v40, %v3973_v3  ;;  %v1210_v4 = vmul.f32 %v3147_v58, %v1209_v51  ;;  %v1048_v51 = vsel %vm1047_vm8, %v4330_v13, %v1046_v37  ;;  %v1078_v1 = vmul.f32 %v4525_v26, %v1077_v29 }
 0x149   : > { %v1200_v59 = vsub.f32 1.5, %v1199_v52  ;;  %v4570_v52 = vsel %vm1037_vm7, %v1038_v34, %v1036_v28  ;;  %vm1203_vm10 = vcmp.eq.f32.partialorder %v4435_v35, inf  ;;  %vm1205_vm11 = vcmp.eq.f32.partialorder %v4435_v35, 0.0 }
 0x14a   : > { %v2685_v32 = vmul.f32 -1.442695, %v567_v20  ;;  %v1211_v40 = vmul.f32 0.5, %v1210_v4  ;;  %v1067_v20 = vmul.f32 0.5, %v1066_v43  ;;  %6149 = vst [vmem:[#allocation101_spill] sm:$0xff] %v4570_v52  ;;  %v4582_v33 = vsel %vm1049_vm9, %v1050_v15, %v1048_v51 }
 0x14b   : > { %v1201_v18 = vmul.f32 %v3143_v49, %v1200_v59  ;;  %v4566_v10 = vpop.eup %3150  ;;  %v4578_v49 = vpop.xlane.xlu0 %1136  ;;  %6150 = vst [vmem:[#allocation102_spill] sm:$0xff] %v4582_v33  ;;  %v1021_v29 = vmul.f32 %v4445_v50, %v1020_v5  ;;  %vm1023_vm12 = vcmp.eq.f32.partialorder %v4378_v31, inf  ;;  %v1206_v34 = vand.u32 2147483648, %v4435_v35 }
 0x14c   : > { %3154 = vpow2.f32 %v2685_v32  ;;  %v1212_v4 = vsub.f32 1.5, %v1211_v40  ;;  %v1068_v43 = vsub.f32 1.5, %v1067_v20  ;;  %v1053_v32 = vmul.f32 %v4566_v10, %v4433_v0  ;;  %v4595_v50 = vpop.xlane.xlu1 %1144 }
 0x14d   : > { %v1202_v22 = vmul.f32 %v1201_v18, %v4435_v35  ;;  %3156 = vrsqrt.f32 %v4561_v23  ;;  %v3153_v37 = vpop.eup %3152  ;;  %v4591_v40 = vmul.f32 0.5, %v1078_v1  ;;  %vm1215_vm13 = vcmp.eq.f32.partialorder %v4462_v42, inf }
 0x14e   : > { %v1213_v18 = vmul.f32 %v3147_v58, %v1212_v4  ;;  %v1233_v59 = vmul.f32 %v3153_v37, %v4540_v9  ;;  %3158 = vrsqrt.f32 %v4578_v49  ;;  %v1218_v58 = vand.u32 2147483648, %v4462_v42 }
 0x14f   : > { %v1204_v28 = vsel %vm1203_vm10, %v4435_v35, %v1202_v22  ;;  %v1022_v35 = vmul.f32 %v1021_v29, %v4378_v31  ;;  %vm1217_vm14 = vcmp.eq.f32.partialorder %v4462_v42, 0.0  ;;  %3160 = vrsqrt.f32 %v4595_v50 }
 0x150   : > { %v1207_v13 = vsel %vm1205_vm11, %v1206_v34, %v1204_v28  ;;  %v1214_v15 = vmul.f32 %v1213_v18, %v4462_v42  ;;  %v1234_v20 = vmul.f32 %v3153_v37, %v1233_v59  ;;  %v6151_v34 = vmax.f32 %v4028_v27, 1e-08 }
 0x151   : > { %v1580_v51 = vmax.f32 %v1207_v13, 1e-08  ;;  %vm1239_vm15 = vcmp.eq.f32.partialorder %v4540_v9, inf  ;;  %vm1241_vm0 = vcmp.eq.f32.partialorder %v4540_v9, 0.0  ;;  %vm1251_vm1 = vcmp.eq.f32.partialorder %v4561_v23, inf }
 0x152   : > { %v3155_v5 = vpop.eup %3154  ;;  %v1216_v22 = vsel %vm1215_vm13, %v4462_v42, %v1214_v15  ;;  %v1235_v30 = vmul.f32 0.5, %v1234_v20  ;;  %v4612_v15 = vmul.f32 %v4566_v10, %v1053_v32  ;;  %v6152_v32 = vmax.f32 %v4099_v38, 1e-08 }
 0x153   : > { %v4599_v4 = vadd.f32 1.0, %v3155_v5  ;;  %v3157_v1 = vpop.eup %3156  ;;  %v1612_v18 = vmul.f32 %v1580_v51, %v6151_v34  ;;  %v1219_v28 = vsel %vm1217_vm14, %v1218_v58, %v1216_v22  ;;  %v4615_v51 = vmul.f32 %v4490_v25, %v1068_v43  ;;  %v4654_v52 = vpop.xlane.xlu0 %1142 }
 0x154   : > { %v1581_v42 = vmax.f32 %v1219_v28, 1e-08  ;;  %v1236_v5 = vsub.f32 1.5, %v1235_v30  ;;  %v3159_v27 = vpop.eup %3158  ;;  %v1245_v20 = vmul.f32 %v3157_v1, %v4561_v23  ;;  %v4623_v22 = vsel %vm1023_vm12, %v4378_v31, %v1022_v35  ;;  %v4628_v28 = vpop.xlane.xlu2 %1146 }
 0x155   : > { %3162 = vrcp.f32 %v4599_v4  ;;  %v1221_v30 = vmul.f32 %v3159_v27, %v4578_v49  ;;  %v1242_v25 = vand.u32 2147483648, %v4540_v9  ;;  %v3161_v59 = vpop.eup %3160  ;;  %v1254_v38 = vand.u32 2147483648, %v4561_v23 }
 0x156   : > { %3164 = vrcp.f32 %v1612_v18  ;;  %v1613_v34 = vmul.f32 %v1581_v42, %v6152_v32  ;;  %v1237_v18 = vmul.f32 %v3153_v37, %v1236_v5  ;;  %v1246_v43 = vmul.f32 %v3157_v1, %v1245_v20 }
 0x157   : > { %3166 = vrsqrt.f32 %v4523_v62  ;;  %v1222_v37 = vmul.f32 %v3159_v27, %v1221_v30  ;;  %vm1253_vm2 = vcmp.eq.f32.partialorder %v4561_v23, 0.0  ;;  %vm1227_vm3 = vcmp.eq.f32.partialorder %v4578_v49, inf }
 0x158   : > { %3168 = vrcp.f32 %v1613_v34  ;;  %v1238_v35 = vmul.f32 %v1237_v18, %v4540_v9  ;;  %v1247_v5 = vmul.f32 0.5, %v1246_v43  ;;  %v1269_v32 = vmul.f32 %v3161_v59, %v4595_v50 }
 0x159   : > { %3170 = vrsqrt.f32 %v4628_v28  ;;  %v1223_v30 = vmul.f32 0.5, %v1222_v37  ;;  %vm1229_vm4 = vcmp.eq.f32.partialorder %v4578_v49, 0.0  ;;  %v1230_v43 = vand.u32 2147483648, %v4578_v49 }
 0x15a   : > { %v1240_v18 = vsel %vm1239_vm15, %v4540_v9, %v1238_v35  ;;  %v1248_v58 = vsub.f32 1.5, %v1247_v5  ;;  %v1270_v3 = vmul.f32 %v3161_v59, %v1269_v32  ;;  %vm577_vm5 = vweird.f32 %v4599_v4 }
 0x15b   : > { %v4636_v42 = vpop.eup %3162  ;;  %v1243_v39 = vsel %vm1241_vm0, %v1242_v25, %v1240_v18  ;;  %v1224_v37 = vsub.f32 1.5, %v1223_v30  ;;  %v583_v60 = vand.u32 2147483648, %v4599_v4  ;;  %v6153_v9 = vmax.f32 %v4067_v41, 1e-08 }
 0x15c   : > { %v3165_v20 = vpop.eup %3164  ;;  %v573_v34 = vmul.f32 %v4636_v42, %v4599_v4  ;;  %v1583_v35 = vmax.f32 %v1243_v39, 1e-08  ;;  %v1249_v46 = vmul.f32 %v3157_v1, %v1248_v58  ;;  %v1271_v45 = vmul.f32 0.5, %v1270_v3 }
 0x15d   : > { %v4649_v13 = vpop.eup %3166  ;;  %v1676_v29 = vmul.f32 %v3165_v20, %v3738_v7  ;;  %v581_v7 = vand.u32 2147483647, %v4599_v4  ;;  %v1225_v5 = vmul.f32 %v3159_v27, %v1224_v37  ;;  %3172 = vrsqrt.f32 %v4654_v52 }
 0x15e   : > { %v574_v33 = vsub.f32 1.0, %v573_v34  ;;  %v3169_v2 = vpop.eup %3168  ;;  %v1615_v25 = vmul.f32 %v1583_v35, %v6153_v9  ;;  %v1250_v39 = vmul.f32 %v1249_v46, %v4561_v23  ;;  %v1272_v34 = vsub.f32 1.5, %v1271_v45 }
 0x15f   : > { %v2686_v44 = vmul.f32 -1.442695, %v1676_v29  ;;  %v3171_v32 = vpop.eup %3170  ;;  %v1677_v20 = vmul.f32 %v3169_v2, %v3750_v56  ;;  %v1226_v3 = vmul.f32 %v1225_v5, %v4578_v49  ;;  %v584_v58 = vor.u32 1.1754944e-38, %v583_v60 }
 0x160   : > { %v575_v29 = vmul.f32 %v4636_v42, %v574_v33  ;;  %v1281_v1 = vmul.f32 %v3171_v32, %v4628_v28  ;;  %vm1025_vm6 = vcmp.eq.f32.partialorder %v4378_v31, 0.0  ;;  %v1273_v27 = vmul.f32 %v3161_v59, %v1272_v34 }
 0x161   : > { %3174 = vpow2.f32 %v2686_v44  ;;  %v2687_v41 = vmul.f32 -1.442695, %v1677_v20  ;;  %v1252_v44 = vsel %vm1251_vm1, %v4561_v23, %v1250_v39  ;;  %vm578_vm7 = vweird.f32 %v4636_v42 }
 0x162   : > { %3176 = vrcp.f32 %v1615_v25  ;;  %v1255_v56 = vsel %vm1253_vm2, %v1254_v38, %v1252_v44  ;;  %v1228_v2 = vsel %vm1227_vm3, %v4578_v49, %v1226_v3  ;;  %v1282_v45 = vmul.f32 %v3171_v32, %v1281_v1  ;;  %vm4684_vm9 = vmor %vm577_vm5, %vm578_vm7 }
 0x163   : > { %3178 = vpow2.f32 %v2687_v41  ;;  %v1584_v46 = vmax.f32 %v1255_v56, 1e-08  ;;  %v1231_v60 = vsel %vm1229_vm4, %v1230_v43, %v1228_v2  ;;  %vm1275_vm8 = vcmp.eq.f32.partialorder %v4595_v50, inf  ;;  %v3173_v33 = vpop.eup %3172 }
 0x164   : > { %v576_v59 = vadd.f32 %v4636_v42, %v575_v29  ;;  %v1582_v18 = vmax.f32 %v1231_v60, 1e-08  ;;  %v1274_v30 = vmul.f32 %v1273_v27, %v4595_v50  ;;  %v1283_v23 = vmul.f32 0.5, %v1282_v45 }
 0x165   : > { %v6156_v37 = vmax.f32 %v4151_v48, 1e-08  ;;  %vm1277_vm10 = vcmp.eq.f32.partialorder %v4595_v50, 0.0  ;;  %v1278_v43 = vand.u32 2147483648, %v4595_v50  ;;  %v1257_v9 = vmul.f32 %v3173_v33, %v4654_v52 }
 0x166   : > { %v6157_v20 = vmax.f32 %v4063_v21, 1e-08  ;;  %v1276_v4 = vsel %vm1275_vm8, %v4595_v50, %v1274_v30  ;;  %v1284_v34 = vsub.f32 1.5, %v1283_v23  ;;  %v580_v1 = vsel %vm4684_vm9, %v4636_v42, %v576_v59  ;;  %v4734_v23 = vpop.xlane.xlu2 %1152 }
 0x167   : > { %v3175_v38 = vpop.eup %3174  ;;  %v1616_v49 = vmul.f32 %v1584_v46, %v6156_v37  ;;  %v1279_v48 = vsel %vm1277_vm10, %v1278_v43, %v1276_v4  ;;  %v1258_v3 = vmul.f32 %v3173_v33, %v1257_v9  ;;  %vm582_vm11 = vcmp.eq.f32.partialorder %v581_v7, 8.507059e+37 }
 0x168   : > { %v3177_v25 = vpop.eup %3176  ;;  %v4693_v5 = vadd.f32 1.0, %v3175_v38  ;;  %v1614_v39 = vmul.f32 %v1582_v18, %v6157_v20  ;;  %v4703_v41 = vmul.f32 0.5, %v4612_v15  ;;  %v1586_v50 = vmax.f32 %v1279_v48, 1e-08 }
 0x169   : > { %v1679_v29 = vmul.f32 %v3177_v25, %v3748_v24  ;;  %3180 = vrcp.f32 %v1616_v49  ;;  %v3179_v21 = vpop.eup %3178  ;;  %v1285_v27 = vmul.f32 %v3171_v32, %v1284_v34  ;;  %v6158_v24 = vand.u32 2147483648, %v4378_v31 }
 0x16a   : > { %3182 = vrcp.f32 %v4693_v5  ;;  %v4715_v42 = vmul.f32 %v4615_v51, %v4380_v54  ;;  %v4717_v15 = vadd.f32 1.0, %v3179_v21  ;;  %v1259_v7 = vmul.f32 0.5, %v1258_v3 }
 0x16b   : > { %v2689_v44 = vmul.f32 -1.442695, %v1679_v29  ;;  %3184 = vrcp.f32 %v1614_v39  ;;  %v4711_v56 = vsel %vm1025_vm6, %v6158_v24, %v4623_v22  ;;  %v585_v2 = vsel %vm582_vm11, %v584_v58, %v580_v1  ;;  %v4728_v58 = vpop.xlane.xlu1 %1150 }
 0x16c   : > { %v6159_v45 = vmax.f32 %v4111_v61, 1e-08  ;;  %v1286_v32 = vmul.f32 %v1285_v27, %v4628_v28  ;;  %vm1287_vm12 = vcmp.eq.f32.partialorder %v4628_v28, inf  ;;  %vm1289_vm13 = vcmp.eq.f32.partialorder %v4628_v28, 0.0 }
 0x16d   : > { %3186 = vpow2.f32 %v2689_v44  ;;  %v1290_v31 = vand.u32 2147483648, %v4628_v28  ;;  %v1260_v60 = vsub.f32 1.5, %v1259_v7  ;;  %vm1263_vm14 = vcmp.eq.f32.partialorder %v4654_v52, inf }
 0x16e   : > { %v1618_v46 = vmul.f32 %v1586_v50, %v6159_v45  ;;  %3188 = vrcp.f32 %v4717_v15  ;;  %v1288_v22 = vsel %vm1287_vm12, %v4628_v28, %v1286_v32  ;;  %v4730_v59 = vsub.f32 1.0, %v585_v2 }
 0x16f   : > { %v3181_v51 = vpop.eup %3180  ;;  %v1291_v30 = vsel %vm1289_vm13, %v1290_v31, %v1288_v22  ;;  %vm1265_vm15 = vcmp.eq.f32.partialorder %v4654_v52, 0.0  ;;  %v1845_v28 = vand.u32 2147483647, %v4693_v5  ;;  %v1261_v49 = vmul.f32 %v3173_v33, %v1260_v60 }
 0x170   : > { %3190 = vrcp.f32 %v1618_v46  ;;  %v3183_v61 = vpop.eup %3182  ;;  %v1680_v18 = vmul.f32 %v3181_v51, %v3732_v63  ;;  %v1587_v37 = vmax.f32 %v1291_v30, 1e-08  ;;  %v1847_v43 = vand.u32 2147483648, %v4693_v5 }
 0x171   : > { %v3185_v38 = vpop.eup %3184  ;;  %v1837_v35 = vmul.f32 %v3183_v61, %v4693_v5  ;;  %3192 = vrsqrt.f32 %v4728_v58  ;;  %v6160_v39 = vmax.f32 %v4217_v12, 1e-08  ;;  %v1266_v34 = vand.u32 2147483648, %v4654_v52 }
 0x172   : > { %v2690_v9 = vmul.f32 -1.442695, %v1680_v18  ;;  %v1678_v25 = vmul.f32 %v3185_v38, %v3736_v53  ;;  %3194 = vrsqrt.f32 %v4734_v23  ;;  %v1262_v3 = vmul.f32 %v1261_v49, %v4654_v52 }
 0x173   : > { %v3187_v63 = vpop.eup %3186  ;;  %v1838_v20 = vsub.f32 1.0, %v1837_v35  ;;  %v1619_v4 = vmul.f32 %v1587_v37, %v6160_v39  ;;  %vm1842_vm0 = vweird.f32 %v3183_v61  ;;  %vm1841_vm1 = vweird.f32 %v4693_v5 }
 0x174   : > { %v3189_v29 = vpop.eup %3188  ;;  %v4745_v48 = vadd.f32 1.0, %v3187_v63  ;;  %3196 = vpow2.f32 %v2690_v9  ;;  %v2688_v33 = vmul.f32 -1.442695, %v1678_v25  ;;  %vm4750_vm2 = vcmp.eq.f32.partialorder %v1845_v28, 8.507059e+37  ;;  %vm1843_vm3 = vmor %vm1841_vm1, %vm1842_vm0 }
 0x175   : > { %v1839_v53 = vmul.f32 %v3183_v61, %v1838_v20  ;;  %v1852_v21 = vmul.f32 %v3189_v29, %v4717_v15  ;;  %3198 = vrcp.f32 %v1619_v4  ;;  %v1848_v44 = vor.u32 1.1754944e-38, %v1847_v43 }
 0x176   : > { %v3191_v1 = vpop.eup %3190  ;;  %3200 = vrcp.f32 %v4745_v48  ;;  %vm1857_vm4 = vweird.f32 %v3189_v29  ;;  %v1860_v2 = vand.u32 2147483647, %v4717_v15  ;;  %v1862_v5 = vand.u32 2147483648, %v4717_v15 }
 0x177   : > { %v1840_v50 = vadd.f32 %v3183_v61, %v1839_v53  ;;  %v1853_v27 = vsub.f32 1.0, %v1852_v21  ;;  %3202 = vpow2.f32 %v2688_v33  ;;  %v1682_v24 = vmul.f32 %v3191_v1, %v3762_v8  ;;  %v4756_v7 = vpop.eup %3192  ;;  %v6165_v1 = vld [vmem:[#allocation6_spill] sm:$0xff] }
 0x178   : > { %v1264_v45 = vsel %vm1263_vm14, %v4654_v52, %v1262_v3  ;;  %v4763_v46 = vpop.eup %3194  ;;  %vm1856_vm5 = vweird.f32 %v4717_v15  ;;  %v1305_v30 = vmul.f32 %v4756_v7, %v4728_v58  ;;  %vm1861_vm7 = vcmp.eq.f32.partialorder %v1860_v2, 8.507059e+37 }
 0x179   : > { %v1844_v32 = vsel %vm1843_vm3, %v3183_v61, %v1840_v50  ;;  %v1854_v31 = vmul.f32 %v3189_v29, %v1853_v27  ;;  %v2692_v51 = vmul.f32 -1.442695, %v1682_v24  ;;  %v1267_v8 = vsel %vm1265_vm15, %v1266_v34, %v1264_v45  ;;  %vm1858_vm6 = vmor %vm1856_vm5, %vm1857_vm4 }
 0x17a   : > { %v3197_v22 = vpop.eup %3196  ;;  %v1849_v60 = vsel %vm4750_vm2, %v1848_v44, %v1844_v32  ;;  %v1585_v18 = vmax.f32 %v1267_v8, 1e-08  ;;  %v1863_v52 = vor.u32 1.1754944e-38, %v1862_v5  ;;  %v6163_v15 = vmax.f32 %v4107_v6, 1e-08 }
 0x17b   : > { %v3199_v38 = vpop.eup %3198  ;;  %v2316_v35 = vsub.f32 1.0, %v1849_v60  ;;  %v1855_v28 = vadd.f32 %v3189_v29, %v1854_v31  ;;  %v4772_v37 = vadd.f32 1.0, %v3197_v22  ;;  %3204 = vpow2.f32 %v2692_v51 }
 0x17c   : > { %v4774_v61 = vpop.eup %3200  ;;  %v1683_v49 = vmul.f32 %v3199_v38, %v3760_v57  ;;  %v1617_v43 = vmul.f32 %v1585_v18, %v6163_v15  ;;  %v1306_v39 = vmul.f32 %v4756_v7, %v1305_v30  ;;  %v1125_v4 = vmax.f32 %v4711_v56, 1e-08 }
 0x17d   : > { %v3203_v9 = vpop.eup %3202  ;;  %v2348_v25 = vmul.f32 %v2316_v35, %v4730_v59  ;;  %v1859_v63 = vsel %vm1858_vm6, %v3189_v29, %v1855_v28  ;;  %v1882_v20 = vmul.f32 %v4774_v61, %v4745_v48  ;;  %v6164_v34 = vsub.f32 1.5, %v4591_v40 }
 0x17e   : > { %v1864_v57 = vsel %vm1861_vm7, %v1863_v52, %v1859_v63  ;;  %3206 = vrcp.f32 %v4772_v37  ;;  %vm1887_vm8 = vweird.f32 %v4774_v61  ;;  %v1317_v29 = vmul.f32 %v4763_v46, %v4734_v23 }
 0x17f   : > { %v4788_v33 = vmul.f32 %v4525_v26, %v6164_v34  ;;  %v2317_v6 = vsub.f32 1.0, %v1864_v57  ;;  %v1883_v3 = vsub.f32 1.0, %v1882_v20  ;;  %v2380_v53 = vmul.f32 %v6165_v1, %v2348_v25 }
 0x180   : > { %v2476_v21 = vmul.f32 %v3476_v11, %v2348_v25  ;;  %v4796_v12 = vadd.f32 1.0, %v3203_v9  ;;  %v2693_v40 = vmul.f32 -1.442695, %v1683_v49  ;;  %3208 = vrcp.f32 %v1617_v43  ;;  %v6166_v11 = vld [vmem:[#allocation7_spill] sm:$0xff]  ;;  %v6169_v9 = vld [vmem:[#allocation64_spill] sm:$0xff] }
 0x181   : > { %v3205_v26 = vpop.eup %3204  ;;  %v2349_v44 = vmul.f32 %v2317_v6, %v4730_v59  ;;  %v1884_v50 = vmul.f32 %v4774_v61, %v1883_v3  ;;  %v1307_v27 = vmul.f32 0.5, %v1306_v39  ;;  %vm1886_vm9 = vweird.f32 %v4745_v48 }
 0x182   : > { %v1890_v24 = vand.u32 2147483647, %v4745_v48  ;;  %v1892_v2 = vand.u32 2147483648, %v4745_v48  ;;  %3210 = vrcp.f32 %v4796_v12  ;;  %v1318_v31 = vmul.f32 %v4763_v46, %v1317_v29  ;;  %vm4818_vm10 = vmor %vm1886_vm9, %vm1887_vm8 }
 0x183   : > { %v2381_v5 = vmul.f32 %v6166_v11, %v2349_v44  ;;  %v2477_v45 = vmul.f32 %v3486_v16, %v2349_v44  ;;  %v1885_v32 = vadd.f32 %v4774_v61, %v1884_v50  ;;  %v1907_v16 = vand.u32 2147483648, %v4772_v37 }
 0x184   : > { %v4808_v51 = vpop.eup %3206  ;;  %v4823_v8 = vadd.f32 1.0, %v3205_v26  ;;  %3212 = vpow2.f32 %v2693_v40  ;;  %v1308_v22 = vsub.f32 1.5, %v1307_v27  ;;  %v1893_v35 = vor.u32 1.1754944e-38, %v1892_v2 }
 0x185   : > { %v2855_v60 = vpack.c.bf16 %v2381_v5, %v2380_v53  ;;  %v2935_v18 = vpack.c.bf16 %v2477_v45, %v2476_v21  ;;  %v1889_v30 = vsel %vm4818_vm10, %v4774_v61, %v1885_v32  ;;  %v1897_v38 = vmul.f32 %v4808_v51, %v4772_v37 }
 0x186   : > { %v1905_v28 = vand.u32 2147483647, %v4772_v37  ;;  %3214 = vrcp.f32 %v4823_v8  ;;  %vm1311_vm11 = vcmp.eq.f32.partialorder %v4728_v58, inf  ;;  %v3209_v52 = vpop.eup %3208  ;;  %vm1891_vm12 = vcmp.eq.f32.partialorder %v1890_v24, 8.507059e+37 }
 0x187   : > { %2856 = vst [vmem:[%s4814_s23] sm:$0xff] %v2855_v60   ;;  %v1898_v49 = vsub.f32 1.0, %v1897_v38  ;;  %vm1901_vm13 = vweird.f32 %v4772_v37  ;;  %vm1313_vm14 = vcmp.eq.f32.partialorder %v4728_v58, 0.0  ;;  %v1314_v61 = vand.u32 2147483648, %v4728_v58 }
 0x188   : > { %v3211_v15 = vpop.eup %3210  ;;  %2936 = vst [vmem:[%s4829_s26] sm:$0xff] %v2935_v18   ;;  %v1894_v43 = vsel %vm1891_vm12, %v1893_v35, %v1889_v30  ;;  %v1681_v25 = vmul.f32 %v3209_v52, %v6169_v9  ;;  %v1309_v63 = vmul.f32 %v4756_v7, %v1308_v22  ;;  %v1319_v20 = vmul.f32 0.5, %v1318_v31 }
 0x189   : > { %v1899_v39 = vmul.f32 %v4808_v51, %v1898_v49  ;;  %v1908_v34 = vor.u32 1.1754944e-38, %v1907_v16  ;;  %v1867_v57 = vmul.f32 %v3211_v15, %v4796_v12  ;;  %v1875_v6 = vand.u32 2147483647, %v4796_v12 }
 0x18a   : > { %v3213_v3 = vpop.eup %3212  ;;  %vm1902_vm15 = vweird.f32 %v4808_v51  ;;  %vm4850_vm0 = vcmp.eq.f32.partialorder %v1905_v28, 8.507059e+37  ;;  %v1877_v1 = vand.u32 2147483648, %v4796_v12  ;;  %v2691_v53 = vmul.f32 -1.442695, %v1681_v25  ;;  %v6178_v25 = vld [vmem:[#allocation10_spill] sm:$0xff] }
 0x18b   : > { %v1310_v7 = vmul.f32 %v1309_v63, %v4728_v58  ;;  %v2319_v21 = vsub.f32 1.0, %v1894_v43  ;;  %v1868_v40 = vsub.f32 1.0, %v1867_v57  ;;  %v1935_v26 = vand.u32 2147483647, %v4823_v8  ;;  %vm4877_vm5 = vmor %vm1901_vm13, %vm1902_vm15 }
 0x18c   : > { %v1937_v44 = vand.u32 2147483648, %v4823_v8  ;;  %v3215_v50 = vpop.eup %3214  ;;  %v1900_v27 = vadd.f32 %v4808_v51, %v1899_v39  ;;  %v4859_v24 = vadd.f32 1.0, %v3213_v3  ;;  %3216 = vpow2.f32 %v2691_v53 }
 0x18d   : > { %v1320_v2 = vsub.f32 1.5, %v1319_v20  ;;  %vm1323_vm1 = vcmp.eq.f32.partialorder %v4734_v23, inf  ;;  %v1869_v11 = vmul.f32 %v3211_v15, %v1868_v40  ;;  %vm1872_vm2 = vweird.f32 %v3211_v15  ;;  %v6179_v20 = vld [vmem:[#allocation11_spill] sm:$0xff] }
 0x18e   : > { %v1927_v5 = vmul.f32 %v3215_v50, %v4823_v8  ;;  %v1312_v45 = vsel %vm1311_vm11, %v4728_v58, %v1310_v7  ;;  %vm1871_vm3 = vweird.f32 %v4796_v12  ;;  %vm4867_vm4 = vcmp.eq.f32.partialorder %v1875_v6, 8.507059e+37  ;;  %v4883_v12 = vpop.xlane.xlu0 %1148 }
 0x18f   : > { %v1878_v31 = vor.u32 1.1754944e-38, %v1877_v1  ;;  %3218 = vrcp.f32 %v4859_v24  ;;  %v2351_v48 = vmul.f32 %v2319_v21, %v4730_v59  ;;  %v1870_v22 = vadd.f32 %v3211_v15, %v1869_v11  ;;  %vm1873_vm8 = vmor %vm1871_vm3, %vm1872_vm2  ;;  %v4923_v11 = vpop.xlane.xlu1 %1156 }
 0x190   : > { %v1928_v60 = vsub.f32 1.0, %v1927_v5  ;;  %vm1931_vm6 = vweird.f32 %v4823_v8  ;;  %vm1325_vm7 = vcmp.eq.f32.partialorder %v4734_v23, 0.0  ;;  %v1904_v18 = vsel %vm4877_vm5, %v4808_v51, %v1900_v27 }
 0x191   : > { %vm4889_vm9 = vcmp.eq.f32.partialorder %v1935_v26, 8.507059e+37  ;;  %v1315_v30 = vsel %vm1313_vm14, %v1314_v61, %v1312_v45  ;;  %v1321_v38 = vmul.f32 %v4763_v46, %v1320_v2  ;;  %v1874_v35 = vsel %vm1873_vm8, %v3211_v15, %v1870_v22  ;;  %v6181_v26 = vld [vmem:[#allocation4_spill] sm:$0xff] }
 0x192   : > { %v1929_v28 = vmul.f32 %v3215_v50, %v1928_v60  ;;  %vm1932_vm10 = vweird.f32 %v3215_v50  ;;  %v1938_v52 = vor.u32 1.1754944e-38, %v1937_v44  ;;  %v3217_v49 = vpop.eup %3216  ;;  %v1879_v43 = vsel %vm4867_vm4, %v1878_v31, %v1874_v35  ;;  %v6182_v44 = vld [vmem:[#allocation5_spill] sm:$0xff] }
 0x193   : > { %v1589_v51 = vmax.f32 %v1315_v30, 1e-08  ;;  %v1322_v9 = vmul.f32 %v1321_v38, %v4734_v23  ;;  %3220 = vrsqrt.f32 %v4883_v12  ;;  %v2383_v63 = vmul.f32 %v6178_v25, %v2351_v48  ;;  %vm1933_vm11 = vmor %vm1931_vm6, %vm1932_vm10 }
 0x194   : > { %v1909_v58 = vsel %vm4850_vm0, %v1908_v34, %v1904_v18  ;;  %v2318_v61 = vsub.f32 1.0, %v1879_v43  ;;  %v1930_v46 = vadd.f32 %v3215_v50, %v1929_v28  ;;  %v2479_v39 = vmul.f32 %v6179_v20, %v2351_v48 }
 0x195   : > { %v3219_v15 = vpop.eup %3218  ;;  %v1950_v57 = vand.u32 2147483647, %v4859_v24  ;;  %v4907_v6 = vadd.f32 1.0, %v3217_v49  ;;  %v6180_v3 = vmax.f32 %v4184_v47, 1e-08  ;;  %v1324_v29 = vsel %vm1323_vm1, %v4734_v23, %v1322_v9  ;;  %v6185_v49 = vld [vmem:[#allocation92_spill] sm:$0xff]  ;;  %v4944_v9 = vpop.xlane.xlu2 %1158 }
 0x196   : > { %v2350_v53 = vmul.f32 %v2318_v61, %v4730_v59  ;;  %v1934_v7 = vsel %vm1933_vm11, %v3215_v50, %v1930_v46  ;;  %v1942_v34 = vmul.f32 %v3219_v15, %v4859_v24  ;;  %v2320_v21 = vsub.f32 1.0, %v1909_v58 }
 0x197   : > { %v1621_v1 = vmul.f32 %v1589_v51, %v6180_v3  ;;  %v1939_v8 = vsel %vm4889_vm9, %v1938_v52, %v1934_v7  ;;  %3222 = vrcp.f32 %v4907_v6  ;;  %v1326_v40 = vand.u32 2147483648, %v4734_v23  ;;  %v6188_v7 = vld [vmem:[#allocation12_spill] sm:$0xff] }
 0x198   : > { %v2382_v47 = vmul.f32 %v6181_v26, %v2350_v53  ;;  %v2478_v27 = vmul.f32 %v6182_v44, %v2350_v53  ;;  %v1943_v2 = vsub.f32 1.0, %v1942_v34  ;;  %v1952_v50 = vand.u32 2147483648, %v4859_v24  ;;  %v4962_v44 = vpop.xlane.xlu1 %1162 }
 0x199   : > { %v3221_v5 = vpop.eup %3220  ;;  %v1056_v45 = vsub.f32 1.5, %v4703_v41  ;;  %v2322_v32 = vsub.f32 1.0, %v1939_v8  ;;  %3224 = vrcp.f32 %v1621_v1  ;;  %v1327_v31 = vsel %vm1325_vm7, %v1326_v40, %v1324_v29  ;;  %v6187_v1 = vld [vmem:[#allocation68_spill] sm:$0xff]  ;;  %v6189_v29 = vld [vmem:[#allocation13_spill] sm:$0xff] }
 0x19a   : > { %v2860_v48 = vpack.c.bf16 %v2383_v63, %v2382_v47  ;;  %v2940_v16 = vpack.c.bf16 %v2479_v39, %v2478_v27  ;;  %v1944_v22 = vmul.f32 %v3219_v15, %v1943_v2  ;;  %vm1947_vm12 = vweird.f32 %v3219_v15 }
 0x19b   : > { %v1098_v60 = vand.u32 2147483648, %v4523_v62  ;;  %vm1946_vm13 = vweird.f32 %v4859_v24  ;;  %v1590_v18 = vmax.f32 %v1327_v31, 1e-08  ;;  %v1293_v37 = vmul.f32 %v3221_v5, %v4883_v12  ;;  %v6192_v31 = vld [vmem:[#allocation16_spill] sm:$0xff] }
 0x19c   : > { %v4932_v30 = vmul.f32 %v2320_v21, %v4730_v59  ;;  %3042 = vst [vmem:[%s4814_s23 + $0x8] sm:$0xff] %v2860_v48   ;;  %v1945_v38 = vadd.f32 %v3219_v15, %v1944_v22  ;;  %vm4935_vm14 = vcmp.eq.f32.partialorder %v1950_v57, 8.507059e+37  ;;  %v1953_v35 = vor.u32 1.1754944e-38, %v1952_v50  ;;  %vm1948_vm15 = vmor %vm1946_vm13, %vm1947_vm12  ;;  %v4954_v57 = vpop.xlane.xlu0 %1154 }
 0x19d   : > { %v3223_v28 = vpop.eup %3222  ;;  %3057 = vst [vmem:[%s4829_s26 + $0x8] sm:$0xff] %v2940_v16   ;;  %v2354_v52 = vmul.f32 %v2322_v32, %v4730_v59  ;;  %v6186_v24 = vmax.f32 %v6185_v49, 1e-08  ;;  %v1294_v51 = vmul.f32 %v3221_v5, %v1293_v37  ;;  %3226 = vrsqrt.f32 %v4923_v11  ;;  %v6193_v16 = vld [vmem:[#allocation17_spill] sm:$0xff] }
 0x19e   : > { %v1949_v25 = vsel %vm1948_vm15, %v3219_v15, %v1945_v38  ;;  %v1912_v63 = vmul.f32 %v3223_v28, %v4907_v6  ;;  %vm1916_vm0 = vweird.f32 %v4907_v6  ;;  %v1920_v58 = vand.u32 2147483647, %v4907_v6 }
 0x19f   : > { %v1622_v43 = vmul.f32 %v1590_v18, %v6186_v24  ;;  %vm1299_vm1 = vcmp.eq.f32.partialorder %v4883_v12, inf  ;;  %v3225_v61 = vpop.eup %3224  ;;  %vm1071_vm2 = vcmp.eq.f32.partialorder %v4380_v54, inf  ;;  %v1954_v46 = vsel %vm4935_vm14, %v1953_v35, %v1949_v25 }
 0x1a0   : > { %v1922_v20 = vand.u32 2147483648, %v4907_v6  ;;  %v1295_v39 = vmul.f32 0.5, %v1294_v51  ;;  %v2323_v15 = vsub.f32 1.0, %v1954_v46  ;;  %v1913_v3 = vsub.f32 1.0, %v1912_v63 }
 0x1a1   : > { %3228 = vrcp.f32 %v1622_v43  ;;  %v1685_v53 = vmul.f32 %v3225_v61, %v6187_v1  ;;  %v2386_v34 = vmul.f32 %v6188_v7, %v2354_v52  ;;  %v2482_v21 = vmul.f32 %v6189_v29, %v2354_v52  ;;  %v6194_v43 = vld [vmem:[#allocation67_spill] sm:$0xff] }
 0x1a2   : > { %3230 = vrsqrt.f32 %v4944_v9  ;;  %vm1917_vm3 = vweird.f32 %v3223_v28  ;;  %v1296_v8 = vsub.f32 1.5, %v1295_v39  ;;  %v2355_v40 = vmul.f32 %v2323_v15, %v4730_v59 }
 0x1a3   : > { %v1914_v26 = vmul.f32 %v3223_v28, %v1913_v3  ;;  %v2695_v47 = vmul.f32 -1.442695, %v1685_v53  ;;  %3232 = vrsqrt.f32 %v4954_v57  ;;  %v3227_v27 = vpop.eup %3226  ;;  %vm4964_vm4 = vcmp.eq.f32.partialorder %v1920_v58, 8.507059e+37  ;;  %vm1918_vm6 = vmor %vm1916_vm0, %vm1917_vm3 }
 0x1a4   : > { %v1923_v50 = vor.u32 1.1754944e-38, %v1922_v20  ;;  %v1297_v32 = vmul.f32 %v3221_v5, %v1296_v8  ;;  %vm1301_vm5 = vcmp.eq.f32.partialorder %v4883_v12, 0.0  ;;  %v2387_v48 = vmul.f32 %v6192_v31, %v2355_v40  ;;  %v6199_v31 = vld [vmem:[#allocation8_spill] sm:$0xff] }
 0x1a5   : > { %v2483_v22 = vmul.f32 %v6193_v16, %v2355_v40  ;;  %v1915_v18 = vadd.f32 %v3223_v28, %v1914_v26  ;;  %3234 = vpow2.f32 %v2695_v47  ;;  %v1302_v23 = vand.u32 2147483648, %v4883_v12  ;;  %v6197_v26 = vld [vmem:[#allocation89_spill] sm:$0xff] }
 0x1a6   : > { %v1298_v38 = vmul.f32 %v1297_v32, %v4883_v12  ;;  %v1341_v5 = vmul.f32 %v3227_v27, %v4923_v11  ;;  %3236 = vrsqrt.f32 %v4962_v44  ;;  %v2870_v52 = vpack.c.bf16 %v2387_v48, %v2386_v34  ;;  %v6195_v34 = vld [vmem:[#allocation2_spill] sm:$0xff]  ;;  %v6200_v16 = vld [vmem:[#allocation9_spill] sm:$0xff] }
 0x1a7   : > { %v3229_v37 = vpop.eup %3228  ;;  %v2950_v49 = vpack.c.bf16 %v2483_v22, %v2482_v21  ;;  %v1919_v24 = vsel %vm1918_vm6, %v3223_v28, %v1915_v18  ;;  %v4991_v46 = vsel %vm1071_vm2, %v4380_v54, %v4715_v42  ;;  %v2384_v29 = vmul.f32 %v6195_v34, %v4932_v30  ;;  %v6196_v42 = vld [vmem:[#allocation3_spill] sm:$0xff] }
 0x1a8   : > { %v3231_v35 = vpop.eup %3230  ;;  %v1686_v51 = vmul.f32 %v3229_v37, %v6194_v43  ;;  %v1924_v6 = vsel %vm4964_vm4, %v1923_v50, %v1919_v24  ;;  %v1300_v25 = vsel %vm1299_vm1, %v4883_v12, %v1298_v38  ;;  %v1342_v63 = vmul.f32 %v3227_v27, %v1341_v5  ;;  %3044 = vst [vmem:[%s4814_s23 + $0x18] sm:$0xff] %v2870_v52   ;;  %v5030_v43 = vpop.xlane.xlu0 %1160 }
 0x1a9   : > { %v1353_v58 = vmul.f32 %v3231_v35, %v4944_v9  ;;  %v4985_v61 = vpop.eup %3232  ;;  %v2321_v28 = vsub.f32 1.0, %v1924_v6  ;;  %v1303_v39 = vsel %vm1301_vm5, %v1302_v23, %v1300_v25  ;;  %3059 = vst [vmem:[%s4829_s26 + $0x18] sm:$0xff] %v2950_v49   ;;  %v2480_v21 = vmul.f32 %v6196_v42, %v4932_v30  ;;  %v5026_v23 = vpop.xlane.xlu2 %1164 }
 0x1aa   : > { %v2696_v20 = vmul.f32 -1.442695, %v1686_v51  ;;  %v1588_v15 = vmax.f32 %v1303_v39, 1e-08  ;;  %v1343_v3 = vmul.f32 0.5, %v1342_v63  ;;  %v1329_v53 = vmul.f32 %v4985_v61, %v4954_v57 }
 0x1ab   : > { %v1354_v1 = vmul.f32 %v3231_v35, %v1353_v58  ;;  %v3235_v7 = vpop.eup %3234  ;;  %v2353_v8 = vmul.f32 %v2321_v28, %v4730_v59  ;;  %v6198_v47 = vmax.f32 %v6197_v26, 1e-08  ;;  %v5017_v37 = vmul.f32 %v4788_v33, %v4393_v36 }
 0x1ac   : > { %3238 = vpow2.f32 %v2696_v20  ;;  %v5004_v40 = vpop.eup %3236  ;;  %v5006_v12 = vadd.f32 1.0, %v3235_v7  ;;  %v1344_v50 = vsub.f32 1.5, %v1343_v3  ;;  %v1330_v18 = vmul.f32 %v4985_v61, %v1329_v53  ;;  %v6201_v53 = vld [vmem:[#allocation65_spill] sm:$0xff] }
 0x1ad   : > { %v1620_v2 = vmul.f32 %v1588_v15, %v6198_v47  ;;  %v1355_v32 = vmul.f32 0.5, %v1354_v1  ;;  %v2385_v48 = vmul.f32 %v6199_v31, %v2353_v8  ;;  %v2481_v22 = vmul.f32 %v6200_v16, %v2353_v8 }
 0x1ae   : > { %v1377_v30 = vmul.f32 %v5004_v40, %v4962_v44  ;;  %v5022_v38 = vmul.f32 %v4566_v10, %v1056_v45  ;;  %3240 = vrcp.f32 %v5006_v12  ;;  %vm1347_vm7 = vcmp.eq.f32.partialorder %v4923_v11, inf }
 0x1af   : > { %v2865_v5 = vpack.c.bf16 %v2385_v48, %v2384_v29  ;;  %v2945_v52 = vpack.c.bf16 %v2481_v22, %v2480_v21  ;;  %3242 = vrcp.f32 %v1620_v2  ;;  %v1345_v49 = vmul.f32 %v3227_v27, %v1344_v50  ;;  %v6202_v2 = vld [vmem:[#allocation91_spill] sm:$0xff] }
 0x1b0   : > { %vm1349_vm8 = vcmp.eq.f32.partialorder %v4923_v11, 0.0  ;;  %v1350_v33 = vand.u32 2147483648, %v4923_v11  ;;  %v1356_v24 = vsub.f32 1.5, %v1355_v32  ;;  %v1331_v41 = vmul.f32 0.5, %v1330_v18 }
 0x1b1   : > { %3043 = vst [vmem:[%s4814_s23 + $0x10] sm:$0xff] %v2865_v5   ;;  %v1346_v45 = vmul.f32 %v1345_v49, %v4923_v11  ;;  %vm1359_vm9 = vcmp.eq.f32.partialorder %v4944_v9, inf  ;;  %v1378_v51 = vmul.f32 %v5004_v40, %v1377_v30  ;;  %3244 = vrsqrt.f32 %v5026_v23 }
 0x1b2   : > { %v3239_v10 = vpop.eup %3238  ;;  %3058 = vst [vmem:[%s4829_s26 + $0x10] sm:$0xff] %v2945_v52   ;;  %v1357_v6 = vmul.f32 %v3231_v35, %v1356_v24  ;;  %vm1361_vm10 = vcmp.eq.f32.partialorder %v4944_v9, 0.0  ;;  %v1362_v25 = vand.u32 2147483648, %v4944_v9  ;;  %v1332_v58 = vsub.f32 1.5, %v1331_v41 }
 0x1b3   : > { %v5038_v27 = vadd.f32 1.0, %v3239_v10  ;;  %v1348_v63 = vsel %vm1347_vm7, %v4923_v11, %v1346_v45  ;;  %v1379_v28 = vmul.f32 0.5, %v1378_v51  ;;  %3246 = vrsqrt.f32 %v5030_v43 }
 0x1b4   : > { %v5046_v20 = vpop.eup %3240  ;;  %vm1335_vm11 = vcmp.eq.f32.partialorder %v4954_v57, inf  ;;  %vm1337_vm12 = vcmp.eq.f32.partialorder %v4954_v57, 0.0  ;;  %v1338_v35 = vand.u32 2147483648, %v4954_v57  ;;  %v1351_v3 = vsel %vm1349_vm8, %v1350_v33, %v1348_v63 }
 0x1b5   : > { %3248 = vrcp.f32 %v5038_v27  ;;  %v3243_v39 = vpop.eup %3242  ;;  %v1972_v15 = vmul.f32 %v5046_v20, %v5006_v12  ;;  %v1358_v1 = vmul.f32 %v1357_v6, %v4944_v9  ;;  %vm1383_vm13 = vcmp.eq.f32.partialorder %v4962_v44, inf }
 0x1b6   : > { %v1684_v7 = vmul.f32 %v3243_v39, %v6201_v53  ;;  %v1592_v34 = vmax.f32 %v1351_v3, 1e-08  ;;  %vm1385_vm14 = vcmp.eq.f32.partialorder %v4962_v44, 0.0  ;;  %v1386_v29 = vand.u32 2147483648, %v4962_v44  ;;  %v6207_v53 = vld [vmem:[#allocation90_spill] sm:$0xff] }
 0x1b7   : > { %v3245_v42 = vpop.eup %3244  ;;  %v1973_v21 = vsub.f32 1.0, %v1972_v15  ;;  %v1360_v8 = vsel %vm1359_vm9, %v4944_v9, %v1358_v1  ;;  %v1333_v11 = vmul.f32 %v4985_v61, %v1332_v58  ;;  %v1380_v26 = vsub.f32 1.5, %v1379_v28 }
 0x1b8   : > { %v2694_v47 = vmul.f32 -1.442695, %v1684_v7  ;;  %v6203_v50 = vmax.f32 %v6202_v2, 1e-08  ;;  %v1363_v31 = vsel %vm1361_vm10, %v1362_v25, %v1360_v8  ;;  %v1389_v48 = vmul.f32 %v3245_v42, %v5026_v23 }
 0x1b9   : > { %v5070_v16 = vpop.eup %3246  ;;  %v1974_v22 = vmul.f32 %v5046_v20, %v1973_v21  ;;  %v1593_v18 = vmax.f32 %v1363_v31, 1e-08  ;;  %v1334_v30 = vmul.f32 %v1333_v11, %v4954_v57  ;;  %v1381_v5 = vmul.f32 %v5004_v40, %v1380_v26 }
 0x1ba   : > { %v1624_v32 = vmul.f32 %v1592_v34, %v6203_v50  ;;  %vm1976_vm15 = vweird.f32 %v5006_v12  ;;  %3250 = vpow2.f32 %v2694_v47  ;;  %v1390_v52 = vmul.f32 %v3245_v42, %v1389_v48  ;;  %v6209_v47 = vld [vmem:[#allocation71_spill] sm:$0xff]  ;;  %v6210_v50 = vld [vmem:[#allocation94_spill] sm:$0xff] }
 0x1bb   : > { %v5075_v61 = vpop.eup %3248  ;;  %v1365_v9 = vmul.f32 %v5070_v16, %v5030_v43  ;;  %vm1977_vm0 = vweird.f32 %v5046_v20  ;;  %v1980_v49 = vand.u32 2147483647, %v5006_v12  ;;  %v6204_v24 = vmax.f32 %v4359_v55, 1e-08 }
 0x1bc   : > { %v1987_v33 = vmul.f32 %v5075_v61, %v5038_v27  ;;  %3252 = vrcp.f32 %v1624_v32  ;;  %v1336_v41 = vsel %vm1335_vm11, %v4954_v57, %v1334_v30  ;;  %v1382_v10 = vmul.f32 %v1381_v5, %v4962_v44  ;;  %vm5107_vm2 = vmor %vm1976_vm15, %vm1977_vm0 }
 0x1bd   : > { %v1625_v40 = vmul.f32 %v1593_v18, %v6204_v24  ;;  %v1391_v45 = vmul.f32 0.5, %v1390_v52  ;;  %v1975_v51 = vadd.f32 %v5046_v20, %v1974_v22  ;;  %v1339_v25 = vsel %vm1337_vm12, %v1338_v35, %v1336_v41 }
 0x1be   : > { %v1988_v6 = vsub.f32 1.0, %v1987_v33  ;;  %v1366_v63 = vmul.f32 %v5070_v16, %v1365_v9  ;;  %v1982_v58 = vand.u32 2147483648, %v5006_v12  ;;  %v1591_v55 = vmax.f32 %v1339_v25, 1e-08  ;;  %v6214_v9 = vld [vmem:[#allocation70_spill] sm:$0xff]  ;;  %v5136_v33 = vpop.xlane.xlu1 %1168 }
 0x1bf   : > { %3254 = vrcp.f32 %v1625_v40  ;;  %v1384_v28 = vsel %vm1383_vm13, %v4962_v44, %v1382_v10  ;;  %v1995_v15 = vand.u32 2147483647, %v5038_v27  ;;  %v1392_v1 = vsub.f32 1.5, %v1391_v45 }
 0x1c0   : > { %v1989_v39 = vmul.f32 %v5075_v61, %v1988_v6  ;;  %v1387_v3 = vsel %vm1385_vm14, %v1386_v29, %v1384_v28  ;;  %vm1395_vm1 = vcmp.eq.f32.partialorder %v5026_v23, inf  ;;  %v3251_v57 = vpop.eup %3250  ;;  %vm1992_vm3 = vweird.f32 %v5075_v61  ;;  %v5151_v28 = vpop.xlane.xlu2 %1170 }
 0x1c1   : > { %v6208_v7 = vmax.f32 %v6207_v53, 1e-08  ;;  %v1595_v21 = vmax.f32 %v1387_v3, 1e-08  ;;  %v1367_v44 = vmul.f32 0.5, %v1366_v63  ;;  %v1979_v8 = vsel %vm5107_vm2, %v5046_v20, %v1975_v51 }
 0x1c2   : > { %v3253_v29 = vpop.eup %3252  ;;  %v1990_v11 = vadd.f32 %v5075_v61, %v1989_v39  ;;  %v5118_v26 = vadd.f32 1.0, %v3251_v57  ;;  %v1393_v12 = vmul.f32 %v3245_v42, %v1392_v1  ;;  %v6211_v32 = vmax.f32 %v6210_v50, 1e-08 }
 0x1c3   : > { %v1623_v34 = vmul.f32 %v1591_v55, %v6208_v7  ;;  %v1688_v2 = vmul.f32 %v3253_v29, %v6209_v47  ;;  %v1368_v48 = vsub.f32 1.5, %v1367_v44  ;;  %vm1981_vm4 = vcmp.eq.f32.partialorder %v1980_v49, 8.507059e+37  ;;  %v6216_v44 = vld [vmem:[#allocation74_spill] sm:$0xff] }
 0x1c4   : > { %v1627_v31 = vmul.f32 %v1595_v21, %v6211_v32  ;;  %v1983_v22 = vor.u32 1.1754944e-38, %v1982_v58  ;;  %v1997_v18 = vand.u32 2147483648, %v5038_v27  ;;  %vm1991_vm5 = vweird.f32 %v5038_v27  ;;  %v6215_v58 = vld [vmem:[#allocation66_spill] sm:$0xff] }
 0x1c5   : > { %3256 = vrcp.f32 %v1623_v34  ;;  %v3255_v30 = vpop.eup %3254  ;;  %vm1397_vm6 = vcmp.eq.f32.partialorder %v5026_v23, 0.0  ;;  %v1398_v20 = vand.u32 2147483648, %v5026_v23  ;;  %vm1371_vm7 = vcmp.eq.f32.partialorder %v5030_v43, inf  ;;  %vm5131_vm8 = vmor %vm1991_vm5, %vm1992_vm3 }
 0x1c6   : > { %3258 = vrcp.f32 %v5118_v26  ;;  %v1984_v42 = vsel %vm1981_vm4, %v1983_v22, %v1979_v8  ;;  %v2698_v52 = vmul.f32 -1.442695, %v1688_v2  ;;  %v1689_v49 = vmul.f32 %v3255_v30, %v6214_v9 }
 0x1c7   : > { %3260 = vrcp.f32 %v1627_v31  ;;  %v1994_v27 = vsel %vm5131_vm8, %v5075_v61, %v1990_v11  ;;  %vm1996_vm9 = vcmp.eq.f32.partialorder %v1995_v15, 8.507059e+37  ;;  %v1394_v24 = vmul.f32 %v1393_v12, %v5026_v23  ;;  %v6218_v31 = vld [vmem:[#allocation93_spill] sm:$0xff] }
 0x1c8   : > { %v1369_v40 = vmul.f32 %v5070_v16, %v1368_v48  ;;  %v1998_v41 = vor.u32 1.1754944e-38, %v1997_v18  ;;  %3262 = vpow2.f32 %v2698_v52  ;;  %v2699_v10 = vmul.f32 -1.442695, %v1689_v49 }
 0x1c9   : > { %vm1373_vm10 = vcmp.eq.f32.partialorder %v5030_v43, 0.0  ;;  %v2325_v51 = vsub.f32 1.0, %v1984_v42  ;;  %v1396_v6 = vsel %vm1395_vm1, %v5026_v23, %v1394_v24  ;;  %3264 = vrsqrt.f32 %v5136_v33 }
 0x1ca   : > { %v1370_v25 = vmul.f32 %v1369_v40, %v5030_v43  ;;  %v1999_v63 = vsel %vm1996_vm9, %v1998_v41, %v1994_v27  ;;  %3266 = vpow2.f32 %v2699_v10  ;;  %v1374_v55 = vand.u32 2147483648, %v5030_v43 }
 0x1cb   : > { %v3257_v45 = vpop.eup %3256  ;;  %v1965_v15 = vand.u32 2147483647, %v5118_v26  ;;  %v1399_v3 = vsel %vm1397_vm6, %v1398_v20, %v1396_v6  ;;  %vm1059_vm11 = vcmp.eq.f32.partialorder %v4433_v0, inf  ;;  %v1967_v35 = vand.u32 2147483648, %v5118_v26 }
 0x1cc   : > { %v3259_v61 = vpop.eup %3258  ;;  %v1687_v16 = vmul.f32 %v3257_v45, %v6215_v58  ;;  %v1372_v1 = vsel %vm1371_vm7, %v5030_v43, %v1370_v25  ;;  %v1596_v7 = vmax.f32 %v1399_v3, 1e-08  ;;  %3268 = vrsqrt.f32 %v5151_v28  ;;  %v6221_v58 = vld [vmem:[#allocation19_spill] sm:$0xff]  ;;  %v5212_v3 = vpop.xlane.xlu0 %1166 }
 0x1cd   : > { %v1957_v39 = vmul.f32 %v3259_v61, %v5118_v26  ;;  %v3261_v57 = vpop.eup %3260  ;;  %v1375_v34 = vsel %vm1373_vm10, %v1374_v55, %v1372_v1  ;;  %v2326_v11 = vsub.f32 1.0, %v1999_v63  ;;  %vm1962_vm12 = vweird.f32 %v3259_v61  ;;  %v6222_v55 = vld [vmem:[#allocation20_spill] sm:$0xff] }
 0x1ce   : > { %v2697_v53 = vmul.f32 -1.442695, %v1687_v16  ;;  %v1691_v29 = vmul.f32 %v3261_v57, %v6216_v44  ;;  %v1594_v8 = vmax.f32 %v1375_v34, 1e-08  ;;  %v3263_v23 = vpop.eup %3262  ;;  %v6217_v12 = vmax.f32 %v4451_v14, 1e-08 }
 0x1cf   : > { %v1958_v21 = vsub.f32 1.0, %v1957_v39  ;;  %v5168_v2 = vpop.eup %3264  ;;  %v5170_v32 = vadd.f32 1.0, %v3263_v23  ;;  %v6219_v48 = vmax.f32 %v6218_v31, 1e-08  ;;  %v1058_v30 = vmul.f32 %v5022_v38, %v4433_v0 }
 0x1d0   : > { %3270 = vpow2.f32 %v2697_v53  ;;  %v1628_v47 = vmul.f32 %v1596_v7, %v6217_v12  ;;  %v2701_v43 = vmul.f32 -1.442695, %v1691_v29  ;;  %v3267_v18 = vpop.eup %3266  ;;  %v5178_v20 = vmul.f32 %v4649_v13, %v4523_v62 }
 0x1d1   : > { %v1959_v50 = vmul.f32 %v3259_v61, %v1958_v21  ;;  %v1626_v22 = vmul.f32 %v1594_v8, %v6219_v48  ;;  %v1413_v14 = vmul.f32 %v5168_v2, %v5136_v33  ;;  %v2357_v42 = vmul.f32 %v2325_v51, %v4730_v59  ;;  %v6220_v51 = vld [vmem:[#allocation18_spill] sm:$0xff] }
 0x1d2   : > { %3272 = vrcp.f32 %v1628_v47  ;;  %vm1961_vm13 = vweird.f32 %v5118_v26  ;;  %v5186_v52 = vmul.f32 %v2326_v11, %v4730_v59  ;;  %v1968_v38 = vor.u32 1.1754944e-38, %v1967_v35  ;;  %v5191_v49 = vpop.eup %3268  ;;  %v6225_v11 = vld [vmem:[#allocation14_spill] sm:$0xff]  ;;  %v6226_v47 = vld [vmem:[#allocation15_spill] sm:$0xff] }
 0x1d3   : > { %v1960_v5 = vadd.f32 %v3259_v61, %v1959_v50  ;;  %3274 = vrcp.f32 %v5170_v32  ;;  %vm1963_vm14 = vmor %vm1961_vm13, %vm1962_vm12  ;;  %v5189_v9 = vadd.f32 1.0, %v3267_v18  ;;  %vm1966_vm15 = vcmp.eq.f32.partialorder %v1965_v15, 8.507059e+37 }
 0x1d4   : > { %3276 = vpow2.f32 %v2701_v43  ;;  %v2027_v24 = vand.u32 2147483648, %v5170_v32  ;;  %v2025_v41 = vand.u32 2147483647, %v5170_v32  ;;  %v1414_v10 = vmul.f32 %v5168_v2, %v1413_v14 }
 0x1d5   : > { %v1964_v27 = vsel %vm1963_vm14, %v3259_v61, %v1960_v5  ;;  %3278 = vrcp.f32 %v1626_v22  ;;  %v5200_v45 = vsel %vm1059_vm11, %v4433_v0, %v1058_v30  ;;  %v2389_v6 = vmul.f32 %v6220_v51, %v2357_v42  ;;  %v6227_v30 = vld [vmem:[#allocation73_spill] sm:$0xff] }
 0x1d6   : > { %v3271_v40 = vpop.eup %3270  ;;  %v1969_v26 = vsel %vm1966_vm15, %v1968_v38, %v1964_v27  ;;  %3280 = vrcp.f32 %v5189_v9  ;;  %v2485_v16 = vmul.f32 %v6221_v58, %v2357_v42  ;;  %v5208_v39 = vmul.f32 %v6222_v55, %v5186_v52  ;;  %v6228_v27 = vld [vmem:[#allocation69_spill] sm:$0xff] }
 0x1d7   : > { %v2324_v25 = vsub.f32 1.0, %v1969_v26  ;;  %v5203_v61 = vadd.f32 1.0, %v3271_v40  ;;  %vm2021_vm0 = vweird.f32 %v5170_v32  ;;  %v1422_v15 = vand.u32 2147483648, %v5136_v33 }
 0x1d8   : > { %v3273_v63 = vpop.eup %3272  ;;  %v2028_v35 = vor.u32 1.1754944e-38, %v2027_v24  ;;  %v2040_v53 = vand.u32 2147483647, %v5189_v9  ;;  %vm5218_vm1 = vcmp.eq.f32.partialorder %v2025_v41, 8.507059e+37  ;;  %v2042_v44 = vand.u32 2147483648, %v5189_v9 }
 0x1d9   : > { %v3275_v1 = vpop.eup %3274  ;;  %v2356_v57 = vmul.f32 %v2324_v25, %v4730_v59  ;;  %3282 = vrcp.f32 %v5203_v61  ;;  %v1415_v29 = vmul.f32 0.5, %v1414_v10  ;;  %v1425_v8 = vmul.f32 %v5191_v49, %v5151_v28 }
 0x1da   : > { %v3277_v7 = vpop.eup %3276  ;;  %v2017_v34 = vmul.f32 %v3275_v1, %v5170_v32  ;;  %vm2036_vm2 = vweird.f32 %v5189_v9  ;;  %3284 = vrsqrt.f32 %v5212_v3  ;;  %v2010_v22 = vand.u32 2147483647, %v5203_v61 }
 0x1db   : > { %v3279_v23 = vpop.eup %3278  ;;  %v2388_v12 = vmul.f32 %v6225_v11, %v2356_v57  ;;  %v2484_v50 = vmul.f32 %v6226_v47, %v2356_v57  ;;  %v5228_v43 = vadd.f32 1.0, %v3277_v7  ;;  %v2012_v18 = vand.u32 2147483648, %v5203_v61 }
 0x1dc   : > { %v3281_v31 = vpop.eup %3280  ;;  %v2018_v48 = vsub.f32 1.0, %v2017_v34  ;;  %v1692_v14 = vmul.f32 %v3273_v63, %v6227_v30  ;;  %v1690_v24 = vmul.f32 %v3279_v23, %v6228_v27  ;;  %vm1419_vm3 = vcmp.eq.f32.partialorder %v5136_v33, inf  ;;  %v6234_v27 = vld [vmem:[#allocation25_spill] sm:$0xff] }
 0x1dd   : > { %v2875_v42 = vpack.c.bf16 %v2389_v6, %v2388_v12  ;;  %v2955_v5 = vpack.c.bf16 %v2485_v16, %v2484_v50  ;;  %v2032_v38 = vmul.f32 %v3281_v31, %v5189_v9  ;;  %vm2022_vm4 = vweird.f32 %v3275_v1 }
 0x1de   : > { %v2019_v40 = vmul.f32 %v3275_v1, %v2018_v48  ;;  %vm5237_vm5 = vcmp.eq.f32.partialorder %v2040_v53, 8.507059e+37  ;;  %3286 = vrcp.f32 %v5228_v43  ;;  %vm1421_vm6 = vcmp.eq.f32.partialorder %v5136_v33, 0.0  ;;  %vm2023_vm9 = vmor %vm2021_vm0, %vm2022_vm4 }
 0x1df   : > { %v3283_v41 = vpop.eup %3282  ;;  %3045 = vst [vmem:[%s4814_s23 + $0x20] sm:$0xff] %v2875_v42   ;;  %v2033_v10 = vsub.f32 1.0, %v2032_v38  ;;  %v2043_v51 = vor.u32 1.1754944e-38, %v2042_v44  ;;  %vm2006_vm7 = vweird.f32 %v5203_v61  ;;  %v1416_v6 = vsub.f32 1.5, %v1415_v29 }
 0x1e0   : > { %3060 = vst [vmem:[%s4829_s26 + $0x20] sm:$0xff] %v2955_v5   ;;  %v2020_v25 = vadd.f32 %v3275_v1, %v2019_v40  ;;  %v2002_v63 = vmul.f32 %v3283_v41, %v5203_v61  ;;  %vm5247_vm8 = vcmp.eq.f32.partialorder %v2010_v22, 8.507059e+37  ;;  %v2702_v16 = vmul.f32 -1.442695, %v1692_v14  ;;  %v5251_v55 = vpop.eup %3284  ;;  %v6233_v5 = vld [vmem:[#allocation24_spill] sm:$0xff] }
 0x1e1   : > { %v2034_v57 = vmul.f32 %v3281_v31, %v2033_v10  ;;  %vm2037_vm10 = vweird.f32 %v3281_v31  ;;  %v2013_v53 = vor.u32 1.1754944e-38, %v2012_v18  ;;  %v2700_v7 = vmul.f32 -1.442695, %v1690_v24 }
 0x1e2   : > { %v2024_v34 = vsel %vm2023_vm9, %v3275_v1, %v2020_v25  ;;  %v2003_v44 = vsub.f32 1.0, %v2002_v63  ;;  %3288 = vpow2.f32 %v2702_v16  ;;  %v1417_v29 = vmul.f32 %v5168_v2, %v1416_v6  ;;  %vm2038_vm11 = vmor %vm2036_vm2, %vm2037_vm10  ;;  %v6235_v16 = vld [vmem:[#allocation26_spill] sm:$0xff] }
 0x1e3   : > { %v2029_v23 = vsel %vm5218_vm1, %v2028_v35, %v2024_v34  ;;  %v2035_v11 = vadd.f32 %v3281_v31, %v2034_v57  ;;  %3290 = vpow2.f32 %v2700_v7  ;;  %v1426_v12 = vmul.f32 %v5191_v49, %v1425_v8  ;;  %v6236_v57 = vld [vmem:[#allocation27_spill] sm:$0xff] }
 0x1e4   : > { %v5260_v47 = vpop.eup %3286  ;;  %v2328_v32 = vsub.f32 1.0, %v2029_v23  ;;  %v2004_v50 = vmul.f32 %v3283_v41, %v2003_v44  ;;  %vm2007_vm12 = vweird.f32 %v3283_v41  ;;  %v1418_v1 = vmul.f32 %v1417_v29, %v5136_v33 }
 0x1e5   : > { %v2039_v48 = vsel %vm2038_vm11, %v3281_v31, %v2035_v11  ;;  %v2062_v2 = vmul.f32 %v5260_v47, %v5228_v43  ;;  %vm2066_vm13 = vweird.f32 %v5228_v43  ;;  %v1427_v35 = vmul.f32 0.5, %v1426_v12  ;;  %vm2008_vm14 = vmor %vm2006_vm7, %vm2007_vm12 }
 0x1e6   : > { %v2360_v21 = vmul.f32 %v2328_v32, %v4730_v59  ;;  %v2044_v8 = vsel %vm5237_vm5, %v2043_v51, %v2039_v48  ;;  %v2005_v22 = vadd.f32 %v3283_v41, %v2004_v50  ;;  %v1420_v9 = vsel %vm1419_vm3, %v5136_v33, %v1418_v1  ;;  %v6240_v1 = vld [vmem:[#allocation21_spill] sm:$0xff]  ;;  %v6241_v48 = vld [vmem:[#allocation22_spill] sm:$0xff] }
 0x1e7   : > { %v2329_v18 = vsub.f32 1.0, %v2044_v8  ;;  %v2063_v31 = vsub.f32 1.0, %v2062_v2  ;;  %v1423_v30 = vsel %vm1421_vm6, %v1422_v15, %v1420_v9  ;;  %v1428_v14 = vsub.f32 1.5, %v1427_v35  ;;  %v6242_v35 = vld [vmem:[#allocation23_spill] sm:$0xff] }
 0x1e8   : > { %v3289_v42 = vpop.eup %3288  ;;  %v2392_v38 = vmul.f32 %v6233_v5, %v2360_v21  ;;  %v2488_v24 = vmul.f32 %v6234_v27, %v2360_v21  ;;  %v2009_v40 = vsel %vm2008_vm14, %v3283_v41, %v2005_v22  ;;  %v1598_v26 = vmax.f32 %v1423_v30, 1e-08 }
 0x1e9   : > { %v3291_v10 = vpop.eup %3290  ;;  %v2361_v51 = vmul.f32 %v2329_v18, %v4730_v59  ;;  %v2014_v61 = vsel %vm5247_vm8, %v2013_v53, %v2009_v40  ;;  %v2064_v6 = vmul.f32 %v5260_v47, %v2063_v31  ;;  %v5286_v25 = vadd.f32 1.0, %v3289_v42 }
 0x1ea   : > { %v2327_v33 = vsub.f32 1.0, %v2014_v61  ;;  %vm2067_vm15 = vweird.f32 %v5260_v47  ;;  %v2072_v15 = vand.u32 2147483648, %v5228_v43  ;;  %v5290_v63 = vadd.f32 1.0, %v3291_v10 }
 0x1eb   : > { %v2393_v41 = vmul.f32 %v6235_v16, %v2361_v51  ;;  %v2489_v7 = vmul.f32 %v6236_v57, %v2361_v51  ;;  %v2065_v34 = vadd.f32 %v5260_v47, %v2064_v6  ;;  %3292 = vrcp.f32 %v5286_v25  ;;  %vm5304_vm0 = vmor %vm2066_vm13, %vm2067_vm15 }
 0x1ec   : > { %v2359_v58 = vmul.f32 %v2327_v33, %v4730_v59  ;;  %v2070_v53 = vand.u32 2147483647, %v5228_v43  ;;  %v6237_v44 = vmax.f32 %v4414_v17, 1e-08  ;;  %v1401_v23 = vmul.f32 %v5251_v55, %v5212_v3 }
 0x1ed   : > { %v2885_v11 = vpack.c.bf16 %v2393_v41, %v2392_v38  ;;  %v2965_v12 = vpack.c.bf16 %v2489_v7, %v2488_v24  ;;  %3294 = vrcp.f32 %v5290_v63  ;;  %v1429_v50 = vmul.f32 %v5191_v49, %v1428_v14  ;;  %v5345_v24 = vpop.xlane.xlu2 %1176 }
 0x1ee   : > { %v1630_v29 = vmul.f32 %v1598_v26, %v6237_v44  ;;  %v2486_v17 = vmul.f32 %v6240_v1, %v5186_v52  ;;  %v2391_v2 = vmul.f32 %v6241_v48, %v2359_v58  ;;  %v2487_v21 = vmul.f32 %v6242_v35, %v2359_v58  ;;  %v5324_v52 = vpop.xlane.xlu1 %1174 }
 0x1ef   : > { %v2069_v8 = vsel %vm5304_vm0, %v5260_v47, %v2065_v34  ;;  %v5319_v43 = vmul.f32 %v4649_v13, %v5178_v20  ;;  %3047 = vst [vmem:[%s4814_s23 + $0x30] sm:$0xff] %v2885_v11   ;;  %v2073_v22 = vor.u32 1.1754944e-38, %v2072_v15  ;;  %vm1431_vm1 = vcmp.eq.f32.partialorder %v5151_v28, inf }
 0x1f0   : > { %vm1433_vm2 = vcmp.eq.f32.partialorder %v5151_v28, 0.0  ;;  %3062 = vst [vmem:[%s4829_s26 + $0x30] sm:$0xff] %v2965_v12   ;;  %v2880_v49 = vpack.c.bf16 %v2391_v2, %v5208_v39  ;;  %v2960_v9 = vpack.c.bf16 %v2487_v21, %v2486_v17  ;;  %vm2071_vm3 = vcmp.eq.f32.partialorder %v2070_v53, 8.507059e+37 }
 0x1f1   : > { %3296 = vrcp.f32 %v1630_v29  ;;  %v5328_v47 = vpop.eup %3292  ;;  %v2074_v20 = vsel %vm2071_vm3, %v2073_v22, %v2069_v8  ;;  %v2087_v18 = vand.u32 2147483648, %v5286_v25  ;;  %v1430_v31 = vmul.f32 %v1429_v50, %v5151_v28  ;;  %v5362_v29 = vpop.xlane.xlu0 %1172  ;;  %v6247_v22 = vld [vmem:[#allocation30_spill] sm:$0xff] }
 0x1f2   : > { %v1402_v30 = vmul.f32 %v5251_v55, %v1401_v23  ;;  %3046 = vst [vmem:[%s4814_s23 + $0x28] sm:$0xff] %v2880_v49   ;;  %v2077_v14 = vmul.f32 %v5328_v47, %v5286_v25  ;;  %v1434_v42 = vand.u32 2147483648, %v5151_v28  ;;  %vm1407_vm4 = vcmp.eq.f32.partialorder %v5212_v3, inf }
 0x1f3   : > { %3298 = vrsqrt.f32 %v5324_v52  ;;  %v3295_v39 = vpop.eup %3294  ;;  %3061 = vst [vmem:[%s4829_s26 + $0x28] sm:$0xff] %v2960_v9   ;;  %v1432_v5 = vsel %vm1431_vm1, %v5151_v28, %v1430_v31  ;;  %vm1409_vm5 = vcmp.eq.f32.partialorder %v5212_v3, 0.0  ;;  %v1410_v27 = vand.u32 2147483648, %v5212_v3  ;;  %v6243_v28 = vld [vmem:[#allocation77_spill] sm:$0xff] }
 0x1f4   : > { %v1403_v38 = vmul.f32 0.5, %v1402_v30  ;;  %v2331_v40 = vsub.f32 1.0, %v2074_v20  ;;  %v2078_v26 = vsub.f32 1.0, %v2077_v14  ;;  %v2047_v10 = vmul.f32 %v3295_v39, %v5290_v63 }
 0x1f5   : > { %v1435_v51 = vsel %vm1433_vm2, %v1434_v42, %v1432_v5  ;;  %v2085_v61 = vand.u32 2147483647, %v5286_v25  ;;  %v5351_v6 = vor.u32 1.1754944e-38, %v2087_v18  ;;  %vm2081_vm6 = vweird.f32 %v5286_v25  ;;  %v6248_v42 = vld [vmem:[#allocation31_spill] sm:$0xff] }
 0x1f6   : > { %v1599_v33 = vmax.f32 %v1435_v51, 1e-08  ;;  %v1404_v15 = vsub.f32 1.5, %v1403_v38  ;;  %v2048_v41 = vsub.f32 1.0, %v2047_v10  ;;  %vm2051_vm7 = vweird.f32 %v5290_v63  ;;  %v5379_v21 = vpop.xlane.xlu1 %1180 }
 0x1f7   : > { %v3297_v16 = vpop.eup %3296  ;;  %v2055_v57 = vand.u32 2147483647, %v5290_v63  ;;  %3300 = vrsqrt.f32 %v5345_v24  ;;  %v2057_v7 = vand.u32 2147483648, %v5290_v63  ;;  %v6244_v58 = vmax.f32 %v4500_v19, 1e-08 }
 0x1f8   : > { %v1694_v34 = vmul.f32 %v3297_v16, %v6243_v28  ;;  %v1405_v44 = vmul.f32 %v5251_v55, %v1404_v15  ;;  %v2363_v11 = vmul.f32 %v2331_v40, %v4730_v59  ;;  %v2079_v12 = vmul.f32 %v5328_v47, %v2078_v26  ;;  %v6253_v16 = vld [vmem:[#allocation76_spill] sm:$0xff] }
 0x1f9   : > { %v1631_v53 = vmul.f32 %v1599_v33, %v6244_v58  ;;  %v3299_v23 = vpop.eup %3298  ;;  %v2049_v32 = vmul.f32 %v3295_v39, %v2048_v41  ;;  %vm2052_vm8 = vweird.f32 %v3295_v39  ;;  %vm2082_vm9 = vweird.f32 %v5328_v47  ;;  %v6254_v58 = vld [vmem:[#allocation28_spill] sm:$0xff] }
 0x1fa   : > { %v2704_v50 = vmul.f32 -1.442695, %v1694_v34  ;;  %v1406_v1 = vmul.f32 %v1405_v44, %v5212_v3  ;;  %v1449_v17 = vmul.f32 %v3299_v23, %v5324_v52  ;;  %vm2056_vm10 = vcmp.eq.f32.partialorder %v2055_v57, 8.507059e+37  ;;  %vm2053_vm12 = vmor %vm2051_vm7, %vm2052_vm8  ;;  %v6255_v44 = vld [vmem:[#allocation29_spill] sm:$0xff] }
 0x1fb   : > { %3302 = vrcp.f32 %v1631_v53  ;;  %v2050_v19 = vadd.f32 %v3295_v39, %v2049_v32  ;;  %vm5370_vm11 = vcmp.eq.f32.partialorder %v2085_v61, 8.507059e+37  ;;  %v2058_v48 = vor.u32 1.1754944e-38, %v2057_v7  ;;  %vm5393_vm14 = vmor %vm2081_vm6, %vm2082_vm9 }
 0x1fc   : > { %3304 = vrsqrt.f32 %v5362_v29  ;;  %v1408_v2 = vsel %vm1407_vm4, %v5212_v3, %v1406_v1  ;;  %v1450_v35 = vmul.f32 %v3299_v23, %v1449_v17  ;;  %v2395_v49 = vmul.f32 %v6247_v22, %v2363_v11 }
 0x1fd   : > { %3306 = vpow2.f32 %v2704_v50  ;;  %v3301_v8 = vpop.eup %3300  ;;  %v2080_v9 = vadd.f32 %v5328_v47, %v2079_v12  ;;  %v2054_v20 = vsel %vm2053_vm12, %v3295_v39, %v2050_v19  ;;  %v1411_v18 = vsel %vm1409_vm5, %v1410_v27, %v1408_v2  ;;  %v6251_v39 = vld [vmem:[#allocation95_spill] sm:$0xff] }
 0x1fe   : > { %v2059_v63 = vsel %vm2056_vm10, %v2058_v48, %v2054_v20  ;;  %v1597_v31 = vmax.f32 %v1411_v18, 1e-08  ;;  %v1451_v30 = vmul.f32 0.5, %v1450_v35  ;;  %v1461_v14 = vmul.f32 %v3301_v8, %v5345_v24 }
 0x1ff   : > { %v2491_v5 = vmul.f32 %v6248_v42, %v2363_v11  ;;  %v2330_v38 = vsub.f32 1.0, %v2059_v63  ;;  %vm1455_vm13 = vcmp.eq.f32.partialorder %v5324_v52, inf  ;;  %3308 = vrsqrt.f32 %v5379_v21 }
 0x200   : > { %v6252_v27 = vmax.f32 %v6251_v39, 1e-08  ;;  %v1452_v10 = vsub.f32 1.5, %v1451_v30  ;;  %vm1457_vm15 = vcmp.eq.f32.partialorder %v5324_v52, 0.0  ;;  %v1462_v51 = vmul.f32 %v3301_v8, %v1461_v14 }
 0x201   : > { %v3303_v40 = vpop.eup %3302  ;;  %v2084_v33 = vsel %vm5393_vm14, %v5328_v47, %v2080_v9  ;;  %v2362_v15 = vmul.f32 %v2330_v38, %v4730_v59  ;;  %v1458_v41 = vand.u32 2147483648, %v5324_v52  ;;  %vm1467_vm0 = vcmp.eq.f32.partialorder %v5345_v24, inf  ;;  %v5428_v9 = vpop.xlane.xlu2 %1182 }
 0x202   : > { %v1629_v26 = vmul.f32 %v1597_v31, %v6252_v27  ;;  %v3305_v61 = vpop.eup %3304  ;;  %v1695_v25 = vmul.f32 %v3303_v40, %v6253_v16  ;;  %v1453_v7 = vmul.f32 %v3299_v23, %v1452_v10  ;;  %v1463_v28 = vmul.f32 0.5, %v1462_v51  ;;  %v6256_v31 = vld [vmem:[#allocation72_spill] sm:$0xff] }
 0x203   : > { %v3307_v57 = vpop.eup %3306  ;;  %v1437_v34 = vmul.f32 %v3305_v61, %v5362_v29  ;;  %v2394_v53 = vmul.f32 %v6254_v58, %v2362_v15  ;;  %v2490_v11 = vmul.f32 %v6255_v44, %v2362_v15  ;;  %v5416_v23 = vsel %vm5370_vm11, %v5351_v6, %v2084_v33  ;;  %v6261_v44 = vld [vmem:[#allocation100_spill] sm:$0xff] }
 0x204   : > { %3310 = vrcp.f32 %v1629_v26  ;;  %v5409_v12 = vadd.f32 1.0, %v3307_v57  ;;  %v2705_v47 = vmul.f32 -1.442695, %v1695_v25  ;;  %v1454_v32 = vmul.f32 %v1453_v7, %v5324_v52 }
 0x205   : > { %v1464_v50 = vsub.f32 1.5, %v1463_v28  ;;  %v1438_v1 = vmul.f32 %v3305_v61, %v1437_v34  ;;  %v3309_v17 = vpop.eup %3308  ;;  %v2890_v19 = vpack.c.bf16 %v2395_v49, %v2394_v53  ;;  %v2970_v48 = vpack.c.bf16 %v2491_v5, %v2490_v11  ;;  %v6257_v5 = vld [vmem:[#allocation97_spill] sm:$0xff] }
 0x206   : > { %3312 = vrcp.f32 %v5409_v12  ;;  %v1456_v2 = vsel %vm1455_vm13, %v5324_v52, %v1454_v32  ;;  %vm1469_vm1 = vcmp.eq.f32.partialorder %v5345_v24, 0.0  ;;  %v1470_v35 = vand.u32 2147483648, %v5345_v24 }
 0x207   : > { %3314 = vpow2.f32 %v2705_v47  ;;  %3048 = vst [vmem:[%s4814_s23 + $0x38] sm:$0xff] %v2890_v19   ;;  %v1459_v55 = vsel %vm1457_vm15, %v1458_v41, %v1456_v2  ;;  %v1465_v6 = vmul.f32 %v3301_v8, %v1464_v50  ;;  %v1439_v22 = vmul.f32 0.5, %v1438_v1 }
 0x208   : > { %v1485_v49 = vmul.f32 %v3309_v17, %v5379_v21  ;;  %v2332_v18 = vsub.f32 1.0, %v5416_v23  ;;  %3063 = vst [vmem:[%s4829_s26 + $0x38] sm:$0xff] %v2970_v48   ;;  %v1601_v63 = vmax.f32 %v1459_v55, 1e-08  ;;  %vm1443_vm2 = vcmp.eq.f32.partialorder %v5362_v29, inf  ;;  %v6268_v23 = vld [vmem:[#allocation79_spill] sm:$0xff] }
 0x209   : > { %vm1445_vm3 = vcmp.eq.f32.partialorder %v5362_v29, 0.0  ;;  %v1466_v52 = vmul.f32 %v1465_v6, %v5345_v24  ;;  %v1440_v14 = vsub.f32 1.5, %v1439_v22  ;;  %v2115_v42 = vand.u32 2147483647, %v5409_v12 }
 0x20a   : > { %v3311_v20 = vpop.eup %3310  ;;  %v1486_v8 = vmul.f32 %v3309_v17, %v1485_v49  ;;  %v6258_v38 = vmax.f32 %v6257_v5, 1e-08  ;;  %v1446_v3 = vand.u32 2147483648, %v5362_v29  ;;  %3316 = vrsqrt.f32 %v5428_v9  ;;  %v6263_v49 = vld [vmem:[#allocation80_spill] sm:$0xff] }
 0x20b   : > { %v1693_v30 = vmul.f32 %v3311_v20, %v6256_v31  ;;  %v1468_v26 = vsel %vm1467_vm0, %v5345_v24, %v1466_v52  ;;  %v1441_v10 = vmul.f32 %v3305_v61, %v1440_v14  ;;  %v2117_v16 = vand.u32 2147483648, %v5409_v12  ;;  %v5453_v61 = vpop.xlane.xlu0 %1178  ;;  %v6264_v52 = vld [vmem:[#allocation96_spill] sm:$0xff] }
 0x20c   : > { %v1633_v40 = vmul.f32 %v1601_v63, %v6258_v38  ;;  %v3313_v39 = vpop.eup %3312  ;;  %v1487_v51 = vmul.f32 0.5, %v1486_v8  ;;  %v1471_v25 = vsel %vm1469_vm1, %v1470_v35, %v1468_v26  ;;  %vm1491_vm4 = vcmp.eq.f32.partialorder %v5379_v21, inf }
 0x20d   : > { %v2703_v27 = vmul.f32 -1.442695, %v1693_v30  ;;  %v3315_v33 = vpop.eup %3314  ;;  %v2107_v15 = vmul.f32 %v3313_v39, %v5409_v12  ;;  %v1602_v57 = vmax.f32 %v1471_v25, 1e-08  ;;  %v1442_v7 = vmul.f32 %v1441_v10, %v5362_v29 }
 0x20e   : > { %3318 = vrcp.f32 %v1633_v40  ;;  %v5448_v41 = vadd.f32 1.0, %v3315_v33  ;;  %v1488_v34 = vsub.f32 1.5, %v1487_v51  ;;  %vm1493_vm5 = vcmp.eq.f32.partialorder %v5379_v21, 0.0 }
 0x20f   : > { %3320 = vpow2.f32 %v2703_v27  ;;  %v2108_v28 = vsub.f32 1.0, %v2107_v15  ;;  %vm2111_vm6 = vweird.f32 %v5409_v12  ;;  %vm2112_vm7 = vweird.f32 %v3313_v39 }
 0x210   : > { %vm5456_vm8 = vcmp.eq.f32.partialorder %v2115_v42, 8.507059e+37  ;;  %3322 = vrcp.f32 %v5448_v41  ;;  %v3317_v58 = vpop.eup %3316  ;;  %v6262_v11 = vmax.f32 %v6261_v44, 1e-08  ;;  %v1444_v32 = vsel %vm1443_vm2, %v5362_v29, %v1442_v7  ;;  %vm2113_vm9 = vmor %vm2111_vm6, %vm2112_vm7 }
 0x211   : > { %v2109_v53 = vmul.f32 %v3313_v39, %v2108_v28  ;;  %v1489_v50 = vmul.f32 %v3309_v17, %v1488_v34  ;;  %v2118_v1 = vor.u32 1.1754944e-38, %v2117_v16  ;;  %v1447_v19 = vsel %vm1445_vm3, %v1446_v3, %v1444_v32  ;;  %v6269_v34 = vld [vmem:[#allocation99_spill] sm:$0xff]  ;;  %v5515_v32 = vpop.xlane.xlu1 %1186 }
 0x212   : > { %v1634_v47 = vmul.f32 %v1602_v57, %v6262_v11  ;;  %v1497_v48 = vmul.f32 %v3317_v58, %v5428_v9  ;;  %3324 = vrsqrt.f32 %v5453_v61  ;;  %v1600_v55 = vmax.f32 %v1447_v19, 1e-08 }
 0x213   : > { %v2110_v35 = vadd.f32 %v3313_v39, %v2109_v53  ;;  %v1490_v6 = vmul.f32 %v1489_v50, %v5379_v21  ;;  %v2130_v17 = vand.u32 2147483647, %v5448_v41  ;;  %v1494_v20 = vand.u32 2147483648, %v5379_v21 }
 0x214   : > { %v3319_v2 = vpop.eup %3318  ;;  %3326 = vrcp.f32 %v1634_v47  ;;  %v1498_v63 = vmul.f32 %v3317_v58, %v1497_v48  ;;  %v6265_v14 = vmax.f32 %v6264_v52, 1e-08  ;;  %v2132_v26 = vand.u32 2147483648, %v5448_v41  ;;  %v6272_v52 = vld [vmem:[#allocation36_spill] sm:$0xff] }
 0x215   : > { %v3321_v22 = vpop.eup %3320  ;;  %v1697_v29 = vmul.f32 %v3319_v2, %v6263_v49  ;;  %v2114_v31 = vsel %vm2113_vm9, %v3313_v39, %v2110_v35  ;;  %v1492_v42 = vsel %vm1491_vm4, %v5379_v21, %v1490_v6  ;;  %v5489_v39 = vmul.f32 0.5, %v5319_v43 }
 0x216   : > { %v5477_v30 = vadd.f32 1.0, %v3321_v22  ;;  %v1632_v8 = vmul.f32 %v1600_v55, %v6265_v14  ;;  %v3323_v5 = vpop.eup %3322  ;;  %v2119_v12 = vsel %vm5456_vm8, %v2118_v1, %v2114_v31  ;;  %v1495_v40 = vsel %vm1493_vm5, %v1494_v20, %v1492_v42  ;;  %v6271_v20 = vld [vmem:[#allocation75_spill] sm:$0xff] }
 0x217   : > { %v2707_v38 = vmul.f32 -1.442695, %v1697_v29  ;;  %v1499_v3 = vmul.f32 0.5, %v1498_v63  ;;  %v2122_v27 = vmul.f32 %v3323_v5, %v5448_v41  ;;  %v5499_v51 = vmul.f32 %v2332_v18, %v4730_v59 }
 0x218   : > { %3328 = vrcp.f32 %v5477_v30  ;;  %v5494_v10 = vpop.eup %3324  ;;  %vm1503_vm10 = vcmp.eq.f32.partialorder %v5428_v9, inf  ;;  %v1506_v21 = vand.u32 2147483648, %v5428_v9  ;;  %v2334_v33 = vsub.f32 1.0, %v2119_v12 }
 0x219   : > { %3330 = vpow2.f32 %v2707_v38  ;;  %v2123_v15 = vsub.f32 1.0, %v2122_v27  ;;  %v1604_v16 = vmax.f32 %v1495_v40, 1e-08  ;;  %vm1505_vm11 = vcmp.eq.f32.partialorder %v5428_v9, 0.0 }
 0x21a   : > { %v3327_v43 = vpop.eup %3326  ;;  %3332 = vrcp.f32 %v1632_v8  ;;  %vm2126_vm12 = vweird.f32 %v5448_v41  ;;  %vm5505_vm13 = vcmp.eq.f32.partialorder %v2130_v17, 8.507059e+37  ;;  %v1500_v57 = vsub.f32 1.5, %v1499_v3  ;;  %v6275_v3 = vld [vmem:[#allocation37_spill] sm:$0xff] }
 0x21b   : > { %v1698_v18 = vmul.f32 %v3327_v43, %v6268_v23  ;;  %v2124_v7 = vmul.f32 %v3323_v5, %v2123_v15  ;;  %vm2127_vm14 = vweird.f32 %v3323_v5  ;;  %v2133_v28 = vor.u32 1.1754944e-38, %v2132_v26  ;;  %v6276_v23 = vld [vmem:[#allocation83_spill] sm:$0xff] }
 0x21c   : > { %v6270_v24 = vmax.f32 %v6269_v34, 1e-08  ;;  %vm2096_vm15 = vweird.f32 %v5477_v30  ;;  %v1501_v11 = vmul.f32 %v3317_v58, %v1500_v57  ;;  %v1473_v47 = vmul.f32 %v5494_v10, %v5453_v61  ;;  %vm2128_vm0 = vmor %vm2126_vm12, %vm2127_vm14  ;;  %v6278_v34 = vld [vmem:[#allocation39_spill] sm:$0xff] }
 0x21d   : > { %v2708_v44 = vmul.f32 -1.442695, %v1698_v18  ;;  %v2366_v1 = vmul.f32 %v2334_v33, %v4730_v59  ;;  %v2125_v19 = vadd.f32 %v3323_v5, %v2124_v7  ;;  %v2100_v48 = vand.u32 2147483647, %v5477_v30  ;;  %v6277_v7 = vld [vmem:[#allocation38_spill] sm:$0xff] }
 0x21e   : > { %v1636_v53 = vmul.f32 %v1604_v16, %v6270_v24  ;;  %v3329_v50 = vpop.eup %3328  ;;  %v2102_v58 = vand.u32 2147483648, %v5477_v30  ;;  %v1502_v55 = vmul.f32 %v1501_v11, %v5428_v9  ;;  %vm1083_vm1 = vcmp.eq.f32.partialorder %v4393_v36, inf }
 0x21f   : > { %v3331_v2 = vpop.eup %3330  ;;  %v2092_v35 = vmul.f32 %v3329_v50, %v5477_v30  ;;  %vm1061_vm2 = vcmp.eq.f32.partialorder %v4433_v0, 0.0  ;;  %v2129_v22 = vsel %vm2128_vm0, %v3323_v5, %v2125_v19  ;;  %v1474_v49 = vmul.f32 %v5494_v10, %v1473_v47 }
 0x220   : > { %3334 = vrcp.f32 %v1636_v53  ;;  %v3333_v6 = vpop.eup %3332  ;;  %v5526_v17 = vadd.f32 1.0, %v3331_v2  ;;  %v2134_v41 = vsel %vm5505_vm13, %v2133_v28, %v2129_v22  ;;  %v1504_v31 = vsel %vm1503_vm10, %v5428_v9, %v1502_v55  ;;  %v6280_v55 = vld [vmem:[#allocation32_spill] sm:$0xff] }
 0x221   : > { %3336 = vpow2.f32 %v2708_v44  ;;  %v2093_v29 = vsub.f32 1.0, %v2092_v35  ;;  %v1696_v63 = vmul.f32 %v3333_v6, %v6271_v20  ;;  %v2398_v14 = vmul.f32 %v6272_v52, %v2366_v1 }
 0x222   : > { %3338 = vrsqrt.f32 %v5515_v32  ;;  %v2335_v8 = vsub.f32 1.0, %v2134_v41  ;;  %vm5537_vm3 = vcmp.eq.f32.partialorder %v2100_v48, 8.507059e+37  ;;  %vm2097_vm4 = vweird.f32 %v3329_v50  ;;  %v6281_v41 = vld [vmem:[#allocation33_spill] sm:$0xff] }
 0x223   : > { %3340 = vrcp.f32 %v5526_v17  ;;  %v2094_v5 = vmul.f32 %v3329_v50, %v2093_v29  ;;  %v2706_v12 = vmul.f32 -1.442695, %v1696_v63  ;;  %v1507_v38 = vsel %vm1505_vm11, %v1506_v21, %v1504_v31  ;;  %vm2098_vm5 = vmor %vm2096_vm15, %vm2097_vm4  ;;  %v6282_v63 = vld [vmem:[#allocation34_spill] sm:$0xff] }
 0x224   : > { %v2494_v27 = vmul.f32 %v6275_v3, %v2366_v1  ;;  %v2367_v26 = vmul.f32 %v2335_v8, %v4730_v59  ;;  %v1605_v43 = vmax.f32 %v1507_v38, 1e-08  ;;  %v1475_v33 = vmul.f32 0.5, %v1474_v49 }
 0x225   : > { %v2095_v16 = vadd.f32 %v3329_v50, %v2094_v5  ;;  %v2103_v25 = vor.u32 1.1754944e-38, %v2102_v58  ;;  %3342 = vpow2.f32 %v2706_v12  ;;  %vm1073_vm6 = vcmp.eq.f32.partialorder %v4380_v54, 0.0 }
 0x226   : > { %v3335_v40 = vpop.eup %3334  ;;  %v2399_v28 = vmul.f32 %v6277_v7, %v2367_v26  ;;  %v2495_v9 = vmul.f32 %v6278_v34, %v2367_v26  ;;  %v1637_v24 = vmul.f32 %v1605_v43, %v1125_v4  ;;  %v1476_v11 = vsub.f32 1.5, %v1475_v33 }
 0x227   : > { %v3337_v15 = vpop.eup %3336  ;;  %v1700_v18 = vmul.f32 %v3335_v40, %v6276_v23  ;;  %v2099_v53 = vsel %vm2098_vm5, %v3329_v50, %v2095_v16  ;;  %v1084_v56 = vsel %vm1083_vm1, %v4393_v36, %v5017_v37  ;;  %v6279_v4 = vand.u32 2147483648, %v4433_v0 }
 0x228   : > { %v5547_v57 = vpop.eup %3338  ;;  %v5554_v21 = vadd.f32 1.0, %v3337_v15  ;;  %v2900_v19 = vpack.c.bf16 %v2399_v28, %v2398_v14  ;;  %v2980_v30 = vpack.c.bf16 %v2495_v9, %v2494_v27  ;;  %v2104_v48 = vsel %vm5537_vm3, %v2103_v25, %v2099_v53 }
 0x229   : > { %v2710_v44 = vmul.f32 -1.442695, %v1700_v18  ;;  %v1521_v47 = vmul.f32 %v5547_v57, %v5515_v32  ;;  %v5560_v1 = vpop.eup %3340  ;;  %v5575_v50 = vsel %vm1061_vm2, %v6279_v4, %v5200_v45  ;;  %v2333_v2 = vsub.f32 1.0, %v2104_v48 }
 0x22a   : > { %3344 = vrcp.f32 %v5554_v21  ;;  %v2152_v35 = vmul.f32 %v5560_v1, %v5526_v17  ;;  %vm1085_vm7 = vcmp.eq.f32.partialorder %v4393_v36, 0.0  ;;  %v1092_v58 = vsub.f32 1.5, %v5489_v39  ;;  %3050 = vst [vmem:[%s4814_s23 + $0x48] sm:$0xff] %v2900_v19  }
 0x22b   : > { %v2396_v6 = vmul.f32 %v6280_v55, %v5499_v51  ;;  %3346 = vpow2.f32 %v2710_v44  ;;  %v1477_v37 = vmul.f32 %v5494_v10, %v1476_v11  ;;  %v3343_v22 = vpop.eup %3342  ;;  %3065 = vst [vmem:[%s4829_s26 + $0x48] sm:$0xff] %v2980_v30   ;;  %v2365_v0 = vmul.f32 %v2333_v2, %v4730_v59  ;;  %v6283_v10 = vld [vmem:[#allocation35_spill] sm:$0xff]  ;;  %v5654_v2 = vpop.xlane.xlu2 %1188 }
 0x22c   : > { %v2153_v45 = vsub.f32 1.0, %v2152_v35  ;;  %3348 = vrcp.f32 %v1637_v24  ;;  %v1522_v49 = vmul.f32 %v5547_v57, %v1521_v47  ;;  %v2492_v29 = vmul.f32 %v6281_v41, %v5499_v51  ;;  %v6289_v47 = vld [vmem:[#allocation98_spill] sm:$0xff]  ;;  %v5666_v41 = vpop.xlane.xlu0 %1184 }
 0x22d   : > { %v5590_v20 = vadd.f32 1.0, %v3343_v22  ;;  %v1478_v39 = vmul.f32 %v1477_v37, %v5453_v61  ;;  %vm1479_vm8 = vcmp.eq.f32.partialorder %v5453_v61, inf  ;;  %v2397_v31 = vmul.f32 %v6282_v63, %v2365_v0 }
 0x22e   : > { %v2493_v52 = vmul.f32 %v6283_v10, %v2365_v0  ;;  %v2154_v14 = vmul.f32 %v5560_v1, %v2153_v45  ;;  %vm1481_vm9 = vcmp.eq.f32.partialorder %v5453_v61, 0.0  ;;  %vm2157_vm10 = vweird.f32 %v5560_v1 }
 0x22f   : > { %3350 = vrcp.f32 %v5590_v20  ;;  %v1482_v51 = vand.u32 2147483648, %v5453_v61  ;;  %v1523_v42 = vmul.f32 0.5, %v1522_v49  ;;  %v2895_v5 = vpack.c.bf16 %v2397_v31, %v2396_v6 }
 0x230   : > { %v5598_v8 = vpop.eup %3344  ;;  %v2975_v12 = vpack.c.bf16 %v2493_v52, %v2492_v29  ;;  %v2155_v38 = vadd.f32 %v5560_v1, %v2154_v14  ;;  %v2162_v40 = vand.u32 2147483648, %v5526_v17  ;;  %vm2156_vm11 = vweird.f32 %v5526_v17 }
 0x231   : > { %v3347_v3 = vpop.eup %3346  ;;  %v2160_v27 = vand.u32 2147483647, %v5526_v17  ;;  %v2167_v26 = vmul.f32 %v5598_v8, %v5554_v21  ;;  %v1480_v43 = vsel %vm1479_vm8, %v5453_v61, %v1478_v39  ;;  %v6284_v15 = vand.u32 2147483648, %v4380_v54  ;;  %3049 = vst [vmem:[%s4814_s23 + $0x40] sm:$0xff] %v2895_v5   ;;  %vm5623_vm12 = vmor %vm2156_vm11, %vm2157_vm10 }
 0x232   : > { %v3349_v33 = vpop.eup %3348  ;;  %v1093_v25 = vmul.f32 %v4649_v13, %v1092_v58  ;;  %v5627_v23 = vadd.f32 1.0, %v3347_v3  ;;  %v1483_v18 = vsel %vm1481_vm9, %v1482_v51, %v1480_v43  ;;  %3064 = vst [vmem:[%s4829_s26 + $0x40] sm:$0xff] %v2975_v12   ;;  %v2159_v54 = vsel %vm5623_vm12, %v5560_v1, %v2155_v38 }
 0x233   : > { %v5617_v16 = vsel %vm1073_vm6, %v6284_v15, %v4991_v46  ;;  %v6287_v46 = vld [vmem:[#allocation82_spill] sm:$0xff]  ;;  %v1603_v13 = vmax.f32 %v1483_v18, 1e-08  ;;  %v1524_v28 = vsub.f32 1.5, %v1523_v42  ;;  %v6288_v34 = vand.u32 2147483648, %v4393_v36  ;;  %v5695_v18 = vpop.xlane.xlu1 %1192 }
 0x234   : > { %v1701_v7 = vmul.f32 %v3349_v33, %v6287_v46  ;;  %v1128_v24 = vmax.f32 %v5575_v50, 1e-08  ;;  %v2163_v53 = vor.u32 1.1754944e-38, %v2162_v40  ;;  %3352 = vrcp.f32 %v5627_v23 }
 0x235   : > { %v5640_v9 = vsel %vm1085_vm7, %v6288_v34, %v1084_v56  ;;  %v3351_v61 = vpop.eup %3350  ;;  %vm2161_vm13 = vcmp.eq.f32.partialorder %v2160_v27, 8.507059e+37  ;;  %v2168_v44 = vsub.f32 1.0, %v2167_v26  ;;  %v6290_v1 = vmax.f32 %v6289_v47, 1e-08  ;;  %v6293_v26 = vld [vmem:[#allocation102_spill] sm:$0xff] }
 0x236   : > { %v2711_v11 = vmul.f32 -1.442695, %v1701_v7  ;;  %v5647_v30 = vmul.f32 %v1093_v25, %v4523_v62  ;;  %v2164_v48 = vsel %vm2161_vm13, %v2163_v53, %v2159_v54  ;;  %v2137_v36 = vmul.f32 %v3351_v61, %v5590_v20  ;;  %v6295_v54 = vld [vmem:[#allocation42_spill] sm:$0xff]  ;;  %v6299_v53 = vld [vmem:[#allocation43_spill] sm:$0xff] }
 0x237   : > { %v1635_v19 = vmul.f32 %v1603_v13, %v6290_v1  ;;  %vm1527_vm14 = vcmp.eq.f32.partialorder %v5515_v32, inf  ;;  %v2175_v56 = vand.u32 2147483647, %v5554_v21  ;;  %v1525_v4 = vmul.f32 %v5547_v57, %v1524_v28  ;;  %v6298_v28 = vld [vmem:[#allocation78_spill] sm:$0xff] }
 0x238   : > { %3354 = vpow2.f32 %v2711_v11  ;;  %vm1529_vm15 = vcmp.eq.f32.partialorder %v5515_v32, 0.0  ;;  %vm2171_vm0 = vweird.f32 %v5554_v21  ;;  %v2177_v35 = vand.u32 2147483648, %v5554_v21 }
 0x239   : > { %v2138_v58 = vsub.f32 1.0, %v2137_v36  ;;  %v2145_v55 = vand.u32 2147483647, %v5590_v20  ;;  %v2147_v6 = vand.u32 2147483648, %v5590_v20  ;;  %v2337_v37 = vsub.f32 1.0, %v2164_v48 }
 0x23a   : > { %v2169_v22 = vmul.f32 %v5598_v8, %v2168_v44  ;;  %3356 = vrcp.f32 %v1635_v19  ;;  %v1526_v0 = vmul.f32 %v1525_v4, %v5515_v32  ;;  %v5662_v57 = vpop.eup %3352  ;;  %vm2142_vm1 = vweird.f32 %v3351_v61  ;;  %v6305_v4 = vld [vmem:[#allocation41_spill] sm:$0xff] }
 0x23b   : > { %v2139_v45 = vmul.f32 %v3351_v61, %v2138_v58  ;;  %v1530_v49 = vand.u32 2147483648, %v5515_v32  ;;  %3358 = vrsqrt.f32 %v5654_v2  ;;  %vm2172_vm2 = vweird.f32 %v5598_v8 }
 0x23c   : > { %vm2141_vm3 = vweird.f32 %v5590_v20  ;;  %v2197_v29 = vmul.f32 %v5662_v57, %v5627_v23  ;;  %v1528_v39 = vsel %vm1527_vm14, %v5515_v32, %v1526_v0  ;;  %vm5675_vm4 = vcmp.eq.f32.partialorder %v2175_v56, 8.507059e+37  ;;  %vm5702_vm9 = vmor %vm2171_vm0, %vm2172_vm2 }
 0x23d   : > { %v2140_v31 = vadd.f32 %v3351_v61, %v2139_v45  ;;  %vm2146_vm5 = vcmp.eq.f32.partialorder %v2145_v55, 8.507059e+37  ;;  %v2148_v10 = vor.u32 1.1754944e-38, %v2147_v6  ;;  %v1531_v52 = vsel %vm1529_vm15, %v1530_v49, %v1528_v39  ;;  %vm2143_vm6 = vmor %vm2141_vm3, %vm2142_vm1 }
 0x23e   : > { %v3355_v14 = vpop.eup %3354  ;;  %v2369_v20 = vmul.f32 %v2337_v37, %v4730_v59  ;;  %v2198_v51 = vsub.f32 1.0, %v2197_v29  ;;  %v1607_v42 = vmax.f32 %v1531_v52, 1e-08  ;;  %3360 = vrsqrt.f32 %v5666_v41  ;;  %v5738_v29 = vpop.xlane.xlu2 %1194  ;;  %v6306_v52 = vld [vmem:[#allocation86_spill] sm:$0xff] }
 0x23f   : > { %v2170_v5 = vadd.f32 %v5598_v8, %v2169_v22  ;;  %v2144_v12 = vsel %vm2143_vm6, %v3351_v61, %v2140_v31  ;;  %vm2201_vm7 = vweird.f32 %v5627_v23  ;;  %v5686_v38 = vadd.f32 1.0, %v3355_v14 }
 0x240   : > { %v3357_v40 = vpop.eup %3356  ;;  %v2149_v3 = vsel %vm2146_vm5, %v2148_v10, %v2144_v12  ;;  %v2199_v32 = vmul.f32 %v5662_v57, %v2198_v51  ;;  %v2205_v27 = vand.u32 2147483647, %v5627_v23  ;;  %v6294_v43 = vmax.f32 %v6293_v26, 1e-08 }
 0x241   : > { %v3359_v15 = vpop.eup %3358  ;;  %v2336_v25 = vsub.f32 1.0, %v2149_v3  ;;  %vm2202_vm8 = vweird.f32 %v5662_v57  ;;  %v2207_v17 = vand.u32 2147483648, %v5627_v23  ;;  %3362 = vrcp.f32 %v5686_v38 }
 0x242   : > { %v1639_v33 = vmul.f32 %v1607_v42, %v6294_v43  ;;  %v2401_v46 = vmul.f32 %v6295_v54, %v2369_v20  ;;  %v2200_v13 = vadd.f32 %v5662_v57, %v2199_v32  ;;  %v1699_v34 = vmul.f32 %v3357_v40, %v6298_v28  ;;  %vm5718_vm10 = vmor %vm2201_vm7, %vm2202_vm8  ;;  %v5753_v43 = vpop.xlane.xlu0 %1190 }
 0x243   : > { %v2497_v61 = vmul.f32 %v6299_v53, %v2369_v20  ;;  %v2174_v44 = vsel %vm5702_vm9, %v5598_v8, %v2170_v5  ;;  %v2368_v11 = vmul.f32 %v2336_v25, %v4730_v59  ;;  %v1533_v47 = vmul.f32 %v3359_v15, %v5654_v2  ;;  %v6304_v8 = vld [vmem:[#allocation40_spill] sm:$0xff] }
 0x244   : > { %3364 = vrcp.f32 %v1639_v33  ;;  %v3361_v21 = vpop.eup %3360  ;;  %v2178_v1 = vor.u32 1.1754944e-38, %v2177_v35  ;;  %vm5722_vm11 = vcmp.eq.f32.partialorder %v2205_v27, 8.507059e+37  ;;  %v2709_v36 = vmul.f32 -1.442695, %v1699_v34 }
 0x245   : > { %3366 = vrsqrt.f32 %v5695_v18  ;;  %v2400_v56 = vmul.f32 %v6304_v8, %v2368_v11  ;;  %v2496_v58 = vmul.f32 %v6305_v4, %v2368_v11  ;;  %v2204_v35 = vsel %vm5718_vm10, %v5662_v57, %v2200_v13 }
 0x246   : > { %v1534_v23 = vmul.f32 %v3359_v15, %v1533_v47  ;;  %v5734_v55 = vsel %vm5675_vm4, %v2178_v1, %v2174_v44  ;;  %v2208_v6 = vor.u32 1.1754944e-38, %v2207_v17  ;;  %3368 = vpow2.f32 %v2709_v36 }
 0x247   : > { %v1509_v37 = vmul.f32 %v3361_v21, %v5666_v41  ;;  %v3363_v22 = vpop.eup %3362  ;;  %v2905_v0 = vpack.c.bf16 %v2401_v46, %v2400_v56  ;;  %v2985_v45 = vpack.c.bf16 %v2497_v61, %v2496_v58  ;;  %vm1539_vm12 = vcmp.eq.f32.partialorder %v5654_v2, inf }
 0x248   : > { %v1535_v49 = vmul.f32 0.5, %v1534_v23  ;;  %v2209_v39 = vsel %vm5722_vm11, %v2208_v6, %v2204_v35  ;;  %v2212_v63 = vmul.f32 %v3363_v22, %v5686_v38  ;;  %vm1541_vm13 = vcmp.eq.f32.partialorder %v5654_v2, 0.0  ;;  %v6307_v6 = vld [vmem:[#allocation48_spill] sm:$0xff] }
 0x249   : > { %v1510_v31 = vmul.f32 %v3361_v21, %v1509_v37  ;;  %3051 = vst [vmem:[%s4814_s23 + $0x50] sm:$0xff] %v2905_v0   ;;  %v2220_v10 = vand.u32 2147483647, %v5686_v38  ;;  %v1542_v51 = vand.u32 2147483648, %v5654_v2  ;;  %vm1095_vm14 = vcmp.eq.f32.partialorder %v4523_v62, inf }
 0x24a   : > { %v3365_v57 = vpop.eup %3364  ;;  %v1536_v20 = vsub.f32 1.5, %v1535_v49  ;;  %3066 = vst [vmem:[%s4829_s26 + $0x50] sm:$0xff] %v2985_v45   ;;  %v2213_v5 = vsub.f32 1.0, %v2212_v63  ;;  %v2222_v12 = vand.u32 2147483648, %v5686_v38  ;;  %3370 = vrsqrt.f32 %v5738_v29  ;;  %v6309_v63 = vld [vmem:[#allocation50_spill] sm:$0xff] }
 0x24b   : > { %v1703_v14 = vmul.f32 %v3365_v57, %v6306_v52  ;;  %v3367_v42 = vpop.eup %3366  ;;  %v1511_v40 = vmul.f32 0.5, %v1510_v31  ;;  %v2340_v3 = vsub.f32 1.0, %v2209_v39  ;;  %vm2217_vm15 = vweird.f32 %v3363_v22 }
 0x24c   : > { %v1537_v27 = vmul.f32 %v3359_v15, %v1536_v20  ;;  %v1557_v26 = vmul.f32 %v3367_v42, %v5695_v18  ;;  %v3369_v33 = vpop.eup %3368  ;;  %v2214_v25 = vmul.f32 %v3363_v22, %v2213_v5  ;;  %vm1515_vm0 = vcmp.eq.f32.partialorder %v5666_v41, inf }
 0x24d   : > { %v2713_v32 = vmul.f32 -1.442695, %v1703_v14  ;;  %v1512_v17 = vsub.f32 1.5, %v1511_v40  ;;  %v5756_v54 = vadd.f32 1.0, %v3369_v33  ;;  %vm2216_vm1 = vweird.f32 %v5686_v38 }
 0x24e   : > { %v1538_v46 = vmul.f32 %v1537_v27, %v5654_v2  ;;  %v1558_v7 = vmul.f32 %v3367_v42, %v1557_v26  ;;  %v2215_v13 = vadd.f32 %v3363_v22, %v2214_v25  ;;  %v2372_v28 = vmul.f32 %v2340_v3, %v4730_v59  ;;  %vm2218_vm2 = vmor %vm2216_vm1, %vm2217_vm15  ;;  %v6311_v3 = vld [vmem:[#allocation101_spill] sm:$0xff] }
 0x24f   : > { %3372 = vpow2.f32 %v2713_v32  ;;  %v1513_v15 = vmul.f32 %v3361_v21, %v1512_v17  ;;  %vm2221_vm3 = vcmp.eq.f32.partialorder %v2220_v10, 8.507059e+37  ;;  %v2223_v34 = vor.u32 1.1754944e-38, %v2222_v12  ;;  %v6310_v10 = vld [vmem:[#allocation51_spill] sm:$0xff] }
 0x250   : > { %3374 = vrsqrt.f32 %v5753_v43  ;;  %v5763_v53 = vpop.eup %3370  ;;  %v2219_v61 = vsel %vm2218_vm2, %v3363_v22, %v2215_v13  ;;  %v1540_v44 = vsel %vm1539_vm12, %v5654_v2, %v1538_v46  ;;  %v1559_v38 = vmul.f32 0.5, %v1558_v7 }
 0x251   : > { %3376 = vrcp.f32 %v5756_v54  ;;  %v1514_v11 = vmul.f32 %v1513_v15, %v5666_v41  ;;  %v2224_v47 = vsel %vm2221_vm3, %v2223_v34, %v2219_v61  ;;  %v1543_v21 = vsel %vm1541_vm13, %v1542_v51, %v1540_v44 }
 0x252   : > { %vm1517_vm4 = vcmp.eq.f32.partialorder %v5666_v41, 0.0  ;;  %v1518_v1 = vand.u32 2147483648, %v5666_v41  ;;  %v2341_v19 = vsub.f32 1.0, %v2224_v47  ;;  %v1608_v48 = vmax.f32 %v1543_v21, 1e-08 }
 0x253   : > { %v1516_v36 = vsel %vm1515_vm0, %v5666_v41, %v1514_v11  ;;  %v1560_v8 = vsub.f32 1.5, %v1559_v38  ;;  %v1096_v4 = vsel %vm1095_vm14, %v4523_v62, %v5647_v30  ;;  %v2338_v2 = vsub.f32 1.0, %v5734_v55  ;;  %v6308_v41 = vld [vmem:[#allocation49_spill] sm:$0xff]  ;;  %v6313_v38 = vld [vmem:[#allocation44_spill] sm:$0xff] }
 0x254   : > { %v1519_v58 = vsel %vm1517_vm4, %v1518_v1, %v1516_v36  ;;  %v1569_v35 = vmul.f32 %v5763_v53, %v5738_v29  ;;  %vm1097_vm5 = vcmp.eq.f32.partialorder %v4523_v62, 0.0  ;;  %v2404_v37 = vmul.f32 %v6307_v6, %v2372_v28  ;;  %v6315_v62 = vld [vmem:[#allocation45_spill] sm:$0xff] }
 0x255   : > { %v3373_v56 = vpop.eup %3372  ;;  %v2500_v22 = vmul.f32 %v6308_v41, %v2372_v28  ;;  %v2373_v0 = vmul.f32 %v2341_v19, %v4730_v59  ;;  %v1640_v45 = vmul.f32 %v1608_v48, %v1128_v24  ;;  %v1606_v55 = vmax.f32 %v1519_v58, 1e-08  ;;  %v6314_v19 = vld [vmem:[#allocation85_spill] sm:$0xff] }
 0x256   : > { %v5783_v23 = vpop.eup %3374  ;;  %v5791_v49 = vadd.f32 1.0, %v3373_v56  ;;  %v1561_v57 = vmul.f32 %v3367_v42, %v1560_v8  ;;  %v1570_v39 = vmul.f32 %v5763_v53, %v1569_v35  ;;  %v2370_v50 = vmul.f32 %v2338_v2, %v4730_v59 }
 0x257   : > { %v3377_v30 = vpop.eup %3376  ;;  %v2405_v31 = vmul.f32 %v6309_v63, %v2373_v0  ;;  %v2501_v52 = vmul.f32 %v6310_v10, %v2373_v0  ;;  %v1545_v20 = vmul.f32 %v5783_v23, %v5753_v43  ;;  %v2190_v24 = vand.u32 2147483647, %v5756_v54 }
 0x258   : > { %v2182_v14 = vmul.f32 %v3377_v30, %v5756_v54  ;;  %vm1563_vm6 = vcmp.eq.f32.partialorder %v5695_v18, inf  ;;  %v1566_v51 = vand.u32 2147483648, %v5695_v18  ;;  %3378 = vrcp.f32 %v1640_v45 }
 0x259   : > { %v2915_v42 = vpack.c.bf16 %v2405_v31, %v2404_v37  ;;  %v2995_v5 = vpack.c.bf16 %v2501_v52, %v2500_v22  ;;  %vm2187_vm7 = vweird.f32 %v3377_v30  ;;  %v2192_v40 = vand.u32 2147483648, %v5756_v54  ;;  %v6316_v37 = vld [vmem:[#allocation81_spill] sm:$0xff] }
 0x25a   : > { %v2183_v12 = vsub.f32 1.0, %v2182_v14  ;;  %v6312_v32 = vmax.f32 %v6311_v3, 1e-08  ;;  %v1562_v26 = vmul.f32 %v1561_v57, %v5695_v18  ;;  %3380 = vrcp.f32 %v5791_v49 }
 0x25b   : > { %3053 = vst [vmem:[%s4814_s23 + $0x60] sm:$0xff] %v2915_v42   ;;  %v1571_v25 = vmul.f32 0.5, %v1570_v39  ;;  %v1546_v17 = vmul.f32 %v5783_v23, %v1545_v20  ;;  %vm2186_vm8 = vweird.f32 %v5756_v54  ;;  %vm1565_vm9 = vcmp.eq.f32.partialorder %v5695_v18, 0.0  ;;  %v6318_v39 = vld [vmem:[#allocation47_spill] sm:$0xff] }
 0x25c   : > { %v1638_v27 = vmul.f32 %v1606_v55, %v6312_v32  ;;  %v2184_v33 = vmul.f32 %v3377_v30, %v2183_v12  ;;  %3068 = vst [vmem:[%s4829_s26 + $0x60] sm:$0xff] %v2995_v5   ;;  %v1564_v46 = vsel %vm1563_vm6, %v5695_v18, %v1562_v26  ;;  %v1130_v34 = vmax.f32 %v5640_v9, 1e-08  ;;  %vm2188_vm10 = vmor %vm2186_vm8, %vm2187_vm7  ;;  %v6317_v55 = vld [vmem:[#allocation46_spill] sm:$0xff]  ;;  %v6319_v12 = vld [vmem:[#allocation88_spill] sm:$0xff] }
 0x25d   : > { %v1567_v13 = vsel %vm1565_vm9, %v1566_v51, %v1564_v46  ;;  %v1572_v15 = vsub.f32 1.5, %v1571_v25  ;;  %v1547_v28 = vmul.f32 0.5, %v1546_v17  ;;  %v1099_v61 = vsel %vm1097_vm5, %v1098_v60, %v1096_v4 }
 0x25e   : > { %3382 = vrcp.f32 %v1638_v27  ;;  %v2185_v7 = vadd.f32 %v3377_v30, %v2184_v33  ;;  %v2193_v54 = vor.u32 1.1754944e-38, %v2192_v40  ;;  %v1610_v44 = vmax.f32 %v1567_v13, 1e-08  ;;  %v3379_v11 = vpop.eup %3378  ;;  %v6320_v13 = vld [vmem:[#allocation87_spill] sm:$0xff] }
 0x25f   : > { %v2402_v47 = vmul.f32 %v6313_v38, %v2370_v50  ;;  %vm2191_vm11 = vcmp.eq.f32.partialorder %v2190_v24, 8.507059e+37  ;;  %v1573_v18 = vmul.f32 %v5763_v53, %v1572_v15  ;;  %v1704_v48 = vmul.f32 %v3379_v11, %v6314_v19 }
 0x260   : > { %v2189_v21 = vsel %vm2188_vm10, %v3377_v30, %v2185_v7  ;;  %v1642_v9 = vmul.f32 %v1610_v44, %v1130_v34  ;;  %v1548_v36 = vsub.f32 1.5, %v1547_v28  ;;  %v5825_v8 = vpop.eup %3380  ;;  %v2498_v60 = vmul.f32 %v6315_v62, %v2370_v50 }
 0x261   : > { %v2194_v1 = vsel %vm2191_vm11, %v2193_v54, %v2189_v21  ;;  %v1574_v4 = vmul.f32 %v1573_v18, %v5738_v29  ;;  %vm1575_vm12 = vcmp.eq.f32.partialorder %v5738_v29, inf  ;;  %v2714_v58 = vmul.f32 -1.442695, %v1704_v48  ;;  %v6321_v18 = vld [vmem:[#allocation84_spill] sm:$0xff] }
 0x262   : > { %v2339_v56 = vsub.f32 1.0, %v2194_v1  ;;  %3384 = vrcp.f32 %v1642_v9  ;;  %v1578_v35 = vand.u32 2147483648, %v5738_v29  ;;  %v1549_v53 = vmul.f32 %v5783_v23, %v1548_v36 }
 0x263   : > { %v1576_v22 = vsel %vm1575_vm12, %v5738_v29, %v1574_v4  ;;  %vm1577_vm13 = vcmp.eq.f32.partialorder %v5738_v29, 0.0  ;;  %v2242_v0 = vmul.f32 %v5825_v8, %v5791_v49  ;;  %3386 = vpow2.f32 %v2714_v58 }
 0x264   : > { %v3383_v2 = vpop.eup %3382  ;;  %v2371_v6 = vmul.f32 %v2339_v56, %v4730_v59  ;;  %v1579_v45 = vsel %vm1577_vm13, %v1578_v35, %v1576_v22  ;;  %v1550_v30 = vmul.f32 %v1549_v53, %v5753_v43  ;;  %vm1551_vm14 = vcmp.eq.f32.partialorder %v5753_v43, inf }
 0x265   : > { %v1702_v41 = vmul.f32 %v3383_v2, %v6316_v37  ;;  %v1131_v31 = vmax.f32 %v1099_v61, 1e-08  ;;  %v1611_v10 = vmax.f32 %v1579_v45, 1e-08  ;;  %v1554_v52 = vand.u32 2147483648, %v5753_v43 }
 0x266   : > { %v2403_v57 = vmul.f32 %v6317_v55, %v2371_v6  ;;  %v2499_v63 = vmul.f32 %v6318_v39, %v2371_v6  ;;  %v1552_v29 = vsel %vm1551_vm14, %v5753_v43, %v1550_v30  ;;  %vm1553_vm15 = vcmp.eq.f32.partialorder %v5753_v43, 0.0 }
 0x267   : > { %v2712_v23 = vmul.f32 -1.442695, %v1702_v41  ;;  %v2243_v24 = vsub.f32 1.0, %v2242_v0  ;;  %v1643_v51 = vmul.f32 %v1611_v10, %v1131_v31  ;;  %v1555_v42 = vsel %vm1553_vm15, %v1554_v52, %v1552_v29  ;;  %v6323_v52 = vld [vmem:[#allocation55_spill] sm:$0xff] }
 0x268   : > { %v2910_v14 = vpack.c.bf16 %v2403_v57, %v2402_v47  ;;  %v2990_v20 = vpack.c.bf16 %v2499_v63, %v2498_v60  ;;  %v3385_v50 = vpop.eup %3384  ;;  %v1129_v5 = vmax.f32 %v5617_v16, 1e-08  ;;  %v1609_v3 = vmax.f32 %v1555_v42, 1e-08  ;;  %v6324_v42 = vld [vmem:[#allocation52_spill] sm:$0xff] }
 0x269   : > { %3388 = vpow2.f32 %v2712_v23  ;;  %v1706_v40 = vmul.f32 %v3385_v50, %v6319_v12  ;;  %v3387_v32 = vpop.eup %3386  ;;  %v2244_v25 = vmul.f32 %v5825_v8, %v2243_v24  ;;  %vm2247_vm0 = vweird.f32 %v5825_v8  ;;  %v6322_v23 = vld [vmem:[#allocation54_spill] sm:$0xff]  ;;  %v6325_v12 = vld [vmem:[#allocation53_spill] sm:$0xff] }
 0x26a   : > { %3052 = vst [vmem:[%s4814_s23 + $0x58] sm:$0xff] %v2910_v14   ;;  %3390 = vrcp.f32 %v1643_v51  ;;  %v5849_v27 = vadd.f32 1.0, %v3387_v32  ;;  %v1641_v33 = vmul.f32 %v1609_v3, %v1129_v5  ;;  %v2252_v7 = vand.u32 2147483648, %v5791_v49 }
 0x26b   : > { %3067 = vst [vmem:[%s4829_s26 + $0x58] sm:$0xff] %v2990_v20   ;;  %v2716_v26 = vmul.f32 -1.442695, %v1706_v40  ;;  %v2245_v46 = vadd.f32 %v5825_v8, %v2244_v25  ;;  %vm2246_vm1 = vweird.f32 %v5791_v49  ;;  %v2250_v28 = vand.u32 2147483647, %v5791_v49 }
 0x26c   : > { %3392 = vrcp.f32 %v5849_v27  ;;  %vm2248_vm2 = vmor %vm2246_vm1, %vm2247_vm0  ;;  %v2253_v38 = vor.u32 1.1754944e-38, %v2252_v7  ;;  %vm2261_vm9 = vweird.f32 %v5849_v27 }
 0x26d   : > { %3394 = vpow2.f32 %v2716_v26  ;;  %v2249_v44 = vsel %vm2248_vm2, %v5825_v8, %v2245_v46  ;;  %vm2251_vm3 = vcmp.eq.f32.partialorder %v2250_v28, 8.507059e+37  ;;  %v2265_v26 = vand.u32 2147483647, %v5849_v27 }
 0x26e   : > { %3396 = vrcp.f32 %v1641_v33  ;;  %v2254_v19 = vsel %vm2251_vm3, %v2253_v38, %v2249_v44  ;;  %v2267_v33 = vand.u32 2147483648, %v5849_v27 }
 0x26f   : > { %v3389_v43 = vpop.eup %3388  ;;  %v2343_v62 = vsub.f32 1.0, %v2254_v19  ;;  %vm2266_vm0 = vcmp.eq.f32.partialorder %v2265_v26, 8.507059e+37 }
 0x270   : > { %v1830_v17 = vadd.f32 1.0, %v3389_v43  ;;  %v3391_v16 = vpop.eup %3390  ;;  %v2268_v44 = vor.u32 1.1754944e-38, %v2267_v33 }
 0x271   : > { %v1707_v15 = vmul.f32 %v3391_v16, %v6320_v13  ;;  %v2375_v6 = vmul.f32 %v2343_v62, %v4730_v59 }
 0x272   : > { %3398 = vrcp.f32 %v1830_v17  ;;  %v5859_v34 = vpop.eup %3392  ;;  %v2237_v60 = vand.u32 2147483648, %v1830_v17  ;;  %v2235_v4 = vand.u32 2147483647, %v1830_v17  ;;  %vm2231_vm5 = vweird.f32 %v1830_v17 }
 0x273   : > { %v2717_v61 = vmul.f32 -1.442695, %v1707_v15  ;;  %v3395_v54 = vpop.eup %3394  ;;  %v2257_v49 = vmul.f32 %v5859_v34, %v5849_v27  ;;  %v2407_v31 = vmul.f32 %v6322_v23, %v2375_v6  ;;  %v2503_v14 = vmul.f32 %v6323_v52, %v2375_v6  ;;  %v6330_v6 = vld [vmem:[#allocation62_spill] sm:$0xff] }
 0x274   : > { %v3397_v11 = vpop.eup %3396  ;;  %v1834_v47 = vadd.f32 1.0, %v3395_v54  ;;  %v2238_v37 = vor.u32 1.1754944e-38, %v2237_v60  ;;  %vm2236_vm7 = vcmp.eq.f32.partialorder %v2235_v4, 8.507059e+37  ;;  %vm2262_vm10 = vweird.f32 %v5859_v34  ;;  %v6329_v4 = vld [vmem:[#allocation61_spill] sm:$0xff] }
 0x275   : > { %3400 = vpow2.f32 %v2717_v61  ;;  %v1705_v1 = vmul.f32 %v3397_v11, %v6321_v18  ;;  %v2258_v2 = vsub.f32 1.0, %v2257_v49  ;;  %vm5886_vm14 = vmor %vm2261_vm9, %vm2262_vm10 }
 0x276   : > { %3402 = vrcp.f32 %v1834_v47  ;;  %v2297_v39 = vand.u32 2147483648, %v1834_v47  ;;  %v2295_v29 = vand.u32 2147483647, %v1834_v47  ;;  %vm2291_vm11 = vweird.f32 %v1834_v47 }
 0x277   : > { %v2715_v9 = vmul.f32 -1.442695, %v1705_v1  ;;  %v2259_v45 = vmul.f32 %v5859_v34, %v2258_v2 }
 0x278   : > { %v3399_v21 = vpop.eup %3398  ;;  %v2298_v3 = vor.u32 1.1754944e-38, %v2297_v39  ;;  %vm2296_vm13 = vcmp.eq.f32.partialorder %v2295_v29, 8.507059e+37  ;;  %v6334_v29 = vld [vmem:[#allocation58_spill] sm:$0xff] }
 0x279   : > { %v2227_v48 = vmul.f32 %v3399_v21, %v1830_v17  ;;  %3404 = vpow2.f32 %v2715_v9  ;;  %vm2232_vm4 = vweird.f32 %v3399_v21  ;;  %v2260_v24 = vadd.f32 %v5859_v34, %v2259_v45 }
 0x27a   : > { %vm2233_vm6 = vmor %vm2231_vm5, %vm2232_vm4 }
 0x27b   : > { %v2228_v36 = vsub.f32 1.0, %v2227_v48  ;;  %v3401_v8 = vpop.eup %3400  ;;  %v2264_v13 = vsel %vm5886_vm14, %v5859_v34, %v2260_v24 }
 0x27c   : > { %v5865_v58 = vadd.f32 1.0, %v3401_v8  ;;  %v3403_v35 = vpop.eup %3402  ;;  %v6328_v8 = vld [vmem:[#allocation60_spill] sm:$0xff] }
 0x27d   : > { %v2229_v56 = vmul.f32 %v3399_v21, %v2228_v36  ;;  %v2287_v41 = vmul.f32 %v3403_v35, %v1834_v47  ;;  %vm2292_vm8 = vweird.f32 %v3403_v35  ;;  %v2269_v47 = vsel %vm2266_vm0, %v2268_v44, %v2264_v13 }
 0x27e   : > { %3406 = vrcp.f32 %v5865_v58  ;;  %vm2293_vm12 = vmor %vm2291_vm11, %vm2292_vm8  ;;  %v2312_v15 = vand.u32 2147483648, %v5865_v58  ;;  %v2310_v27 = vand.u32 2147483647, %v5865_v58  ;;  %vm2306_vm1 = vweird.f32 %v5865_v58 }
 0x27f   : > { %v2230_v53 = vadd.f32 %v3399_v21, %v2229_v56  ;;  %v3405_v0 = vpop.eup %3404  ;;  %v2288_v55 = vsub.f32 1.0, %v2287_v41  ;;  %v2344_v62 = vsub.f32 1.0, %v2269_v47  ;;  %v6331_v41 = vld [vmem:[#allocation63_spill] sm:$0xff] }
 0x280   : > { %v5870_v63 = vadd.f32 1.0, %v3405_v0  ;;  %v2313_v34 = vor.u32 1.1754944e-38, %v2312_v15  ;;  %vm2311_vm3 = vcmp.eq.f32.partialorder %v2310_v27, 8.507059e+37 }
 0x281   : > { %v2234_v22 = vsel %vm2233_vm6, %v3399_v21, %v2230_v53  ;;  %v2289_v10 = vmul.f32 %v3403_v35, %v2288_v55  ;;  %v2376_v45 = vmul.f32 %v2344_v62, %v4730_v59 }
 0x282   : > { %v2239_v30 = vsel %vm2236_vm7, %v2238_v37, %v2234_v22  ;;  %3408 = vrcp.f32 %v5870_v63  ;;  %v2282_v19 = vand.u32 2147483648, %v5870_v63  ;;  %v2280_v9 = vand.u32 2147483647, %v5870_v63 }
 0x283   : > { %v2342_v57 = vsub.f32 1.0, %v2239_v30  ;;  %v2290_v51 = vadd.f32 %v3403_v35, %v2289_v10  ;;  %vm2276_vm5 = vweird.f32 %v5870_v63 }
 0x284   : > { %v3407_v50 = vpop.eup %3406  ;;  %vm2281_vm7 = vcmp.eq.f32.partialorder %v2280_v9, 8.507059e+37 }
 0x285   : > { %v2374_v20 = vmul.f32 %v2342_v57, %v4730_v59  ;;  %v2302_v32 = vmul.f32 %v3407_v50, %v5865_v58  ;;  %v2294_v25 = vsel %vm2293_vm12, %v3403_v35, %v2290_v51  ;;  %vm2307_vm15 = vweird.f32 %v3407_v50 }
 0x286   : > { %v2299_v46 = vsel %vm2296_vm13, %v2298_v3, %v2294_v25  ;;  %vm2308_vm2 = vmor %vm2306_vm1, %vm2307_vm15  ;;  %v2283_v35 = vor.u32 1.1754944e-38, %v2282_v19 }
 0x287   : > { %v2406_v5 = vmul.f32 %v6324_v42, %v2374_v20  ;;  %v2502_v40 = vmul.f32 %v6325_v12, %v2374_v20  ;;  %v2303_v7 = vsub.f32 1.0, %v2302_v32  ;;  %v2346_v61 = vsub.f32 1.0, %v2299_v46 }
 0x288   : > { %v3409_v28 = vpop.eup %3408 }
 0x289   : > { %v2920_v17 = vpack.c.bf16 %v2407_v31, %v2406_v5  ;;  %v3000_v16 = vpack.c.bf16 %v2503_v14, %v2502_v40  ;;  %v2304_v54 = vmul.f32 %v3407_v50, %v2303_v7  ;;  %v2272_v11 = vmul.f32 %v3409_v28, %v5870_v63  ;;  %v6332_v63 = vld [vmem:[#allocation56_spill] sm:$0xff]  ;;  %v6333_v31 = vld [vmem:[#allocation57_spill] sm:$0xff]  ;;  %v6335_v14 = vld [vmem:[#allocation59_spill] sm:$0xff] }
 0x28a   : > { %v2378_v18 = vmul.f32 %v2346_v61, %v4730_v59  ;;  %vm2277_vm4 = vweird.f32 %v3409_v28  ;;  %v2408_v23 = vmul.f32 %v6332_v63, %v2376_v45  ;;  %v2504_v10 = vmul.f32 %v6333_v31, %v2376_v45 }
 0x28b   : > { %3054 = vst [vmem:[%s4814_s23 + $0x68] sm:$0xff] %v2920_v17   ;;  %v2305_v38 = vadd.f32 %v3407_v50, %v2304_v54  ;;  %v2273_v21 = vsub.f32 1.0, %v2272_v11  ;;  %vm2278_vm6 = vmor %vm2276_vm5, %vm2277_vm4 }
 0x28c   : > { %3069 = vst [vmem:[%s4829_s26 + $0x68] sm:$0xff] %v3000_v16   ;;  %v2410_v56 = vmul.f32 %v6328_v8, %v2378_v18  ;;  %v2506_v2 = vmul.f32 %v6329_v4, %v2378_v18 }
 0x28d   : > { %v2309_v1 = vsel %vm2308_vm2, %v3407_v50, %v2305_v38  ;;  %v2274_v49 = vmul.f32 %v3409_v28, %v2273_v21 }
 0x28e   : > { %v2314_v48 = vsel %vm2311_vm3, %v2313_v34, %v2309_v1 }
 0x28f   : > { %v2347_v36 = vsub.f32 1.0, %v2314_v48  ;;  %v2275_v60 = vadd.f32 %v3409_v28, %v2274_v49 }
 0x291   : > { %v2379_v58 = vmul.f32 %v2347_v36, %v4730_v59  ;;  %v2279_v53 = vsel %vm2278_vm6, %v3409_v28, %v2275_v60 }
 0x292   : > { %v2284_v0 = vsel %vm2281_vm7, %v2283_v35, %v2279_v53 }
 0x293   : > { %v2411_v37 = vmul.f32 %v6330_v6, %v2379_v58  ;;  %v2507_v22 = vmul.f32 %v6331_v41, %v2379_v58  ;;  %v2345_v30 = vsub.f32 1.0, %v2284_v0 }
 0x295   : > { %v2930_v55 = vpack.c.bf16 %v2411_v37, %v2410_v56  ;;  %v3010_v57 = vpack.c.bf16 %v2507_v22, %v2506_v2  ;;  %v2377_v39 = vmul.f32 %v2345_v30, %v4730_v59 }
 0x297   : > { %3056 = vst [vmem:[%s4814_s23 + $0x78] sm:$0xff] %v2930_v55   ;;  %v2409_v52 = vmul.f32 %v6334_v29, %v2377_v39  ;;  %v2505_v20 = vmul.f32 %v6335_v14, %v2377_v39 }
 0x298   : > { %3071 = vst [vmem:[%s4829_s26 + $0x78] sm:$0xff] %v3010_v57  }
 0x299   : > { %v2925_v50 = vpack.c.bf16 %v2409_v52, %v2408_v23  ;;  %v3005_v24 = vpack.c.bf16 %v2505_v20, %v2504_v10 }
 0x29b   : > { %3055 = vst [vmem:[%s4814_s23 + $0x70] sm:$0xff] %v2925_v50  }
 0x29c   : > { %3070 = vst [vmem:[%s4829_s26 + $0x70] sm:$0xff] %v3005_v24  }
 0x29d PF: > { %s14_s12 = sadd.s32 1, %s3416_s12  }
 0x29e   : > { %p11_p4 = scmp.ge.s32.totalorder %s14_s12, 4  }
 0x2a0   :  { %13 = sbr.rel (!%p11_p4) target bundleno = 1 (0x1), region = 73 }

// kernel: cdweights_forward.9
= control target key start
LH: loop header
LB: loop body
LE: loop exit
PB: predicated region body
PF: predicated region fallthrough
CT: control target
= control target key end

     0   :  { %10 = vsyncpa [#allocation4], 0  ;;  %s7818_s0 = inlined_call_operand.vmem [shape: bf16[2,456,128], index: 0, kind: input, shape index: {}]   ;;  %s7819_s1 = inlined_call_operand.vmem [shape: bf16[9,128,128], index: 1, kind: input, shape index: {}]   ;;  %s7820_s2 = inlined_call_operand.vmem [shape: f32[1,128], index: 2, kind: input, shape index: {}]   ;;  %s7821_s3 = inlined_call_operand.vmem [shape: bf16[2,256,128], index: 3, kind: input, shape index: {}]   ;;  %s7822_s4 = inlined_call_operand.vmem [shape: bf16[2,256,128], index: 4, kind: input, shape index: {}]   ;;  %s7823_s5 = inlined_call_operand.hbm [shape: f32[2,256,128], index: 5, kind: output, shape index: {}]  }
   0x1   :  { %12 = vsyncpa [#allocation4 + $0x1], 0  ;;  %s6742_s18 = smov 0   ;;  %s6744_s19 = smov 0  }
   0x2   :  { %s6746_s20 = smov 0   ;;  %s6748_s21 = smov 0  }
   0x3   :  { %s6750_s22 = smov 0   ;;  %s6752_s23 = smov 0  }
   0x4 LB: > { %s5133_s24 = sadd.s32 4294967295, %s6708_s23   ;;  %s5134_s25 = sadd.s32 4294967294, %s6708_s23   ;;  %s6708_s23 = sphi %s6752_s23, %s18_s23   ;;  %s6704_s22 = sphi %s6750_s22, %s7830_s22   ;;  %s6700_s21 = sphi %s6748_s21, %s7829_s21   ;;  %s6696_s20 = sphi %s6746_s20, %s7828_s20   ;;  %s6692_s19 = sphi %s6744_s19, %s7827_s19   ;;  %s6688_s18 = sphi %s6742_s18, %s7826_s18  }
   0x5   : > { %s37_s26 = sadd.s32 1, %s6704_s22  ;;  %s184_s27 = sadd.s32 1, %s6696_s20 }
   0x6   : > { %p39_p0 = scmp.ge.s32.totalorder %s37_s26, 2  ;;  %p194_p1 = scmp.ne.s32.totalorder %s6696_s20, %s6692_s19 }
   0x7   : > { %p195_p2 = scmp.eq.s32.totalorder %s5133_s24, 1  ;;  %p200_p3 = scmp.ne.s32.totalorder %s6692_s19, %s6688_s18 }
   0x8   : > { %s7832_s26 = smov (%p39_p0, %s37_s26), 0  ;;  %p201_p5 = scmp.eq.s32.totalorder %s5134_s25, 1 }
   0x9   : > { %p6782_p4 = por %p195_p2, %p194_p1  ;;  %s179_s29 = ssub.s32 %s6704_s22, %s7832_s26 }
   0xa   : > { %p5139_p6 = scmp.ge.s32.totalorder %s6708_s23, 1  ;;  %p182_p7 = scmp.eq.s32.totalorder %s179_s29, 0 }
   0xb   : > { %p6789_p8 = por %p201_p5, %p200_p3  ;;  %p270_p9 = scmp.lt.s32.totalorder %s6708_s23, 3 }
   0xc   : > { %s6795_s6 = scalar_select %p182_p7, %s6696_s20, %s184_s27  }
   0xd   : > { %p271_p10 = pnand %p5139_p6, %p270_p9 }
   0xe   : > { %p328_p11 = scmp.lt.s32.totalorder (!%p271_p10), %s6700_s21, 1  ;;  %s325_s27 = sand.u32 (!%p271_p10), 1, %s6692_s19  }
   0xf   : > { %274 = sbr.rel (%p271_p10) target bundleno = 1050 (0x41a), region = 40  ;;  %s5140_s29 = sshll.u32 (!%p271_p10), %s325_s27, 8 }
  0x14   : > { %v6164_v0 = vld [vmem:[%s7819_s1 + $0x38] sm:$0xff]  ;;  %v6163_v1 = vld [vmem:[%s7819_s1 + $0x30] sm:$0xff]  ;;  %v6162_v2 = vld [vmem:[%s7819_s1 + $0x28] sm:$0xff]  ;;  %s6817_s25 = scalar_select %p328_p11, %s6700_s21, 1  ;;  %vm1086_vm0 = vsmask.f32 7424 }
  0x15   : > { %6520 = vmatpush.bf16.msra.mxu1 %v6164_v0  ;;  %6521 = vmatpush.bf16.msra.mxu2 %v6164_v0  ;;  %v6161_v3 = vld [vmem:[%s7819_s1 + $0x20] sm:$0xff]  ;;  %v6160_v4 = vld [vmem:[%s7819_s1 + $0x18] sm:$0xff]  ;;  %v6159_v5 = vld [vmem:[%s7819_s1 + $0x10] sm:$0xff]  ;;  %vm1553_vm1 = vcmask 1046528  }
  0x16   : > { %6522 = vmatpush.bf16.msra.mxu3 %v6164_v0  ;;  %720 = vmatpush.bf16.msra.mxu0 %v6164_v0  ;;  %v6158_v6 = vld [vmem:[%s7819_s1 + $0x8] sm:$0xff]  ;;  %s6544_s7 = smul.u32 228, %s6817_s25  ;;  %v6157_v7 = vld [vmem:[%s7819_s1] sm:$0xff]  ;;  %v6203_v8 = vld [vmem:[%s7819_s1 + $0xb8] sm:$0xff]  ;;  %s6131_s10 = sshll.u32 %s6817_s25, 7 }
  0x17   : > { %v6235_v9 = vld [vmem:[%s7819_s1 + $0xf8] sm:$0xff]  ;;  %v6202_v16 = vld [vmem:[%s7819_s1 + $0xb0] sm:$0xff]  ;;  %v6201_v20 = vld [vmem:[%s7819_s1 + $0xa8] sm:$0xff]  ;;  %s7469_s14 = scalar_lea.vmem %s7821_s3, %s6131_s10  ;;  %s7479_s16 = scalar_lea.vmem %s7822_s4, %s6131_s10 }
  0x18   : > { %s6829_s12 = scalar_lea.vmem %s7818_s0, %s6544_s7  ;;  %v6195_v14 = vld [vmem:[%s7819_s1 + $0x78] sm:$0xff]  ;;  %v6234_v17 = vld [vmem:[%s7819_s1 + $0xf0] sm:$0xff]  ;;  %v6233_v21 = vld [vmem:[%s7819_s1 + $0xe8] sm:$0xff]  ;;  %s7499_s7 = scalar_lea.vmem [#allocation3], %s5140_s29 }
  0x19   : > { %6523 = vmatpush.bf16.msra.mxu1 %v6163_v1  ;;  %6524 = vmatpush.bf16.msra.mxu2 %v6163_v1  ;;  %v6139_v10 = vld [vmem:[%s6829_s12 + $0x30] sm:$0xff]  ;;  %v6145_v11 = vld [vmem:[%s6829_s12 + $0x60] sm:$0xff]  ;;  %v6266_v15 = vld [vmem:[%s7819_s1 + $0x138] sm:$0xff]  ;;  %s6650_s29 = scalar_lea.hbm %s7823_s5, 512 }
  0x1a   : > { %6525 = vmatpush.bf16.msra.mxu3 %v6163_v1  ;;  %721 = vmatpush.bf16.msra.mxu0 %v6163_v1  ;;  %v6151_v12 = vld [vmem:[%s6829_s12 + $0x90] sm:$0xff]  ;;  %v6133_v13 = vld [vmem:[%s6829_s12] sm:$0xff]  ;;  %v6193_v22 = vld [vmem:[%s7819_s1 + $0x68] sm:$0xff] }
  0x1b   : > { %v6194_v18 = vld [vmem:[%s7819_s1 + $0x70] sm:$0xff]  ;;  %v6264_v23 = vld [vmem:[%s7819_s1 + $0x128] sm:$0xff]  ;;  %v6200_v24 = vld [vmem:[%s7819_s1 + $0xa0] sm:$0xff] }
  0x1c   : > { %v6265_v19 = vld [vmem:[%s7819_s1 + $0x130] sm:$0xff]  ;;  %v6232_v25 = vld [vmem:[%s7819_s1 + $0xe0] sm:$0xff]  ;;  %v6140_v28 = vld [vmem:[%s6829_s12 + $0x38] sm:$0xff] }
  0x1d   : > { %6526 = vmatpush.bf16.msra.mxu1 %v6162_v2  ;;  %6527 = vmatpush.bf16.msra.mxu2 %v6162_v2  ;;  %v6192_v26 = vld [vmem:[%s7819_s1 + $0x60] sm:$0xff]  ;;  %v6146_v29 = vld [vmem:[%s6829_s12 + $0x68] sm:$0xff]  ;;  %v6152_v30 = vld [vmem:[%s6829_s12 + $0x98] sm:$0xff] }
  0x1e   : > { %6528 = vmatpush.bf16.msra.mxu3 %v6162_v2  ;;  %722 = vmatpush.bf16.msra.mxu0 %v6162_v2  ;;  %v6263_v27 = vld [vmem:[%s7819_s1 + $0x120] sm:$0xff]  ;;  %v6134_v31 = vld [vmem:[%s6829_s12 + $0x8] sm:$0xff]  ;;  %v6199_v32 = vld [vmem:[%s7819_s1 + $0x98] sm:$0xff] }
  0x1f   : > { %v6231_v33 = vld [vmem:[%s7819_s1 + $0xd8] sm:$0xff]  ;;  %v6198_v36 = vld [vmem:[%s7819_s1 + $0x90] sm:$0xff]  ;;  %v6141_v38 = vld [vmem:[%s6829_s12 + $0x40] sm:$0xff] }
  0x20   : > { %v6191_v34 = vld [vmem:[%s7819_s1 + $0x58] sm:$0xff]  ;;  %v6230_v37 = vld [vmem:[%s7819_s1 + $0xd0] sm:$0xff]  ;;  %v6153_v40 = vld [vmem:[%s6829_s12 + $0xa0] sm:$0xff] }
  0x21   : > { %6529 = vmatpush.bf16.msra.mxu1 %v6161_v3  ;;  %6530 = vmatpush.bf16.msra.mxu2 %v6161_v3  ;;  %v6262_v35 = vld [vmem:[%s7819_s1 + $0x118] sm:$0xff]  ;;  %v6147_v39 = vld [vmem:[%s6829_s12 + $0x70] sm:$0xff]  ;;  %v6197_v44 = vld [vmem:[%s7819_s1 + $0x88] sm:$0xff] }
  0x22   : > { %6531 = vmatpush.bf16.msra.mxu3 %v6161_v3  ;;  %723 = vmatpush.bf16.msra.mxu0 %v6161_v3  ;;  %v6135_v41 = vld [vmem:[%s6829_s12 + $0x10] sm:$0xff]  ;;  %v6229_v45 = vld [vmem:[%s7819_s1 + $0xc8] sm:$0xff]  ;;  %v6148_v48 = vld [vmem:[%s6829_s12 + $0x78] sm:$0xff] }
  0x23   : > { %v6190_v42 = vld [vmem:[%s7819_s1 + $0x50] sm:$0xff]  ;;  %v6189_v46 = vld [vmem:[%s7819_s1 + $0x48] sm:$0xff]  ;;  %v6136_v50 = vld [vmem:[%s6829_s12 + $0x18] sm:$0xff] }
  0x24   : > { %v6261_v43 = vld [vmem:[%s7819_s1 + $0x110] sm:$0xff]  ;;  %v6142_v47 = vld [vmem:[%s6829_s12 + $0x48] sm:$0xff]  ;;  %v6196_v52 = vld [vmem:[%s7819_s1 + $0x80] sm:$0xff] }
  0x25   : > { %6532 = vmatpush.bf16.msra.mxu1 %v6160_v4  ;;  %6533 = vmatpush.bf16.msra.mxu2 %v6160_v4  ;;  %v6154_v49 = vld [vmem:[%s6829_s12 + $0xa8] sm:$0xff]  ;;  %v6228_v53 = vld [vmem:[%s7819_s1 + $0xc0] sm:$0xff]  ;;  %v6143_v56 = vld [vmem:[%s6829_s12 + $0x50] sm:$0xff] }
  0x26   : > { %6534 = vmatpush.bf16.msra.mxu3 %v6160_v4  ;;  %724 = vmatpush.bf16.msra.mxu0 %v6160_v4  ;;  %v6260_v51 = vld [vmem:[%s7819_s1 + $0x108] sm:$0xff]  ;;  %v6188_v54 = vld [vmem:[%s7819_s1 + $0x40] sm:$0xff]  ;;  %v6155_v58 = vld [vmem:[%s6829_s12 + $0xb0] sm:$0xff] }
  0x27   : > { %v6259_v55 = vld [vmem:[%s7819_s1 + $0x100] sm:$0xff]  ;;  %v6306_v60 = vld [vmem:[%s7819_s1 + $0x1b8] sm:$0xff]  ;;  %v2286_v0 = vld [vmem:[%s6829_s12 + $0xc] sm:$0xff]  }
  0x28   : > { %v6149_v57 = vld [vmem:[%s6829_s12 + $0x80] sm:$0xff]  ;;  %v6337_v61 = vld [vmem:[%s7819_s1 + $0x1f8] sm:$0xff]  ;;  %v6961_v1 = vld [vmem:[%s6829_s12 + $0xc] sm:$0xf0] }
  0x29   : > { %6535 = vmatpush.bf16.msra.mxu1 %v6159_v5  ;;  %6536 = vmatpush.bf16.msra.mxu2 %v6159_v5  ;;  %v6137_v59 = vld [vmem:[%s6829_s12 + $0x20] sm:$0xff]  ;;  %v6274_v62 = vld [vmem:[%s7819_s1 + $0x178] sm:$0xff]  ;;  %v6150_v3 = vld [vmem:[%s6829_s12 + $0x88] sm:$0xff] }
  0x2a   : > { %6537 = vmatpush.bf16.msra.mxu3 %v6159_v5  ;;  %725 = vmatpush.bf16.msra.mxu0 %v6159_v5  ;;  %v6345_v63 = vld [vmem:[%s7819_s1 + $0x238] sm:$0xff]  ;;  %v6138_v5 = vld [vmem:[%s6829_s12 + $0x28] sm:$0xff] }
  0x2b   : > { %v6144_v2 = vld [vmem:[%s6829_s12 + $0x58] sm:$0xff] }
  0x2c   : > { %v6156_v4 = vld [vmem:[%s6829_s12 + $0xb8] sm:$0xff] }
  0x2d   : > { %6538 = vmatpush.bf16.msra.mxu1 %v6158_v6  ;;  %6539 = vmatpush.bf16.msra.mxu2 %v6158_v6 }
  0x2e   : > { %6540 = vmatpush.bf16.msra.mxu3 %v6158_v6  ;;  %726 = vmatpush.bf16.msra.mxu0 %v6158_v6  ;;  %v6348_v6 = vld [vmem:[%s6829_s12] sm:$0xff]  }
  0x31   : > { %6541 = vmatpush.bf16.msra.mxu1 %v6157_v7  ;;  %6542 = vmatpush.bf16.msra.mxu2 %v6157_v7 }
  0x32   : > { %6543 = vmatpush.bf16.msra.mxu3 %v6157_v7  ;;  %727 = vmatpush.bf16.msra.mxu0 %v6157_v7  ;;  %v6165_v7 = vld [vmem:[%s6829_s12 + $0x8] sm:$0xff] }
  0x34   : > { %758 = vmatmul.bf16.vlgmr.msra.gmra.mxu1 %v6139_v10  ;;  %788 = vmatmul.bf16.vlgmr.msra.gmra.mxu2 %v6145_v11  ;;  %v6484_v10 = vld [vmem:[%s6829_s12] sm:$0xe]  ;;  %v6236_v11 = vld [vmem:[%s6829_s12 + $0x14] sm:$0xff] }
  0x35   : > { %1675 = vmatpush.bf16.msrb.mxu2 %v6203_v8  ;;  %818 = vmatmul.bf16.vlgmr.msra.gmra.mxu3 %v6151_v12  ;;  %v1090_v8 = vshll.u32 %v6348_v6, 16  ;;  %v2478_v12 = vshll.u32 %v2286_v0, 16 }
  0x36   : > { %2109 = vmatpush.bf16.msrb.mxu3 %v6235_v9  ;;  %728 = vmatmul.bf16.vlgmr.msra.gmra.mxu0 %v6133_v13  ;;  %v6483_v9 = vld [vmem:[%s6829_s12] sm:$0xf0]  ;;  %v1088_v13 = vshrl.u32 %v6348_v6, 16 }
  0x37   : > { %1355 = vmatpush.bf16.msrb.mxu1 %v6195_v14  ;;  %2743 = vmatpush.bf16.msrb.mxu0 %v6266_v15  ;;  %v1092_v14 = vrot.slane %v1090_v8, 1  ;;  %v1095_v15 = vshll.u32 %v6165_v7, 16 }
  0x39   : > { %1676 = vmatpush.bf16.msrb.mxu2 %v6202_v16  ;;  %v6485_v16 = vor.u32 %v6484_v10, %v6483_v9 }
  0x3a   : > { %2110 = vmatpush.bf16.msrb.mxu3 %v6234_v17  ;;  %v2476_v17 = vshrl.u32 %v2286_v0, 16 }
  0x3b   : > { %1356 = vmatpush.bf16.msrb.mxu1 %v6194_v18  ;;  %2744 = vmatpush.bf16.msrb.mxu0 %v6265_v19  ;;  %v2480_v18 = vrot.slane %v2478_v12, 1  ;;  %v2483_v19 = vshll.u32 %v6236_v11, 16 }
  0x3d   : > { %1677 = vmatpush.bf16.msrb.mxu2 %v6201_v20  ;;  %v1093_v20 = vor.u32 %v1092_v14, %v1088_v13 }
  0x3e   : > { %2111 = vmatpush.bf16.msrb.mxu3 %v6233_v21  ;;  %v1097_v21 = vrot.slane %v1095_v15, 1 }
  0x3f   : > { %1357 = vmatpush.bf16.msrb.mxu1 %v6193_v22  ;;  %2745 = vmatpush.bf16.msrb.mxu0 %v6264_v23  ;;  %v1554_v22 = vrot.slane %v6485_v16, 1  ;;  %v1555_v23 = vrot.slane %v6165_v7, 1 }
  0x41   : > { %1678 = vmatpush.bf16.msrb.mxu2 %v6200_v24  ;;  %v2481_v24 = vor.u32 %v2480_v18, %v2476_v17 }
  0x42   : > { %2112 = vmatpush.bf16.msrb.mxu3 %v6232_v25  ;;  %v2485_v25 = vrot.slane %v2483_v19, 1 }
  0x43   : > { %1358 = vmatpush.bf16.msrb.mxu1 %v6192_v26  ;;  %2746 = vmatpush.bf16.msrb.mxu0 %v6263_v27  ;;  %v1098_v26 = vsel %vm1086_vm0, %v1093_v20, %v1097_v21  ;;  %v1556_v27 = vsel %vm1553_vm1, %v1554_v22, %v1555_v23 }
  0x44   : > { %763 = vmatmul.bf16.gmra.mxu1 %v6140_v28  ;;  %793 = vmatmul.bf16.gmra.mxu2 %v6146_v29  ;;  %v6204_v28 = vld [vmem:[%s6829_s12 + $0xc] sm:$0xff]  ;;  %v2486_v29 = vsel %vm1086_vm0, %v2481_v24, %v2485_v25 }
  0x45   : > { %823 = vmatmul.bf16.gmra.mxu3 %v6152_v30  ;;  %1679 = vmatpush.bf16.msrb.mxu2 %v6199_v32  ;;  %v6166_v30 = vld [vmem:[%s6829_s12 + $0x10] sm:$0xff]  ;;  %v1099_v32 = vshrl.u32 %v6165_v7, 16 }
  0x46   : > { %733 = vmatmul.bf16.gmra.mxu0 %v6134_v31  ;;  %2113 = vmatpush.bf16.msrb.mxu3 %v6231_v33  ;;  %v6237_v31 = vld [vmem:[%s6829_s12 + $0x1c] sm:$0xff]  ;;  %v1103_v33 = vshll.u32 %v6166_v30, 16 }
  0x47   : > { %1359 = vmatpush.bf16.msrb.mxu1 %v6191_v34  ;;  %2747 = vmatpush.bf16.msrb.mxu0 %v6262_v35  ;;  %v2487_v34 = vshrl.u32 %v6236_v11, 16  ;;  %v2491_v35 = vshll.u32 %v6237_v31, 16 }
  0x49   : > { %1680 = vmatpush.bf16.msrb.mxu2 %v6198_v36  ;;  %v1101_v36 = vor.u32 %v1099_v32, %v1097_v21 }
  0x4a   : > { %2114 = vmatpush.bf16.msrb.mxu3 %v6230_v37  ;;  %v1105_v37 = vrot.slane %v1103_v33, 1 }
  0x4b   : > { %1360 = vmatpush.bf16.msrb.mxu1 %v6190_v42  ;;  %2748 = vmatpush.bf16.msrb.mxu0 %v6261_v43  ;;  %v6205_v43 = vld [vmem:[%s6829_s12 + $0x14] sm:$0xff] }
  0x4d   : > { %1681 = vmatpush.bf16.msrb.mxu2 %v6197_v44 }
  0x4e   : > { %2115 = vmatpush.bf16.msrb.mxu3 %v6229_v45  ;;  %v6167_v45 = vld [vmem:[%s6829_s12 + $0x18] sm:$0xff] }
  0x4f   : > { %1361 = vmatpush.bf16.msrb.mxu1 %v6189_v46  ;;  %2749 = vmatpush.bf16.msrb.mxu0 %v6260_v51  ;;  %v6305_v46 = vld [vmem:[%s7819_s1 + $0x1b0] sm:$0xff]  ;;  %v1111_v51 = vshll.u32 %v6167_v45, 16  ;;  %v1115_v8 = vshrl.u32 %v6167_v45, 16 }
  0x51   : > { %1682 = vmatpush.bf16.msrb.mxu2 %v6196_v52  ;;  %v2495_v52 = vshrl.u32 %v6237_v31, 16 }
  0x52   : > { %2116 = vmatpush.bf16.msrb.mxu3 %v6228_v53 }
  0x53   : > { %1362 = vmatpush.bf16.msrb.mxu1 %v6188_v54  ;;  %2750 = vmatpush.bf16.msrb.mxu0 %v6259_v55  ;;  %v6344_v54 = vld [vmem:[%s7819_s1 + $0x230] sm:$0xff] }
  0x54   : > { %768 = vmatmul.bf16.gmra.mxu1 %v6141_v38  ;;  %798 = vmatmul.bf16.gmra.mxu2 %v6147_v39  ;;  %v1557_v38 = vrot.slane %v6166_v30, 1  ;;  %v2489_v39 = vor.u32 %v2487_v34, %v2485_v25 }
  0x55   : > { %828 = vmatmul.bf16.gmra.mxu3 %v6153_v40  ;;  %3496 = vmatpush.bf16.msra.mxu2 %v6306_v60  ;;  %v2493_v40 = vrot.slane %v2491_v35, 1 }
  0x56   : > { %738 = vmatmul.bf16.gmra.mxu0 %v6135_v41  ;;  %4130 = vmatpush.bf16.msra.mxu3 %v6337_v61  ;;  %v1106_v41 = vsel %vm1086_vm0, %v1101_v36, %v1105_v37  ;;  %v1558_v42 = vsel %vm1553_vm1, %v1555_v23, %v1557_v38  ;;  %v6207_v23 = vld [vmem:[%s6829_s12 + $0x24] sm:$0xff] }
  0x57   : > { %3062 = vmatpush.bf16.msra.mxu1 %v6274_v62  ;;  %4449 = vmatpush.bf16.msra.mxu0 %v6345_v63  ;;  %v2494_v44 = vsel %vm1086_vm0, %v2489_v39, %v2493_v40  ;;  %v6206_v63 = vld [vmem:[%s6829_s12 + $0x1c] sm:$0xff] }
  0x59   : > { %3497 = vmatpush.bf16.msra.mxu2 %v6305_v46  ;;  %v6208_v46 = vld [vmem:[%s6829_s12 + $0x2c] sm:$0xff] }
  0x5b   : > { %4450 = vmatpush.bf16.msra.mxu0 %v6344_v54 }
  0x64   : > { %773 = vmatmul.bf16.gmra.mxu1 %v6142_v47  ;;  %803 = vmatmul.bf16.gmra.mxu2 %v6148_v48  ;;  %v6336_v47 = vld [vmem:[%s7819_s1 + $0x1f0] sm:$0xff]  ;;  %v6238_v48 = vld [vmem:[%s6829_s12 + $0x24] sm:$0xff] }
  0x65   : > { %833 = vmatmul.bf16.gmra.mxu3 %v6154_v49  ;;  %v6273_v49 = vld [vmem:[%s7819_s1 + $0x170] sm:$0xff]  ;;  %v2499_v53 = vshll.u32 %v6238_v48, 16  ;;  %v2503_v11 = vshrl.u32 %v6238_v48, 16 }
  0x66   : > { %743 = vmatmul.bf16.gmra.mxu0 %v6136_v50  ;;  %4131 = vmatpush.bf16.msra.mxu3 %v6336_v47  ;;  %v1107_v50 = vshrl.u32 %v6166_v30, 16 }
  0x67   : > { %3063 = vmatpush.bf16.msra.mxu1 %v6273_v49  ;;  %v6170_v49 = vld [vmem:[%s6829_s12 + $0x30] sm:$0xff] }
  0x68   : > { %v1109_v55 = vor.u32 %v1107_v50, %v1105_v37  ;;  %v6304_v50 = vld [vmem:[%s7819_s1 + $0x1a8] sm:$0xff] }
  0x69   : > { %3498 = vmatpush.bf16.msra.mxu2 %v6304_v50  ;;  %v6172_v50 = vld [vmem:[%s6829_s12 + $0x40] sm:$0xff] }
  0x74   : > { %778 = vmatmul.bf16.gmra.mxu1 %v6143_v56  ;;  %808 = vmatmul.bf16.gmra.mxu2 %v6149_v57  ;;  %v1113_v56 = vrot.slane %v1111_v51, 1  ;;  %v1559_v57 = vrot.slane %v6167_v45, 1  ;;  %v6335_v51 = vld [vmem:[%s7819_s1 + $0x1e8] sm:$0xff] }
  0x75   : > { %838 = vmatmul.bf16.gmra.mxu3 %v6155_v58  ;;  %v2497_v58 = vor.u32 %v2495_v52, %v2493_v40  ;;  %v6241_v52 = vld [vmem:[%s6829_s12 + $0x3c] sm:$0xff] }
  0x76   : > { %748 = vmatmul.bf16.gmra.mxu0 %v6137_v59  ;;  %v2501_v59 = vrot.slane %v2499_v53, 1  ;;  %v1114_v61 = vsel %vm1086_vm0, %v1109_v55, %v1113_v56  ;;  %v1560_v62 = vsel %vm1553_vm1, %v1557_v38, %v1559_v57  ;;  %v1117_v13 = vor.u32 %v1115_v8, %v1113_v56  ;;  %4132 = vmatpush.bf16.msra.mxu3 %v6335_v51  ;;  %v6272_v55 = vld [vmem:[%s7819_s1 + $0x168] sm:$0xff] }
  0x77   : > { %3064 = vmatpush.bf16.msra.mxu1 %v6272_v55  ;;  %v6243_v51 = vld [vmem:[%s6829_s12 + $0x4c] sm:$0xff] }
  0x78   : > { %v2505_v16 = vor.u32 %v2503_v11, %v2501_v59 }
  0x84   : > { %783 = vmatmul.bf16.gmra.mxu1 %v6144_v2  ;;  %813 = vmatmul.bf16.gmra.mxu2 %v6150_v3  ;;  %v2502_v2 = vsel %vm1086_vm0, %v2497_v58, %v2501_v59  ;;  %v6168_v3 = vld [vmem:[%s6829_s12 + $0x20] sm:$0xff]  ;;  %v1135_v58 = vshll.u32 %v6170_v49, 16 }
  0x85   : > { %843 = vmatmul.bf16.gmra.mxu3 %v6156_v4  ;;  %v6239_v4 = vld [vmem:[%s6829_s12 + $0x2c] sm:$0xff]  ;;  %v1119_v9 = vshll.u32 %v6168_v3, 16  ;;  %v1561_v15 = vrot.slane %v6168_v3, 1  ;;  %v1123_v31 = vshrl.u32 %v6168_v3, 16 }
  0x86   : > { %753 = vmatmul.bf16.gmra.mxu0 %v6138_v5  ;;  %v2507_v12 = vshll.u32 %v6239_v4, 16  ;;  %v2511_v34 = vshrl.u32 %v6239_v4, 16  ;;  %v1137_v3 = vrot.slane %v1135_v58, 1  ;;  %v1565_v4 = vrot.slane %v6170_v49, 1 }
  0x87   : > { %v1121_v14 = vrot.slane %v1119_v9, 1  ;;  %v1562_v22 = vsel %vm1553_vm1, %v1559_v57, %v1561_v15  ;;  %v1151_v58 = vshll.u32 %v6172_v50, 16 }
  0x88   : > { %v2509_v17 = vrot.slane %v2507_v12, 1 }
  0x89   : > { %v1122_v21 = vsel %vm1086_vm0, %v1117_v13, %v1121_v14  ;;  %v1125_v36 = vor.u32 %v1123_v31, %v1121_v14 }
  0x8a   : > { %v2510_v25 = vsel %vm1086_vm0, %v2505_v16, %v2509_v17  ;;  %v2513_v39 = vor.u32 %v2511_v34, %v2509_v17  ;;  %v6209_v16 = vld [vmem:[%s6829_s12 + $0x34] sm:$0xff] }
  0x94   : > { %1363 = vmatmul.bf16.vlgmr.msrb.gmra.mxu1 %v1098_v26  ;;  %1683 = vmatmul.bf16.vlgmr.msrb.gmra.mxu2 %v1556_v27  ;;  %v6169_v26 = vld [vmem:[%s6829_s12 + $0x28] sm:$0xff]  ;;  %v6240_v27 = vld [vmem:[%s6829_s12 + $0x34] sm:$0xff] }
  0x95   : > { %2117 = vmatmul.bf16.vlgmr.msrb.gmra.mxu3 %v6204_v28  ;;  %v1127_v32 = vshll.u32 %v6169_v26, 16  ;;  %v2515_v35 = vshll.u32 %v6240_v27, 16  ;;  %v1563_v38 = vrot.slane %v6169_v26, 1  ;;  %v1131_v57 = vshrl.u32 %v6169_v26, 16 }
  0x96   : > { %2751 = vmatmul.bf16.vlgmr.msrb.gmra.mxu0 %v2486_v29  ;;  %v1139_v26 = vshrl.u32 %v6170_v49, 16 }
  0x97   : > { %v1129_v37 = vrot.slane %v1127_v32, 1  ;;  %v2517_v40 = vrot.slane %v2515_v35, 1  ;;  %v1564_v45 = vsel %vm1553_vm1, %v1561_v15, %v1563_v38  ;;  %v1566_v15 = vsel %vm1553_vm1, %v1563_v38, %v1565_v4 }
  0x98   : > { %v1141_v32 = vor.u32 %v1139_v26, %v1137_v3  ;;  %v6303_v26 = vld [vmem:[%s7819_s1 + $0x1a0] sm:$0xff] }
  0x99   : > { %v2518_v48 = vsel %vm1086_vm0, %v2513_v39, %v2517_v40  ;;  %3499 = vmatpush.bf16.msra.mxu2 %v6303_v26 }
  0xa4   : > { %1368 = vmatmul.bf16.gmra.mxu1 %v1106_v41  ;;  %1688 = vmatmul.bf16.gmra.mxu2 %v1558_v42 }
  0xa5   : > { %2122 = vmatmul.bf16.gmra.mxu3 %v6205_v43 }
  0xa6   : > { %2756 = vmatmul.bf16.gmra.mxu0 %v2494_v44  ;;  %v1130_v44 = vsel %vm1086_vm0, %v1125_v36, %v1129_v37 }
  0xb1   : > { %v6996_v60 = vpop.f32.mrf.mxu1 }
  0xb3   : > { %v7001_v0 = vpop.f32.mrf.mxu0 }
  0xb4   : > { %1373 = vmatmul.bf16.gmra.mxu1 %v1114_v61  ;;  %1693 = vmatmul.bf16.gmra.mxu2 %v1560_v62  ;;  %v2519_v61 = vshrl.u32 %v6240_v27, 16  ;;  %v2523_v62 = vshll.u32 %v6241_v52, 16 }
  0xb5   : > { %2127 = vmatmul.bf16.gmra.mxu3 %v6206_v63  ;;  %v6343_v63 = vld [vmem:[%s7819_s1 + $0x228] sm:$0xff] }
  0xb6   : > { %2761 = vmatmul.bf16.gmra.mxu0 %v2502_v2  ;;  %v1133_v2 = vor.u32 %v1131_v57, %v1129_v37  ;;  %v2521_v8 = vor.u32 %v2519_v61, %v2517_v40  ;;  %v2525_v9 = vrot.slane %v2523_v62, 1  ;;  %v2539_v62 = vshll.u32 %v6243_v51, 16 }
  0xb7   : > { %v7006_v5 = vpop.f32.mrf.mxu2  ;;  %4451 = vmatpush.bf16.msra.mxu0 %v6343_v63 }
  0xb8   : > { %v7008_v6 = vpop.f32.mrf.mxu3  ;;  %v1138_v14 = vsel %vm1086_vm0, %v1133_v2, %v1137_v3  ;;  %v1153_v2 = vrot.slane %v1151_v58, 1  ;;  %v1569_v3 = vrot.slane %v6172_v50, 1 }
  0xb9   : > { %v7010_v7 = vpop.f32.mrf.mxu1 }
  0xbb   : > { %v7012_v10 = vpop.f32.mrf.mxu0 }
  0xbf   : > { %v7014_v18 = vpop.f32.mrf.mxu2 }
  0xc0   : > { %v7016_v19 = vpop.f32.mrf.mxu3 }
  0xc1   : > { %v764_v20 = vpop.f32.mrf.mxu1 }
  0xc2   : > { %v2526_v20 = vsel %vm1086_vm0, %v2521_v8, %v2525_v9  ;;  %v2541_v8 = vrot.slane %v2539_v62, 1 }
  0xc3   : > { %v734_v24 = vpop.f32.mrf.mxu0 }
  0xc4   : > { %1378 = vmatmul.bf16.gmra.mxu1 %v1122_v21  ;;  %1698 = vmatmul.bf16.gmra.mxu2 %v1562_v22  ;;  %v6171_v21 = vld [vmem:[%s6829_s12 + $0x38] sm:$0xff]  ;;  %v6242_v22 = vld [vmem:[%s6829_s12 + $0x44] sm:$0xff] }
  0xc5   : > { %2132 = vmatmul.bf16.gmra.mxu3 %v6207_v23  ;;  %v1143_v27 = vshll.u32 %v6171_v21, 16  ;;  %v2531_v31 = vshll.u32 %v6242_v22, 16  ;;  %v1567_v35 = vrot.slane %v6171_v21, 1  ;;  %v1147_v57 = vshrl.u32 %v6171_v21, 16 }
  0xc6   : > { %2766 = vmatmul.bf16.gmra.mxu0 %v2510_v25  ;;  %v2535_v61 = vshrl.u32 %v6242_v22, 16  ;;  %v6173_v22 = vld [vmem:[%s6829_s12 + $0x48] sm:$0xff] }
  0xc7   : > { %v794_v28 = vpop.f32.mrf.mxu2  ;;  %v1145_v34 = vrot.slane %v1143_v27, 1  ;;  %v2533_v37 = vrot.slane %v2531_v31, 1  ;;  %v6334_v27 = vld [vmem:[%s7819_s1 + $0x1e0] sm:$0xff] }
  0xc8   : > { %v824_v29 = vpop.f32.mrf.mxu3  ;;  %4133 = vmatpush.bf16.msra.mxu3 %v6334_v27 }
  0xc9   : > { %v7024_v30 = vpop.f32.mrf.mxu1  ;;  %v2527_v29 = vshrl.u32 %v6241_v52, 16  ;;  %v1149_v63 = vor.u32 %v1147_v57, %v1145_v34 }
  0xcb   : > { %v7026_v33 = vpop.f32.mrf.mxu0  ;;  %v2529_v36 = vor.u32 %v2527_v29, %v2525_v9  ;;  %v6244_v29 = vld [vmem:[%s6829_s12 + $0x54] sm:$0xff] }
  0xcd   : > { %v2534_v49 = vsel %vm1086_vm0, %v2529_v36, %v2533_v37  ;;  %v1155_v36 = vshrl.u32 %v6172_v50, 16 }
  0xcf   : > { %v7028_v41 = vpop.f32.mrf.mxu2 }
  0xd0   : > { %v7030_v42 = vpop.f32.mrf.mxu3 }
  0xd1   : > { %v7032_v43 = vpop.f32.mrf.mxu1 }
  0xd3   : > { %v7037_v47 = vpop.f32.mrf.mxu0 }
  0xd4   : > { %1383 = vmatmul.bf16.gmra.mxu1 %v1130_v44  ;;  %1703 = vmatmul.bf16.gmra.mxu2 %v1564_v45  ;;  %v1146_v44 = vsel %vm1086_vm0, %v1141_v32, %v1145_v34  ;;  %v1568_v45 = vsel %vm1553_vm1, %v1565_v4, %v1567_v35  ;;  %v2537_v4 = vor.u32 %v2535_v61, %v2533_v37  ;;  %v6271_v34 = vld [vmem:[%s7819_s1 + $0x160] sm:$0xff]  ;;  %v1159_v37 = vshll.u32 %v6173_v22, 16 }
  0xd5   : > { %2137 = vmatmul.bf16.gmra.mxu3 %v6208_v46  ;;  %v6210_v46 = vld [vmem:[%s6829_s12 + $0x3c] sm:$0xff]  ;;  %3065 = vmatpush.bf16.msra.mxu1 %v6271_v34  ;;  %v1163_v34 = vshrl.u32 %v6173_v22, 16 }
  0xd6   : > { %2771 = vmatmul.bf16.gmra.mxu0 %v2518_v48  ;;  %v2542_v21 = vsel %vm1086_vm0, %v2537_v4, %v2541_v8 }
  0xd7   : > { %v7048_v53 = vpop.f32.mrf.mxu2 }
  0xd8   : > { %v7050_v54 = vpop.f32.mrf.mxu3 }
  0xd9   : > { %v771_v56 = vpop.f32.mrf.mxu1 }
  0xdb   : > { %v741_v59 = vpop.f32.mrf.mxu0 }
  0xdf   : > { %v801_v11 = vpop.f32.mrf.mxu2 }
  0xe0   : > { %v831_v12 = vpop.f32.mrf.mxu3 }
  0xe1   : > { %v7058_v13 = vpop.f32.mrf.mxu1 }
  0xe3   : > { %v7063_v17 = vpop.f32.mrf.mxu0 }
  0xe4   : > { %1388 = vmatmul.bf16.gmra.mxu1 %v1138_v14  ;;  %1708 = vmatmul.bf16.gmra.mxu2 %v1566_v15  ;;  %v1154_v14 = vsel %vm1086_vm0, %v1149_v63, %v1153_v2  ;;  %v1570_v15 = vsel %vm1553_vm1, %v1567_v35, %v1569_v3  ;;  %v6212_v63 = vld [vmem:[%s6829_s12 + $0x4c] sm:$0xff] }
  0xe5   : > { %2142 = vmatmul.bf16.gmra.mxu3 %v6209_v16  ;;  %v6211_v16 = vld [vmem:[%s6829_s12 + $0x44] sm:$0xff] }
  0xe6   : > { %2776 = vmatmul.bf16.gmra.mxu0 %v2526_v20 }
  0xe7   : > { %v7068_v23 = vpop.f32.mrf.mxu2 }
  0xe8   : > { %v7070_v24 = vpop.f32.mrf.mxu3 }
  0xe9   : > { %v7072_v25 = vpop.f32.mrf.mxu1 }
  0xeb   : > { %v7074_v28 = vpop.f32.mrf.mxu0 }
  0xef   : > { %v7076_v38 = vpop.f32.mrf.mxu2 }
  0xf0   : > { %v7078_v39 = vpop.f32.mrf.mxu3 }
  0xf1   : > { %v779_v40 = vpop.f32.mrf.mxu1 }
  0xf3   : > { %v749_v48 = vpop.f32.mrf.mxu0 }
  0xf4   : > { %1393 = vmatmul.bf16.gmra.mxu1 %v1146_v44  ;;  %1713 = vmatmul.bf16.gmra.mxu2 %v1568_v45  ;;  %v2543_v44 = vshrl.u32 %v6243_v51, 16  ;;  %v2547_v45 = vshll.u32 %v6244_v29, 16  ;;  %v1157_v48 = vor.u32 %v1155_v36, %v1153_v2  ;;  %v6174_v2 = vld [vmem:[%s6829_s12 + $0x50] sm:$0xff] }
  0xf5   : > { %2147 = vmatmul.bf16.gmra.mxu3 %v6210_v46  ;;  %v6342_v46 = vld [vmem:[%s7819_s1 + $0x220] sm:$0xff] }
  0xf6   : > { %2781 = vmatmul.bf16.gmra.mxu0 %v2534_v49  ;;  %v1161_v49 = vrot.slane %v1159_v37, 1  ;;  %v2549_v57 = vrot.slane %v2547_v45, 1  ;;  %v2551_v37 = vshrl.u32 %v6244_v29, 16 }
  0xf7   : > { %v809_v52 = vpop.f32.mrf.mxu2  ;;  %4452 = vmatpush.bf16.msra.mxu0 %v6342_v46 }
  0xf8   : > { %v839_v55 = vpop.f32.mrf.mxu3  ;;  %v1571_v52 = vrot.slane %v6173_v22, 1  ;;  %v1162_v62 = vsel %vm1086_vm0, %v1157_v48, %v1161_v49  ;;  %v1165_v45 = vor.u32 %v1163_v34, %v1161_v49  ;;  %v1573_v48 = vrot.slane %v6174_v2, 1 }
  0xf9   : > { %v7086_v56 = vpop.f32.mrf.mxu1  ;;  %v2545_v55 = vor.u32 %v2543_v44, %v2541_v8 }
  0xfa   : > { %v1572_v51 = vsel %vm1553_vm1, %v1569_v3, %v1571_v52  ;;  %v1574_v29 = vsel %vm1553_vm1, %v1571_v52, %v1573_v48 }
  0xfb   : > { %v7088_v59 = vpop.f32.mrf.mxu0 }
  0xff   : > { %v7090_v9 = vpop.f32.mrf.mxu2 }
 0x100   : > { %v7092_v11 = vpop.f32.mrf.mxu3 }
 0x101   : > { %v7094_v12 = vpop.f32.mrf.mxu1 }
 0x103   : > { %v7099_v20 = vpop.f32.mrf.mxu0 }
 0x104   : > { %1398 = vmatmul.bf16.gmra.mxu1 %v1154_v14  ;;  %1718 = vmatmul.bf16.gmra.mxu2 %v1570_v15  ;;  %v2550_v14 = vsel %vm1086_vm0, %v2545_v55, %v2549_v57  ;;  %v6245_v15 = vld [vmem:[%s6829_s12 + $0x5c] sm:$0xff] }
 0x105   : > { %2152 = vmatmul.bf16.gmra.mxu3 %v6211_v16 }
 0x106   : > { %2786 = vmatmul.bf16.gmra.mxu0 %v2542_v21 }
 0x107   : > { %v7110_v31 = vpop.f32.mrf.mxu2 }
 0x108   : > { %v7112_v32 = vpop.f32.mrf.mxu3 }
 0x109   : > { %v786_v35 = vpop.f32.mrf.mxu1 }
 0x10a   : > { %v1167_v35 = vshll.u32 %v6174_v2, 16 }
 0x10b   : > { %v756_v40 = vpop.f32.mrf.mxu0 }
 0x10c   : > { %v2555_v40 = vshll.u32 %v6245_v15, 16  ;;  %v1169_v46 = vrot.slane %v1167_v35, 1  ;;  %v2559_v35 = vshrl.u32 %v6245_v15, 16  ;;  %v6214_v15 = vld [vmem:[%s6829_s12 + $0x5c] sm:$0xff] }
 0x10f   : > { %v816_v58 = vpop.f32.mrf.mxu2 }
 0x110   : > { %v846_v50 = vpop.f32.mrf.mxu3  ;;  %v2557_v58 = vrot.slane %v2555_v40, 1 }
 0x111   : > { %v1364_v61 = vpop.f32.mrf.mxu1 }
 0x112   : > { %v1484_v8 = vadd.f32 %v1364_v61, %v7001_v0  ;;  %v2553_v0 = vor.u32 %v2551_v37, %v2549_v57  ;;  %v7137_v57 = vld [vmem:[%s6829_s12 + $0x58] sm:$0xff] }
 0x113   : > { %v2752_v4 = vpop.f32.mrf.mxu0  ;;  %v1175_v52 = vshll.u32 %v7137_v57, 16 }
 0x114   : > { %1403 = vmatmul.bf16.gmra.mxu1 %v1162_v62  ;;  %1723 = vmatmul.bf16.gmra.mxu2 %v1572_v51  ;;  %v1170_v51 = vsel %vm1086_vm0, %v1165_v45, %v1169_v46  ;;  %v2558_v49 = vsel %vm1086_vm0, %v2553_v0, %v2557_v58 }
 0x115   : > { %2157 = vmatmul.bf16.gmra.mxu3 %v6212_v63  ;;  %v6213_v63 = vld [vmem:[%s6829_s12 + $0x54] sm:$0xff]  ;;  %v1177_v40 = vrot.slane %v1175_v52, 1 }
 0x116   : > { %2791 = vmatmul.bf16.gmra.mxu0 %v2550_v14 }
 0x117   : > { %v1684_v16 = vpop.f32.mrf.mxu2 }
 0x118   : > { %v1804_v21 = vadd.f32 %v1684_v16, %v1484_v8  ;;  %v2118_v26 = vpop.f32.mrf.mxu3  ;;  %v6246_v8 = vld [vmem:[%s6829_s12 + $0x64] sm:$0xff] }
 0x119   : > { %v1366_v27 = vpop.f32.mrf.mxu1 }
 0x11a   : > { %v2238_v36 = vadd.f32 %v2118_v26, %v1804_v21  ;;  %v1485_v55 = vadd.f32 %v1366_v27, %v7012_v10  ;;  %v1171_v27 = vshrl.u32 %v6174_v2, 16 }
 0x11b   : > { %v2754_v3 = vpop.f32.mrf.mxu0 }
 0x11c   : > { %v7127_v44 = vadd.f32 %v2752_v4, %v2238_v36  ;;  %v2563_v36 = vshll.u32 %v6246_v8, 16  ;;  %v1173_v37 = vor.u32 %v1171_v27, %v1169_v46  ;;  %v6270_v27 = vld [vmem:[%s7819_s1 + $0x158] sm:$0xff] }
 0x11d   : > { %3066 = vmatpush.bf16.msra.mxu1 %v6270_v27 }
 0x11e   : > { %v2565_v0 = vrot.slane %v2563_v36, 1  ;;  %v1178_v2 = vsel %vm1086_vm0, %v1173_v37, %v1177_v40 }
 0x11f   : > { %v1686_v50 = vpop.f32.mrf.mxu2 }
 0x120   : > { %v1805_v61 = vadd.f32 %v1686_v50, %v1485_v55  ;;  %v2120_v22 = vpop.f32.mrf.mxu3  ;;  %v2561_v55 = vor.u32 %v2559_v35, %v2557_v58  ;;  %v7150_v58 = vld [vmem:[%s6829_s12 + $0x60] sm:$0xff] }
 0x121   : > { %v1369_v62 = vpop.f32.mrf.mxu1  ;;  %v1183_v35 = vshll.u32 %v7150_v58, 16 }
 0x122   : > { %v2239_v4 = vadd.f32 %v2120_v22, %v1805_v61 }
 0x123   : > { %v2757_v14 = vpop.f32.mrf.mxu0 }
 0x124   : > { %1408 = vmatmul.bf16.gmra.mxu1 %v1170_v51  ;;  %1728 = vmatmul.bf16.gmra.mxu2 %v1574_v29  ;;  %v7134_v10 = vadd.f32 %v2754_v3, %v2239_v4  ;;  %v1575_v3 = vrot.slane %v7137_v57, 1  ;;  %v6302_v4 = vld [vmem:[%s7819_s1 + $0x198] sm:$0xff] }
 0x125   : > { %2162 = vmatmul.bf16.gmra.mxu3 %v6213_v63  ;;  %v2566_v63 = vsel %vm1086_vm0, %v2561_v55, %v2565_v0  ;;  %3500 = vmatpush.bf16.msra.mxu2 %v6302_v4  ;;  %v6341_v55 = vld [vmem:[%s7819_s1 + $0x218] sm:$0xff]  ;;  %v6215_v4 = vld [vmem:[%s6829_s12 + $0x64] sm:$0xff] }
 0x126   : > { %2796 = vmatmul.bf16.gmra.mxu0 %v2558_v49  ;;  %v1576_v51 = vsel %vm1553_vm1, %v1573_v48, %v1575_v3  ;;  %v6333_v48 = vld [vmem:[%s7819_s1 + $0x1d8] sm:$0xff]  ;;  %v6247_v49 = vld [vmem:[%s6829_s12 + $0x6c] sm:$0xff] }
 0x127   : > { %v1689_v16 = vpop.f32.mrf.mxu2  ;;  %4134 = vmatpush.bf16.msra.mxu3 %v6333_v48  ;;  %4453 = vmatpush.bf16.msra.mxu0 %v6341_v55 }
 0x128   : > { %v2123_v21 = vpop.f32.mrf.mxu3 }
 0x129   : > { %v1371_v26 = vpop.f32.mrf.mxu1 }
 0x12a   : > { %v1487_v45 = vadd.f32 %v1371_v26, %v7026_v33 }
 0x12b   : > { %v2759_v34 = vpop.f32.mrf.mxu0 }
 0x12f   : > { %v1691_v50 = vpop.f32.mrf.mxu2 }
 0x130   : > { %v1807_v61 = vadd.f32 %v1691_v50, %v1487_v45  ;;  %v2125_v22 = vpop.f32.mrf.mxu3  ;;  %v2567_v45 = vshrl.u32 %v6246_v8, 16 }
 0x131   : > { %v1374_v62 = vpop.f32.mrf.mxu1 }
 0x132   : > { %v2241_v29 = vadd.f32 %v2125_v22, %v1807_v61  ;;  %v1488_v14 = vadd.f32 %v1374_v62, %v7037_v47  ;;  %v2571_v47 = vshll.u32 %v6247_v49, 16  ;;  %v1185_v22 = vrot.slane %v1183_v35, 1 }
 0x133   : > { %v2762_v46 = vpop.f32.mrf.mxu0  ;;  %v2569_v62 = vor.u32 %v2567_v45, %v2565_v0 }
 0x134   : > { %1413 = vmatmul.bf16.gmra.mxu1 %v1178_v2  ;;  %1733 = vmatmul.bf16.gmra.mxu2 %v1576_v51  ;;  %v7147_v33 = vadd.f32 %v2759_v34, %v2241_v29  ;;  %v1179_v34 = vshrl.u32 %v7137_v57, 16  ;;  %v1577_v57 = vrot.slane %v7150_v58, 1  ;;  %v2573_v2 = vrot.slane %v2571_v47, 1 }
 0x135   : > { %2167 = vmatmul.bf16.gmra.mxu3 %v6214_v15 }
 0x136   : > { %2801 = vmatmul.bf16.gmra.mxu0 %v2566_v63  ;;  %v1181_v61 = vor.u32 %v1179_v34, %v1177_v40  ;;  %v1578_v63 = vsel %vm1553_vm1, %v1575_v3, %v1577_v57  ;;  %v6177_v40 = vld [vmem:[%s6829_s12 + $0x68] sm:$0xff] }
 0x137   : > { %v1694_v16 = vpop.f32.mrf.mxu2  ;;  %v1191_v34 = vshll.u32 %v6177_v40, 16 }
 0x138   : > { %v1808_v21 = vadd.f32 %v1694_v16, %v1488_v14  ;;  %v2128_v26 = vpop.f32.mrf.mxu3  ;;  %v1186_v29 = vsel %vm1086_vm0, %v1181_v61, %v1185_v22  ;;  %v6248_v14 = vld [vmem:[%s6829_s12 + $0x74] sm:$0xff]  ;;  %v1579_v61 = vrot.slane %v6177_v40, 1 }
 0x139   : > { %v1376_v52 = vpop.f32.mrf.mxu1  ;;  %v1193_v55 = vrot.slane %v1191_v34, 1  ;;  %v2583_v34 = vshrl.u32 %v6248_v14, 16 }
 0x13a   : > { %v2242_v36 = vadd.f32 %v2128_v26, %v1808_v21  ;;  %v1187_v52 = vshrl.u32 %v7150_v58, 16 }
 0x13b   : > { %v2764_v37 = vpop.f32.mrf.mxu0 }
 0x13c   : > { %v7168_v50 = vadd.f32 %v2762_v46, %v2242_v36  ;;  %v2574_v46 = vsel %vm1086_vm0, %v2569_v62, %v2573_v2  ;;  %v2575_v36 = vshrl.u32 %v6247_v49, 16  ;;  %v2579_v37 = vshll.u32 %v6248_v14, 16  ;;  %v6217_v14 = vld [vmem:[%s6829_s12 + $0x74] sm:$0xff] }
 0x13d   : > { %v1189_v47 = vor.u32 %v1187_v52, %v1185_v22  ;;  %v1580_v49 = vsel %vm1553_vm1, %v1577_v57, %v1579_v61 }
 0x13e   : > { %v2577_v62 = vor.u32 %v2575_v36, %v2573_v2  ;;  %v7189_v2 = vld [vmem:[%s6829_s12 + $0x70] sm:$0xff] }
 0x13f   : > { %v1696_v51 = vpop.f32.mrf.mxu2  ;;  %v1199_v57 = vshll.u32 %v7189_v2, 16 }
 0x140   : > { %v2130_v8 = vpop.f32.mrf.mxu3  ;;  %v2581_v51 = vrot.slane %v2579_v37, 1 }
 0x141   : > { %v1379_v15 = vpop.f32.mrf.mxu1  ;;  %v1201_v37 = vrot.slane %v1199_v57, 1 }
 0x142   : > { %v1490_v0 = vadd.f32 %v1379_v15, %v7063_v17  ;;  %v2582_v22 = vsel %vm1086_vm0, %v2577_v62, %v2581_v51 }
 0x143   : > { %v2767_v48 = vpop.f32.mrf.mxu0 }
 0x144   : > { %1418 = vmatmul.bf16.gmra.mxu1 %v1186_v29  ;;  %1738 = vmatmul.bf16.gmra.mxu2 %v1578_v63  ;;  %v1194_v63 = vsel %vm1086_vm0, %v1189_v47, %v1193_v55 }
 0x145   : > { %2172 = vmatmul.bf16.gmra.mxu3 %v6215_v4  ;;  %v6216_v4 = vld [vmem:[%s6829_s12 + $0x6c] sm:$0xff] }
 0x146   : > { %2806 = vmatmul.bf16.gmra.mxu0 %v2574_v46 }
 0x147   : > { %v1699_v16 = vpop.f32.mrf.mxu2 }
 0x148   : > { %v1810_v21 = vadd.f32 %v1699_v16, %v1490_v0  ;;  %v2133_v26 = vpop.f32.mrf.mxu3  ;;  %v6249_v0 = vld [vmem:[%s6829_s12 + $0x7c] sm:$0xff] }
 0x149   : > { %v1381_v27 = vpop.f32.mrf.mxu1 }
 0x14a   : > { %v2244_v3 = vadd.f32 %v2133_v26, %v1810_v21  ;;  %v1491_v17 = vadd.f32 %v1381_v27, %v7074_v28  ;;  %v1195_v27 = vshrl.u32 %v6177_v40, 16 }
 0x14b   : > { %v2769_v35 = vpop.f32.mrf.mxu0 }
 0x14c   : > { %v7179_v45 = vadd.f32 %v2767_v48, %v2244_v3  ;;  %v2587_v3 = vshll.u32 %v6249_v0, 16  ;;  %v1197_v36 = vor.u32 %v1195_v27, %v1193_v55  ;;  %v6269_v27 = vld [vmem:[%s7819_s1 + $0x150] sm:$0xff] }
 0x14d   : > { %3067 = vmatpush.bf16.msra.mxu1 %v6269_v27 }
 0x14e   : > { %v2589_v62 = vrot.slane %v2587_v3, 1  ;;  %v1202_v40 = vsel %vm1086_vm0, %v1197_v36, %v1201_v37 }
 0x14f   : > { %v1701_v8 = vpop.f32.mrf.mxu2 }
 0x150   : > { %v1811_v15 = vadd.f32 %v1701_v8, %v1491_v17  ;;  %v2135_v58 = vpop.f32.mrf.mxu3  ;;  %v2585_v17 = vor.u32 %v2583_v34, %v2581_v51  ;;  %v7202_v51 = vld [vmem:[%s6829_s12 + $0x78] sm:$0xff] }
 0x151   : > { %v1384_v29 = vpop.f32.mrf.mxu1  ;;  %v1207_v34 = vshll.u32 %v7202_v51, 16 }
 0x152   : > { %v2245_v48 = vadd.f32 %v2135_v58, %v1811_v15 }
 0x153   : > { %v2772_v46 = vpop.f32.mrf.mxu0 }
 0x154   : > { %1423 = vmatmul.bf16.gmra.mxu1 %v1194_v63  ;;  %1743 = vmatmul.bf16.gmra.mxu2 %v1580_v49  ;;  %v7186_v28 = vadd.f32 %v2769_v35, %v2245_v48  ;;  %v1581_v35 = vrot.slane %v7189_v2, 1  ;;  %v6301_v48 = vld [vmem:[%s7819_s1 + $0x190] sm:$0xff] }
 0x155   : > { %2177 = vmatmul.bf16.gmra.mxu3 %v6216_v4  ;;  %v2590_v4 = vsel %vm1086_vm0, %v2585_v17, %v2589_v62  ;;  %3501 = vmatpush.bf16.msra.mxu2 %v6301_v48  ;;  %v6340_v17 = vld [vmem:[%s7819_s1 + $0x210] sm:$0xff]  ;;  %v6218_v48 = vld [vmem:[%s6829_s12 + $0x7c] sm:$0xff] }
 0x156   : > { %2811 = vmatmul.bf16.gmra.mxu0 %v2582_v22  ;;  %v1582_v63 = vsel %vm1553_vm1, %v1579_v61, %v1581_v35  ;;  %v6332_v61 = vld [vmem:[%s7819_s1 + $0x1d0] sm:$0xff]  ;;  %v6250_v22 = vld [vmem:[%s6829_s12 + $0x84] sm:$0xff] }
 0x157   : > { %v1704_v16 = vpop.f32.mrf.mxu2  ;;  %4135 = vmatpush.bf16.msra.mxu3 %v6332_v61  ;;  %4454 = vmatpush.bf16.msra.mxu0 %v6340_v17 }
 0x158   : > { %v2138_v21 = vpop.f32.mrf.mxu3 }
 0x159   : > { %v1386_v26 = vpop.f32.mrf.mxu1 }
 0x15a   : > { %v1493_v47 = vadd.f32 %v1386_v26, %v7088_v59 }
 0x15b   : > { %v2774_v52 = vpop.f32.mrf.mxu0 }
 0x15f   : > { %v1706_v8 = vpop.f32.mrf.mxu2 }
 0x160   : > { %v1813_v15 = vadd.f32 %v1706_v8, %v1493_v47  ;;  %v2140_v58 = vpop.f32.mrf.mxu3  ;;  %v2591_v47 = vshrl.u32 %v6249_v0, 16 }
 0x161   : > { %v1389_v29 = vpop.f32.mrf.mxu1 }
 0x162   : > { %v2247_v49 = vadd.f32 %v2140_v58, %v1813_v15  ;;  %v1494_v46 = vadd.f32 %v1389_v29, %v7099_v20  ;;  %v2595_v20 = vshll.u32 %v6250_v22, 16  ;;  %v1209_v58 = vrot.slane %v1207_v34, 1 }
 0x163   : > { %v2777_v55 = vpop.f32.mrf.mxu0  ;;  %v2593_v29 = vor.u32 %v2591_v47, %v2589_v62 }
 0x164   : > { %1428 = vmatmul.bf16.gmra.mxu1 %v1202_v40  ;;  %1748 = vmatmul.bf16.gmra.mxu2 %v1582_v63  ;;  %v7199_v59 = vadd.f32 %v2774_v52, %v2247_v49  ;;  %v1203_v52 = vshrl.u32 %v7189_v2, 16  ;;  %v1583_v2 = vrot.slane %v7202_v51, 1  ;;  %v2597_v40 = vrot.slane %v2595_v20, 1 }
 0x165   : > { %2182 = vmatmul.bf16.gmra.mxu3 %v6217_v14 }
 0x166   : > { %2816 = vmatmul.bf16.gmra.mxu0 %v2590_v4  ;;  %v1205_v15 = vor.u32 %v1203_v52, %v1201_v37  ;;  %v1584_v4 = vsel %vm1553_vm1, %v1581_v35, %v1583_v2  ;;  %v6180_v37 = vld [vmem:[%s6829_s12 + $0x80] sm:$0xff] }
 0x167   : > { %v1709_v16 = vpop.f32.mrf.mxu2  ;;  %v1215_v52 = vshll.u32 %v6180_v37, 16 }
 0x168   : > { %v1814_v21 = vadd.f32 %v1709_v16, %v1494_v46  ;;  %v2143_v26 = vpop.f32.mrf.mxu3  ;;  %v1210_v49 = vsel %vm1086_vm0, %v1205_v15, %v1209_v58  ;;  %v6251_v46 = vld [vmem:[%s6829_s12 + $0x8c] sm:$0xff]  ;;  %v1585_v15 = vrot.slane %v6180_v37, 1 }
 0x169   : > { %v1391_v57 = vpop.f32.mrf.mxu1  ;;  %v1217_v17 = vrot.slane %v1215_v52, 1  ;;  %v2607_v52 = vshrl.u32 %v6251_v46, 16 }
 0x16a   : > { %v2248_v3 = vadd.f32 %v2143_v26, %v1814_v21  ;;  %v1211_v57 = vshrl.u32 %v7202_v51, 16 }
 0x16b   : > { %v2779_v36 = vpop.f32.mrf.mxu0 }
 0x16c   : > { %v7220_v8 = vadd.f32 %v2777_v55, %v2248_v3  ;;  %v2598_v55 = vsel %vm1086_vm0, %v2593_v29, %v2597_v40  ;;  %v2599_v3 = vshrl.u32 %v6250_v22, 16  ;;  %v2603_v36 = vshll.u32 %v6251_v46, 16  ;;  %v6220_v46 = vld [vmem:[%s6829_s12 + $0x8c] sm:$0xff] }
 0x16d   : > { %v1213_v20 = vor.u32 %v1211_v57, %v1209_v58  ;;  %v1586_v22 = vsel %vm1553_vm1, %v1583_v2, %v1585_v15 }
 0x16e   : > { %v2601_v29 = vor.u32 %v2599_v3, %v2597_v40  ;;  %v7241_v40 = vld [vmem:[%s6829_s12 + $0x88] sm:$0xff] }
 0x16f   : > { %v1711_v63 = vpop.f32.mrf.mxu2  ;;  %v1223_v2 = vshll.u32 %v7241_v40, 16 }
 0x170   : > { %v2145_v0 = vpop.f32.mrf.mxu3  ;;  %v2605_v63 = vrot.slane %v2603_v36, 1 }
 0x171   : > { %v1394_v14 = vpop.f32.mrf.mxu1  ;;  %v1225_v36 = vrot.slane %v1223_v2, 1 }
 0x172   : > { %v1496_v62 = vadd.f32 %v1394_v14, %v6996_v60  ;;  %v2606_v58 = vsel %vm1086_vm0, %v2601_v29, %v2605_v63 }
 0x173   : > { %v2782_v61 = vpop.f32.mrf.mxu0 }
 0x174   : > { %1433 = vmatmul.bf16.gmra.mxu1 %v1210_v49  ;;  %1753 = vmatmul.bf16.gmra.mxu2 %v1584_v4  ;;  %v1218_v4 = vsel %vm1086_vm0, %v1213_v20, %v1217_v17 }
 0x175   : > { %2187 = vmatmul.bf16.gmra.mxu3 %v6218_v48  ;;  %v6219_v48 = vld [vmem:[%s6829_s12 + $0x84] sm:$0xff] }
 0x176   : > { %2821 = vmatmul.bf16.gmra.mxu0 %v2598_v55 }
 0x177   : > { %v1714_v16 = vpop.f32.mrf.mxu2 }
 0x178   : > { %v1816_v21 = vadd.f32 %v1714_v16, %v1496_v62  ;;  %v2148_v26 = vpop.f32.mrf.mxu3  ;;  %v6252_v62 = vld [vmem:[%s6829_s12 + $0x94] sm:$0xff] }
 0x179   : > { %v1396_v27 = vpop.f32.mrf.mxu1 }
 0x17a   : > { %v2250_v35 = vadd.f32 %v2148_v26, %v1816_v21  ;;  %v1497_v60 = vadd.f32 %v1396_v27, %v7010_v7  ;;  %v1219_v27 = vshrl.u32 %v6180_v37, 16 }
 0x17b   : > { %v2784_v34 = vpop.f32.mrf.mxu0 }
 0x17c   : > { %v7231_v47 = vadd.f32 %v2782_v61, %v2250_v35  ;;  %v2611_v35 = vshll.u32 %v6252_v62, 16  ;;  %v1221_v3 = vor.u32 %v1219_v27, %v1217_v17  ;;  %v6268_v27 = vld [vmem:[%s7819_s1 + $0x148] sm:$0xff] }
 0x17d   : > { %3068 = vmatpush.bf16.msra.mxu1 %v6268_v27 }
 0x17e   : > { %v2613_v29 = vrot.slane %v2611_v35, 1  ;;  %v1226_v37 = vsel %vm1086_vm0, %v1221_v3, %v1225_v36 }
 0x17f   : > { %v1716_v0 = vpop.f32.mrf.mxu2 }
 0x180   : > { %v1817_v14 = vadd.f32 %v1716_v0, %v1497_v60  ;;  %v2150_v51 = vpop.f32.mrf.mxu3  ;;  %v2609_v60 = vor.u32 %v2607_v52, %v2605_v63  ;;  %v7254_v63 = vld [vmem:[%s6829_s12 + $0x90] sm:$0xff] }
 0x181   : > { %v1399_v49 = vpop.f32.mrf.mxu1  ;;  %v1231_v52 = vshll.u32 %v7254_v63, 16 }
 0x182   : > { %v2251_v61 = vadd.f32 %v2150_v51, %v1817_v14 }
 0x183   : > { %v2787_v55 = vpop.f32.mrf.mxu0 }
 0x184   : > { %1438 = vmatmul.bf16.gmra.mxu1 %v1218_v4  ;;  %1758 = vmatmul.bf16.gmra.mxu2 %v1586_v22  ;;  %v7238_v7 = vadd.f32 %v2784_v34, %v2251_v61  ;;  %v1587_v34 = vrot.slane %v7241_v40, 1  ;;  %v6300_v61 = vld [vmem:[%s7819_s1 + $0x188] sm:$0xff] }
 0x185   : > { %2192 = vmatmul.bf16.gmra.mxu3 %v6219_v48  ;;  %v2614_v48 = vsel %vm1086_vm0, %v2609_v60, %v2613_v29  ;;  %3502 = vmatpush.bf16.msra.mxu2 %v6300_v61  ;;  %v6339_v60 = vld [vmem:[%s7819_s1 + $0x208] sm:$0xff]  ;;  %v6221_v61 = vld [vmem:[%s6829_s12 + $0x94] sm:$0xff] }
 0x186   : > { %2826 = vmatmul.bf16.gmra.mxu0 %v2606_v58  ;;  %v1588_v4 = vsel %vm1553_vm1, %v1585_v15, %v1587_v34  ;;  %v6331_v15 = vld [vmem:[%s7819_s1 + $0x1c8] sm:$0xff]  ;;  %v6253_v58 = vld [vmem:[%s6829_s12 + $0x9c] sm:$0xff] }
 0x187   : > { %v1719_v16 = vpop.f32.mrf.mxu2  ;;  %4136 = vmatpush.bf16.msra.mxu3 %v6331_v15  ;;  %4455 = vmatpush.bf16.msra.mxu0 %v6339_v60 }
 0x188   : > { %v2153_v21 = vpop.f32.mrf.mxu3 }
 0x189   : > { %v1401_v26 = vpop.f32.mrf.mxu1 }
 0x18a   : > { %v1499_v20 = vadd.f32 %v1401_v26, %v7024_v30 }
 0x18b   : > { %v2789_v57 = vpop.f32.mrf.mxu0 }
 0x18f   : > { %v1721_v0 = vpop.f32.mrf.mxu2 }
 0x190   : > { %v1819_v14 = vadd.f32 %v1721_v0, %v1499_v20  ;;  %v2155_v51 = vpop.f32.mrf.mxu3  ;;  %v2615_v20 = vshrl.u32 %v6252_v62, 16 }
 0x191   : > { %v1404_v49 = vpop.f32.mrf.mxu1 }
 0x192   : > { %v2253_v22 = vadd.f32 %v2155_v51, %v1819_v14  ;;  %v1500_v55 = vadd.f32 %v1404_v49, %v7032_v43  ;;  %v2619_v43 = vshll.u32 %v6253_v58, 16  ;;  %v1233_v51 = vrot.slane %v1231_v52, 1 }
 0x193   : > { %v2792_v17 = vpop.f32.mrf.mxu0  ;;  %v2617_v49 = vor.u32 %v2615_v20, %v2613_v29 }
 0x194   : > { %1443 = vmatmul.bf16.gmra.mxu1 %v1226_v37  ;;  %1763 = vmatmul.bf16.gmra.mxu2 %v1588_v4  ;;  %v7251_v30 = vadd.f32 %v2789_v57, %v2253_v22  ;;  %v1227_v57 = vshrl.u32 %v7241_v40, 16  ;;  %v1589_v40 = vrot.slane %v7254_v63, 1  ;;  %v2621_v37 = vrot.slane %v2619_v43, 1 }
 0x195   : > { %2197 = vmatmul.bf16.gmra.mxu3 %v6220_v46 }
 0x196   : > { %2831 = vmatmul.bf16.gmra.mxu0 %v2614_v48  ;;  %v1229_v14 = vor.u32 %v1227_v57, %v1225_v36  ;;  %v1590_v48 = vsel %vm1553_vm1, %v1587_v34, %v1589_v40  ;;  %v6183_v36 = vld [vmem:[%s6829_s12 + $0x98] sm:$0xff] }
 0x197   : > { %v1724_v16 = vpop.f32.mrf.mxu2  ;;  %v1239_v57 = vshll.u32 %v6183_v36, 16 }
 0x198   : > { %v1820_v21 = vadd.f32 %v1724_v16, %v1500_v55  ;;  %v2158_v26 = vpop.f32.mrf.mxu3  ;;  %v1234_v22 = vsel %vm1086_vm0, %v1229_v14, %v1233_v51  ;;  %v6254_v55 = vld [vmem:[%s6829_s12 + $0xa4] sm:$0xff]  ;;  %v1591_v14 = vrot.slane %v6183_v36, 1 }
 0x199   : > { %v1406_v2 = vpop.f32.mrf.mxu1  ;;  %v1241_v60 = vrot.slane %v1239_v57, 1  ;;  %v2631_v57 = vshrl.u32 %v6254_v55, 16 }
 0x19a   : > { %v2254_v35 = vadd.f32 %v2158_v26, %v1820_v21  ;;  %v1235_v2 = vshrl.u32 %v7254_v63, 16 }
 0x19b   : > { %v2794_v3 = vpop.f32.mrf.mxu0 }
 0x19c   : > { %v7272_v0 = vadd.f32 %v2792_v17, %v2254_v35  ;;  %v2622_v17 = vsel %vm1086_vm0, %v2617_v49, %v2621_v37  ;;  %v2623_v35 = vshrl.u32 %v6253_v58, 16  ;;  %v2627_v3 = vshll.u32 %v6254_v55, 16  ;;  %v6223_v55 = vld [vmem:[%s6829_s12 + $0xa4] sm:$0xff] }
 0x19d   : > { %v1237_v43 = vor.u32 %v1235_v2, %v1233_v51  ;;  %v1592_v58 = vsel %vm1553_vm1, %v1589_v40, %v1591_v14 }
 0x19e   : > { %v2625_v49 = vor.u32 %v2623_v35, %v2621_v37  ;;  %v7293_v37 = vld [vmem:[%s6829_s12 + $0xa0] sm:$0xff] }
 0x19f   : > { %v1726_v4 = vpop.f32.mrf.mxu2  ;;  %v1247_v40 = vshll.u32 %v7293_v37, 16 }
 0x1a0   : > { %v2160_v62 = vpop.f32.mrf.mxu3  ;;  %v2629_v4 = vrot.slane %v2627_v3, 1 }
 0x1a1   : > { %v1409_v46 = vpop.f32.mrf.mxu1  ;;  %v1249_v3 = vrot.slane %v1247_v40, 1 }
 0x1a2   : > { %v1502_v29 = vadd.f32 %v1409_v46, %v7058_v13  ;;  %v2630_v51 = vsel %vm1086_vm0, %v2625_v49, %v2629_v4 }
 0x1a3   : > { %v2797_v15 = vpop.f32.mrf.mxu0 }
 0x1a4   : > { %1448 = vmatmul.bf16.gmra.mxu1 %v1234_v22  ;;  %1768 = vmatmul.bf16.gmra.mxu2 %v1590_v48  ;;  %v1242_v48 = vsel %vm1086_vm0, %v1237_v43, %v1241_v60 }
 0x1a5   : > { %2202 = vmatmul.bf16.gmra.mxu3 %v6221_v61  ;;  %v6222_v61 = vld [vmem:[%s6829_s12 + $0x9c] sm:$0xff] }
 0x1a6   : > { %2836 = vmatmul.bf16.gmra.mxu0 %v2622_v17 }
 0x1a7   : > { %v1729_v16 = vpop.f32.mrf.mxu2 }
 0x1a8   : > { %v1822_v21 = vadd.f32 %v1729_v16, %v1502_v29  ;;  %v2163_v26 = vpop.f32.mrf.mxu3  ;;  %v6255_v29 = vld [vmem:[%s6829_s12 + $0xac] sm:$0xff] }
 0x1a9   : > { %v1411_v27 = vpop.f32.mrf.mxu1 }
 0x1aa   : > { %v2256_v34 = vadd.f32 %v2163_v26, %v1822_v21  ;;  %v1503_v13 = vadd.f32 %v1411_v27, %v7072_v25  ;;  %v1243_v27 = vshrl.u32 %v6183_v36, 16 }
 0x1ab   : > { %v2799_v52 = vpop.f32.mrf.mxu0 }
 0x1ac   : > { %v7283_v20 = vadd.f32 %v2797_v15, %v2256_v34  ;;  %v2635_v34 = vshll.u32 %v6255_v29, 16  ;;  %v1245_v35 = vor.u32 %v1243_v27, %v1241_v60  ;;  %v6267_v27 = vld [vmem:[%s7819_s1 + $0x140] sm:$0xff] }
 0x1ad   : > { %3069 = vmatpush.bf16.msra.mxu1 %v6267_v27 }
 0x1ae   : > { %v2637_v49 = vrot.slane %v2635_v34, 1  ;;  %v1250_v36 = vsel %vm1086_vm0, %v1245_v35, %v1249_v3 }
 0x1af   : > { %v1731_v62 = vpop.f32.mrf.mxu2 }
 0x1b0   : > { %v1823_v46 = vadd.f32 %v1731_v62, %v1503_v13  ;;  %v2165_v63 = vpop.f32.mrf.mxu3  ;;  %v2633_v13 = vor.u32 %v2631_v57, %v2629_v4  ;;  %v7306_v4 = vld [vmem:[%s6829_s12 + $0xa8] sm:$0xff] }
 0x1b1   : > { %v1414_v22 = vpop.f32.mrf.mxu1  ;;  %v1255_v57 = vshll.u32 %v7306_v4, 16 }
 0x1b2   : > { %v2257_v15 = vadd.f32 %v2165_v63, %v1823_v46 }
 0x1b3   : > { %v2802_v17 = vpop.f32.mrf.mxu0 }
 0x1b4   : > { %1453 = vmatmul.bf16.gmra.mxu1 %v1242_v48  ;;  %1773 = vmatmul.bf16.gmra.mxu2 %v1592_v58  ;;  %v7290_v25 = vadd.f32 %v2799_v52, %v2257_v15  ;;  %v1593_v52 = vrot.slane %v7293_v37, 1  ;;  %v6299_v15 = vld [vmem:[%s7819_s1 + $0x180] sm:$0xff] }
 0x1b5   : > { %2207 = vmatmul.bf16.gmra.mxu3 %v6222_v61  ;;  %v2638_v61 = vsel %vm1086_vm0, %v2633_v13, %v2637_v49  ;;  %3503 = vmatpush.bf16.msra.mxu2 %v6299_v15  ;;  %v6338_v13 = vld [vmem:[%s7819_s1 + $0x200] sm:$0xff]  ;;  %v6224_v15 = vld [vmem:[%s6829_s12 + $0xac] sm:$0xff] }
 0x1b6   : > { %2841 = vmatmul.bf16.gmra.mxu0 %v2630_v51  ;;  %v1594_v48 = vsel %vm1553_vm1, %v1591_v14, %v1593_v52  ;;  %v6330_v14 = vld [vmem:[%s7819_s1 + $0x1c0] sm:$0xff]  ;;  %v6256_v51 = vld [vmem:[%s6829_s12 + $0xb4] sm:$0xff] }
 0x1b7   : > { %v1734_v16 = vpop.f32.mrf.mxu2  ;;  %4137 = vmatpush.bf16.msra.mxu3 %v6330_v14  ;;  %4456 = vmatpush.bf16.msra.mxu0 %v6338_v13 }
 0x1b8   : > { %v2168_v21 = vpop.f32.mrf.mxu3 }
 0x1b9   : > { %v1416_v26 = vpop.f32.mrf.mxu1 }
 0x1ba   : > { %v1505_v43 = vadd.f32 %v1416_v26, %v7086_v56 }
 0x1bb   : > { %v2804_v2 = vpop.f32.mrf.mxu0 }
 0x1bf   : > { %v1736_v62 = vpop.f32.mrf.mxu2 }
 0x1c0   : > { %v1825_v46 = vadd.f32 %v1736_v62, %v1505_v43  ;;  %v2170_v63 = vpop.f32.mrf.mxu3  ;;  %v2639_v43 = vshrl.u32 %v6255_v29, 16 }
 0x1c1   : > { %v1419_v22 = vpop.f32.mrf.mxu1 }
 0x1c2   : > { %v2259_v58 = vadd.f32 %v2170_v63, %v1825_v46  ;;  %v1506_v17 = vadd.f32 %v1419_v22, %v7094_v12  ;;  %v2643_v12 = vshll.u32 %v6256_v51, 16  ;;  %v1257_v63 = vrot.slane %v1255_v57, 1 }
 0x1c3   : > { %v2807_v60 = vpop.f32.mrf.mxu0  ;;  %v2641_v22 = vor.u32 %v2639_v43, %v2637_v49 }
 0x1c4   : > { %1458 = vmatmul.bf16.gmra.mxu1 %v1250_v36  ;;  %1778 = vmatmul.bf16.gmra.mxu2 %v1594_v48  ;;  %v7303_v56 = vadd.f32 %v2804_v2, %v2259_v58  ;;  %v1251_v2 = vshrl.u32 %v7293_v37, 16  ;;  %v1595_v37 = vrot.slane %v7306_v4, 1  ;;  %v2645_v36 = vrot.slane %v2643_v12, 1 }
 0x1c5   : > { %2212 = vmatmul.bf16.gmra.mxu3 %v6223_v55 }
 0x1c6   : > { %2846 = vmatmul.bf16.gmra.mxu0 %v2638_v61  ;;  %v1253_v46 = vor.u32 %v1251_v2, %v1249_v3  ;;  %v1596_v61 = vsel %vm1553_vm1, %v1593_v52, %v1595_v37  ;;  %v6186_v3 = vld [vmem:[%s6829_s12 + $0xb0] sm:$0xff] }
 0x1c7   : > { %v1739_v16 = vpop.f32.mrf.mxu2  ;;  %v1263_v2 = vshll.u32 %v6186_v3, 16 }
 0x1c8   : > { %v1826_v21 = vadd.f32 %v1739_v16, %v1506_v17  ;;  %v2173_v26 = vpop.f32.mrf.mxu3  ;;  %v1258_v58 = vsel %vm1086_vm0, %v1253_v46, %v1257_v63  ;;  %v6257_v17 = vld [vmem:[%s6829_s12 + $0xbc] sm:$0xff]  ;;  %v1597_v46 = vrot.slane %v6186_v3, 1 }
 0x1c9   : > { %v1421_v40 = vpop.f32.mrf.mxu1  ;;  %v1265_v13 = vrot.slane %v1263_v2, 1  ;;  %v2655_v2 = vshrl.u32 %v6257_v17, 16 }
 0x1ca   : > { %v2260_v34 = vadd.f32 %v2173_v26, %v1826_v21  ;;  %v1259_v40 = vshrl.u32 %v7306_v4, 16 }
 0x1cb   : > { %v2809_v35 = vpop.f32.mrf.mxu0 }
 0x1cc   : > { %v7324_v62 = vadd.f32 %v2807_v60, %v2260_v34  ;;  %v2646_v60 = vsel %vm1086_vm0, %v2641_v22, %v2645_v36  ;;  %v2647_v34 = vshrl.u32 %v6256_v51, 16  ;;  %v2651_v35 = vshll.u32 %v6257_v17, 16  ;;  %v6226_v17 = vld [vmem:[%s6829_s12 + $0xbc] sm:$0xff] }
 0x1cd   : > { %v1261_v12 = vor.u32 %v1259_v40, %v1257_v63  ;;  %v1598_v51 = vsel %vm1553_vm1, %v1595_v37, %v1597_v46 }
 0x1ce   : > { %v2649_v22 = vor.u32 %v2647_v34, %v2645_v36  ;;  %v6187_v36 = vld [vmem:[%s6829_s12 + $0xb8] sm:$0xff] }
 0x1cf   : > { %v1741_v48 = vpop.f32.mrf.mxu2  ;;  %v1271_v37 = vshll.u32 %v6187_v36, 16 }
 0x1d0   : > { %v2175_v29 = vpop.f32.mrf.mxu3  ;;  %v2653_v48 = vrot.slane %v2651_v35, 1 }
 0x1d1   : > { %v1424_v55 = vpop.f32.mrf.mxu1  ;;  %v1273_v35 = vrot.slane %v1271_v37, 1 }
 0x1d2   : > { %v1508_v49 = vadd.f32 %v1424_v55, %v7006_v5  ;;  %v2654_v63 = vsel %vm1086_vm0, %v2649_v22, %v2653_v48 }
 0x1d3   : > { %v2812_v14 = vpop.f32.mrf.mxu0 }
 0x1d4   : > { %1463 = vmatmul.bf16.gmra.mxu1 %v1258_v58  ;;  %1783 = vmatmul.bf16.gmra.mxu2 %v1596_v61  ;;  %v1266_v61 = vsel %vm1086_vm0, %v1261_v12, %v1265_v13  ;;  %v1599_v12 = vrot.slane %v6187_v36, 1 }
 0x1d5   : > { %2217 = vmatmul.bf16.gmra.mxu3 %v6224_v15  ;;  %v6225_v15 = vld [vmem:[%s6829_s12 + $0xb4] sm:$0xff] }
 0x1d6   : > { %2851 = vmatmul.bf16.gmra.mxu0 %v2646_v60 }
 0x1d7   : > { %v1744_v16 = vpop.f32.mrf.mxu2 }
 0x1d8   : > { %v1828_v21 = vadd.f32 %v1744_v16, %v1508_v49  ;;  %v2178_v26 = vpop.f32.mrf.mxu3  ;;  %v6258_v49 = vld [vmem:[%s6829_s12 + $0xc4] sm:$0xff] }
 0x1d9   : > { %v1426_v27 = vpop.f32.mrf.mxu1 }
 0x1da   : > { %v2262_v52 = vadd.f32 %v2178_v26, %v1828_v21  ;;  %v1509_v5 = vadd.f32 %v1426_v27, %v7014_v18  ;;  %v1267_v27 = vshrl.u32 %v6186_v3, 16 }
 0x1db   : > { %v2814_v57 = vpop.f32.mrf.mxu0 }
 0x1dc   : > { %v7335_v43 = vadd.f32 %v2812_v14, %v2262_v52  ;;  %v2659_v52 = vshll.u32 %v6258_v49, 16  ;;  %v1269_v34 = vor.u32 %v1267_v27, %v1265_v13 }
 0x1de   : > { %v2661_v22 = vrot.slane %v2659_v52, 1  ;;  %v1274_v3 = vsel %vm1086_vm0, %v1269_v34, %v1273_v35  ;;  %v1275_v52 = vshrl.u32 %v6187_v36, 16 }
 0x1df   : > { %v1746_v29 = vpop.f32.mrf.mxu2 }
 0x1e0   : > { %v1829_v55 = vadd.f32 %v1746_v29, %v1509_v5  ;;  %v2180_v4 = vpop.f32.mrf.mxu3  ;;  %v2657_v5 = vor.u32 %v2655_v2, %v2653_v48  ;;  %v945_v29 = vld [vmem:[%s6829_s12 + $0xc0] sm:$0x1] }
 0x1e1   : > { %v1429_v58 = vpop.f32.mrf.mxu1 }
 0x1e2   : > { %v2263_v14 = vadd.f32 %v2180_v4, %v1829_v55  ;;  %v2334_v4 = vld [vmem:[%s6829_s12 + $0xcc] sm:$0x1] }
 0x1e3   : > { %v2817_v60 = vpop.f32.mrf.mxu0 }
 0x1e4   : > { %1468 = vmatmul.bf16.gmra.mxu1 %v1266_v61  ;;  %1788 = vmatmul.bf16.gmra.mxu2 %v1598_v51  ;;  %v7342_v18 = vadd.f32 %v2814_v57, %v2263_v14  ;;  %v1060_v14 = vunpack.c.l.b16 %v945_v29  ;;  %v2663_v29 = vshrl.u32 %v6258_v49, 16 }
 0x1e5   : > { %2222 = vmatmul.bf16.gmra.mxu3 %v6225_v15  ;;  %v1600_v15 = vsel %vm1553_vm1, %v1597_v46, %v1599_v12 }
 0x1e6   : > { %2856 = vmatmul.bf16.gmra.mxu0 %v2654_v63  ;;  %v2662_v63 = vsel %vm1086_vm0, %v2657_v5, %v2661_v22  ;;  %v1085_v48 = vpack.c.b16 %v1060_v14, %v1060_v14  ;;  %v6227_v14 = vld [vmem:[%s6829_s12 + $0xc4] sm:$0xff] }
 0x1e7   : > { %v1749_v16 = vpop.f32.mrf.mxu2 }
 0x1e8   : > { %v2183_v21 = vpop.f32.mrf.mxu3  ;;  %v2449_v16 = vunpack.c.l.b16 %v2334_v4  ;;  %v1279_v34 = vshll.u32 %v1085_v48, 16  ;;  %v1277_v4 = vor.u32 %v1275_v52, %v1273_v35  ;;  %v6486_v35 = vld [vmem:[%s6829_s12 + $0x18] sm:$0xff]  }
 0x1e9   : > { %v1431_v26 = vpop.f32.mrf.mxu1 }
 0x1ea   : > { %v1511_v57 = vadd.f32 %v1431_v26, %v7028_v41  ;;  %v7356_v26 = vpack.c.b16 %v2449_v16, %v2449_v16 }
 0x1eb   : > { %v2819_v40 = vpop.f32.mrf.mxu0 }
 0x1ef   : > { %v1751_v55 = vpop.f32.mrf.mxu2 }
 0x1f0   : > { %v1831_v58 = vadd.f32 %v1751_v55, %v1511_v57  ;;  %v2185_v61 = vpop.f32.mrf.mxu3 }
 0x1f1   : > { %v1434_v51 = vpop.f32.mrf.mxu1 }
 0x1f2   : > { %v2265_v60 = vadd.f32 %v2185_v61, %v1831_v58  ;;  %v1512_v21 = vadd.f32 %v1434_v51, %v7048_v53  ;;  %v1281_v53 = vrot.slane %v1279_v34, 1  ;;  %v1601_v58 = vrot.slane %v1085_v48, 1  ;;  %v6307_v48 = vld [vmem:[%s6829_s12 + $0x20] sm:$0xff] }
 0x1f3   : > { %v2822_v13 = vpop.f32.mrf.mxu0  ;;  %v2665_v61 = vor.u32 %v2663_v29, %v2661_v22  ;;  %v3865_v22 = vshll.u32 %v6486_v35, 16  ;;  %v3863_v34 = vshrl.u32 %v6486_v35, 16 }
 0x1f4   : > { %1473 = vmatmul.bf16.gmra.mxu1 %v1274_v3  ;;  %1793 = vmatmul.bf16.gmra.mxu2 %v1600_v15  ;;  %v7353_v41 = vadd.f32 %v2819_v40, %v2265_v60  ;;  %v2667_v40 = vshll.u32 %v7356_v26, 16  ;;  %v1602_v49 = vsel %vm1553_vm1, %v1599_v12, %v1601_v58  ;;  %v6603_v58 = vld [vmem:[%s6829_s12 + $0x14] sm:$0xff] }
 0x1f5   : > { %2227 = vmatmul.bf16.gmra.mxu3 %v6226_v17  ;;  %v1282_v17 = vsel %vm1086_vm0, %v1277_v4, %v1281_v53 }
 0x1f6   : > { %2861 = vmatmul.bf16.gmra.mxu0 %v2662_v63  ;;  %v2669_v51 = vrot.slane %v2667_v40, 1  ;;  %v6628_v63 = vld [vmem:[%s6829_s12 + $0xc] sm:$0xe]  ;;  %v3870_v40 = vshll.u32 %v6307_v48, 16 }
 0x1f7   : > { %v1754_v27 = vpop.f32.mrf.mxu2  ;;  %v6629_v52 = vor.u32 %v6628_v63, %v6961_v1 }
 0x1f8   : > { %v1832_v46 = vadd.f32 %v1754_v27, %v1512_v21  ;;  %v2188_v37 = vpop.f32.mrf.mxu3  ;;  %v6487_v27 = vld [vmem:[%s6829_s12 + $0x18] sm:$0xf0] }
 0x1f9   : > { %v1436_v2 = vpop.f32.mrf.mxu1 }
 0x1fa   : > { %v2266_v57 = vadd.f32 %v2188_v37, %v1832_v46  ;;  %v6488_v46 = vld [vmem:[%s6829_s12 + $0x18] sm:$0xe] }
 0x1fb   : > { %v2824_v5 = vpop.f32.mrf.mxu0  ;;  %v6489_v4 = vor.u32 %v6488_v46, %v6487_v27  ;;  %v6308_v27 = vld [vmem:[%s6829_s12 + $0x28] sm:$0xff] }
 0x1fc   : > { %v7359_v55 = vadd.f32 %v2822_v13, %v2266_v57  ;;  %v2670_v13 = vsel %vm1086_vm0, %v2665_v61, %v2669_v51  ;;  %v3867_v57 = vrot.slane %v3865_v22, 1  ;;  %v2942_v61 = vrot.slane %v6603_v58, 1 }
 0x1fd   : > { %v4331_v58 = vrot.slane %v6308_v27, 1 }
 0x1fe   : > { %v3868_v51 = vor.u32 %v3867_v57, %v3863_v34  ;;  %v3878_v34 = vshll.u32 %v6308_v27, 16  ;;  %v6604_v57 = vld [vmem:[%s6829_s12 + $0x1c] sm:$0xff] }
 0x1ff   : > { %v1756_v3 = vpop.f32.mrf.mxu2 }
 0x200   : > { %v2190_v15 = vpop.f32.mrf.mxu3 }
 0x201   : > { %v1439_v36 = vpop.f32.mrf.mxu1  ;;  %v3872_v15 = vrot.slane %v3870_v40, 1 }
 0x202   : > { %v1514_v16 = vadd.f32 %v1439_v36, %v7068_v23  ;;  %v2941_v23 = vrot.slane %v6629_v52, 1  ;;  %v4328_v36 = vrot.slane %v6489_v4, 1  ;;  %v3874_v52 = vshrl.u32 %v6307_v48, 16 }
 0x203   : > { %v2827_v60 = vpop.f32.mrf.mxu0 }
 0x204   : > { %1478 = vmatmul.bf16.gmra.mxu1 %v1282_v17  ;;  %1798 = vmatmul.bf16.gmra.mxu2 %v1602_v49  ;;  %v4329_v17 = vrot.slane %v6307_v48, 1  ;;  %v2943_v35 = vsel %vm1553_vm1, %v2941_v23, %v2942_v61  ;;  %v3876_v4 = vor.u32 %v3874_v52, %v3872_v15  ;;  %v3880_v23 = vrot.slane %v3878_v34, 1  ;;  %v6605_v52 = vld [vmem:[%s6829_s12 + $0x24] sm:$0xff] }
 0x205   : > { %2232 = vmatmul.bf16.gmra.mxu3 %v6227_v14  ;;  %v2946_v34 = vrot.slane %v6605_v52, 1 }
 0x206   : > { %2866 = vmatmul.bf16.gmra.mxu0 %v2670_v13  ;;  %v6275_v13 = vld [vmem:[%s6829_s12 + $0x18] sm:$0xff]  ;;  %v3881_v48 = vsel %vm1086_vm0, %v3876_v4, %v3880_v23 }
 0x207   : > { %v1759_v21 = vpop.f32.mrf.mxu2 }
 0x208   : > { %v1834_v37 = vadd.f32 %v1759_v21, %v1514_v16  ;;  %v2193_v12 = vpop.f32.mrf.mxu3  ;;  %v3873_v16 = vsel %vm1086_vm0, %v3868_v51, %v3872_v15  ;;  %v4330_v21 = vsel %vm1553_vm1, %v4328_v36, %v4329_v17  ;;  %v6276_v36 = vld [vmem:[%s6829_s12 + $0x20] sm:$0xff] }
 0x209   : > { %v1441_v2 = vpop.f32.mrf.mxu1 }
 0x20a   : > { %v2268_v5 = vadd.f32 %v2193_v12, %v1834_v37  ;;  %v1515_v3 = vadd.f32 %v1441_v2, %v7076_v38 }
 0x20b   : > { %v2829_v29 = vpop.f32.mrf.mxu0 }
 0x20c   : > { %v7372_v53 = vadd.f32 %v2827_v60, %v2268_v5  ;;  %v2944_v5 = vrot.slane %v6604_v57, 1 }
 0x20f   : > { %v1761_v1 = vpop.f32.mrf.mxu2 }
 0x210   : > { %v1835_v49 = vadd.f32 %v1761_v1, %v1515_v3  ;;  %v2195_v14 = vpop.f32.mrf.mxu3 }
 0x211   : > { %v1444_v63 = vpop.f32.mrf.mxu1 }
 0x212   : > { %v2269_v22 = vadd.f32 %v2195_v14, %v1835_v49  ;;  %v2945_v49 = vsel %vm1553_vm1, %v2942_v61, %v2944_v5  ;;  %v4332_v63 = vsel %vm1553_vm1, %v4329_v17, %v4331_v58 }
 0x213   : > { %v2832_v60 = vpop.f32.mrf.mxu0 }
 0x214   : > { %3070 = vmatmul.bf16.vlgmr.msra.gmra.mxu1 %v2943_v35  ;;  %3504 = vmatmul.bf16.vlgmr.msra.gmra.mxu2 %v6275_v13  ;;  %v7380_v38 = vadd.f32 %v2829_v29, %v2269_v22  ;;  %v6309_v35 = vld [vmem:[%s6829_s12 + $0x30] sm:$0xff] }
 0x215   : > { %4138 = vmatmul.bf16.vlgmr.msra.gmra.mxu3 %v3873_v16 }
 0x216   : > { %4457 = vmatmul.bf16.vlgmr.msra.gmra.mxu0 %v4330_v21 }
 0x217   : > { %v1764_v46 = vpop.f32.mrf.mxu2 }
 0x218   : > { %v2198_v37 = vpop.f32.mrf.mxu3 }
 0x219   : > { %v1446_v12 = vpop.f32.mrf.mxu1  ;;  %v3882_v37 = vshrl.u32 %v6308_v27, 16 }
 0x21a   : > { %v1517_v40 = vadd.f32 %v1446_v12, %v7090_v9  ;;  %v3886_v12 = vshll.u32 %v6309_v35, 16 }
 0x21b   : > { %v2834_v2 = vpop.f32.mrf.mxu0 }
 0x21c   : > { %v3888_v57 = vrot.slane %v3886_v12, 1 }
 0x21f   : > { %v1766_v51 = vpop.f32.mrf.mxu2 }
 0x220   : > { %v1837_v29 = vadd.f32 %v1766_v51, %v1517_v40  ;;  %v2200_v3 = vpop.f32.mrf.mxu3  ;;  %v4333_v40 = vrot.slane %v6309_v35, 1  ;;  %v6277_v51 = vld [vmem:[%s6829_s12 + $0x28] sm:$0xff] }
 0x221   : > { %v1449_v1 = vpop.f32.mrf.mxu1 }
 0x222   : > { %v2271_v14 = vadd.f32 %v2200_v3, %v1837_v29  ;;  %v1518_v15 = vadd.f32 %v1449_v1, %v7110_v31  ;;  %v2947_v3 = vsel %vm1553_vm1, %v2944_v5, %v2946_v34  ;;  %v4334_v27 = vsel %vm1553_vm1, %v4331_v58, %v4333_v40  ;;  %v6606_v58 = vld [vmem:[%s6829_s12 + $0x2c] sm:$0xff] }
 0x223   : > { %v2837_v13 = vpop.f32.mrf.mxu0 }
 0x224   : > { %3075 = vmatmul.bf16.gmra.mxu1 %v2945_v49  ;;  %3509 = vmatmul.bf16.gmra.mxu2 %v6276_v36  ;;  %v7389_v9 = vadd.f32 %v2834_v2, %v2271_v14  ;;  %v3884_v2 = vor.u32 %v3882_v37, %v3880_v23  ;;  %v6310_v49 = vld [vmem:[%s6829_s12 + $0x38] sm:$0xff] }
 0x225   : > { %4143 = vmatmul.bf16.gmra.mxu3 %v3881_v48  ;;  %v4335_v12 = vrot.slane %v6310_v49, 1 }
 0x226   : > { %4462 = vmatmul.bf16.gmra.mxu0 %v4332_v63  ;;  %v3889_v1 = vsel %vm1086_vm0, %v3884_v2, %v3888_v57 }
 0x227   : > { %v1769_v22 = vpop.f32.mrf.mxu2 }
 0x228   : > { %v1838_v60 = vadd.f32 %v1769_v22, %v1518_v15  ;;  %v2203_v61 = vpop.f32.mrf.mxu3  ;;  %v3890_v22 = vshrl.u32 %v6309_v35, 16 }
 0x229   : > { %v1451_v16 = vpop.f32.mrf.mxu1 }
 0x22a   : > { %v2272_v21 = vadd.f32 %v2203_v61, %v1838_v60  ;;  %v3894_v60 = vshll.u32 %v6310_v49, 16  ;;  %v2948_v16 = vrot.slane %v6606_v58, 1 }
 0x22b   : > { %v2839_v46 = vpop.f32.mrf.mxu0 }
 0x22c   : > { %v7393_v17 = vadd.f32 %v2837_v13, %v2272_v21  ;;  %v3892_v46 = vor.u32 %v3890_v22, %v3888_v57  ;;  %v3896_v37 = vrot.slane %v3894_v60, 1  ;;  %v6311_v57 = vld [vmem:[%s6829_s12 + $0x40] sm:$0xff] }
 0x22d   : > { %v4337_v60 = vrot.slane %v6311_v57, 1 }
 0x22f   : > { %v1771_v4 = vpop.f32.mrf.mxu2 }
 0x230   : > { %v2205_v31 = vpop.f32.mrf.mxu3  ;;  %v6278_v4 = vld [vmem:[%s6829_s12 + $0x30] sm:$0xff] }
 0x231   : > { %v1454_v29 = vpop.f32.mrf.mxu1 }
 0x232   : > { %v1520_v23 = vadd.f32 %v1454_v29, %v7008_v6 }
 0x233   : > { %v2842_v36 = vpop.f32.mrf.mxu0 }
 0x234   : > { %3080 = vmatmul.bf16.gmra.mxu1 %v2947_v3  ;;  %3514 = vmatmul.bf16.gmra.mxu2 %v6277_v51  ;;  %v2949_v51 = vsel %vm1553_vm1, %v2946_v34, %v2948_v16  ;;  %v3897_v3 = vsel %vm1086_vm0, %v3892_v46, %v3896_v37  ;;  %v3898_v34 = vshrl.u32 %v6310_v49, 16  ;;  %v6279_v46 = vld [vmem:[%s6829_s12 + $0x38] sm:$0xff] }
 0x235   : > { %4148 = vmatmul.bf16.gmra.mxu3 %v3889_v1 }
 0x236   : > { %4467 = vmatmul.bf16.gmra.mxu0 %v4334_v27  ;;  %v3900_v22 = vor.u32 %v3898_v34, %v3896_v37  ;;  %v6608_v34 = vld [vmem:[%s6829_s12 + $0x3c] sm:$0xff] }
 0x237   : > { %v1774_v14 = vpop.f32.mrf.mxu2 }
 0x238   : > { %v1840_v13 = vadd.f32 %v1774_v14, %v1520_v23  ;;  %v2208_v48 = vpop.f32.mrf.mxu3 }
 0x239   : > { %v1456_v63 = vpop.f32.mrf.mxu1 }
 0x23a   : > { %v2274_v15 = vadd.f32 %v2208_v48, %v1840_v13  ;;  %v1521_v21 = vadd.f32 %v1456_v63, %v7016_v19  ;;  %v3902_v13 = vshll.u32 %v6311_v57, 16  ;;  %v6607_v48 = vld [vmem:[%s6829_s12 + $0x34] sm:$0xff] }
 0x23b   : > { %v2844_v5 = vpop.f32.mrf.mxu0  ;;  %v2950_v63 = vrot.slane %v6607_v48, 1 }
 0x23c   : > { %v7402_v61 = vadd.f32 %v2842_v36, %v2274_v15  ;;  %v4336_v36 = vsel %vm1553_vm1, %v4333_v40, %v4335_v12  ;;  %v3904_v40 = vrot.slane %v3902_v13, 1  ;;  %v2952_v13 = vrot.slane %v6608_v34, 1 }
 0x23e   : > { %v3905_v49 = vsel %vm1086_vm0, %v3900_v22, %v3904_v40 }
 0x23f   : > { %v1776_v6 = vpop.f32.mrf.mxu2 }
 0x240   : > { %v1841_v52 = vadd.f32 %v1776_v6, %v1521_v21  ;;  %v2210_v2 = vpop.f32.mrf.mxu3 }
 0x241   : > { %v1459_v31 = vpop.f32.mrf.mxu1 }
 0x242   : > { %v2275_v29 = vadd.f32 %v2210_v2, %v1841_v52  ;;  %v2951_v52 = vsel %vm1553_vm1, %v2948_v16, %v2950_v63  ;;  %v4338_v31 = vsel %vm1553_vm1, %v4335_v12, %v4337_v60 }
 0x243   : > { %v2847_v35 = vpop.f32.mrf.mxu0 }
 0x244   : > { %3085 = vmatmul.bf16.gmra.mxu1 %v2949_v51  ;;  %3519 = vmatmul.bf16.gmra.mxu2 %v6278_v4  ;;  %v7410_v19 = vadd.f32 %v2844_v5, %v2275_v29  ;;  %v6312_v51 = vld [vmem:[%s6829_s12 + $0x48] sm:$0xff] }
 0x245   : > { %4153 = vmatmul.bf16.gmra.mxu3 %v3897_v3 }
 0x246   : > { %4472 = vmatmul.bf16.gmra.mxu0 %v4336_v36 }
 0x247   : > { %v1779_v1 = vpop.f32.mrf.mxu2 }
 0x248   : > { %v2213_v27 = vpop.f32.mrf.mxu3 }
 0x249   : > { %v1461_v23 = vpop.f32.mrf.mxu1  ;;  %v3906_v27 = vshrl.u32 %v6311_v57, 16 }
 0x24a   : > { %v1523_v15 = vadd.f32 %v1461_v23, %v7030_v42  ;;  %v3910_v23 = vshll.u32 %v6312_v51, 16 }
 0x24b   : > { %v2849_v14 = vpop.f32.mrf.mxu0 }
 0x24c   : > { %v3912_v48 = vrot.slane %v3910_v23, 1 }
 0x24f   : > { %v1781_v58 = vpop.f32.mrf.mxu2 }
 0x250   : > { %v1843_v5 = vadd.f32 %v1781_v58, %v1523_v15  ;;  %v2215_v21 = vpop.f32.mrf.mxu3  ;;  %v4339_v15 = vrot.slane %v6312_v51, 1  ;;  %v6280_v58 = vld [vmem:[%s6829_s12 + $0x40] sm:$0xff] }
 0x251   : > { %v1464_v6 = vpop.f32.mrf.mxu1 }
 0x252   : > { %v2277_v2 = vadd.f32 %v2215_v21, %v1843_v5  ;;  %v1524_v37 = vadd.f32 %v1464_v6, %v7050_v54  ;;  %v2953_v21 = vsel %vm1553_vm1, %v2950_v63, %v2952_v13  ;;  %v4340_v57 = vsel %vm1553_vm1, %v4337_v60, %v4339_v15  ;;  %v6609_v60 = vld [vmem:[%s6829_s12 + $0x44] sm:$0xff] }
 0x253   : > { %v2852_v4 = vpop.f32.mrf.mxu0 }
 0x254   : > { %3090 = vmatmul.bf16.gmra.mxu1 %v2951_v52  ;;  %3524 = vmatmul.bf16.gmra.mxu2 %v6279_v46  ;;  %v7419_v42 = vadd.f32 %v2849_v14, %v2277_v2  ;;  %v3908_v14 = vor.u32 %v3906_v27, %v3904_v40  ;;  %v6313_v52 = vld [vmem:[%s6829_s12 + $0x50] sm:$0xff] }
 0x255   : > { %4158 = vmatmul.bf16.gmra.mxu3 %v3905_v49  ;;  %v4341_v23 = vrot.slane %v6313_v52, 1 }
 0x256   : > { %4477 = vmatmul.bf16.gmra.mxu0 %v4338_v31  ;;  %v3913_v6 = vsel %vm1086_vm0, %v3908_v14, %v3912_v48 }
 0x257   : > { %v1784_v29 = vpop.f32.mrf.mxu2 }
 0x258   : > { %v1844_v35 = vadd.f32 %v1784_v29, %v1524_v37  ;;  %v2218_v16 = vpop.f32.mrf.mxu3  ;;  %v3914_v29 = vshrl.u32 %v6312_v51, 16 }
 0x259   : > { %v1466_v3 = vpop.f32.mrf.mxu1 }
 0x25a   : > { %v2278_v36 = vadd.f32 %v2218_v16, %v1844_v35  ;;  %v3918_v35 = vshll.u32 %v6313_v52, 16  ;;  %v2954_v3 = vrot.slane %v6609_v60, 1 }
 0x25b   : > { %v2854_v1 = vpop.f32.mrf.mxu0 }
 0x25c   : > { %v7423_v12 = vadd.f32 %v2852_v4, %v2278_v36  ;;  %v3916_v1 = vor.u32 %v3914_v29, %v3912_v48  ;;  %v3920_v27 = vrot.slane %v3918_v35, 1  ;;  %v6314_v48 = vld [vmem:[%s6829_s12 + $0x58] sm:$0xff] }
 0x25d   : > { %v4343_v35 = vrot.slane %v6314_v48, 1 }
 0x25f   : > { %v1786_v22 = vpop.f32.mrf.mxu2 }
 0x260   : > { %v2220_v54 = vpop.f32.mrf.mxu3  ;;  %v6281_v22 = vld [vmem:[%s6829_s12 + $0x48] sm:$0xff] }
 0x261   : > { %v1469_v5 = vpop.f32.mrf.mxu1 }
 0x262   : > { %v1526_v40 = vadd.f32 %v1469_v5, %v7070_v24 }
 0x263   : > { %v2857_v46 = vpop.f32.mrf.mxu0 }
 0x264   : > { %3095 = vmatmul.bf16.gmra.mxu1 %v2953_v21  ;;  %3529 = vmatmul.bf16.gmra.mxu2 %v6280_v58  ;;  %v2955_v58 = vsel %vm1553_vm1, %v2952_v13, %v2954_v3  ;;  %v3921_v21 = vsel %vm1086_vm0, %v3916_v1, %v3920_v27  ;;  %v3922_v13 = vshrl.u32 %v6313_v52, 16  ;;  %v6282_v1 = vld [vmem:[%s6829_s12 + $0x50] sm:$0xff] }
 0x265   : > { %4163 = vmatmul.bf16.gmra.mxu3 %v3913_v6 }
 0x266   : > { %4482 = vmatmul.bf16.gmra.mxu0 %v4340_v57  ;;  %v3924_v29 = vor.u32 %v3922_v13, %v3920_v27 }
 0x267   : > { %v1789_v2 = vpop.f32.mrf.mxu2 }
 0x268   : > { %v1846_v4 = vadd.f32 %v1789_v2, %v1526_v40  ;;  %v2223_v49 = vpop.f32.mrf.mxu3 }
 0x269   : > { %v1471_v31 = vpop.f32.mrf.mxu1 }
 0x26a   : > { %v2280_v37 = vadd.f32 %v2223_v49, %v1846_v4  ;;  %v1527_v36 = vadd.f32 %v1471_v31, %v7078_v39  ;;  %v3926_v4 = vshll.u32 %v6314_v48, 16  ;;  %v6610_v49 = vld [vmem:[%s6829_s12 + $0x4c] sm:$0xff] }
 0x26b   : > { %v2859_v63 = vpop.f32.mrf.mxu0  ;;  %v2956_v31 = vrot.slane %v6610_v49, 1 }
 0x26c   : > { %v7432_v16 = vadd.f32 %v2857_v46, %v2280_v37  ;;  %v4342_v46 = vsel %vm1553_vm1, %v4339_v15, %v4341_v23  ;;  %v3928_v15 = vrot.slane %v3926_v4, 1 }
 0x26e   : > { %v3929_v52 = vsel %vm1086_vm0, %v3924_v29, %v3928_v15 }
 0x26f   : > { %v1791_v24 = vpop.f32.mrf.mxu2 }
 0x270   : > { %v1847_v34 = vadd.f32 %v1791_v24, %v1527_v36  ;;  %v2225_v14 = vpop.f32.mrf.mxu3 }
 0x271   : > { %v1474_v54 = vpop.f32.mrf.mxu1 }
 0x272   : > { %v2281_v5 = vadd.f32 %v2225_v14, %v1847_v34  ;;  %v2957_v34 = vsel %vm1553_vm1, %v2954_v3, %v2956_v31  ;;  %v4344_v54 = vsel %vm1553_vm1, %v4341_v23, %v4343_v35 }
 0x273   : > { %v2862_v51 = vpop.f32.mrf.mxu0 }
 0x274   : > { %3100 = vmatmul.bf16.gmra.mxu1 %v2955_v58  ;;  %3534 = vmatmul.bf16.gmra.mxu2 %v6281_v22  ;;  %v7440_v39 = vadd.f32 %v2859_v63, %v2281_v5  ;;  %v7453_v58 = vld [vmem:[%s6829_s12 + $0x60] sm:$0xff] }
 0x275   : > { %4168 = vmatmul.bf16.gmra.mxu3 %v3921_v21  ;;  %v3934_v23 = vshll.u32 %v7453_v58, 16 }
 0x276   : > { %4487 = vmatmul.bf16.gmra.mxu0 %v4342_v46 }
 0x277   : > { %v1794_v6 = vpop.f32.mrf.mxu2  ;;  %v3936_v49 = vrot.slane %v3934_v23, 1 }
 0x278   : > { %v2228_v57 = vpop.f32.mrf.mxu3 }
 0x279   : > { %v1476_v40 = vpop.f32.mrf.mxu1  ;;  %v3930_v57 = vshrl.u32 %v6314_v48, 16 }
 0x27a   : > { %v1529_v37 = vadd.f32 %v1476_v40, %v7092_v11 }
 0x27b   : > { %v2864_v2 = vpop.f32.mrf.mxu0  ;;  %v3932_v4 = vor.u32 %v3930_v57, %v3928_v15 }
 0x27d   : > { %v3937_v48 = vsel %vm1086_vm0, %v3932_v4, %v3936_v49 }
 0x27f   : > { %v1796_v60 = vpop.f32.mrf.mxu2 }
 0x280   : > { %v1849_v63 = vadd.f32 %v1796_v60, %v1529_v37  ;;  %v2230_v36 = vpop.f32.mrf.mxu3  ;;  %v6283_v60 = vld [vmem:[%s6829_s12 + $0x58] sm:$0xff] }
 0x281   : > { %v1479_v24 = vpop.f32.mrf.mxu1 }
 0x282   : > { %v2283_v14 = vadd.f32 %v2230_v36, %v1849_v63  ;;  %v1530_v27 = vadd.f32 %v1479_v24, %v7112_v32  ;;  %v4345_v32 = vrot.slane %v7453_v58, 1 }
 0x283   : > { %v2867_v22 = vpop.f32.mrf.mxu0 }
 0x284   : > { %3105 = vmatmul.bf16.gmra.mxu1 %v2957_v34  ;;  %3539 = vmatmul.bf16.gmra.mxu2 %v6282_v1  ;;  %v7449_v11 = vadd.f32 %v2864_v2, %v2283_v14  ;;  %v6611_v2 = vld [vmem:[%s6829_s12 + $0x54] sm:$0xff]  ;;  %v4346_v24 = vsel %vm1553_vm1, %v4343_v35, %v4345_v32 }
 0x285   : > { %4173 = vmatmul.bf16.gmra.mxu3 %v3929_v52  ;;  %v2958_v13 = vrot.slane %v6611_v2, 1 }
 0x286   : > { %4492 = vmatmul.bf16.gmra.mxu0 %v4344_v54  ;;  %v3938_v54 = vshrl.u32 %v7453_v58, 16  ;;  %v6420_v58 = vld [vmem:[%s7479_s16] sm:$0xff]  }
 0x287   : > { %v1799_v5 = vpop.f32.mrf.mxu2  ;;  %v2959_v36 = vsel %vm1553_vm1, %v2956_v31, %v2958_v13  ;;  %v7472_v31 = vld [vmem:[%s6829_s12 + $0x68] sm:$0xff] }
 0x288   : > { %v1850_v3 = vadd.f32 %v1799_v5, %v1530_v27  ;;  %v2233_v51 = vpop.f32.mrf.mxu3  ;;  %v7484_v27 = vld [vmem:[%s7820_s2] ss:$0 sm:$0xff]  ;;  %v3940_v57 = vor.u32 %v3938_v54, %v3936_v49 }
 0x289   : > { %v1481_v21 = vpop.f32.mrf.mxu1 }
 0x28a   : > { %v2284_v46 = vadd.f32 %v2233_v51, %v1850_v3  ;;  %v3942_v3 = vshll.u32 %v7472_v31, 16 }
 0x28b   : > { %v2869_v6 = vpop.f32.mrf.mxu0 }
 0x28c   : > { %v7456_v40 = vadd.f32 %v2867_v22, %v2284_v46  ;;  %v6356_v22 = vld [vmem:[%s7469_s14] sm:$0xff]   ;;  %v3944_v4 = vrot.slane %v3942_v3, 1  ;;  %v7504_v3 = vld [vmem:[%s6829_s12 + $0x70] sm:$0xff] }
 0x28d   : > { %v6357_v21 = vunpack.c.l.bf16 %v6356_v22  ;;  %v6612_v46 = vld [vmem:[%s6829_s12 + $0x5c] sm:$0xff] }
 0x28e   : > { %v2960_v6 = vrot.slane %v6612_v46, 1 }
 0x28f   : > { %v1801_v37 = vpop.f32.mrf.mxu2 }
 0x290   : > { %v2235_v29 = vpop.f32.mrf.mxu3  ;;  %v4347_v37 = vrot.slane %v7472_v31, 1 }
 0x291   : > { %v3071_v63 = vpop.f32.mrf.mxu1 }
 0x292   : > { %v3191_v15 = vadd.f32 %v3071_v63, %v7127_v44  ;;  %v6421_v63 = vunpack.c.l.bf16 %v6420_v58 }
 0x293   : > { %v4458_v1 = vpop.f32.mrf.mxu0 }
 0x294   : > { %3110 = vmatmul.bf16.gmra.mxu1 %v2959_v36  ;;  %3544 = vmatmul.bf16.gmra.mxu2 %v6283_v60 }
 0x295   : > { %4178 = vmatmul.bf16.gmra.mxu3 %v3937_v48  ;;  %v6284_v48 = vld [vmem:[%s6829_s12 + $0x60] sm:$0xff] }
 0x296   : > { %4497 = vmatmul.bf16.gmra.mxu0 %v4346_v24 }
 0x297   : > { %v3505_v34 = vpop.f32.mrf.mxu2 }
 0x298   : > { %v3625_v14 = vadd.f32 %v3505_v34, %v3191_v15  ;;  %v4139_v35 = vpop.f32.mrf.mxu3  ;;  %v2961_v15 = vsel %vm1553_vm1, %v2958_v13, %v2960_v6 }
 0x299   : > { %v3073_v52 = vpop.f32.mrf.mxu1 }
 0x29a   : > { %v4259_v44 = vadd.f32 %v4139_v35, %v3625_v14  ;;  %v3192_v2 = vadd.f32 %v3073_v52, %v7134_v10  ;;  %v3945_v10 = vsel %vm1086_vm0, %v3940_v57, %v3944_v4  ;;  %v4348_v35 = vsel %vm1553_vm1, %v4345_v32, %v4347_v37 }
 0x29b   : > { %v4460_v5 = vpop.f32.mrf.mxu0  ;;  %v6422_v32 = vunpack.c.h.bf16 %v6420_v58  ;;  %v4349_v58 = vrot.slane %v7504_v3, 1 }
 0x29c   : > { %v4578_v51 = vadd.f32 %v4458_v1, %v4259_v44  ;;  %v6358_v44 = vunpack.c.h.bf16 %v6356_v22 }
 0x29e   : > { %v4681_v23 = vadd.f32 %v7484_v27, %v4578_v51 }
 0x29f   : > { %v3507_v29 = vpop.f32.mrf.mxu2 }
 0x2a0   : > { %v4777_v60 = vadd.f32 %v6357_v21, %v4681_v23  ;;  %v3626_v36 = vadd.f32 %v3507_v29, %v3192_v2  ;;  %v4141_v1 = vpop.f32.mrf.mxu3  ;;  %v3946_v23 = vshrl.u32 %v7472_v31, 16  ;;  %v3950_v2 = vshll.u32 %v7504_v3, 16 }
 0x2a1   : > { %v3076_v24 = vpop.f32.mrf.mxu1 }
 0x2a2   : > { %v4809_v49 = vmax.f32 %v4777_v60, 0.0  ;;  %v4260_v34 = vadd.f32 %v4141_v1, %v3626_v36  ;;  %v6613_v60 = vld [vmem:[%s6829_s12 + $0x64] sm:$0xff]  ;;  %v3948_v1 = vor.u32 %v3946_v23, %v3944_v4 }
 0x2a3   : > { %v4463_v14 = vpop.f32.mrf.mxu0 }
 0x2a4   : > { %v4905_v52 = vadd.f32 %v6421_v63, %v4809_v49  ;;  %v4579_v54 = vadd.f32 %v4460_v5, %v4260_v34  ;;  %3115 = vmatmul.bf16.gmra.mxu1 %v2961_v15  ;;  %3549 = vmatmul.bf16.gmra.mxu2 %v6284_v48  ;;  %v2962_v63 = vrot.slane %v6613_v60, 1  ;;  %v3952_v48 = vrot.slane %v3950_v2, 1  ;;  %v6285_v34 = vld [vmem:[%s6829_s12 + $0x68] sm:$0xff] }
 0x2a5   : > { %4183 = vmatmul.bf16.gmra.mxu3 %v3945_v10  ;;  %v6490_v14 = vld [vmem:[%s7469_s14 + $0x8] sm:$0xff]   ;;  %v3954_v60 = vshrl.u32 %v7504_v3, 16 }
 0x2a6   : > { %4502 = vmatmul.bf16.gmra.mxu0 %v4348_v35  ;;  %4937 = vst [vmem:[%s7499_s7] sm:$0xff] %v4905_v52  ;;  %v4682_v13 = vadd.f32 %v7484_v27, %v4579_v54  ;;  %v2963_v10 = vsel %vm1553_vm1, %v2960_v6, %v2962_v63  ;;  %v3953_v54 = vsel %vm1086_vm0, %v3948_v1, %v3952_v48 }
 0x2a7   : > { %v3510_v51 = vpop.f32.mrf.mxu2 }
 0x2a8   : > { %v4778_v21 = vadd.f32 %v6358_v44, %v4682_v13  ;;  %v4144_v46 = vpop.f32.mrf.mxu3  ;;  %v6361_v44 = vunpack.c.l.bf16 %v6490_v14  ;;  %v6505_v13 = vld [vmem:[%s7479_s16 + $0x8] sm:$0xff]  }
 0x2a9   : > { %v3078_v5 = vpop.f32.mrf.mxu1 }
 0x2aa   : > { %v4810_v22 = vmax.f32 %v4778_v21, 0.0  ;;  %v3194_v36 = vadd.f32 %v3078_v5, %v7147_v33  ;;  %v4350_v33 = vsel %vm1553_vm1, %v4347_v37, %v4349_v58  ;;  %v6425_v5 = vunpack.c.l.bf16 %v6505_v13 }
 0x2ab   : > { %v4465_v57 = vpop.f32.mrf.mxu0 }
 0x2ac   : > { %v4906_v29 = vadd.f32 %v6422_v32, %v4810_v22  ;;  %v7521_v32 = vld [vmem:[%s6829_s12 + $0x78] sm:$0xff] }
 0x2ae   : > { %4938 = vst [vmem:[%s7499_s7 + $0x8] sm:$0xff] %v4906_v29 }
 0x2af   : > { %v3512_v24 = vpop.f32.mrf.mxu2 }
 0x2b0   : > { %v3628_v15 = vadd.f32 %v3512_v24, %v3194_v36  ;;  %v4146_v49 = vpop.f32.mrf.mxu3  ;;  %v3958_v36 = vshll.u32 %v7521_v32, 16  ;;  %v6362_v24 = vunpack.c.h.bf16 %v6490_v14 }
 0x2b1   : > { %v3081_v31 = vpop.f32.mrf.mxu1 }
 0x2b2   : > { %v4262_v35 = vadd.f32 %v4146_v49, %v3628_v15  ;;  %v3195_v21 = vadd.f32 %v3081_v31, %v7168_v50  ;;  %v6614_v15 = vld [vmem:[%s6829_s12 + $0x6c] sm:$0xff]  ;;  %v3956_v31 = vor.u32 %v3954_v60, %v3952_v48 }
 0x2b3   : > { %v4468_v52 = vpop.f32.mrf.mxu0  ;;  %v2964_v49 = vrot.slane %v6614_v15, 1 }
 0x2b4   : > { %v4581_v4 = vadd.f32 %v4465_v57, %v4262_v35  ;;  %3120 = vmatmul.bf16.gmra.mxu1 %v2963_v10  ;;  %3554 = vmatmul.bf16.gmra.mxu2 %v6285_v34  ;;  %v3960_v10 = vrot.slane %v3958_v36, 1  ;;  %v4351_v35 = vrot.slane %v7521_v32, 1 }
 0x2b5   : > { %4188 = vmatmul.bf16.gmra.mxu3 %v3953_v54 }
 0x2b6   : > { %4507 = vmatmul.bf16.gmra.mxu0 %v4350_v33  ;;  %v4683_v51 = vadd.f32 %v7484_v27, %v4581_v4  ;;  %v6426_v4 = vunpack.c.h.bf16 %v6505_v13  ;;  %v4352_v48 = vsel %vm1553_vm1, %v4349_v58, %v4351_v35 }
 0x2b7   : > { %v3515_v6 = vpop.f32.mrf.mxu2 }
 0x2b8   : > { %v4779_v46 = vadd.f32 %v6361_v44, %v4683_v51  ;;  %v3629_v22 = vadd.f32 %v3515_v6, %v3195_v21  ;;  %v4149_v37 = vpop.f32.mrf.mxu3  ;;  %v6286_v44 = vld [vmem:[%s6829_s12 + $0x70] sm:$0xff]  ;;  %v3961_v6 = vsel %vm1086_vm0, %v3956_v31, %v3960_v10 }
 0x2b9   : > { %v3083_v57 = vpop.f32.mrf.mxu1 }
 0x2ba   : > { %v4811_v23 = vmax.f32 %v4779_v46, 0.0  ;;  %v4263_v2 = vadd.f32 %v4149_v37, %v3629_v22  ;;  %v6491_v57 = vld [vmem:[%s7469_s14 + $0x10] sm:$0xff]  }
 0x2bb   : > { %v4470_v29 = vpop.f32.mrf.mxu0 }
 0x2bc   : > { %v4907_v1 = vadd.f32 %v6425_v5, %v4811_v23  ;;  %v4582_v50 = vadd.f32 %v4468_v52, %v4263_v2  ;;  %v2965_v52 = vsel %vm1553_vm1, %v2962_v63, %v2964_v49  ;;  %v7536_v5 = vld [vmem:[%s6829_s12 + $0x80] sm:$0xff]  ;;  %v3962_v2 = vshrl.u32 %v7521_v32, 16 }
 0x2bd   : > { %v3966_v60 = vshll.u32 %v7536_v5, 16 }
 0x2be   : > { %4939 = vst [vmem:[%s7499_s7 + $0x10] sm:$0xff] %v4907_v1  ;;  %v4684_v34 = vadd.f32 %v7484_v27, %v4582_v50  ;;  %v6365_v1 = vunpack.c.l.bf16 %v6491_v57  ;;  %v6506_v50 = vld [vmem:[%s7479_s16 + $0x10] sm:$0xff]  }
 0x2bf   : > { %v3517_v54 = vpop.f32.mrf.mxu2 }
 0x2c0   : > { %v4780_v33 = vadd.f32 %v6362_v24, %v4684_v34  ;;  %v4151_v3 = vpop.f32.mrf.mxu3  ;;  %v6615_v24 = vld [vmem:[%s6829_s12 + $0x74] sm:$0xff]  ;;  %v3968_v54 = vrot.slane %v3966_v60, 1 }
 0x2c1   : > { %v3086_v51 = vpop.f32.mrf.mxu1  ;;  %v2966_v15 = vrot.slane %v6615_v24, 1  ;;  %v6429_v3 = vunpack.c.l.bf16 %v6506_v50 }
 0x2c2   : > { %v4812_v14 = vmax.f32 %v4780_v33, 0.0  ;;  %v3197_v13 = vadd.f32 %v3086_v51, %v7179_v45  ;;  %v3964_v45 = vor.u32 %v3962_v2, %v3960_v10  ;;  %v4353_v33 = vrot.slane %v7536_v5, 1 }
 0x2c3   : > { %v4473_v21 = vpop.f32.mrf.mxu0 }
 0x2c4   : > { %v4908_v46 = vadd.f32 %v6426_v4, %v4812_v14  ;;  %3125 = vmatmul.bf16.gmra.mxu1 %v2965_v52  ;;  %3559 = vmatmul.bf16.gmra.mxu2 %v6286_v44  ;;  %v6287_v52 = vld [vmem:[%s6829_s12 + $0x78] sm:$0xff] }
 0x2c5   : > { %4193 = vmatmul.bf16.gmra.mxu3 %v3961_v6 }
 0x2c6   : > { %4512 = vmatmul.bf16.gmra.mxu0 %v4352_v48  ;;  %4940 = vst [vmem:[%s7499_s7 + $0x18] sm:$0xff] %v4908_v46  ;;  %v3969_v46 = vsel %vm1086_vm0, %v3964_v45, %v3968_v54  ;;  %v6616_v45 = vld [vmem:[%s6829_s12 + $0x7c] sm:$0xff] }
 0x2c7   : > { %v3520_v63 = vpop.f32.mrf.mxu2 }
 0x2c8   : > { %v3631_v22 = vadd.f32 %v3520_v63, %v3197_v13  ;;  %v4154_v37 = vpop.f32.mrf.mxu3 }
 0x2c9   : > { %v3088_v23 = vpop.f32.mrf.mxu1 }
 0x2ca   : > { %v4265_v58 = vadd.f32 %v4154_v37, %v3631_v22  ;;  %v3198_v31 = vadd.f32 %v3088_v23, %v7186_v28  ;;  %v4354_v28 = vsel %vm1553_vm1, %v4351_v35, %v4353_v33  ;;  %v6366_v22 = vunpack.c.h.bf16 %v6491_v57 }
 0x2cb   : > { %v4475_v29 = vpop.f32.mrf.mxu0 }
 0x2cc   : > { %v4584_v36 = vadd.f32 %v4473_v21, %v4265_v58  ;;  %v2967_v21 = vsel %vm1553_vm1, %v2964_v49, %v2966_v15  ;;  %v7553_v49 = vld [vmem:[%s6829_s12 + $0x88] sm:$0xff]  ;;  %v6430_v58 = vunpack.c.h.bf16 %v6506_v50 }
 0x2cd   : > { %v4355_v50 = vrot.slane %v7553_v49, 1 }
 0x2ce   : > { %v4685_v34 = vadd.f32 %v7484_v27, %v4584_v36 }
 0x2cf   : > { %v3522_v4 = vpop.f32.mrf.mxu2 }
 0x2d0   : > { %v4781_v32 = vadd.f32 %v6365_v1, %v4685_v34  ;;  %v3632_v44 = vadd.f32 %v3522_v4, %v3198_v31  ;;  %v4156_v51 = vpop.f32.mrf.mxu3  ;;  %v3974_v1 = vshll.u32 %v7553_v49, 16  ;;  %v2968_v34 = vrot.slane %v6616_v45, 1  ;;  %v6617_v45 = vld [vmem:[%s6829_s12 + $0x84] sm:$0xff] }
 0x2d1   : > { %v3091_v14 = vpop.f32.mrf.mxu1 }
 0x2d2   : > { %v4813_v6 = vmax.f32 %v4781_v32, 0.0  ;;  %v4266_v10 = vadd.f32 %v4156_v51, %v3632_v44  ;;  %v3976_v32 = vrot.slane %v3974_v1, 1  ;;  %v6492_v14 = vld [vmem:[%s7469_s14 + $0x18] sm:$0xff]  }
 0x2d3   : > { %v4478_v48 = vpop.f32.mrf.mxu0 }
 0x2d4   : > { %v4909_v13 = vadd.f32 %v6429_v3, %v4813_v6  ;;  %v4585_v63 = vadd.f32 %v4475_v29, %v4266_v10  ;;  %3130 = vmatmul.bf16.gmra.mxu1 %v2967_v21  ;;  %3564 = vmatmul.bf16.gmra.mxu2 %v6287_v52  ;;  %v3970_v29 = vshrl.u32 %v7536_v5, 16  ;;  %v6288_v52 = vld [vmem:[%s6829_s12 + $0x80] sm:$0xff]  ;;  %v2969_v21 = vsel %vm1553_vm1, %v2966_v15, %v2968_v34 }
 0x2d5   : > { %4198 = vmatmul.bf16.gmra.mxu3 %v3969_v46  ;;  %v6369_v46 = vunpack.c.l.bf16 %v6492_v14 }
 0x2d6   : > { %4517 = vmatmul.bf16.gmra.mxu0 %v4354_v28  ;;  %4941 = vst [vmem:[%s7499_s7 + $0x20] sm:$0xff] %v4909_v13  ;;  %v4686_v37 = vadd.f32 %v7484_v27, %v4585_v63  ;;  %v3972_v4 = vor.u32 %v3970_v29, %v3968_v54  ;;  %v6507_v28 = vld [vmem:[%s7479_s16 + $0x18] sm:$0xff]  }
 0x2d7   : > { %v3525_v23 = vpop.f32.mrf.mxu2 }
 0x2d8   : > { %v4782_v2 = vadd.f32 %v6366_v22, %v4686_v37  ;;  %v4159_v60 = vpop.f32.mrf.mxu3  ;;  %v3977_v48 = vsel %vm1086_vm0, %v3972_v4, %v3976_v32  ;;  %v7570_v22 = vld [vmem:[%s6829_s12 + $0x90] sm:$0xff]  ;;  %v6433_v23 = vunpack.c.l.bf16 %v6507_v28 }
 0x2d9   : > { %v3093_v36 = vpop.f32.mrf.mxu1  ;;  %v3982_v29 = vshll.u32 %v7570_v22, 16 }
 0x2da   : > { %v4814_v35 = vmax.f32 %v4782_v2, 0.0  ;;  %v3200_v31 = vadd.f32 %v3093_v36, %v7199_v59  ;;  %v4356_v59 = vsel %vm1553_vm1, %v4353_v33, %v4355_v50 }
 0x2db   : > { %v4480_v57 = vpop.f32.mrf.mxu0 }
 0x2dc   : > { %v4910_v24 = vadd.f32 %v6430_v58, %v4814_v35 }
 0x2de   : > { %4942 = vst [vmem:[%s7499_s7 + $0x28] sm:$0xff] %v4910_v24  ;;  %v6370_v24 = vunpack.c.h.bf16 %v6492_v14 }
 0x2df   : > { %v3527_v3 = vpop.f32.mrf.mxu2 }
 0x2e0   : > { %v3634_v44 = vadd.f32 %v3527_v3, %v3200_v31  ;;  %v4161_v51 = vpop.f32.mrf.mxu3  ;;  %v2970_v31 = vrot.slane %v6617_v45, 1 }
 0x2e1   : > { %v3096_v5 = vpop.f32.mrf.mxu1 }
 0x2e2   : > { %v4268_v6 = vadd.f32 %v4161_v51, %v3634_v44  ;;  %v3201_v63 = vadd.f32 %v3096_v5, %v7220_v8  ;;  %v3984_v44 = vrot.slane %v3982_v29, 1  ;;  %v4357_v51 = vrot.slane %v7570_v22, 1 }
 0x2e3   : > { %v4483_v10 = vpop.f32.mrf.mxu0 }
 0x2e4   : > { %v4587_v54 = vadd.f32 %v4480_v57, %v4268_v6  ;;  %3135 = vmatmul.bf16.gmra.mxu1 %v2969_v21  ;;  %3569 = vmatmul.bf16.gmra.mxu2 %v6288_v52  ;;  %v3978_v57 = vshrl.u32 %v7553_v49, 16  ;;  %v6434_v21 = vunpack.c.h.bf16 %v6507_v28  ;;  %v6289_v6 = vld [vmem:[%s6829_s12 + $0x88] sm:$0xff] }
 0x2e5   : > { %4203 = vmatmul.bf16.gmra.mxu3 %v3977_v48 }
 0x2e6   : > { %4522 = vmatmul.bf16.gmra.mxu0 %v4356_v59  ;;  %v4687_v13 = vadd.f32 %v7484_v27, %v4587_v54  ;;  %v3980_v3 = vor.u32 %v3978_v57, %v3976_v32  ;;  %v4358_v32 = vsel %vm1553_vm1, %v4355_v50, %v4357_v51  ;;  %v6618_v57 = vld [vmem:[%s6829_s12 + $0x8c] sm:$0xff] }
 0x2e7   : > { %v3530_v15 = vpop.f32.mrf.mxu2  ;;  %v2972_v29 = vrot.slane %v6618_v57, 1 }
 0x2e8   : > { %v4783_v37 = vadd.f32 %v6369_v46, %v4687_v13  ;;  %v3635_v2 = vadd.f32 %v3530_v15, %v3201_v63  ;;  %v4164_v33 = vpop.f32.mrf.mxu3  ;;  %v3985_v54 = vsel %vm1086_vm0, %v3980_v3, %v3984_v44  ;;  %v7585_v13 = vld [vmem:[%s6829_s12 + $0x98] sm:$0xff] }
 0x2e9   : > { %v3098_v58 = vpop.f32.mrf.mxu1  ;;  %v4359_v45 = vrot.slane %v7585_v13, 1 }
 0x2ea   : > { %v4815_v60 = vmax.f32 %v4783_v37, 0.0  ;;  %v4269_v36 = vadd.f32 %v4164_v33, %v3635_v2  ;;  %v6493_v37 = vld [vmem:[%s7469_s14 + $0x20] sm:$0xff]   ;;  %v3986_v2 = vshrl.u32 %v7570_v22, 16  ;;  %v3990_v58 = vshll.u32 %v7585_v13, 16 }
 0x2eb   : > { %v4485_v35 = vpop.f32.mrf.mxu0 }
 0x2ec   : > { %v4911_v1 = vadd.f32 %v6433_v23, %v4815_v60  ;;  %v4588_v8 = vadd.f32 %v4483_v10, %v4269_v36  ;;  %v2971_v10 = vsel %vm1553_vm1, %v2968_v34, %v2970_v31  ;;  %v6373_v36 = vunpack.c.l.bf16 %v6493_v37  ;;  %v6508_v35 = vld [vmem:[%s7479_s16 + $0x20] sm:$0xff]  }
 0x2ed   : > { %v6437_v3 = vunpack.c.l.bf16 %v6508_v35 }
 0x2ee   : > { %4943 = vst [vmem:[%s7499_s7 + $0x30] sm:$0xff] %v4911_v1  ;;  %v4688_v4 = vadd.f32 %v7484_v27, %v4588_v8 }
 0x2ef   : > { %v3532_v52 = vpop.f32.mrf.mxu2 }
 0x2f0   : > { %v4784_v5 = vadd.f32 %v6370_v24, %v4688_v4  ;;  %v4166_v49 = vpop.f32.mrf.mxu3  ;;  %v3992_v24 = vrot.slane %v3990_v58, 1  ;;  %v6619_v58 = vld [vmem:[%s6829_s12 + $0x94] sm:$0xff] }
 0x2f1   : > { %v3101_v48 = vpop.f32.mrf.mxu1 }
 0x2f2   : > { %v4816_v14 = vmax.f32 %v4784_v5, 0.0  ;;  %v3203_v28 = vadd.f32 %v3101_v48, %v7231_v47  ;;  %v3988_v47 = vor.u32 %v3986_v2, %v3984_v44  ;;  %v3994_v2 = vshrl.u32 %v7585_v13, 16 }
 0x2f3   : > { %v4488_v59 = vpop.f32.mrf.mxu0 }
 0x2f4   : > { %v4912_v46 = vadd.f32 %v6434_v21, %v4816_v14  ;;  %3140 = vmatmul.bf16.gmra.mxu1 %v2971_v10  ;;  %3574 = vmatmul.bf16.gmra.mxu2 %v6289_v6  ;;  %v6290_v21 = vld [vmem:[%s6829_s12 + $0x90] sm:$0xff]  ;;  %v2973_v6 = vsel %vm1553_vm1, %v2970_v31, %v2972_v29  ;;  %v3993_v14 = vsel %vm1086_vm0, %v3988_v47, %v3992_v24  ;;  %v7602_v31 = vld [vmem:[%s6829_s12 + $0xa0] sm:$0xff] }
 0x2f5   : > { %4208 = vmatmul.bf16.gmra.mxu3 %v3985_v54  ;;  %v3996_v57 = vor.u32 %v3994_v2, %v3992_v24 }
 0x2f6   : > { %4527 = vmatmul.bf16.gmra.mxu0 %v4358_v32  ;;  %4944 = vst [vmem:[%s7499_s7 + $0x38] sm:$0xff] %v4912_v46  ;;  %v6374_v32 = vunpack.c.h.bf16 %v6493_v37 }
 0x2f7   : > { %v3535_v34 = vpop.f32.mrf.mxu2 }
 0x2f8   : > { %v3637_v63 = vadd.f32 %v3535_v34, %v3203_v28  ;;  %v4169_v15 = vpop.f32.mrf.mxu3 }
 0x2f9   : > { %v3103_v23 = vpop.f32.mrf.mxu1 }
 0x2fa   : > { %v4271_v50 = vadd.f32 %v4169_v15, %v3637_v63  ;;  %v3204_v8 = vadd.f32 %v3103_v23, %v7238_v7  ;;  %v4360_v7 = vsel %vm1553_vm1, %v4357_v51, %v4359_v45  ;;  %v6438_v63 = vunpack.c.h.bf16 %v6508_v35 }
 0x2fb   : > { %v4490_v33 = vpop.f32.mrf.mxu0  ;;  %v4361_v35 = vrot.slane %v7602_v31, 1 }
 0x2fc   : > { %v4590_v60 = vadd.f32 %v4488_v59, %v4271_v50  ;;  %v3998_v50 = vshll.u32 %v7602_v31, 16 }
 0x2fe   : > { %v4689_v1 = vadd.f32 %v7484_v27, %v4590_v60  ;;  %v2974_v60 = vrot.slane %v6619_v58, 1  ;;  %v4000_v47 = vrot.slane %v3998_v50, 1 }
 0x2ff   : > { %v3537_v4 = vpop.f32.mrf.mxu2 }
 0x300   : > { %v4785_v22 = vadd.f32 %v6373_v36, %v4689_v1  ;;  %v3638_v52 = vadd.f32 %v3537_v4, %v3204_v8  ;;  %v4171_v5 = vpop.f32.mrf.mxu3 }
 0x301   : > { %v3106_v49 = vpop.f32.mrf.mxu1 }
 0x302   : > { %v4817_v48 = vmax.f32 %v4785_v22, 0.0  ;;  %v4272_v44 = vadd.f32 %v4171_v5, %v3638_v52  ;;  %v6291_v22 = vld [vmem:[%s6829_s12 + $0x98] sm:$0xff]  ;;  %v2975_v52 = vsel %vm1553_vm1, %v2972_v29, %v2974_v60  ;;  %v4001_v49 = vsel %vm1086_vm0, %v3996_v57, %v4000_v47 }
 0x303   : > { %v4493_v10 = vpop.f32.mrf.mxu0 }
 0x304   : > { %v4913_v59 = vadd.f32 %v6437_v3, %v4817_v48  ;;  %v4591_v54 = vadd.f32 %v4490_v33, %v4272_v44  ;;  %3145 = vmatmul.bf16.gmra.mxu1 %v2973_v6  ;;  %3579 = vmatmul.bf16.gmra.mxu2 %v6290_v21  ;;  %v6494_v3 = vld [vmem:[%s7469_s14 + $0x28] sm:$0xff]  }
 0x305   : > { %4213 = vmatmul.bf16.gmra.mxu3 %v3993_v14  ;;  %v6377_v6 = vunpack.c.l.bf16 %v6494_v3  ;;  %v6509_v48 = vld [vmem:[%s7479_s16 + $0x28] sm:$0xff]  }
 0x306   : > { %4532 = vmatmul.bf16.gmra.mxu0 %v4360_v7  ;;  %4945 = vst [vmem:[%s7499_s7 + $0x40] sm:$0xff] %v4913_v59  ;;  %v4690_v46 = vadd.f32 %v7484_v27, %v4591_v54  ;;  %v7619_v14 = vld [vmem:[%s6829_s12 + $0xa8] sm:$0xff]  ;;  %v6441_v59 = vunpack.c.l.bf16 %v6509_v48 }
 0x307   : > { %v3540_v28 = vpop.f32.mrf.mxu2 }
 0x308   : > { %v4786_v34 = vadd.f32 %v6374_v32, %v4690_v46  ;;  %v4174_v15 = vpop.f32.mrf.mxu3 }
 0x309   : > { %v3108_v23 = vpop.f32.mrf.mxu1  ;;  %v4006_v15 = vshll.u32 %v7619_v14, 16 }
 0x30a   : > { %v4818_v51 = vmax.f32 %v4786_v34, 0.0  ;;  %v3206_v36 = vadd.f32 %v3108_v23, %v7251_v30  ;;  %v4362_v30 = vsel %vm1553_vm1, %v4359_v45, %v4361_v35 }
 0x30b   : > { %v4495_v37 = vpop.f32.mrf.mxu0  ;;  %v4008_v58 = vrot.slane %v4006_v15, 1 }
 0x30c   : > { %v4914_v33 = vadd.f32 %v6438_v63, %v4818_v51  ;;  %v4002_v63 = vshrl.u32 %v7602_v31, 16  ;;  %v6378_v51 = vunpack.c.h.bf16 %v6494_v3 }
 0x30e   : > { %4946 = vst [vmem:[%s7499_s7 + $0x48] sm:$0xff] %v4914_v33  ;;  %v4004_v33 = vor.u32 %v4002_v63, %v4000_v47 }
 0x30f   : > { %v3542_v1 = vpop.f32.mrf.mxu2 }
 0x310   : > { %v3640_v8 = vadd.f32 %v3542_v1, %v3206_v36  ;;  %v4176_v4 = vpop.f32.mrf.mxu3  ;;  %v4363_v36 = vrot.slane %v7619_v14, 1 }
 0x311   : > { %v3111_v13 = vpop.f32.mrf.mxu1 }
 0x312   : > { %v4274_v5 = vadd.f32 %v4176_v4, %v3640_v8  ;;  %v3207_v10 = vadd.f32 %v3111_v13, %v7272_v0  ;;  %v6442_v8 = vunpack.c.h.bf16 %v6509_v48  ;;  %v6292_v4 = vld [vmem:[%s6829_s12 + $0xa0] sm:$0xff]  ;;  %v4364_v47 = vsel %vm1553_vm1, %v4361_v35, %v4363_v36  ;;  %v6495_v48 = vld [vmem:[%s7469_s14 + $0x30] sm:$0xff]  }
 0x313   : > { %v4498_v21 = vpop.f32.mrf.mxu0 }
 0x314   : > { %v4593_v24 = vadd.f32 %v4495_v37, %v4274_v5  ;;  %3150 = vmatmul.bf16.gmra.mxu1 %v2975_v52  ;;  %3584 = vmatmul.bf16.gmra.mxu2 %v6291_v22  ;;  %v6620_v37 = vld [vmem:[%s6829_s12 + $0x9c] sm:$0xff]  ;;  %v4009_v5 = vsel %vm1086_vm0, %v4004_v33, %v4008_v58 }
 0x315   : > { %4218 = vmatmul.bf16.gmra.mxu3 %v4001_v49  ;;  %v2976_v2 = vrot.slane %v6620_v37, 1 }
 0x316   : > { %4537 = vmatmul.bf16.gmra.mxu0 %v4362_v30  ;;  %v4691_v44 = vadd.f32 %v7484_v27, %v4593_v24  ;;  %v7634_v30 = vld [vmem:[%s6829_s12 + $0xb0] sm:$0xff] }
 0x317   : > { %v3545_v29 = vpop.f32.mrf.mxu2  ;;  %v2977_v13 = vsel %vm1553_vm1, %v2974_v60, %v2976_v2  ;;  %v4365_v15 = vrot.slane %v7634_v30, 1 }
 0x318   : > { %v4787_v7 = vadd.f32 %v6377_v6, %v4691_v44  ;;  %v3641_v54 = vadd.f32 %v3545_v29, %v3207_v10  ;;  %v4179_v45 = vpop.f32.mrf.mxu3  ;;  %v4010_v10 = vshrl.u32 %v7619_v14, 16 }
 0x319   : > { %v3113_v32 = vpop.f32.mrf.mxu1 }
 0x31a   : > { %v4819_v46 = vmax.f32 %v4787_v7, 0.0  ;;  %v4275_v28 = vadd.f32 %v4179_v45, %v3641_v54  ;;  %v4014_v7 = vshll.u32 %v7634_v30, 16  ;;  %v6381_v54 = vunpack.c.l.bf16 %v6495_v48  ;;  %v6510_v45 = vld [vmem:[%s7479_s16 + $0x30] sm:$0xff]   ;;  %v6621_v32 = vld [vmem:[%s6829_s12 + $0xa4] sm:$0xff] }
 0x31b   : > { %v4500_v34 = vpop.f32.mrf.mxu0 }
 0x31c   : > { %v4915_v23 = vadd.f32 %v6441_v59, %v4819_v46  ;;  %v4594_v0 = vadd.f32 %v4498_v21, %v4275_v28  ;;  %v2978_v46 = vrot.slane %v6621_v32, 1  ;;  %v4016_v63 = vrot.slane %v4014_v7, 1 }
 0x31e   : > { %4947 = vst [vmem:[%s7499_s7 + $0x50] sm:$0xff] %v4915_v23  ;;  %v4692_v50 = vadd.f32 %v7484_v27, %v4594_v0  ;;  %v6445_v0 = vunpack.c.l.bf16 %v6510_v45 }
 0x31f   : > { %v3547_v57 = vpop.f32.mrf.mxu2 }
 0x320   : > { %v4788_v1 = vadd.f32 %v6378_v51, %v4692_v50  ;;  %v4181_v31 = vpop.f32.mrf.mxu3  ;;  %v6293_v50 = vld [vmem:[%s6829_s12 + $0xa8] sm:$0xff]  ;;  %v2979_v57 = vsel %vm1553_vm1, %v2976_v2, %v2978_v46  ;;  %v7651_v2 = vld [vmem:[%s6829_s12 + $0xb8] sm:$0xff] }
 0x321   : > { %v3116_v22 = vpop.f32.mrf.mxu1 }
 0x322   : > { %v4820_v3 = vmax.f32 %v4788_v1, 0.0  ;;  %v3209_v49 = vadd.f32 %v3116_v22, %v7283_v20  ;;  %v4012_v20 = vor.u32 %v4010_v10, %v4008_v58 }
 0x323   : > { %v4503_v52 = vpop.f32.mrf.mxu0 }
 0x324   : > { %v4916_v21 = vadd.f32 %v6442_v8, %v4820_v3  ;;  %3155 = vmatmul.bf16.gmra.mxu1 %v2977_v13  ;;  %3589 = vmatmul.bf16.gmra.mxu2 %v6292_v4  ;;  %v4017_v31 = vsel %vm1086_vm0, %v4012_v20, %v4016_v63  ;;  %v6382_v13 = vunpack.c.h.bf16 %v6495_v48  ;;  %v6294_v20 = vld [vmem:[%s6829_s12 + $0xb0] sm:$0xff] }
 0x325   : > { %4223 = vmatmul.bf16.gmra.mxu3 %v4009_v5 }
 0x326   : > { %4542 = vmatmul.bf16.gmra.mxu0 %v4364_v47  ;;  %4948 = vst [vmem:[%s7499_s7 + $0x58] sm:$0xff] %v4916_v21  ;;  %v6446_v47 = vunpack.c.h.bf16 %v6510_v45 }
 0x327   : > { %v3550_v60 = vpop.f32.mrf.mxu2 }
 0x328   : > { %v3643_v24 = vadd.f32 %v3550_v60, %v3209_v49  ;;  %v4184_v6 = vpop.f32.mrf.mxu3 }
 0x329   : > { %v3118_v44 = vpop.f32.mrf.mxu1 }
 0x32a   : > { %v4277_v35 = vadd.f32 %v4184_v6, %v3643_v24  ;;  %v3210_v34 = vadd.f32 %v3118_v44, %v7290_v25  ;;  %v4366_v25 = vsel %vm1553_vm1, %v4363_v36, %v4365_v15  ;;  %v4018_v24 = vshrl.u32 %v7634_v30, 16  ;;  %v6622_v44 = vld [vmem:[%s6829_s12 + $0xac] sm:$0xff] }
 0x32b   : > { %v4505_v29 = vpop.f32.mrf.mxu0  ;;  %v4022_v6 = vshll.u32 %v7651_v2, 16  ;;  %v2980_v10 = vrot.slane %v6622_v44, 1 }
 0x32c   : > { %v4596_v59 = vadd.f32 %v4503_v52, %v4277_v35 }
 0x32d   : > { %v4024_v7 = vrot.slane %v4022_v6, 1 }
 0x32e   : > { %v4693_v28 = vadd.f32 %v7484_v27, %v4596_v59  ;;  %v4367_v59 = vrot.slane %v7651_v2, 1 }
 0x32f   : > { %v3552_v23 = vpop.f32.mrf.mxu2 }
 0x330   : > { %v4789_v14 = vadd.f32 %v6381_v54, %v4693_v28  ;;  %v3644_v51 = vadd.f32 %v3552_v23, %v3210_v34  ;;  %v4186_v37 = vpop.f32.mrf.mxu3  ;;  %v6496_v28 = vld [vmem:[%s7469_s14 + $0x38] sm:$0xff]   ;;  %v2981_v34 = vsel %vm1553_vm1, %v2978_v46, %v2980_v10 }
 0x331   : > { %v3121_v33 = vpop.f32.mrf.mxu1 }
 0x332   : > { %v4821_v1 = vmax.f32 %v4789_v14, 0.0  ;;  %v4278_v58 = vadd.f32 %v4186_v37, %v3644_v51  ;;  %v6385_v51 = vunpack.c.l.bf16 %v6496_v28  ;;  %v6511_v37 = vld [vmem:[%s7479_s16 + $0x38] sm:$0xff]  }
 0x333   : > { %v4508_v8 = vpop.f32.mrf.mxu0  ;;  %v6450_v44 = vunpack.c.h.bf16 %v6511_v37 }
 0x334   : > { %v4917_v4 = vadd.f32 %v6445_v0, %v4821_v1  ;;  %v4597_v22 = vadd.f32 %v4505_v29, %v4278_v58  ;;  %3160 = vmatmul.bf16.gmra.mxu1 %v2979_v57  ;;  %3594 = vmatmul.bf16.gmra.mxu2 %v6293_v50  ;;  %v4020_v29 = vor.u32 %v4018_v24, %v4016_v63  ;;  %v7668_v57 = vld [vmem:[%s6829_s12 + $0xc0] sm:$0xff]  ;;  %v6449_v58 = vunpack.c.l.bf16 %v6511_v37 }
 0x335   : > { %4228 = vmatmul.bf16.gmra.mxu3 %v4017_v31  ;;  %v4369_v24 = vrot.slane %v7668_v57, 1 }
 0x336   : > { %4547 = vmatmul.bf16.gmra.mxu0 %v4366_v25  ;;  %4949 = vst [vmem:[%s7499_s7 + $0x60] sm:$0xff] %v4917_v4  ;;  %v4694_v3 = vadd.f32 %v7484_v27, %v4597_v22  ;;  %v4025_v0 = vsel %vm1086_vm0, %v4020_v29, %v4024_v7 }
 0x337   : > { %v3555_v52 = vpop.f32.mrf.mxu2 }
 0x338   : > { %v4790_v5 = vadd.f32 %v6382_v13, %v4694_v3  ;;  %v4189_v21 = vpop.f32.mrf.mxu3  ;;  %v4026_v13 = vshrl.u32 %v7651_v2, 16  ;;  %v4030_v3 = vshll.u32 %v7668_v57, 16 }
 0x339   : > { %v3123_v49 = vpop.f32.mrf.mxu1 }
 0x33a   : > { %v4822_v36 = vmax.f32 %v4790_v5, 0.0  ;;  %v3212_v35 = vadd.f32 %v3123_v49, %v7303_v56  ;;  %v4368_v56 = vsel %vm1553_vm1, %v4365_v15, %v4367_v59  ;;  %v6386_v5 = vunpack.c.h.bf16 %v6496_v28 }
 0x33b   : > { %v4510_v60 = vpop.f32.mrf.mxu0 }
 0x33c   : > { %v4918_v48 = vadd.f32 %v6446_v47, %v4822_v36  ;;  %v6623_v47 = vld [vmem:[%s6829_s12 + $0xb4] sm:$0xff]  ;;  %v4028_v36 = vor.u32 %v4026_v13, %v4024_v7  ;;  %v4370_v7 = vsel %vm1553_vm1, %v4367_v59, %v4369_v24 }
 0x33d   : > { %v2982_v21 = vrot.slane %v6623_v47, 1 }
 0x33e   : > { %4950 = vst [vmem:[%s7499_s7 + $0x68] sm:$0xff] %v4918_v48 }
 0x33f   : > { %v3557_v54 = vpop.f32.mrf.mxu2 }
 0x340   : > { %v3646_v45 = vadd.f32 %v3557_v54, %v3212_v35  ;;  %v4191_v32 = vpop.f32.mrf.mxu3  ;;  %v6295_v35 = vld [vmem:[%s6829_s12 + $0xb8] sm:$0xff]  ;;  %v2983_v54 = vsel %vm1553_vm1, %v2980_v10, %v2982_v21 }
 0x341   : > { %v3126_v30 = vpop.f32.mrf.mxu1 }
 0x342   : > { %v4280_v23 = vadd.f32 %v4191_v32, %v3646_v45  ;;  %v3213_v33 = vadd.f32 %v3126_v30, %v7324_v62 }
 0x343   : > { %v4513_v14 = vpop.f32.mrf.mxu0 }
 0x344   : > { %v4599_v63 = vadd.f32 %v4510_v60, %v4280_v23  ;;  %3165 = vmatmul.bf16.gmra.mxu1 %v2981_v34  ;;  %3599 = vmatmul.bf16.gmra.mxu2 %v6294_v20  ;;  %v4032_v60 = vrot.slane %v4030_v3, 1  ;;  %v7683_v34 = vld [vmem:[%s6829_s12 + $0xc8] sm:$0xff] }
 0x345   : > { %4233 = vmatmul.bf16.gmra.mxu3 %v4025_v0  ;;  %v6497_v0 = vld [vmem:[%s7469_s14 + $0x40] sm:$0xff]   ;;  %v4038_v37 = vshll.u32 %v7683_v34, 16 }
 0x346   : > { %4552 = vmatmul.bf16.gmra.mxu0 %v4368_v56  ;;  %v4695_v50 = vadd.f32 %v7484_v27, %v4599_v63  ;;  %v4033_v20 = vsel %vm1086_vm0, %v4028_v36, %v4032_v60  ;;  %v4034_v63 = vshrl.u32 %v7668_v57, 16 }
 0x347   : > { %v3560_v46 = vpop.f32.mrf.mxu2 }
 0x348   : > { %v4791_v1 = vadd.f32 %v6385_v51, %v4695_v50  ;;  %v3647_v8 = vadd.f32 %v3560_v46, %v3213_v33  ;;  %v4194_v15 = vpop.f32.mrf.mxu3  ;;  %v6389_v33 = vunpack.c.l.bf16 %v6497_v0  ;;  %v6512_v46 = vld [vmem:[%s7479_s16 + $0x40] sm:$0xff]  }
 0x349   : > { %v3128_v31 = vpop.f32.mrf.mxu1 }
 0x34a   : > { %v4823_v25 = vmax.f32 %v4791_v1, 0.0  ;;  %v4281_v4 = vadd.f32 %v4194_v15, %v3647_v8  ;;  %v6624_v1 = vld [vmem:[%s6829_s12 + $0xbc] sm:$0xff]  ;;  %v4040_v31 = vrot.slane %v4038_v37, 1 }
 0x34b   : > { %v4515_v22 = vpop.f32.mrf.mxu0 }
 0x34c   : > { %v4919_v52 = vadd.f32 %v6449_v58, %v4823_v25  ;;  %v4600_v62 = vadd.f32 %v4513_v14, %v4281_v4  ;;  %v2984_v58 = vrot.slane %v6624_v1, 1  ;;  %v4371_v25 = vrot.slane %v7683_v34, 1 }
 0x34d   : > { %v6453_v22 = vunpack.c.l.bf16 %v6512_v46 }
 0x34e   : > { %4951 = vst [vmem:[%s7499_s7 + $0x70] sm:$0xff] %v4919_v52  ;;  %v4696_v49 = vadd.f32 %v7484_v27, %v4600_v62  ;;  %v6296_v52 = vld [vmem:[%s6829_s12 + $0xc0] sm:$0xff] }
 0x34f   : > { %v3562_v6 = vpop.f32.mrf.mxu2 }
 0x350   : > { %v4792_v48 = vadd.f32 %v6386_v5, %v4696_v49  ;;  %v4196_v2 = vpop.f32.mrf.mxu3  ;;  %v2985_v5 = vsel %vm1553_vm1, %v2982_v21, %v2984_v58  ;;  %v7700_v21 = vld [vmem:[%s6829_s12 + $0xd0] sm:$0xff] }
 0x351   : > { %v3131_v29 = vpop.f32.mrf.mxu1 }
 0x352   : > { %v4824_v45 = vmax.f32 %v4792_v48, 0.0  ;;  %v3215_v30 = vadd.f32 %v3131_v29, %v7335_v43  ;;  %v4036_v43 = vor.u32 %v4034_v63, %v4032_v60 }
 0x353   : > { %v4518_v32 = vpop.f32.mrf.mxu0 }
 0x354   : > { %v4920_v28 = vadd.f32 %v6450_v44, %v4824_v45  ;;  %3170 = vmatmul.bf16.gmra.mxu1 %v2983_v54  ;;  %3604 = vmatmul.bf16.gmra.mxu2 %v6295_v35  ;;  %v4041_v60 = vsel %vm1086_vm0, %v4036_v43, %v4040_v31  ;;  %v6390_v44 = vunpack.c.h.bf16 %v6497_v0  ;;  %v6454_v54 = vunpack.c.h.bf16 %v6512_v46 }
 0x355   : > { %4238 = vmatmul.bf16.gmra.mxu3 %v4033_v20 }
 0x356   : > { %4557 = vmatmul.bf16.gmra.mxu0 %v4370_v7  ;;  %4952 = vst [vmem:[%s7499_s7 + $0x78] sm:$0xff] %v4920_v28  ;;  %v4042_v7 = vshrl.u32 %v7683_v34, 16  ;;  %v4046_v28 = vshll.u32 %v7700_v21, 16 }
 0x357   : > { %v3565_v10 = vpop.f32.mrf.mxu2 }
 0x358   : > { %v3649_v23 = vadd.f32 %v3565_v10, %v3215_v30  ;;  %v4199_v14 = vpop.f32.mrf.mxu3  ;;  %v6625_v10 = vld [vmem:[%s6829_s12 + $0xc4] sm:$0xff]  ;;  %v4048_v0 = vrot.slane %v4046_v28, 1 }
 0x359   : > { %v3133_v56 = vpop.f32.mrf.mxu1 }
 0x35a   : > { %v4283_v59 = vadd.f32 %v4199_v14, %v3649_v23  ;;  %v3216_v15 = vadd.f32 %v3133_v56, %v7342_v18  ;;  %v4372_v18 = vsel %vm1553_vm1, %v4369_v24, %v4371_v25  ;;  %v2986_v23 = vrot.slane %v6625_v10, 1 }
 0x35b   : > { %v4520_v51 = vpop.f32.mrf.mxu0  ;;  %v4044_v14 = vor.u32 %v4042_v7, %v4040_v31  ;;  %v4373_v56 = vrot.slane %v7700_v21, 1 }
 0x35c   : > { %v4602_v50 = vadd.f32 %v4518_v32, %v4283_v59  ;;  %v3721_v59 = vld [vmem:[%s6829_s12 + $0xd8] sm:$0x1]  ;;  %v2987_v46 = vsel %vm1553_vm1, %v2984_v58, %v2986_v23 }
 0x35e   : > { %v4697_v8 = vadd.f32 %v7484_v27, %v4602_v50  ;;  %v6297_v50 = vld [vmem:[%s6829_s12 + $0xc8] sm:$0xff] }
 0x35f   : > { %v3567_v4 = vpop.f32.mrf.mxu2 }
 0x360   : > { %v4793_v57 = vadd.f32 %v6389_v33, %v4697_v8  ;;  %v3650_v13 = vadd.f32 %v3567_v4, %v3216_v15  ;;  %v4201_v3 = vpop.f32.mrf.mxu3  ;;  %v6498_v33 = vld [vmem:[%s7469_s14 + $0x48] sm:$0xff]   ;;  %v4049_v8 = vsel %vm1086_vm0, %v4044_v14, %v4048_v0  ;;  %v3836_v15 = vunpack.c.l.b16 %v3721_v59 }
 0x361   : > { %v3136_v62 = vpop.f32.mrf.mxu1  ;;  %v6393_v4 = vunpack.c.l.bf16 %v6498_v33 }
 0x362   : > { %v4825_v47 = vmax.f32 %v4793_v57, 0.0  ;;  %v4284_v49 = vadd.f32 %v4201_v3, %v3650_v13  ;;  %v6513_v57 = vld [vmem:[%s7479_s16 + $0x48] sm:$0xff]   ;;  %v3861_v3 = vpack.c.b16 %v3836_v15, %v3836_v15 }
 0x363   : > { %v4523_v36 = vpop.f32.mrf.mxu0  ;;  %v6457_v62 = vunpack.c.l.bf16 %v6513_v57  ;;  %v6458_v7 = vunpack.c.h.bf16 %v6513_v57 }
 0x364   : > { %v4921_v6 = vadd.f32 %v6453_v22, %v4825_v47  ;;  %v4603_v48 = vadd.f32 %v4520_v51, %v4284_v49  ;;  %3175 = vmatmul.bf16.gmra.mxu1 %v2985_v5  ;;  %3609 = vmatmul.bf16.gmra.mxu2 %v6296_v52  ;;  %v7718_v22 = vld [vmem:[%s7820_s2] ss:$0 sm:$0xff] }
 0x365   : > { %4243 = vmatmul.bf16.gmra.mxu3 %v4041_v60 }
 0x366   : > { %4562 = vmatmul.bf16.gmra.mxu0 %v4372_v18  ;;  %4953 = vst [vmem:[%s7499_s7 + $0x80] sm:$0xff] %v4921_v6  ;;  %v4698_v2 = vadd.f32 %v7484_v27, %v4603_v48  ;;  %v4050_v6 = vshrl.u32 %v7700_v21, 16  ;;  %v4054_v48 = vshll.u32 %v3861_v3, 16 }
 0x367   : > { %v3570_v35 = vpop.f32.mrf.mxu2 }
 0x368   : > { %v4794_v29 = vadd.f32 %v6390_v44, %v4698_v2  ;;  %v4204_v45 = vpop.f32.mrf.mxu3  ;;  %v6394_v35 = vunpack.c.h.bf16 %v6498_v33  ;;  %v6499_v33 = vld [vmem:[%s7469_s14 + $0x50] sm:$0xff]  }
 0x369   : > { %v3138_v24 = vpop.f32.mrf.mxu1  ;;  %v4056_v45 = vrot.slane %v4054_v48, 1 }
 0x36a   : > { %v4826_v32 = vmax.f32 %v4794_v29, 0.0  ;;  %v3218_v27 = vadd.f32 %v3138_v24, %v7353_v41  ;;  %v4374_v41 = vsel %vm1553_vm1, %v4371_v25, %v4373_v56  ;;  %v4375_v24 = vrot.slane %v3861_v3, 1 }
 0x36b   : > { %v4525_v20 = vpop.f32.mrf.mxu0 }
 0x36c   : > { %v4922_v30 = vadd.f32 %v6454_v54, %v4826_v32  ;;  %v4052_v54 = vor.u32 %v4050_v6, %v4048_v0 }
 0x36e   : > { %4954 = vst [vmem:[%s7499_s7 + $0x88] sm:$0xff] %v4922_v30  ;;  %v6298_v30 = vld [vmem:[%s6829_s12 + $0xd0] sm:$0xff]  ;;  %s6346_s12 = sshll.u32 %s6700_s21, 8  ;;  %s4970_s21 = scalar_lea.sflag [#allocation4], %s325_s27 }
 0x36f   : > { %v3572_v63 = vpop.f32.mrf.mxu2  ;;  %s4982_s13 = scalar_lea.hbm %s7823_s5, %s6346_s12 }
 0x370   : > { %v3652_v51 = vadd.f32 %v3572_v63, %v3218_v27  ;;  %v4206_v37 = vpop.f32.mrf.mxu3  ;;  %v4376_v63 = vsel %vm1553_vm1, %v4373_v56, %v4375_v24  ;;  %v6514_v56 = vld [vmem:[%s7479_s16 + $0x50] sm:$0xff]   ;;  %s4985_s25 = sshll.u32 %s4982_s13, 4  ;;  %s4986_s25 = int_to_ptr.hbm [resolvable:$true] %s4985_s25 }
 0x371   : > { %v3141_v34 = vpop.f32.mrf.mxu1  ;;  %s6644_s15 = sshra.s32 %s4986_s25, 4  ;;  %s6645_s15 = int_to_ptr.hbm [resolvable:$true] %s6644_s15 }
 0x372   : > { %v4286_v1 = vadd.f32 %v4206_v37, %v3652_v51  ;;  %v3219_v13 = vadd.f32 %v3141_v34, %v7359_v55  ;;  %v2988_v55 = vrot.slane %v7356_v26, 1  ;;  %v4057_v26 = vsel %vm1086_vm0, %v4052_v54, %v4056_v45  ;;  %v6500_v54 = vld [vmem:[%s7469_s14 + $0x58] sm:$0xff]   ;;  %p6651_p1 = scmp.lt.s32.totalorder %s6645_s15, %s7823_s5 }
 0x373   : > { %v4528_v43 = vpop.f32.mrf.mxu0 }
 0x374   : > { %v4605_v31 = vadd.f32 %v4525_v20, %v4286_v1  ;;  %3180 = vmatmul.bf16.gmra.mxu1 %v2987_v46  ;;  %3614 = vmatmul.bf16.gmra.mxu2 %v6297_v50  ;;  %v2989_v21 = vsel %vm1553_vm1, %v2986_v23, %v2988_v55 }
 0x375   : > { %4248 = vmatmul.bf16.gmra.mxu3 %v4049_v8 }
 0x376   : > { %4567 = vmatmul.bf16.gmra.mxu0 %v4374_v41  ;;  %v4699_v58 = vadd.f32 %v7718_v22, %v4605_v31 }
 0x377   : > { %v3575_v25 = vpop.f32.mrf.mxu2 }
 0x378   : > { %v4795_v52 = vadd.f32 %v6393_v4, %v4699_v58  ;;  %v3653_v5 = vadd.f32 %v3575_v25, %v3219_v13  ;;  %v4209_v47 = vpop.f32.mrf.mxu3  ;;  %v6461_v4 = vunpack.c.l.bf16 %v6514_v56 }
 0x379   : > { %v3143_v49 = vpop.f32.mrf.mxu1 }
 0x37a   : > { %v4827_v36 = vmax.f32 %v4795_v52, 0.0  ;;  %v4287_v60 = vadd.f32 %v4209_v47, %v3653_v5  ;;  %v6398_v5 = vunpack.c.h.bf16 %v6499_v33 }
 0x37b   : > { %v4530_v18 = vpop.f32.mrf.mxu0 }
 0x37c   : > { %v4923_v44 = vadd.f32 %v6457_v62, %v4827_v36  ;;  %v4606_v2 = vadd.f32 %v4528_v43, %v4287_v60  ;;  %v6397_v43 = vunpack.c.l.bf16 %v6499_v33  ;;  %v6402_v33 = vunpack.c.h.bf16 %v6500_v54 }
 0x37e   : > { %4955 = vst [vmem:[%s7499_s7 + $0x90] sm:$0xff] %v4923_v44  ;;  %v4700_v29 = vadd.f32 %v7718_v22, %v4606_v2 }
 0x37f   : > { %v3577_v32 = vpop.f32.mrf.mxu2 }
 0x380   : > { %v4796_v20 = vadd.f32 %v6394_v35, %v4700_v29  ;;  %v4211_v28 = vpop.f32.mrf.mxu3 }
 0x381   : > { %v3146_v10 = vpop.f32.mrf.mxu1  ;;  %v6515_v28 = vld [vmem:[%s7479_s16 + $0x58] sm:$0xff]  }
 0x382   : > { %v4828_v27 = vmax.f32 %v4796_v20, 0.0  ;;  %v3221_v0 = vadd.f32 %v3146_v10, %v7372_v53 }
 0x383   : > { %v4533_v14 = vpop.f32.mrf.mxu0 }
 0x384   : > { %v4924_v59 = vadd.f32 %v6458_v7, %v4828_v27  ;;  %3185 = vmatmul.bf16.gmra.mxu1 %v2989_v21  ;;  %3619 = vmatmul.bf16.gmra.mxu2 %v6298_v30  ;;  %v6401_v7 = vunpack.c.l.bf16 %v6500_v54 }
 0x385   : > { %4253 = vmatmul.bf16.gmra.mxu3 %v4057_v26 }
 0x386   : > { %4572 = vmatmul.bf16.gmra.mxu0 %v4376_v63  ;;  %4956 = vst [vmem:[%s7499_s7 + $0x98] sm:$0xff] %v4924_v59 }
 0x387   : > { %v3580_v51 = vpop.f32.mrf.mxu2 }
 0x388   : > { %v3655_v37 = vadd.f32 %v3580_v51, %v3221_v0  ;;  %v4214_v50 = vpop.f32.mrf.mxu3 }
 0x389   : > { %v3148_v23 = vpop.f32.mrf.mxu1 }
 0x38a   : > { %v4289_v34 = vadd.f32 %v4214_v50, %v3655_v37  ;;  %v3222_v41 = vadd.f32 %v3148_v23, %v7380_v38  ;;  %v6462_v38 = vunpack.c.h.bf16 %v6514_v56 }
 0x38b   : > { %v4535_v46 = vpop.f32.mrf.mxu0 }
 0x38c   : > { %v4608_v1 = vadd.f32 %v4533_v14, %v4289_v34  ;;  %v6465_v14 = vunpack.c.l.bf16 %v6515_v28 }
 0x38e   : > { %v4701_v8 = vadd.f32 %v7718_v22, %v4608_v1 }
 0x38f   : > { %v3582_v15 = vpop.f32.mrf.mxu2 }
 0x390   : > { %v4797_v31 = vadd.f32 %v6397_v43, %v4701_v8  ;;  %v3656_v57 = vadd.f32 %v3582_v15, %v3222_v41  ;;  %v4216_v53 = vpop.f32.mrf.mxu3 }
 0x391   : > { %v3151_v58 = vpop.f32.mrf.mxu1 }
 0x392   : > { %v4829_v13 = vmax.f32 %v4797_v31, 0.0  ;;  %v4290_v3 = vadd.f32 %v4216_v53, %v3656_v57  ;;  %v6501_v53 = vld [vmem:[%s7469_s14 + $0x60] sm:$0xff]  }
 0x393   : > { %v4538_v25 = vpop.f32.mrf.mxu0 }
 0x394   : > { %v4925_v52 = vadd.f32 %v6461_v4, %v4829_v13  ;;  %v4609_v62 = vadd.f32 %v4535_v46, %v4290_v3 }
 0x396   : > { %4957 = vst [vmem:[%s7499_s7 + $0xa0] sm:$0xff] %v4925_v52  ;;  %v4702_v47 = vadd.f32 %v7718_v22, %v4609_v62  ;;  %v6405_v52 = vunpack.c.l.bf16 %v6501_v53  ;;  %v6516_v62 = vld [vmem:[%s7479_s16 + $0x60] sm:$0xff]  }
 0x397   : > { %v3585_v49 = vpop.f32.mrf.mxu2 }
 0x398   : > { %v4798_v36 = vadd.f32 %v6398_v5, %v4702_v47  ;;  %v4219_v60 = vpop.f32.mrf.mxu3 }
 0x399   : > { %v3153_v18 = vpop.f32.mrf.mxu1 }
 0x39a   : > { %v4830_v6 = vmax.f32 %v4798_v36, 0.0  ;;  %v3224_v2 = vadd.f32 %v3153_v18, %v7389_v9 }
 0x39b   : > { %v4540_v48 = vpop.f32.mrf.mxu0 }
 0x39c   : > { %v4926_v44 = vadd.f32 %v6462_v38, %v4830_v6  ;;  %v6469_v38 = vunpack.c.l.bf16 %v6516_v62 }
 0x39e   : > { %4958 = vst [vmem:[%s7499_s7 + $0xa8] sm:$0xff] %v4926_v44 }
 0x39f   : > { %v3587_v35 = vpop.f32.mrf.mxu2 }
 0x3a0   : > { %v3658_v55 = vadd.f32 %v3587_v35, %v3224_v2  ;;  %v4221_v29 = vpop.f32.mrf.mxu3 }
 0x3a1   : > { %v3156_v45 = vpop.f32.mrf.mxu1 }
 0x3a2   : > { %v4292_v24 = vadd.f32 %v4221_v29, %v3658_v55  ;;  %v3225_v10 = vadd.f32 %v3156_v45, %v7393_v17  ;;  %v6466_v17 = vunpack.c.h.bf16 %v6515_v28  ;;  %v6406_v55 = vunpack.c.h.bf16 %v6501_v53 }
 0x3a3   : > { %v4543_v32 = vpop.f32.mrf.mxu0 }
 0x3a4   : > { %v4611_v20 = vadd.f32 %v4540_v48, %v4292_v24 }
 0x3a6   : > { %v4703_v30 = vadd.f32 %v7718_v22, %v4611_v20 }
 0x3a7   : > { %v3590_v21 = vpop.f32.mrf.mxu2 }
 0x3a8   : > { %v4799_v27 = vadd.f32 %v6401_v7, %v4703_v30  ;;  %v3659_v26 = vadd.f32 %v3590_v21, %v3225_v10  ;;  %v4224_v9 = vpop.f32.mrf.mxu3 }
 0x3a9   : > { %v3158_v63 = vpop.f32.mrf.mxu1 }
 0x3aa   : > { %v4831_v59 = vmax.f32 %v4799_v27, 0.0  ;;  %v4293_v0 = vadd.f32 %v4224_v9, %v3659_v26 }
 0x3ab   : > { %v4545_v51 = vpop.f32.mrf.mxu0 }
 0x3ac   : > { %v4927_v37 = vadd.f32 %v6465_v14, %v4831_v59  ;;  %v4612_v50 = vadd.f32 %v4543_v32, %v4293_v0  ;;  %v6502_v14 = vld [vmem:[%s7469_s14 + $0x68] sm:$0xff]  }
 0x3ad   : > { %v6409_v0 = vunpack.c.l.bf16 %v6502_v14  ;;  %v6517_v51 = vld [vmem:[%s7479_s16 + $0x68] sm:$0xff]  }
 0x3ae   : > { %4959 = vst [vmem:[%s7499_s7 + $0xb0] sm:$0xff] %v4927_v37  ;;  %v4704_v23 = vadd.f32 %v7718_v22, %v4612_v50 }
 0x3af   : > { %v3592_v34 = vpop.f32.mrf.mxu2 }
 0x3b0   : > { %v4800_v46 = vadd.f32 %v6402_v33, %v4704_v23  ;;  %v4226_v1 = vpop.f32.mrf.mxu3  ;;  %v6473_v34 = vunpack.c.l.bf16 %v6517_v51 }
 0x3b1   : > { %v3161_v43 = vpop.f32.mrf.mxu1 }
 0x3b2   : > { %v4832_v56 = vmax.f32 %v4800_v46, 0.0  ;;  %v3227_v15 = vadd.f32 %v3161_v43, %v7402_v61 }
 0x3b3   : > { %v4548_v8 = vpop.f32.mrf.mxu0 }
 0x3b4   : > { %v4928_v41 = vadd.f32 %v6466_v17, %v4832_v56 }
 0x3b6   : > { %4960 = vst [vmem:[%s7499_s7 + $0xb8] sm:$0xff] %v4928_v41 }
 0x3b7   : > { %v3595_v31 = vpop.f32.mrf.mxu2 }
 0x3b8   : > { %v3661_v4 = vadd.f32 %v3595_v31, %v3227_v15  ;;  %v4229_v57 = vpop.f32.mrf.mxu3  ;;  %v6410_v15 = vunpack.c.h.bf16 %v6502_v14 }
 0x3b9   : > { %v3163_v58 = vpop.f32.mrf.mxu1 }
 0x3ba   : > { %v4295_v13 = vadd.f32 %v4229_v57, %v3661_v4  ;;  %v3228_v47 = vadd.f32 %v3163_v58, %v7410_v19  ;;  %v6470_v19 = vunpack.c.h.bf16 %v6516_v62 }
 0x3bb   : > { %v4550_v3 = vpop.f32.mrf.mxu0 }
 0x3bc   : > { %v4614_v25 = vadd.f32 %v4548_v8, %v4295_v13 }
 0x3be   : > { %v4705_v5 = vadd.f32 %v7718_v22, %v4614_v25 }
 0x3bf   : > { %v3597_v49 = vpop.f32.mrf.mxu2 }
 0x3c0   : > { %v4801_v36 = vadd.f32 %v6405_v52, %v4705_v5  ;;  %v3662_v60 = vadd.f32 %v3597_v49, %v3228_v47  ;;  %v4231_v61 = vpop.f32.mrf.mxu3  ;;  %v6503_v49 = vld [vmem:[%s7469_s14 + $0x70] sm:$0xff]  }
 0x3c1   : > { %v3166_v18 = vpop.f32.mrf.mxu1 }
 0x3c2   : > { %v4833_v6 = vmax.f32 %v4801_v36, 0.0  ;;  %v4296_v48 = vadd.f32 %v4231_v61, %v3662_v60  ;;  %v6413_v18 = vunpack.c.l.bf16 %v6503_v49 }
 0x3c3   : > { %v4553_v44 = vpop.f32.mrf.mxu0 }
 0x3c4   : > { %v4929_v2 = vadd.f32 %v6469_v38, %v4833_v6  ;;  %v4615_v35 = vadd.f32 %v4550_v3, %v4296_v48  ;;  %v6518_v6 = vld [vmem:[%s7479_s16 + $0x70] sm:$0xff]  }
 0x3c6   : > { %4961 = vst [vmem:[%s7499_s7 + $0xc0] sm:$0xff] %v4929_v2  ;;  %v4706_v29 = vadd.f32 %v7718_v22, %v4615_v35 }
 0x3c7   : > { %v3600_v54 = vpop.f32.mrf.mxu2 }
 0x3c8   : > { %v4802_v45 = vadd.f32 %v6406_v55, %v4706_v29  ;;  %v4234_v24 = vpop.f32.mrf.mxu3  ;;  %v6477_v55 = vunpack.c.l.bf16 %v6518_v6 }
 0x3c9   : > { %v3168_v32 = vpop.f32.mrf.mxu1 }
 0x3ca   : > { %v4834_v20 = vmax.f32 %v4802_v45, 0.0  ;;  %v3230_v30 = vadd.f32 %v3168_v32, %v7419_v42 }
 0x3cb   : > { %v4555_v7 = vpop.f32.mrf.mxu0 }
 0x3cc   : > { %v4930_v28 = vadd.f32 %v6470_v19, %v4834_v20 }
 0x3ce   : > { %4962 = vst [vmem:[%s7499_s7 + $0xc8] sm:$0xff] %v4930_v28 }
 0x3cf   : > { %v3602_v10 = vpop.f32.mrf.mxu2 }
 0x3d0   : > { %v3664_v21 = vadd.f32 %v3602_v10, %v3230_v30  ;;  %v4236_v27 = vpop.f32.mrf.mxu3 }
 0x3d1   : > { %v3171_v26 = vpop.f32.mrf.mxu1 }
 0x3d2   : > { %v4298_v9 = vadd.f32 %v4236_v27, %v3664_v21  ;;  %v3231_v50 = vadd.f32 %v3171_v26, %v7423_v12  ;;  %v6474_v12 = vunpack.c.h.bf16 %v6517_v51 }
 0x3d3   : > { %v4558_v63 = vpop.f32.mrf.mxu0 }
 0x3d4   : > { %v4617_v59 = vadd.f32 %v4555_v7, %v4298_v9  ;;  %v6414_v7 = vunpack.c.h.bf16 %v6503_v49 }
 0x3d6   : > { %v4707_v37 = vadd.f32 %v7718_v22, %v4617_v59 }
 0x3d7   : > { %v3605_v33 = vpop.f32.mrf.mxu2 }
 0x3d8   : > { %v4803_v23 = vadd.f32 %v6409_v0, %v4707_v37  ;;  %v3665_v46 = vadd.f32 %v3605_v33, %v3231_v50  ;;  %v4239_v42 = vpop.f32.mrf.mxu3  ;;  %v6504_v37 = vld [vmem:[%s7469_s14 + $0x78] sm:$0xff]   ;;  %s4983_s14 = sshll.u32 %s7499_s7, 4  ;;  %s4984_s14 = int_to_ptr.vmem [resolvable:$true] %s4983_s14 }
 0x3d9   : > { %v3173_v17 = vpop.f32.mrf.mxu1 }
 0x3da   : > { %v4835_v1 = vmax.f32 %v4803_v23, 0.0  ;;  %v4299_v43 = vadd.f32 %v4239_v42, %v3665_v46  ;;  %v6417_v46 = vunpack.c.l.bf16 %v6504_v37  ;;  %v6519_v42 = vld [vmem:[%s7479_s16 + $0x78] sm:$0xff]   ;;  %s6646_s16 = scalar_lea.hbm %s6645_s15, 256 }
 0x3db   : > { %v4560_v56 = vpop.f32.mrf.mxu0  ;;  %p6647_p12 = scmp.ne.s32.totalorder %s6645_s15, %s6646_s16  ;;  %p6652_p2 = scmp.lt.s32.totalorder %s6650_s29, %s6646_s16 }
 0x3dc   : > { %v4931_v8 = vadd.f32 %v6473_v34, %v4835_v1  ;;  %v4618_v41 = vadd.f32 %v4558_v63, %v4299_v43 }
 0x3dd   : > { %p6648_p13 = pnand %p6647_p12, %p6782_p4  ;;  %p6653_p3 = por %p6652_p2, %p6651_p1 }
 0x3de   : > { %4963 = vst [vmem:[%s7499_s7 + $0xd0] sm:$0xff] %v4931_v8  ;;  %v4708_v31 = vadd.f32 %v7718_v22, %v4618_v41  ;;  %v6481_v8 = vunpack.c.l.bf16 %v6519_v42 }
 0x3df   : > { %v3607_v4 = vpop.f32.mrf.mxu2  ;;  %p6649_p0 = pneg %p6648_p13 }
 0x3e0   : > { %v4804_v57 = vadd.f32 %v6410_v15, %v4708_v31  ;;  %v4241_v53 = vpop.f32.mrf.mxu3 }
 0x3e1   : > { %v3176_v58 = vpop.f32.mrf.mxu1  ;;  %p6654_p5 = pnand %p6653_p3, %p6649_p0 }
 0x3e2   : > { %v4836_v13 = vmax.f32 %v4804_v57, 0.0  ;;  %v3233_v52 = vadd.f32 %v3176_v58, %v7432_v16  ;;  %v6418_v58 = vunpack.c.h.bf16 %v6504_v37 }
 0x3e3   : > { %v4563_v3 = vpop.f32.mrf.mxu0 }
 0x3e4   : > { %v4932_v25 = vadd.f32 %v6474_v12, %v4836_v13 }
 0x3e6   : > { %4964 = vst [vmem:[%s7499_s7 + $0xd8] sm:$0xff] %v4932_v25  ;;  %v6482_v25 = vunpack.c.h.bf16 %v6519_v42 }
 0x3e7   : > { %v3610_v62 = vpop.f32.mrf.mxu2 }
 0x3e8   : > { %v3667_v5 = vadd.f32 %v3610_v62, %v3233_v52  ;;  %v4244_v47 = vpop.f32.mrf.mxu3 }
 0x3e9   : > { %v3178_v36 = vpop.f32.mrf.mxu1 }
 0x3ea   : > { %v4301_v38 = vadd.f32 %v4244_v47, %v3667_v5  ;;  %v3234_v44 = vadd.f32 %v3178_v36, %v7440_v39  ;;  %v6478_v39 = vunpack.c.h.bf16 %v6518_v6 }
 0x3eb   : > { %v4565_v60 = vpop.f32.mrf.mxu0 }
 0x3ec   : > { %v4620_v61 = vadd.f32 %v4563_v3, %v4301_v38 }
 0x3ee   : > { %v4709_v48 = vadd.f32 %v7718_v22, %v4620_v61 }
 0x3ef   : > { %v3612_v2 = vpop.f32.mrf.mxu2 }
 0x3f0   : > { %v4805_v35 = vadd.f32 %v6413_v18, %v4709_v48  ;;  %v3668_v29 = vadd.f32 %v3612_v2, %v3234_v44  ;;  %v4246_v16 = vpop.f32.mrf.mxu3 }
 0x3f1   : > { %v3181_v54 = vpop.f32.mrf.mxu1 }
 0x3f2   : > { %v4837_v45 = vmax.f32 %v4805_v35, 0.0  ;;  %v4302_v19 = vadd.f32 %v4246_v16, %v3668_v29 }
 0x3f3   : > { %v4568_v24 = vpop.f32.mrf.mxu0 }
 0x3f4   : > { %v4933_v32 = vadd.f32 %v6477_v55, %v4837_v45  ;;  %v4621_v20 = vadd.f32 %v4565_v60, %v4302_v19 }
 0x3f6   : > { %4965 = vst [vmem:[%s7499_s7 + $0xe0] sm:$0xff] %v4933_v32  ;;  %v4710_v28 = vadd.f32 %v7718_v22, %v4621_v20 }
 0x3f7   : > { %v3615_v30 = vpop.f32.mrf.mxu2 }
 0x3f8   : > { %v4806_v10 = vadd.f32 %v6414_v7, %v4710_v28  ;;  %v4249_v21 = vpop.f32.mrf.mxu3 }
 0x3f9   : > { %v3183_v27 = vpop.f32.mrf.mxu1 }
 0x3fa   : > { %v4838_v14 = vmax.f32 %v4806_v10, 0.0  ;;  %v3236_v63 = vadd.f32 %v3183_v27, %v7449_v11 }
 0x3fb   : > { %v4570_v26 = vpop.f32.mrf.mxu0 }
 0x3fc   : > { %v4934_v9 = vadd.f32 %v6478_v39, %v4838_v14 }
 0x3fe   : > { %4966 = vst [vmem:[%s7499_s7 + $0xe8] sm:$0xff] %v4934_v9 }
 0x3ff   : > { %v3617_v59 = vpop.f32.mrf.mxu2 }
 0x400   : > { %v3670_v0 = vadd.f32 %v3617_v59, %v3236_v63  ;;  %v4251_v51 = vpop.f32.mrf.mxu3 }
 0x401   : > { %v3186_v50 = vpop.f32.mrf.mxu1 }
 0x402   : > { %v4304_v33 = vadd.f32 %v4251_v51, %v3670_v0  ;;  %v3237_v1 = vadd.f32 %v3186_v50, %v7456_v40 }
 0x403   : > { %v4573_v23 = vpop.f32.mrf.mxu0 }
 0x404   : > { %v4623_v34 = vadd.f32 %v4570_v26, %v4304_v33 }
 0x406   : > { %v4711_v17 = vadd.f32 %v7718_v22, %v4623_v34 }
 0x407   : > { %v3620_v43 = vpop.f32.mrf.mxu2 }
 0x408   : > { %v4807_v56 = vadd.f32 %v6417_v46, %v4711_v17  ;;  %v3671_v11 = vadd.f32 %v3620_v43, %v3237_v1  ;;  %v4254_v41 = vpop.f32.mrf.mxu3 }
 0x409   : > { %v3188_v15 = vpop.f32.mrf.mxu1 }
 0x40a   : > { %v4839_v31 = vmax.f32 %v4807_v56, 0.0  ;;  %v4305_v4 = vadd.f32 %v4254_v41, %v3671_v11 }
 0x40b   : > { %v4575_v57 = vpop.f32.mrf.mxu0 }
 0x40c   : > { %v4935_v12 = vadd.f32 %v6481_v8, %v4839_v31  ;;  %v4624_v53 = vadd.f32 %v4573_v23, %v4305_v4 }
 0x40e   : > { %4967 = vst [vmem:[%s7499_s7 + $0xf0] sm:$0xff] %v4935_v12  ;;  %v4712_v40 = vadd.f32 %v7718_v22, %v4624_v53 }
 0x40f   : > { %v3622_v13 = vpop.f32.mrf.mxu2 }
 0x410   : > { %v4808_v3 = vadd.f32 %v6418_v58, %v4712_v40  ;;  %v4256_v52 = vpop.f32.mrf.mxu3 }
 0x412   : > { %v4840_v62 = vmax.f32 %v4808_v3, 0.0 }
 0x414   : > { %v4936_v5 = vadd.f32 %v6482_v25, %v4840_v62 }
 0x416   : > { %4968 = vst [vmem:[%s7499_s7 + $0xf8] sm:$0xff] %v4936_v5 }
 0x417   : > { %6657 = shalt.err (!%p6654_p5)
}
 0x418   : > { %s6710_s27 = smov 128   ;;  %s6711_s7 = smov 8  }
 0x419   : > { %6545 = dma.vmem_to_hbm [thread:$0]  (%p6782_p4), %s4984_s14, 4096, %s4986_s25, %s4970_s21, %s6710_s27, %s6710_s27, %s6711_s7  }
 0x41a PF: > { %p6551_p6 = scmp.ge.s32.totalorder %s6708_s23, 2  ;;  %s5000_s12 = sand.u32 1, %s6688_s18  }
 0x41b   : > { %s5001_s10 = scalar_lea.sflag [#allocation4], %s5000_s12 }
 0x41c   : > { %p6548_p7 = pnand %p6551_p6, %p6789_p8 }
 0x41e   : > { %p6549_p9 = pneg %p6548_p7 }
 0x420   : > { %6683 = dma.done.wait (%p6549_p9), %s5001_s10, 4096  }
 0x421   : > { %6685 = vsyncadd (%p6549_p9), %s5001_s10, 4294963200  ;;  %s18_s23 = sadd.s32 1, %s6708_s23   ;;  %s7826_s18 = smov %s6692_s19 }
 0x422   : > { %p15_p10 = scmp.ge.s32.totalorder %s18_s23, 4   ;;  %s7827_s19 = smov %s6696_s20 }
 0x423   : > { %s7828_s20 = smov %s6795_s6  ;;  %s7829_s21 = smov %s6704_s22 }
 0x424   : > { %s7830_s22 = smov %s7832_s26  ;;  %17 = sbr.rel (!%p15_p10) target bundleno = 4 (0x4), region = 103 }
 0x429   :  { %5007 = vsyncpa [#allocation4], 1 }
 0x42a   :  { %5009 = vsyncpa [#allocation4 + $0x1], 1 }

// kernel: cdweights_forward.8
= control target key start
LH: loop header
LB: loop body
LE: loop exit
PB: predicated region body
PF: predicated region fallthrough
CT: control target
= control target key end

     0   :  { %s6255_s12 = smov 0   ;;  %s6257_s13 = smov 0   ;;  %s7148_s0 = inlined_call_operand.vmem [shape: bf16[2,456,128], index: 0, kind: input, shape index: {}]   ;;  %s7149_s1 = inlined_call_operand.vmem [shape: bf16[9,128,128], index: 1, kind: input, shape index: {}]   ;;  %s7150_s2 = inlined_call_operand.vmem [shape: f32[1,128], index: 2, kind: input, shape index: {}]   ;;  %s7151_s3 = inlined_call_operand.vmem [shape: bf16[2,256,128], index: 3, kind: output, shape index: {}]  }
   0x1   :  { %s6259_s14 = smov 0  }
   0x2 LB: > { %s32_s15 = sadd.s32 1, %s6229_s13  ;;  %p4824_p0 = scmp.ge.s32.totalorder %s6233_s14, 1  ;;  %s6233_s14 = sphi %s6259_s14, %s13_s14   ;;  %s6229_s13 = sphi %s6257_s13, %s7153_s13   ;;  %s6225_s12 = sphi %s6255_s12, %s7152_s12  }
   0x3   : > { %p34_p1 = scmp.ge.s32.totalorder %s32_s15, 2  ;;  %p187_p2 = scmp.lt.s32.totalorder %s6233_s14, 3 }
   0x5   : > { %s7155_s15 = smov (%p34_p1, %s32_s15), 0  ;;  %p188_p3 = pnand %p4824_p0, %p187_p2 }
   0x6   : > { %p228_p4 = scmp.lt.s32.totalorder (!%p188_p3), %s6225_s12, 1 }
   0x7   : > { %191 = sbr.rel (%p188_p3) target bundleno = 1037 (0x40d), region = 32 }
   0xc   : > { %v5842_v0 = vld [vmem:[%s7149_s1 + $0x38] sm:$0xff]  ;;  %v5841_v1 = vld [vmem:[%s7149_s1 + $0x30] sm:$0xff]  ;;  %v5840_v2 = vld [vmem:[%s7149_s1 + $0x28] sm:$0xff]  ;;  %s7157_s12 = smov (!%p228_p4, %s6225_s12), 1  ;;  %vm978_vm0 = vsmask.f32 7424 }
   0xd   : > { %6134 = vmatpush.bf16.msra.mxu1 %v5842_v0  ;;  %6135 = vmatpush.bf16.msra.mxu2 %v5842_v0  ;;  %v5839_v3 = vld [vmem:[%s7149_s1 + $0x20] sm:$0xff]  ;;  %v5838_v4 = vld [vmem:[%s7149_s1 + $0x18] sm:$0xff]  ;;  %v5837_v5 = vld [vmem:[%s7149_s1 + $0x10] sm:$0xff]  ;;  %s6158_s30 = smul.u32 228, %s7157_s12  ;;  %vm1445_vm1 = vcmask 1046528   ;;  %s5810_s6 = sshll.u32 %s7157_s12, 7 }
   0xe   : > { %6136 = vmatpush.bf16.msra.mxu3 %v5842_v0  ;;  %612 = vmatpush.bf16.msra.mxu0 %v5842_v0  ;;  %v5836_v6 = vld [vmem:[%s7149_s1 + $0x8] sm:$0xff]  ;;  %v5835_v7 = vld [vmem:[%s7149_s1] sm:$0xff]  ;;  %v5881_v8 = vld [vmem:[%s7149_s1 + $0xb8] sm:$0xff]  ;;  %s6964_s10 = scalar_lea.vmem %s7151_s3, %s5810_s6 }
   0xf   : > { %s6307_s8 = scalar_lea.vmem %s7148_s0, %s6158_s30  ;;  %v5913_v9 = vld [vmem:[%s7149_s1 + $0xf8] sm:$0xff]  ;;  %v5880_v16 = vld [vmem:[%s7149_s1 + $0xb0] sm:$0xff]  ;;  %v5879_v20 = vld [vmem:[%s7149_s1 + $0xa8] sm:$0xff] }
  0x10   : > { %v5817_v10 = vld [vmem:[%s6307_s8 + $0x30] sm:$0xff]  ;;  %v5823_v11 = vld [vmem:[%s6307_s8 + $0x60] sm:$0xff]  ;;  %v5873_v14 = vld [vmem:[%s7149_s1 + $0x78] sm:$0xff] }
  0x11   : > { %6137 = vmatpush.bf16.msra.mxu1 %v5841_v1  ;;  %6138 = vmatpush.bf16.msra.mxu2 %v5841_v1  ;;  %v5829_v12 = vld [vmem:[%s6307_s8 + $0x90] sm:$0xff]  ;;  %v5811_v13 = vld [vmem:[%s6307_s8] sm:$0xff]  ;;  %v5944_v15 = vld [vmem:[%s7149_s1 + $0x138] sm:$0xff] }
  0x12   : > { %6139 = vmatpush.bf16.msra.mxu3 %v5841_v1  ;;  %613 = vmatpush.bf16.msra.mxu0 %v5841_v1  ;;  %v5912_v17 = vld [vmem:[%s7149_s1 + $0xf0] sm:$0xff]  ;;  %v5911_v21 = vld [vmem:[%s7149_s1 + $0xe8] sm:$0xff]  ;;  %v5878_v24 = vld [vmem:[%s7149_s1 + $0xa0] sm:$0xff] }
  0x13   : > { %v5872_v18 = vld [vmem:[%s7149_s1 + $0x70] sm:$0xff]  ;;  %v5871_v22 = vld [vmem:[%s7149_s1 + $0x68] sm:$0xff]  ;;  %v5910_v25 = vld [vmem:[%s7149_s1 + $0xe0] sm:$0xff] }
  0x14   : > { %v5943_v19 = vld [vmem:[%s7149_s1 + $0x130] sm:$0xff]  ;;  %v5942_v23 = vld [vmem:[%s7149_s1 + $0x128] sm:$0xff]  ;;  %v5870_v26 = vld [vmem:[%s7149_s1 + $0x60] sm:$0xff] }
  0x15   : > { %6140 = vmatpush.bf16.msra.mxu1 %v5840_v2  ;;  %6141 = vmatpush.bf16.msra.mxu2 %v5840_v2  ;;  %v5941_v27 = vld [vmem:[%s7149_s1 + $0x120] sm:$0xff]  ;;  %v5818_v28 = vld [vmem:[%s6307_s8 + $0x38] sm:$0xff]  ;;  %v5824_v29 = vld [vmem:[%s6307_s8 + $0x68] sm:$0xff] }
  0x16   : > { %6142 = vmatpush.bf16.msra.mxu3 %v5840_v2  ;;  %614 = vmatpush.bf16.msra.mxu0 %v5840_v2  ;;  %v5830_v30 = vld [vmem:[%s6307_s8 + $0x98] sm:$0xff]  ;;  %v5812_v31 = vld [vmem:[%s6307_s8 + $0x8] sm:$0xff]  ;;  %v5876_v36 = vld [vmem:[%s7149_s1 + $0x90] sm:$0xff] }
  0x17   : > { %v5877_v32 = vld [vmem:[%s7149_s1 + $0x98] sm:$0xff]  ;;  %v5908_v37 = vld [vmem:[%s7149_s1 + $0xd0] sm:$0xff]  ;;  %v5819_v38 = vld [vmem:[%s6307_s8 + $0x40] sm:$0xff] }
  0x18   : > { %v5909_v33 = vld [vmem:[%s7149_s1 + $0xd8] sm:$0xff]  ;;  %v5825_v39 = vld [vmem:[%s6307_s8 + $0x70] sm:$0xff]  ;;  %v5831_v40 = vld [vmem:[%s6307_s8 + $0xa0] sm:$0xff] }
  0x19   : > { %6143 = vmatpush.bf16.msra.mxu1 %v5839_v3  ;;  %6144 = vmatpush.bf16.msra.mxu2 %v5839_v3  ;;  %v5869_v34 = vld [vmem:[%s7149_s1 + $0x58] sm:$0xff]  ;;  %v5813_v41 = vld [vmem:[%s6307_s8 + $0x10] sm:$0xff]  ;;  %v5875_v44 = vld [vmem:[%s7149_s1 + $0x88] sm:$0xff] }
  0x1a   : > { %6145 = vmatpush.bf16.msra.mxu3 %v5839_v3  ;;  %615 = vmatpush.bf16.msra.mxu0 %v5839_v3  ;;  %v5940_v35 = vld [vmem:[%s7149_s1 + $0x118] sm:$0xff]  ;;  %v5868_v42 = vld [vmem:[%s7149_s1 + $0x50] sm:$0xff]  ;;  %v5907_v45 = vld [vmem:[%s7149_s1 + $0xc8] sm:$0xff] }
  0x1b   : > { %v5939_v43 = vld [vmem:[%s7149_s1 + $0x110] sm:$0xff]  ;;  %v5867_v46 = vld [vmem:[%s7149_s1 + $0x48] sm:$0xff]  ;;  %v5826_v48 = vld [vmem:[%s6307_s8 + $0x78] sm:$0xff] }
  0x1c   : > { %v5820_v47 = vld [vmem:[%s6307_s8 + $0x48] sm:$0xff]  ;;  %v5814_v50 = vld [vmem:[%s6307_s8 + $0x18] sm:$0xff]  ;;  %v5874_v52 = vld [vmem:[%s7149_s1 + $0x80] sm:$0xff] }
  0x1d   : > { %6146 = vmatpush.bf16.msra.mxu1 %v5838_v4  ;;  %6147 = vmatpush.bf16.msra.mxu2 %v5838_v4  ;;  %v5832_v49 = vld [vmem:[%s6307_s8 + $0xa8] sm:$0xff]  ;;  %v5906_v53 = vld [vmem:[%s7149_s1 + $0xc0] sm:$0xff]  ;;  %v5821_v56 = vld [vmem:[%s6307_s8 + $0x50] sm:$0xff] }
  0x1e   : > { %6148 = vmatpush.bf16.msra.mxu3 %v5838_v4  ;;  %616 = vmatpush.bf16.msra.mxu0 %v5838_v4  ;;  %v5938_v51 = vld [vmem:[%s7149_s1 + $0x108] sm:$0xff]  ;;  %v5866_v54 = vld [vmem:[%s7149_s1 + $0x40] sm:$0xff]  ;;  %v5833_v58 = vld [vmem:[%s6307_s8 + $0xb0] sm:$0xff] }
  0x1f   : > { %v5937_v55 = vld [vmem:[%s7149_s1 + $0x100] sm:$0xff]  ;;  %v5984_v60 = vld [vmem:[%s7149_s1 + $0x1b8] sm:$0xff]  ;;  %v2178_v0 = vld [vmem:[%s6307_s8 + $0xc] sm:$0xff]  }
  0x20   : > { %v5827_v57 = vld [vmem:[%s6307_s8 + $0x80] sm:$0xff]  ;;  %v6015_v61 = vld [vmem:[%s7149_s1 + $0x1f8] sm:$0xff]  ;;  %v6439_v1 = vld [vmem:[%s6307_s8 + $0xc] sm:$0xf0] }
  0x21   : > { %6149 = vmatpush.bf16.msra.mxu1 %v5837_v5  ;;  %6150 = vmatpush.bf16.msra.mxu2 %v5837_v5  ;;  %v5815_v59 = vld [vmem:[%s6307_s8 + $0x20] sm:$0xff]  ;;  %v5952_v62 = vld [vmem:[%s7149_s1 + $0x178] sm:$0xff]  ;;  %v5828_v3 = vld [vmem:[%s6307_s8 + $0x88] sm:$0xff] }
  0x22   : > { %6151 = vmatpush.bf16.msra.mxu3 %v5837_v5  ;;  %617 = vmatpush.bf16.msra.mxu0 %v5837_v5  ;;  %v6023_v63 = vld [vmem:[%s7149_s1 + $0x238] sm:$0xff]  ;;  %v5816_v5 = vld [vmem:[%s6307_s8 + $0x28] sm:$0xff] }
  0x23   : > { %v5822_v2 = vld [vmem:[%s6307_s8 + $0x58] sm:$0xff] }
  0x24   : > { %v5834_v4 = vld [vmem:[%s6307_s8 + $0xb8] sm:$0xff] }
  0x25   : > { %6152 = vmatpush.bf16.msra.mxu1 %v5836_v6  ;;  %6153 = vmatpush.bf16.msra.mxu2 %v5836_v6 }
  0x26   : > { %6154 = vmatpush.bf16.msra.mxu3 %v5836_v6  ;;  %618 = vmatpush.bf16.msra.mxu0 %v5836_v6  ;;  %v6025_v6 = vld [vmem:[%s6307_s8] sm:$0xff]  }
  0x29   : > { %6155 = vmatpush.bf16.msra.mxu1 %v5835_v7  ;;  %6156 = vmatpush.bf16.msra.mxu2 %v5835_v7 }
  0x2a   : > { %6157 = vmatpush.bf16.msra.mxu3 %v5835_v7  ;;  %619 = vmatpush.bf16.msra.mxu0 %v5835_v7  ;;  %v5843_v7 = vld [vmem:[%s6307_s8 + $0x8] sm:$0xff] }
  0x2c   : > { %650 = vmatmul.bf16.vlgmr.msra.gmra.mxu1 %v5817_v10  ;;  %680 = vmatmul.bf16.vlgmr.msra.gmra.mxu2 %v5823_v11  ;;  %v6113_v10 = vld [vmem:[%s6307_s8] sm:$0xe]  ;;  %v5914_v11 = vld [vmem:[%s6307_s8 + $0x14] sm:$0xff] }
  0x2d   : > { %1567 = vmatpush.bf16.msrb.mxu2 %v5881_v8  ;;  %710 = vmatmul.bf16.vlgmr.msra.gmra.mxu3 %v5829_v12  ;;  %v982_v8 = vshll.u32 %v6025_v6, 16  ;;  %v2370_v12 = vshll.u32 %v2178_v0, 16 }
  0x2e   : > { %2001 = vmatpush.bf16.msrb.mxu3 %v5913_v9  ;;  %620 = vmatmul.bf16.vlgmr.msra.gmra.mxu0 %v5811_v13  ;;  %v6112_v9 = vld [vmem:[%s6307_s8] sm:$0xf0]  ;;  %v980_v13 = vshrl.u32 %v6025_v6, 16 }
  0x2f   : > { %1247 = vmatpush.bf16.msrb.mxu1 %v5873_v14  ;;  %2635 = vmatpush.bf16.msrb.mxu0 %v5944_v15  ;;  %v984_v14 = vrot.slane %v982_v8, 1  ;;  %v987_v15 = vshll.u32 %v5843_v7, 16 }
  0x31   : > { %1568 = vmatpush.bf16.msrb.mxu2 %v5880_v16  ;;  %v6114_v16 = vor.u32 %v6113_v10, %v6112_v9 }
  0x32   : > { %2002 = vmatpush.bf16.msrb.mxu3 %v5912_v17  ;;  %v2368_v17 = vshrl.u32 %v2178_v0, 16 }
  0x33   : > { %1248 = vmatpush.bf16.msrb.mxu1 %v5872_v18  ;;  %2636 = vmatpush.bf16.msrb.mxu0 %v5943_v19  ;;  %v2372_v18 = vrot.slane %v2370_v12, 1  ;;  %v2375_v19 = vshll.u32 %v5914_v11, 16 }
  0x35   : > { %1569 = vmatpush.bf16.msrb.mxu2 %v5879_v20  ;;  %v985_v20 = vor.u32 %v984_v14, %v980_v13 }
  0x36   : > { %2003 = vmatpush.bf16.msrb.mxu3 %v5911_v21  ;;  %v989_v21 = vrot.slane %v987_v15, 1 }
  0x37   : > { %1249 = vmatpush.bf16.msrb.mxu1 %v5871_v22  ;;  %2637 = vmatpush.bf16.msrb.mxu0 %v5942_v23  ;;  %v1446_v22 = vrot.slane %v6114_v16, 1  ;;  %v1447_v23 = vrot.slane %v5843_v7, 1 }
  0x39   : > { %1570 = vmatpush.bf16.msrb.mxu2 %v5878_v24  ;;  %v2373_v24 = vor.u32 %v2372_v18, %v2368_v17 }
  0x3a   : > { %2004 = vmatpush.bf16.msrb.mxu3 %v5910_v25  ;;  %v2377_v25 = vrot.slane %v2375_v19, 1 }
  0x3b   : > { %1250 = vmatpush.bf16.msrb.mxu1 %v5870_v26  ;;  %2638 = vmatpush.bf16.msrb.mxu0 %v5941_v27  ;;  %v990_v26 = vsel %vm978_vm0, %v985_v20, %v989_v21  ;;  %v1448_v27 = vsel %vm1445_vm1, %v1446_v22, %v1447_v23 }
  0x3c   : > { %655 = vmatmul.bf16.gmra.mxu1 %v5818_v28  ;;  %685 = vmatmul.bf16.gmra.mxu2 %v5824_v29  ;;  %v5882_v28 = vld [vmem:[%s6307_s8 + $0xc] sm:$0xff]  ;;  %v2378_v29 = vsel %vm978_vm0, %v2373_v24, %v2377_v25 }
  0x3d   : > { %715 = vmatmul.bf16.gmra.mxu3 %v5830_v30  ;;  %1571 = vmatpush.bf16.msrb.mxu2 %v5877_v32  ;;  %v5844_v30 = vld [vmem:[%s6307_s8 + $0x10] sm:$0xff]  ;;  %v991_v32 = vshrl.u32 %v5843_v7, 16 }
  0x3e   : > { %625 = vmatmul.bf16.gmra.mxu0 %v5812_v31  ;;  %2005 = vmatpush.bf16.msrb.mxu3 %v5909_v33  ;;  %v5915_v31 = vld [vmem:[%s6307_s8 + $0x1c] sm:$0xff]  ;;  %v995_v33 = vshll.u32 %v5844_v30, 16 }
  0x3f   : > { %1251 = vmatpush.bf16.msrb.mxu1 %v5869_v34  ;;  %2639 = vmatpush.bf16.msrb.mxu0 %v5940_v35  ;;  %v2379_v34 = vshrl.u32 %v5914_v11, 16  ;;  %v2383_v35 = vshll.u32 %v5915_v31, 16 }
  0x41   : > { %1572 = vmatpush.bf16.msrb.mxu2 %v5876_v36  ;;  %v993_v36 = vor.u32 %v991_v32, %v989_v21 }
  0x42   : > { %2006 = vmatpush.bf16.msrb.mxu3 %v5908_v37  ;;  %v997_v37 = vrot.slane %v995_v33, 1 }
  0x43   : > { %1252 = vmatpush.bf16.msrb.mxu1 %v5868_v42  ;;  %2640 = vmatpush.bf16.msrb.mxu0 %v5939_v43  ;;  %v5883_v43 = vld [vmem:[%s6307_s8 + $0x14] sm:$0xff] }
  0x45   : > { %1573 = vmatpush.bf16.msrb.mxu2 %v5875_v44 }
  0x46   : > { %2007 = vmatpush.bf16.msrb.mxu3 %v5907_v45  ;;  %v5845_v45 = vld [vmem:[%s6307_s8 + $0x18] sm:$0xff] }
  0x47   : > { %1253 = vmatpush.bf16.msrb.mxu1 %v5867_v46  ;;  %2641 = vmatpush.bf16.msrb.mxu0 %v5938_v51  ;;  %v5983_v46 = vld [vmem:[%s7149_s1 + $0x1b0] sm:$0xff]  ;;  %v1003_v51 = vshll.u32 %v5845_v45, 16  ;;  %v1007_v8 = vshrl.u32 %v5845_v45, 16 }
  0x49   : > { %1574 = vmatpush.bf16.msrb.mxu2 %v5874_v52  ;;  %v2387_v52 = vshrl.u32 %v5915_v31, 16 }
  0x4a   : > { %2008 = vmatpush.bf16.msrb.mxu3 %v5906_v53 }
  0x4b   : > { %1254 = vmatpush.bf16.msrb.mxu1 %v5866_v54  ;;  %2642 = vmatpush.bf16.msrb.mxu0 %v5937_v55  ;;  %v6022_v54 = vld [vmem:[%s7149_s1 + $0x230] sm:$0xff] }
  0x4c   : > { %660 = vmatmul.bf16.gmra.mxu1 %v5819_v38  ;;  %690 = vmatmul.bf16.gmra.mxu2 %v5825_v39  ;;  %v1449_v38 = vrot.slane %v5844_v30, 1  ;;  %v2381_v39 = vor.u32 %v2379_v34, %v2377_v25 }
  0x4d   : > { %720 = vmatmul.bf16.gmra.mxu3 %v5831_v40  ;;  %3388 = vmatpush.bf16.msra.mxu2 %v5984_v60  ;;  %v2385_v40 = vrot.slane %v2383_v35, 1 }
  0x4e   : > { %630 = vmatmul.bf16.gmra.mxu0 %v5813_v41  ;;  %4022 = vmatpush.bf16.msra.mxu3 %v6015_v61  ;;  %v998_v41 = vsel %vm978_vm0, %v993_v36, %v997_v37  ;;  %v1450_v42 = vsel %vm1445_vm1, %v1447_v23, %v1449_v38  ;;  %v5885_v23 = vld [vmem:[%s6307_s8 + $0x24] sm:$0xff] }
  0x4f   : > { %2954 = vmatpush.bf16.msra.mxu1 %v5952_v62  ;;  %4341 = vmatpush.bf16.msra.mxu0 %v6023_v63  ;;  %v2386_v44 = vsel %vm978_vm0, %v2381_v39, %v2385_v40  ;;  %v5884_v63 = vld [vmem:[%s6307_s8 + $0x1c] sm:$0xff] }
  0x51   : > { %3389 = vmatpush.bf16.msra.mxu2 %v5983_v46  ;;  %v5886_v46 = vld [vmem:[%s6307_s8 + $0x2c] sm:$0xff] }
  0x53   : > { %4342 = vmatpush.bf16.msra.mxu0 %v6022_v54 }
  0x5c   : > { %665 = vmatmul.bf16.gmra.mxu1 %v5820_v47  ;;  %695 = vmatmul.bf16.gmra.mxu2 %v5826_v48  ;;  %v6014_v47 = vld [vmem:[%s7149_s1 + $0x1f0] sm:$0xff]  ;;  %v5916_v48 = vld [vmem:[%s6307_s8 + $0x24] sm:$0xff] }
  0x5d   : > { %725 = vmatmul.bf16.gmra.mxu3 %v5832_v49  ;;  %v5951_v49 = vld [vmem:[%s7149_s1 + $0x170] sm:$0xff]  ;;  %v2391_v53 = vshll.u32 %v5916_v48, 16  ;;  %v2395_v11 = vshrl.u32 %v5916_v48, 16 }
  0x5e   : > { %635 = vmatmul.bf16.gmra.mxu0 %v5814_v50  ;;  %4023 = vmatpush.bf16.msra.mxu3 %v6014_v47  ;;  %v999_v50 = vshrl.u32 %v5844_v30, 16 }
  0x5f   : > { %2955 = vmatpush.bf16.msra.mxu1 %v5951_v49  ;;  %v5848_v49 = vld [vmem:[%s6307_s8 + $0x30] sm:$0xff] }
  0x60   : > { %v1001_v55 = vor.u32 %v999_v50, %v997_v37  ;;  %v5982_v50 = vld [vmem:[%s7149_s1 + $0x1a8] sm:$0xff] }
  0x61   : > { %3390 = vmatpush.bf16.msra.mxu2 %v5982_v50  ;;  %v5850_v50 = vld [vmem:[%s6307_s8 + $0x40] sm:$0xff] }
  0x6c   : > { %670 = vmatmul.bf16.gmra.mxu1 %v5821_v56  ;;  %700 = vmatmul.bf16.gmra.mxu2 %v5827_v57  ;;  %v1005_v56 = vrot.slane %v1003_v51, 1  ;;  %v1451_v57 = vrot.slane %v5845_v45, 1  ;;  %v6013_v51 = vld [vmem:[%s7149_s1 + $0x1e8] sm:$0xff] }
  0x6d   : > { %730 = vmatmul.bf16.gmra.mxu3 %v5833_v58  ;;  %v2389_v58 = vor.u32 %v2387_v52, %v2385_v40  ;;  %v5919_v52 = vld [vmem:[%s6307_s8 + $0x3c] sm:$0xff] }
  0x6e   : > { %640 = vmatmul.bf16.gmra.mxu0 %v5815_v59  ;;  %v2393_v59 = vrot.slane %v2391_v53, 1  ;;  %v1006_v61 = vsel %vm978_vm0, %v1001_v55, %v1005_v56  ;;  %v1452_v62 = vsel %vm1445_vm1, %v1449_v38, %v1451_v57  ;;  %v1009_v13 = vor.u32 %v1007_v8, %v1005_v56  ;;  %4024 = vmatpush.bf16.msra.mxu3 %v6013_v51  ;;  %v5950_v55 = vld [vmem:[%s7149_s1 + $0x168] sm:$0xff] }
  0x6f   : > { %2956 = vmatpush.bf16.msra.mxu1 %v5950_v55  ;;  %v5921_v51 = vld [vmem:[%s6307_s8 + $0x4c] sm:$0xff] }
  0x70   : > { %v2397_v16 = vor.u32 %v2395_v11, %v2393_v59 }
  0x7c   : > { %675 = vmatmul.bf16.gmra.mxu1 %v5822_v2  ;;  %705 = vmatmul.bf16.gmra.mxu2 %v5828_v3  ;;  %v2394_v2 = vsel %vm978_vm0, %v2389_v58, %v2393_v59  ;;  %v5846_v3 = vld [vmem:[%s6307_s8 + $0x20] sm:$0xff]  ;;  %v1027_v58 = vshll.u32 %v5848_v49, 16 }
  0x7d   : > { %735 = vmatmul.bf16.gmra.mxu3 %v5834_v4  ;;  %v5917_v4 = vld [vmem:[%s6307_s8 + $0x2c] sm:$0xff]  ;;  %v1011_v9 = vshll.u32 %v5846_v3, 16  ;;  %v1453_v15 = vrot.slane %v5846_v3, 1  ;;  %v1015_v31 = vshrl.u32 %v5846_v3, 16 }
  0x7e   : > { %645 = vmatmul.bf16.gmra.mxu0 %v5816_v5  ;;  %v2399_v12 = vshll.u32 %v5917_v4, 16  ;;  %v2403_v34 = vshrl.u32 %v5917_v4, 16  ;;  %v1029_v3 = vrot.slane %v1027_v58, 1  ;;  %v1457_v4 = vrot.slane %v5848_v49, 1 }
  0x7f   : > { %v1013_v14 = vrot.slane %v1011_v9, 1  ;;  %v1454_v22 = vsel %vm1445_vm1, %v1451_v57, %v1453_v15  ;;  %v1043_v58 = vshll.u32 %v5850_v50, 16 }
  0x80   : > { %v2401_v17 = vrot.slane %v2399_v12, 1 }
  0x81   : > { %v1014_v21 = vsel %vm978_vm0, %v1009_v13, %v1013_v14  ;;  %v1017_v36 = vor.u32 %v1015_v31, %v1013_v14 }
  0x82   : > { %v2402_v25 = vsel %vm978_vm0, %v2397_v16, %v2401_v17  ;;  %v2405_v39 = vor.u32 %v2403_v34, %v2401_v17  ;;  %v5887_v16 = vld [vmem:[%s6307_s8 + $0x34] sm:$0xff] }
  0x8c   : > { %1255 = vmatmul.bf16.vlgmr.msrb.gmra.mxu1 %v990_v26  ;;  %1575 = vmatmul.bf16.vlgmr.msrb.gmra.mxu2 %v1448_v27  ;;  %v5847_v26 = vld [vmem:[%s6307_s8 + $0x28] sm:$0xff]  ;;  %v5918_v27 = vld [vmem:[%s6307_s8 + $0x34] sm:$0xff] }
  0x8d   : > { %2009 = vmatmul.bf16.vlgmr.msrb.gmra.mxu3 %v5882_v28  ;;  %v1019_v32 = vshll.u32 %v5847_v26, 16  ;;  %v2407_v35 = vshll.u32 %v5918_v27, 16  ;;  %v1455_v38 = vrot.slane %v5847_v26, 1  ;;  %v1023_v57 = vshrl.u32 %v5847_v26, 16 }
  0x8e   : > { %2643 = vmatmul.bf16.vlgmr.msrb.gmra.mxu0 %v2378_v29  ;;  %v1031_v26 = vshrl.u32 %v5848_v49, 16 }
  0x8f   : > { %v1021_v37 = vrot.slane %v1019_v32, 1  ;;  %v2409_v40 = vrot.slane %v2407_v35, 1  ;;  %v1456_v45 = vsel %vm1445_vm1, %v1453_v15, %v1455_v38  ;;  %v1458_v15 = vsel %vm1445_vm1, %v1455_v38, %v1457_v4 }
  0x90   : > { %v1033_v32 = vor.u32 %v1031_v26, %v1029_v3  ;;  %v5981_v26 = vld [vmem:[%s7149_s1 + $0x1a0] sm:$0xff] }
  0x91   : > { %v2410_v48 = vsel %vm978_vm0, %v2405_v39, %v2409_v40  ;;  %3391 = vmatpush.bf16.msra.mxu2 %v5981_v26 }
  0x9c   : > { %1260 = vmatmul.bf16.gmra.mxu1 %v998_v41  ;;  %1580 = vmatmul.bf16.gmra.mxu2 %v1450_v42 }
  0x9d   : > { %2014 = vmatmul.bf16.gmra.mxu3 %v5883_v43 }
  0x9e   : > { %2648 = vmatmul.bf16.gmra.mxu0 %v2386_v44  ;;  %v1022_v44 = vsel %vm978_vm0, %v1017_v36, %v1021_v37 }
  0xa9   : > { %v6474_v60 = vpop.f32.mrf.mxu1 }
  0xab   : > { %v6479_v0 = vpop.f32.mrf.mxu0 }
  0xac   : > { %1265 = vmatmul.bf16.gmra.mxu1 %v1006_v61  ;;  %1585 = vmatmul.bf16.gmra.mxu2 %v1452_v62  ;;  %v2411_v61 = vshrl.u32 %v5918_v27, 16  ;;  %v2415_v62 = vshll.u32 %v5919_v52, 16 }
  0xad   : > { %2019 = vmatmul.bf16.gmra.mxu3 %v5884_v63  ;;  %v6021_v63 = vld [vmem:[%s7149_s1 + $0x228] sm:$0xff] }
  0xae   : > { %2653 = vmatmul.bf16.gmra.mxu0 %v2394_v2  ;;  %v1025_v2 = vor.u32 %v1023_v57, %v1021_v37  ;;  %v2413_v8 = vor.u32 %v2411_v61, %v2409_v40  ;;  %v2417_v9 = vrot.slane %v2415_v62, 1  ;;  %v2431_v62 = vshll.u32 %v5921_v51, 16 }
  0xaf   : > { %v6484_v5 = vpop.f32.mrf.mxu2  ;;  %4343 = vmatpush.bf16.msra.mxu0 %v6021_v63 }
  0xb0   : > { %v6486_v6 = vpop.f32.mrf.mxu3  ;;  %v1030_v14 = vsel %vm978_vm0, %v1025_v2, %v1029_v3  ;;  %v1045_v2 = vrot.slane %v1043_v58, 1  ;;  %v1461_v3 = vrot.slane %v5850_v50, 1 }
  0xb1   : > { %v6488_v7 = vpop.f32.mrf.mxu1 }
  0xb3   : > { %v6490_v10 = vpop.f32.mrf.mxu0 }
  0xb7   : > { %v6492_v18 = vpop.f32.mrf.mxu2 }
  0xb8   : > { %v6494_v19 = vpop.f32.mrf.mxu3 }
  0xb9   : > { %v656_v20 = vpop.f32.mrf.mxu1 }
  0xba   : > { %v2418_v20 = vsel %vm978_vm0, %v2413_v8, %v2417_v9  ;;  %v2433_v8 = vrot.slane %v2431_v62, 1 }
  0xbb   : > { %v626_v24 = vpop.f32.mrf.mxu0 }
  0xbc   : > { %1270 = vmatmul.bf16.gmra.mxu1 %v1014_v21  ;;  %1590 = vmatmul.bf16.gmra.mxu2 %v1454_v22  ;;  %v5849_v21 = vld [vmem:[%s6307_s8 + $0x38] sm:$0xff]  ;;  %v5920_v22 = vld [vmem:[%s6307_s8 + $0x44] sm:$0xff] }
  0xbd   : > { %2024 = vmatmul.bf16.gmra.mxu3 %v5885_v23  ;;  %v1035_v27 = vshll.u32 %v5849_v21, 16  ;;  %v2423_v31 = vshll.u32 %v5920_v22, 16  ;;  %v1459_v35 = vrot.slane %v5849_v21, 1  ;;  %v1039_v57 = vshrl.u32 %v5849_v21, 16 }
  0xbe   : > { %2658 = vmatmul.bf16.gmra.mxu0 %v2402_v25  ;;  %v2427_v61 = vshrl.u32 %v5920_v22, 16  ;;  %v5851_v22 = vld [vmem:[%s6307_s8 + $0x48] sm:$0xff] }
  0xbf   : > { %v686_v28 = vpop.f32.mrf.mxu2  ;;  %v1037_v34 = vrot.slane %v1035_v27, 1  ;;  %v2425_v37 = vrot.slane %v2423_v31, 1  ;;  %v6012_v27 = vld [vmem:[%s7149_s1 + $0x1e0] sm:$0xff] }
  0xc0   : > { %v716_v29 = vpop.f32.mrf.mxu3  ;;  %4025 = vmatpush.bf16.msra.mxu3 %v6012_v27 }
  0xc1   : > { %v6502_v30 = vpop.f32.mrf.mxu1  ;;  %v2419_v29 = vshrl.u32 %v5919_v52, 16  ;;  %v1041_v63 = vor.u32 %v1039_v57, %v1037_v34 }
  0xc3   : > { %v6504_v33 = vpop.f32.mrf.mxu0  ;;  %v2421_v36 = vor.u32 %v2419_v29, %v2417_v9  ;;  %v5922_v29 = vld [vmem:[%s6307_s8 + $0x54] sm:$0xff] }
  0xc5   : > { %v2426_v49 = vsel %vm978_vm0, %v2421_v36, %v2425_v37  ;;  %v1047_v36 = vshrl.u32 %v5850_v50, 16 }
  0xc7   : > { %v6506_v41 = vpop.f32.mrf.mxu2 }
  0xc8   : > { %v6508_v42 = vpop.f32.mrf.mxu3 }
  0xc9   : > { %v6510_v43 = vpop.f32.mrf.mxu1 }
  0xcb   : > { %v6515_v47 = vpop.f32.mrf.mxu0 }
  0xcc   : > { %1275 = vmatmul.bf16.gmra.mxu1 %v1022_v44  ;;  %1595 = vmatmul.bf16.gmra.mxu2 %v1456_v45  ;;  %v1038_v44 = vsel %vm978_vm0, %v1033_v32, %v1037_v34  ;;  %v1460_v45 = vsel %vm1445_vm1, %v1457_v4, %v1459_v35  ;;  %v2429_v4 = vor.u32 %v2427_v61, %v2425_v37  ;;  %v5949_v34 = vld [vmem:[%s7149_s1 + $0x160] sm:$0xff]  ;;  %v1051_v37 = vshll.u32 %v5851_v22, 16 }
  0xcd   : > { %2029 = vmatmul.bf16.gmra.mxu3 %v5886_v46  ;;  %v5888_v46 = vld [vmem:[%s6307_s8 + $0x3c] sm:$0xff]  ;;  %2957 = vmatpush.bf16.msra.mxu1 %v5949_v34  ;;  %v1055_v34 = vshrl.u32 %v5851_v22, 16 }
  0xce   : > { %2663 = vmatmul.bf16.gmra.mxu0 %v2410_v48  ;;  %v2434_v21 = vsel %vm978_vm0, %v2429_v4, %v2433_v8 }
  0xcf   : > { %v6526_v53 = vpop.f32.mrf.mxu2 }
  0xd0   : > { %v6528_v54 = vpop.f32.mrf.mxu3 }
  0xd1   : > { %v663_v56 = vpop.f32.mrf.mxu1 }
  0xd3   : > { %v633_v59 = vpop.f32.mrf.mxu0 }
  0xd7   : > { %v693_v11 = vpop.f32.mrf.mxu2 }
  0xd8   : > { %v723_v12 = vpop.f32.mrf.mxu3 }
  0xd9   : > { %v6536_v13 = vpop.f32.mrf.mxu1 }
  0xdb   : > { %v6541_v17 = vpop.f32.mrf.mxu0 }
  0xdc   : > { %1280 = vmatmul.bf16.gmra.mxu1 %v1030_v14  ;;  %1600 = vmatmul.bf16.gmra.mxu2 %v1458_v15  ;;  %v1046_v14 = vsel %vm978_vm0, %v1041_v63, %v1045_v2  ;;  %v1462_v15 = vsel %vm1445_vm1, %v1459_v35, %v1461_v3  ;;  %v5890_v63 = vld [vmem:[%s6307_s8 + $0x4c] sm:$0xff] }
  0xdd   : > { %2034 = vmatmul.bf16.gmra.mxu3 %v5887_v16  ;;  %v5889_v16 = vld [vmem:[%s6307_s8 + $0x44] sm:$0xff] }
  0xde   : > { %2668 = vmatmul.bf16.gmra.mxu0 %v2418_v20 }
  0xdf   : > { %v6546_v23 = vpop.f32.mrf.mxu2 }
  0xe0   : > { %v6548_v24 = vpop.f32.mrf.mxu3 }
  0xe1   : > { %v6550_v25 = vpop.f32.mrf.mxu1 }
  0xe3   : > { %v6552_v28 = vpop.f32.mrf.mxu0 }
  0xe7   : > { %v6554_v38 = vpop.f32.mrf.mxu2 }
  0xe8   : > { %v6556_v39 = vpop.f32.mrf.mxu3 }
  0xe9   : > { %v671_v40 = vpop.f32.mrf.mxu1 }
  0xeb   : > { %v641_v48 = vpop.f32.mrf.mxu0 }
  0xec   : > { %1285 = vmatmul.bf16.gmra.mxu1 %v1038_v44  ;;  %1605 = vmatmul.bf16.gmra.mxu2 %v1460_v45  ;;  %v2435_v44 = vshrl.u32 %v5921_v51, 16  ;;  %v2439_v45 = vshll.u32 %v5922_v29, 16  ;;  %v1049_v48 = vor.u32 %v1047_v36, %v1045_v2  ;;  %v5852_v2 = vld [vmem:[%s6307_s8 + $0x50] sm:$0xff] }
  0xed   : > { %2039 = vmatmul.bf16.gmra.mxu3 %v5888_v46  ;;  %v6020_v46 = vld [vmem:[%s7149_s1 + $0x220] sm:$0xff] }
  0xee   : > { %2673 = vmatmul.bf16.gmra.mxu0 %v2426_v49  ;;  %v1053_v49 = vrot.slane %v1051_v37, 1  ;;  %v2441_v57 = vrot.slane %v2439_v45, 1  ;;  %v2443_v37 = vshrl.u32 %v5922_v29, 16 }
  0xef   : > { %v701_v52 = vpop.f32.mrf.mxu2  ;;  %4344 = vmatpush.bf16.msra.mxu0 %v6020_v46 }
  0xf0   : > { %v731_v55 = vpop.f32.mrf.mxu3  ;;  %v1463_v52 = vrot.slane %v5851_v22, 1  ;;  %v1054_v62 = vsel %vm978_vm0, %v1049_v48, %v1053_v49  ;;  %v1057_v45 = vor.u32 %v1055_v34, %v1053_v49  ;;  %v1465_v48 = vrot.slane %v5852_v2, 1 }
  0xf1   : > { %v6564_v56 = vpop.f32.mrf.mxu1  ;;  %v2437_v55 = vor.u32 %v2435_v44, %v2433_v8 }
  0xf2   : > { %v1464_v51 = vsel %vm1445_vm1, %v1461_v3, %v1463_v52  ;;  %v1466_v29 = vsel %vm1445_vm1, %v1463_v52, %v1465_v48 }
  0xf3   : > { %v6566_v59 = vpop.f32.mrf.mxu0 }
  0xf7   : > { %v6568_v9 = vpop.f32.mrf.mxu2 }
  0xf8   : > { %v6570_v11 = vpop.f32.mrf.mxu3 }
  0xf9   : > { %v6572_v12 = vpop.f32.mrf.mxu1 }
  0xfb   : > { %v6577_v20 = vpop.f32.mrf.mxu0 }
  0xfc   : > { %1290 = vmatmul.bf16.gmra.mxu1 %v1046_v14  ;;  %1610 = vmatmul.bf16.gmra.mxu2 %v1462_v15  ;;  %v2442_v14 = vsel %vm978_vm0, %v2437_v55, %v2441_v57  ;;  %v5923_v15 = vld [vmem:[%s6307_s8 + $0x5c] sm:$0xff] }
  0xfd   : > { %2044 = vmatmul.bf16.gmra.mxu3 %v5889_v16 }
  0xfe   : > { %2678 = vmatmul.bf16.gmra.mxu0 %v2434_v21 }
  0xff   : > { %v6588_v31 = vpop.f32.mrf.mxu2 }
 0x100   : > { %v6590_v32 = vpop.f32.mrf.mxu3 }
 0x101   : > { %v678_v35 = vpop.f32.mrf.mxu1 }
 0x102   : > { %v1059_v35 = vshll.u32 %v5852_v2, 16 }
 0x103   : > { %v648_v40 = vpop.f32.mrf.mxu0 }
 0x104   : > { %v2447_v40 = vshll.u32 %v5923_v15, 16  ;;  %v1061_v46 = vrot.slane %v1059_v35, 1  ;;  %v2451_v35 = vshrl.u32 %v5923_v15, 16  ;;  %v5892_v15 = vld [vmem:[%s6307_s8 + $0x5c] sm:$0xff] }
 0x107   : > { %v708_v58 = vpop.f32.mrf.mxu2 }
 0x108   : > { %v738_v50 = vpop.f32.mrf.mxu3  ;;  %v2449_v58 = vrot.slane %v2447_v40, 1 }
 0x109   : > { %v1256_v61 = vpop.f32.mrf.mxu1 }
 0x10a   : > { %v1376_v8 = vadd.f32 %v1256_v61, %v6479_v0  ;;  %v2445_v0 = vor.u32 %v2443_v37, %v2441_v57  ;;  %v6615_v57 = vld [vmem:[%s6307_s8 + $0x58] sm:$0xff] }
 0x10b   : > { %v2644_v4 = vpop.f32.mrf.mxu0  ;;  %v1067_v52 = vshll.u32 %v6615_v57, 16 }
 0x10c   : > { %1295 = vmatmul.bf16.gmra.mxu1 %v1054_v62  ;;  %1615 = vmatmul.bf16.gmra.mxu2 %v1464_v51  ;;  %v1062_v51 = vsel %vm978_vm0, %v1057_v45, %v1061_v46  ;;  %v2450_v49 = vsel %vm978_vm0, %v2445_v0, %v2449_v58 }
 0x10d   : > { %2049 = vmatmul.bf16.gmra.mxu3 %v5890_v63  ;;  %v5891_v63 = vld [vmem:[%s6307_s8 + $0x54] sm:$0xff]  ;;  %v1069_v40 = vrot.slane %v1067_v52, 1 }
 0x10e   : > { %2683 = vmatmul.bf16.gmra.mxu0 %v2442_v14 }
 0x10f   : > { %v1576_v16 = vpop.f32.mrf.mxu2 }
 0x110   : > { %v1696_v21 = vadd.f32 %v1576_v16, %v1376_v8  ;;  %v2010_v26 = vpop.f32.mrf.mxu3  ;;  %v5924_v8 = vld [vmem:[%s6307_s8 + $0x64] sm:$0xff] }
 0x111   : > { %v1258_v27 = vpop.f32.mrf.mxu1 }
 0x112   : > { %v2130_v36 = vadd.f32 %v2010_v26, %v1696_v21  ;;  %v1377_v55 = vadd.f32 %v1258_v27, %v6490_v10  ;;  %v1063_v27 = vshrl.u32 %v5852_v2, 16 }
 0x113   : > { %v2646_v3 = vpop.f32.mrf.mxu0 }
 0x114   : > { %v6605_v44 = vadd.f32 %v2644_v4, %v2130_v36  ;;  %v2455_v36 = vshll.u32 %v5924_v8, 16  ;;  %v1065_v37 = vor.u32 %v1063_v27, %v1061_v46  ;;  %v5948_v27 = vld [vmem:[%s7149_s1 + $0x158] sm:$0xff] }
 0x115   : > { %2958 = vmatpush.bf16.msra.mxu1 %v5948_v27 }
 0x116   : > { %v2457_v0 = vrot.slane %v2455_v36, 1  ;;  %v1070_v2 = vsel %vm978_vm0, %v1065_v37, %v1069_v40 }
 0x117   : > { %v1578_v50 = vpop.f32.mrf.mxu2 }
 0x118   : > { %v1697_v61 = vadd.f32 %v1578_v50, %v1377_v55  ;;  %v2012_v22 = vpop.f32.mrf.mxu3  ;;  %v2453_v55 = vor.u32 %v2451_v35, %v2449_v58  ;;  %v6628_v58 = vld [vmem:[%s6307_s8 + $0x60] sm:$0xff] }
 0x119   : > { %v1261_v62 = vpop.f32.mrf.mxu1  ;;  %v1075_v35 = vshll.u32 %v6628_v58, 16 }
 0x11a   : > { %v2131_v4 = vadd.f32 %v2012_v22, %v1697_v61 }
 0x11b   : > { %v2649_v14 = vpop.f32.mrf.mxu0 }
 0x11c   : > { %1300 = vmatmul.bf16.gmra.mxu1 %v1062_v51  ;;  %1620 = vmatmul.bf16.gmra.mxu2 %v1466_v29  ;;  %v6612_v10 = vadd.f32 %v2646_v3, %v2131_v4  ;;  %v1467_v3 = vrot.slane %v6615_v57, 1  ;;  %v5980_v4 = vld [vmem:[%s7149_s1 + $0x198] sm:$0xff] }
 0x11d   : > { %2054 = vmatmul.bf16.gmra.mxu3 %v5891_v63  ;;  %v2458_v63 = vsel %vm978_vm0, %v2453_v55, %v2457_v0  ;;  %3392 = vmatpush.bf16.msra.mxu2 %v5980_v4  ;;  %v6019_v55 = vld [vmem:[%s7149_s1 + $0x218] sm:$0xff]  ;;  %v5893_v4 = vld [vmem:[%s6307_s8 + $0x64] sm:$0xff] }
 0x11e   : > { %2688 = vmatmul.bf16.gmra.mxu0 %v2450_v49  ;;  %v1468_v51 = vsel %vm1445_vm1, %v1465_v48, %v1467_v3  ;;  %v6011_v48 = vld [vmem:[%s7149_s1 + $0x1d8] sm:$0xff]  ;;  %v5925_v49 = vld [vmem:[%s6307_s8 + $0x6c] sm:$0xff] }
 0x11f   : > { %v1581_v16 = vpop.f32.mrf.mxu2  ;;  %4026 = vmatpush.bf16.msra.mxu3 %v6011_v48  ;;  %4345 = vmatpush.bf16.msra.mxu0 %v6019_v55 }
 0x120   : > { %v2015_v21 = vpop.f32.mrf.mxu3 }
 0x121   : > { %v1263_v26 = vpop.f32.mrf.mxu1 }
 0x122   : > { %v1379_v45 = vadd.f32 %v1263_v26, %v6504_v33 }
 0x123   : > { %v2651_v34 = vpop.f32.mrf.mxu0 }
 0x127   : > { %v1583_v50 = vpop.f32.mrf.mxu2 }
 0x128   : > { %v1699_v61 = vadd.f32 %v1583_v50, %v1379_v45  ;;  %v2017_v22 = vpop.f32.mrf.mxu3  ;;  %v2459_v45 = vshrl.u32 %v5924_v8, 16 }
 0x129   : > { %v1266_v62 = vpop.f32.mrf.mxu1 }
 0x12a   : > { %v2133_v29 = vadd.f32 %v2017_v22, %v1699_v61  ;;  %v1380_v14 = vadd.f32 %v1266_v62, %v6515_v47  ;;  %v2463_v47 = vshll.u32 %v5925_v49, 16  ;;  %v1077_v22 = vrot.slane %v1075_v35, 1 }
 0x12b   : > { %v2654_v46 = vpop.f32.mrf.mxu0  ;;  %v2461_v62 = vor.u32 %v2459_v45, %v2457_v0 }
 0x12c   : > { %1305 = vmatmul.bf16.gmra.mxu1 %v1070_v2  ;;  %1625 = vmatmul.bf16.gmra.mxu2 %v1468_v51  ;;  %v6625_v33 = vadd.f32 %v2651_v34, %v2133_v29  ;;  %v1071_v34 = vshrl.u32 %v6615_v57, 16  ;;  %v1469_v57 = vrot.slane %v6628_v58, 1  ;;  %v2465_v2 = vrot.slane %v2463_v47, 1 }
 0x12d   : > { %2059 = vmatmul.bf16.gmra.mxu3 %v5892_v15 }
 0x12e   : > { %2693 = vmatmul.bf16.gmra.mxu0 %v2458_v63  ;;  %v1073_v61 = vor.u32 %v1071_v34, %v1069_v40  ;;  %v1470_v63 = vsel %vm1445_vm1, %v1467_v3, %v1469_v57  ;;  %v5855_v40 = vld [vmem:[%s6307_s8 + $0x68] sm:$0xff] }
 0x12f   : > { %v1586_v16 = vpop.f32.mrf.mxu2  ;;  %v1083_v34 = vshll.u32 %v5855_v40, 16 }
 0x130   : > { %v1700_v21 = vadd.f32 %v1586_v16, %v1380_v14  ;;  %v2020_v26 = vpop.f32.mrf.mxu3  ;;  %v1078_v29 = vsel %vm978_vm0, %v1073_v61, %v1077_v22  ;;  %v5926_v14 = vld [vmem:[%s6307_s8 + $0x74] sm:$0xff]  ;;  %v1471_v61 = vrot.slane %v5855_v40, 1 }
 0x131   : > { %v1268_v52 = vpop.f32.mrf.mxu1  ;;  %v1085_v55 = vrot.slane %v1083_v34, 1  ;;  %v2475_v34 = vshrl.u32 %v5926_v14, 16 }
 0x132   : > { %v2134_v36 = vadd.f32 %v2020_v26, %v1700_v21  ;;  %v1079_v52 = vshrl.u32 %v6628_v58, 16 }
 0x133   : > { %v2656_v37 = vpop.f32.mrf.mxu0 }
 0x134   : > { %v6646_v50 = vadd.f32 %v2654_v46, %v2134_v36  ;;  %v2466_v46 = vsel %vm978_vm0, %v2461_v62, %v2465_v2  ;;  %v2467_v36 = vshrl.u32 %v5925_v49, 16  ;;  %v2471_v37 = vshll.u32 %v5926_v14, 16  ;;  %v5895_v14 = vld [vmem:[%s6307_s8 + $0x74] sm:$0xff] }
 0x135   : > { %v1081_v47 = vor.u32 %v1079_v52, %v1077_v22  ;;  %v1472_v49 = vsel %vm1445_vm1, %v1469_v57, %v1471_v61 }
 0x136   : > { %v2469_v62 = vor.u32 %v2467_v36, %v2465_v2  ;;  %v6667_v2 = vld [vmem:[%s6307_s8 + $0x70] sm:$0xff] }
 0x137   : > { %v1588_v51 = vpop.f32.mrf.mxu2  ;;  %v1091_v57 = vshll.u32 %v6667_v2, 16 }
 0x138   : > { %v2022_v8 = vpop.f32.mrf.mxu3  ;;  %v2473_v51 = vrot.slane %v2471_v37, 1 }
 0x139   : > { %v1271_v15 = vpop.f32.mrf.mxu1  ;;  %v1093_v37 = vrot.slane %v1091_v57, 1 }
 0x13a   : > { %v1382_v0 = vadd.f32 %v1271_v15, %v6541_v17  ;;  %v2474_v22 = vsel %vm978_vm0, %v2469_v62, %v2473_v51 }
 0x13b   : > { %v2659_v48 = vpop.f32.mrf.mxu0 }
 0x13c   : > { %1310 = vmatmul.bf16.gmra.mxu1 %v1078_v29  ;;  %1630 = vmatmul.bf16.gmra.mxu2 %v1470_v63  ;;  %v1086_v63 = vsel %vm978_vm0, %v1081_v47, %v1085_v55 }
 0x13d   : > { %2064 = vmatmul.bf16.gmra.mxu3 %v5893_v4  ;;  %v5894_v4 = vld [vmem:[%s6307_s8 + $0x6c] sm:$0xff] }
 0x13e   : > { %2698 = vmatmul.bf16.gmra.mxu0 %v2466_v46 }
 0x13f   : > { %v1591_v16 = vpop.f32.mrf.mxu2 }
 0x140   : > { %v1702_v21 = vadd.f32 %v1591_v16, %v1382_v0  ;;  %v2025_v26 = vpop.f32.mrf.mxu3  ;;  %v5927_v0 = vld [vmem:[%s6307_s8 + $0x7c] sm:$0xff] }
 0x141   : > { %v1273_v27 = vpop.f32.mrf.mxu1 }
 0x142   : > { %v2136_v3 = vadd.f32 %v2025_v26, %v1702_v21  ;;  %v1383_v17 = vadd.f32 %v1273_v27, %v6552_v28  ;;  %v1087_v27 = vshrl.u32 %v5855_v40, 16 }
 0x143   : > { %v2661_v35 = vpop.f32.mrf.mxu0 }
 0x144   : > { %v6657_v45 = vadd.f32 %v2659_v48, %v2136_v3  ;;  %v2479_v3 = vshll.u32 %v5927_v0, 16  ;;  %v1089_v36 = vor.u32 %v1087_v27, %v1085_v55  ;;  %v5947_v27 = vld [vmem:[%s7149_s1 + $0x150] sm:$0xff] }
 0x145   : > { %2959 = vmatpush.bf16.msra.mxu1 %v5947_v27 }
 0x146   : > { %v2481_v62 = vrot.slane %v2479_v3, 1  ;;  %v1094_v40 = vsel %vm978_vm0, %v1089_v36, %v1093_v37 }
 0x147   : > { %v1593_v8 = vpop.f32.mrf.mxu2 }
 0x148   : > { %v1703_v15 = vadd.f32 %v1593_v8, %v1383_v17  ;;  %v2027_v58 = vpop.f32.mrf.mxu3  ;;  %v2477_v17 = vor.u32 %v2475_v34, %v2473_v51  ;;  %v6680_v51 = vld [vmem:[%s6307_s8 + $0x78] sm:$0xff] }
 0x149   : > { %v1276_v29 = vpop.f32.mrf.mxu1  ;;  %v1099_v34 = vshll.u32 %v6680_v51, 16 }
 0x14a   : > { %v2137_v48 = vadd.f32 %v2027_v58, %v1703_v15 }
 0x14b   : > { %v2664_v46 = vpop.f32.mrf.mxu0 }
 0x14c   : > { %1315 = vmatmul.bf16.gmra.mxu1 %v1086_v63  ;;  %1635 = vmatmul.bf16.gmra.mxu2 %v1472_v49  ;;  %v6664_v28 = vadd.f32 %v2661_v35, %v2137_v48  ;;  %v1473_v35 = vrot.slane %v6667_v2, 1  ;;  %v5979_v48 = vld [vmem:[%s7149_s1 + $0x190] sm:$0xff] }
 0x14d   : > { %2069 = vmatmul.bf16.gmra.mxu3 %v5894_v4  ;;  %v2482_v4 = vsel %vm978_vm0, %v2477_v17, %v2481_v62  ;;  %3393 = vmatpush.bf16.msra.mxu2 %v5979_v48  ;;  %v6018_v17 = vld [vmem:[%s7149_s1 + $0x210] sm:$0xff]  ;;  %v5896_v48 = vld [vmem:[%s6307_s8 + $0x7c] sm:$0xff] }
 0x14e   : > { %2703 = vmatmul.bf16.gmra.mxu0 %v2474_v22  ;;  %v1474_v63 = vsel %vm1445_vm1, %v1471_v61, %v1473_v35  ;;  %v6010_v61 = vld [vmem:[%s7149_s1 + $0x1d0] sm:$0xff]  ;;  %v5928_v22 = vld [vmem:[%s6307_s8 + $0x84] sm:$0xff] }
 0x14f   : > { %v1596_v16 = vpop.f32.mrf.mxu2  ;;  %4027 = vmatpush.bf16.msra.mxu3 %v6010_v61  ;;  %4346 = vmatpush.bf16.msra.mxu0 %v6018_v17 }
 0x150   : > { %v2030_v21 = vpop.f32.mrf.mxu3 }
 0x151   : > { %v1278_v26 = vpop.f32.mrf.mxu1 }
 0x152   : > { %v1385_v47 = vadd.f32 %v1278_v26, %v6566_v59 }
 0x153   : > { %v2666_v52 = vpop.f32.mrf.mxu0 }
 0x157   : > { %v1598_v8 = vpop.f32.mrf.mxu2 }
 0x158   : > { %v1705_v15 = vadd.f32 %v1598_v8, %v1385_v47  ;;  %v2032_v58 = vpop.f32.mrf.mxu3  ;;  %v2483_v47 = vshrl.u32 %v5927_v0, 16 }
 0x159   : > { %v1281_v29 = vpop.f32.mrf.mxu1 }
 0x15a   : > { %v2139_v49 = vadd.f32 %v2032_v58, %v1705_v15  ;;  %v1386_v46 = vadd.f32 %v1281_v29, %v6577_v20  ;;  %v2487_v20 = vshll.u32 %v5928_v22, 16  ;;  %v1101_v58 = vrot.slane %v1099_v34, 1 }
 0x15b   : > { %v2669_v55 = vpop.f32.mrf.mxu0  ;;  %v2485_v29 = vor.u32 %v2483_v47, %v2481_v62 }
 0x15c   : > { %1320 = vmatmul.bf16.gmra.mxu1 %v1094_v40  ;;  %1640 = vmatmul.bf16.gmra.mxu2 %v1474_v63  ;;  %v6677_v59 = vadd.f32 %v2666_v52, %v2139_v49  ;;  %v1095_v52 = vshrl.u32 %v6667_v2, 16  ;;  %v1475_v2 = vrot.slane %v6680_v51, 1  ;;  %v2489_v40 = vrot.slane %v2487_v20, 1 }
 0x15d   : > { %2074 = vmatmul.bf16.gmra.mxu3 %v5895_v14 }
 0x15e   : > { %2708 = vmatmul.bf16.gmra.mxu0 %v2482_v4  ;;  %v1097_v15 = vor.u32 %v1095_v52, %v1093_v37  ;;  %v1476_v4 = vsel %vm1445_vm1, %v1473_v35, %v1475_v2  ;;  %v5858_v37 = vld [vmem:[%s6307_s8 + $0x80] sm:$0xff] }
 0x15f   : > { %v1601_v16 = vpop.f32.mrf.mxu2  ;;  %v1107_v52 = vshll.u32 %v5858_v37, 16 }
 0x160   : > { %v1706_v21 = vadd.f32 %v1601_v16, %v1386_v46  ;;  %v2035_v26 = vpop.f32.mrf.mxu3  ;;  %v1102_v49 = vsel %vm978_vm0, %v1097_v15, %v1101_v58  ;;  %v5929_v46 = vld [vmem:[%s6307_s8 + $0x8c] sm:$0xff]  ;;  %v1477_v15 = vrot.slane %v5858_v37, 1 }
 0x161   : > { %v1283_v57 = vpop.f32.mrf.mxu1  ;;  %v1109_v17 = vrot.slane %v1107_v52, 1  ;;  %v2499_v52 = vshrl.u32 %v5929_v46, 16 }
 0x162   : > { %v2140_v3 = vadd.f32 %v2035_v26, %v1706_v21  ;;  %v1103_v57 = vshrl.u32 %v6680_v51, 16 }
 0x163   : > { %v2671_v36 = vpop.f32.mrf.mxu0 }
 0x164   : > { %v6698_v8 = vadd.f32 %v2669_v55, %v2140_v3  ;;  %v2490_v55 = vsel %vm978_vm0, %v2485_v29, %v2489_v40  ;;  %v2491_v3 = vshrl.u32 %v5928_v22, 16  ;;  %v2495_v36 = vshll.u32 %v5929_v46, 16  ;;  %v5898_v46 = vld [vmem:[%s6307_s8 + $0x8c] sm:$0xff] }
 0x165   : > { %v1105_v20 = vor.u32 %v1103_v57, %v1101_v58  ;;  %v1478_v22 = vsel %vm1445_vm1, %v1475_v2, %v1477_v15 }
 0x166   : > { %v2493_v29 = vor.u32 %v2491_v3, %v2489_v40  ;;  %v6719_v40 = vld [vmem:[%s6307_s8 + $0x88] sm:$0xff] }
 0x167   : > { %v1603_v63 = vpop.f32.mrf.mxu2  ;;  %v1115_v2 = vshll.u32 %v6719_v40, 16 }
 0x168   : > { %v2037_v0 = vpop.f32.mrf.mxu3  ;;  %v2497_v63 = vrot.slane %v2495_v36, 1 }
 0x169   : > { %v1286_v14 = vpop.f32.mrf.mxu1  ;;  %v1117_v36 = vrot.slane %v1115_v2, 1 }
 0x16a   : > { %v1388_v62 = vadd.f32 %v1286_v14, %v6474_v60  ;;  %v2498_v58 = vsel %vm978_vm0, %v2493_v29, %v2497_v63 }
 0x16b   : > { %v2674_v61 = vpop.f32.mrf.mxu0 }
 0x16c   : > { %1325 = vmatmul.bf16.gmra.mxu1 %v1102_v49  ;;  %1645 = vmatmul.bf16.gmra.mxu2 %v1476_v4  ;;  %v1110_v4 = vsel %vm978_vm0, %v1105_v20, %v1109_v17 }
 0x16d   : > { %2079 = vmatmul.bf16.gmra.mxu3 %v5896_v48  ;;  %v5897_v48 = vld [vmem:[%s6307_s8 + $0x84] sm:$0xff] }
 0x16e   : > { %2713 = vmatmul.bf16.gmra.mxu0 %v2490_v55 }
 0x16f   : > { %v1606_v16 = vpop.f32.mrf.mxu2 }
 0x170   : > { %v1708_v21 = vadd.f32 %v1606_v16, %v1388_v62  ;;  %v2040_v26 = vpop.f32.mrf.mxu3  ;;  %v5930_v62 = vld [vmem:[%s6307_s8 + $0x94] sm:$0xff] }
 0x171   : > { %v1288_v27 = vpop.f32.mrf.mxu1 }
 0x172   : > { %v2142_v35 = vadd.f32 %v2040_v26, %v1708_v21  ;;  %v1389_v60 = vadd.f32 %v1288_v27, %v6488_v7  ;;  %v1111_v27 = vshrl.u32 %v5858_v37, 16 }
 0x173   : > { %v2676_v34 = vpop.f32.mrf.mxu0 }
 0x174   : > { %v6709_v47 = vadd.f32 %v2674_v61, %v2142_v35  ;;  %v2503_v35 = vshll.u32 %v5930_v62, 16  ;;  %v1113_v3 = vor.u32 %v1111_v27, %v1109_v17  ;;  %v5946_v27 = vld [vmem:[%s7149_s1 + $0x148] sm:$0xff] }
 0x175   : > { %2960 = vmatpush.bf16.msra.mxu1 %v5946_v27 }
 0x176   : > { %v2505_v29 = vrot.slane %v2503_v35, 1  ;;  %v1118_v37 = vsel %vm978_vm0, %v1113_v3, %v1117_v36 }
 0x177   : > { %v1608_v0 = vpop.f32.mrf.mxu2 }
 0x178   : > { %v1709_v14 = vadd.f32 %v1608_v0, %v1389_v60  ;;  %v2042_v51 = vpop.f32.mrf.mxu3  ;;  %v2501_v60 = vor.u32 %v2499_v52, %v2497_v63  ;;  %v6732_v63 = vld [vmem:[%s6307_s8 + $0x90] sm:$0xff] }
 0x179   : > { %v1291_v49 = vpop.f32.mrf.mxu1  ;;  %v1123_v52 = vshll.u32 %v6732_v63, 16 }
 0x17a   : > { %v2143_v61 = vadd.f32 %v2042_v51, %v1709_v14 }
 0x17b   : > { %v2679_v55 = vpop.f32.mrf.mxu0 }
 0x17c   : > { %1330 = vmatmul.bf16.gmra.mxu1 %v1110_v4  ;;  %1650 = vmatmul.bf16.gmra.mxu2 %v1478_v22  ;;  %v6716_v7 = vadd.f32 %v2676_v34, %v2143_v61  ;;  %v1479_v34 = vrot.slane %v6719_v40, 1  ;;  %v5978_v61 = vld [vmem:[%s7149_s1 + $0x188] sm:$0xff] }
 0x17d   : > { %2084 = vmatmul.bf16.gmra.mxu3 %v5897_v48  ;;  %v2506_v48 = vsel %vm978_vm0, %v2501_v60, %v2505_v29  ;;  %3394 = vmatpush.bf16.msra.mxu2 %v5978_v61  ;;  %v6017_v60 = vld [vmem:[%s7149_s1 + $0x208] sm:$0xff]  ;;  %v5899_v61 = vld [vmem:[%s6307_s8 + $0x94] sm:$0xff] }
 0x17e   : > { %2718 = vmatmul.bf16.gmra.mxu0 %v2498_v58  ;;  %v1480_v4 = vsel %vm1445_vm1, %v1477_v15, %v1479_v34  ;;  %v6009_v15 = vld [vmem:[%s7149_s1 + $0x1c8] sm:$0xff]  ;;  %v5931_v58 = vld [vmem:[%s6307_s8 + $0x9c] sm:$0xff] }
 0x17f   : > { %v1611_v16 = vpop.f32.mrf.mxu2  ;;  %4028 = vmatpush.bf16.msra.mxu3 %v6009_v15  ;;  %4347 = vmatpush.bf16.msra.mxu0 %v6017_v60 }
 0x180   : > { %v2045_v21 = vpop.f32.mrf.mxu3 }
 0x181   : > { %v1293_v26 = vpop.f32.mrf.mxu1 }
 0x182   : > { %v1391_v20 = vadd.f32 %v1293_v26, %v6502_v30 }
 0x183   : > { %v2681_v57 = vpop.f32.mrf.mxu0 }
 0x187   : > { %v1613_v0 = vpop.f32.mrf.mxu2 }
 0x188   : > { %v1711_v14 = vadd.f32 %v1613_v0, %v1391_v20  ;;  %v2047_v51 = vpop.f32.mrf.mxu3  ;;  %v2507_v20 = vshrl.u32 %v5930_v62, 16 }
 0x189   : > { %v1296_v49 = vpop.f32.mrf.mxu1 }
 0x18a   : > { %v2145_v22 = vadd.f32 %v2047_v51, %v1711_v14  ;;  %v1392_v55 = vadd.f32 %v1296_v49, %v6510_v43  ;;  %v2511_v43 = vshll.u32 %v5931_v58, 16  ;;  %v1125_v51 = vrot.slane %v1123_v52, 1 }
 0x18b   : > { %v2684_v17 = vpop.f32.mrf.mxu0  ;;  %v2509_v49 = vor.u32 %v2507_v20, %v2505_v29 }
 0x18c   : > { %1335 = vmatmul.bf16.gmra.mxu1 %v1118_v37  ;;  %1655 = vmatmul.bf16.gmra.mxu2 %v1480_v4  ;;  %v6729_v30 = vadd.f32 %v2681_v57, %v2145_v22  ;;  %v1119_v57 = vshrl.u32 %v6719_v40, 16  ;;  %v1481_v40 = vrot.slane %v6732_v63, 1  ;;  %v2513_v37 = vrot.slane %v2511_v43, 1 }
 0x18d   : > { %2089 = vmatmul.bf16.gmra.mxu3 %v5898_v46 }
 0x18e   : > { %2723 = vmatmul.bf16.gmra.mxu0 %v2506_v48  ;;  %v1121_v14 = vor.u32 %v1119_v57, %v1117_v36  ;;  %v1482_v48 = vsel %vm1445_vm1, %v1479_v34, %v1481_v40  ;;  %v5861_v36 = vld [vmem:[%s6307_s8 + $0x98] sm:$0xff] }
 0x18f   : > { %v1616_v16 = vpop.f32.mrf.mxu2  ;;  %v1131_v57 = vshll.u32 %v5861_v36, 16 }
 0x190   : > { %v1712_v21 = vadd.f32 %v1616_v16, %v1392_v55  ;;  %v2050_v26 = vpop.f32.mrf.mxu3  ;;  %v1126_v22 = vsel %vm978_vm0, %v1121_v14, %v1125_v51  ;;  %v5932_v55 = vld [vmem:[%s6307_s8 + $0xa4] sm:$0xff]  ;;  %v1483_v14 = vrot.slane %v5861_v36, 1 }
 0x191   : > { %v1298_v2 = vpop.f32.mrf.mxu1  ;;  %v1133_v60 = vrot.slane %v1131_v57, 1  ;;  %v2523_v57 = vshrl.u32 %v5932_v55, 16 }
 0x192   : > { %v2146_v35 = vadd.f32 %v2050_v26, %v1712_v21  ;;  %v1127_v2 = vshrl.u32 %v6732_v63, 16 }
 0x193   : > { %v2686_v3 = vpop.f32.mrf.mxu0 }
 0x194   : > { %v6750_v0 = vadd.f32 %v2684_v17, %v2146_v35  ;;  %v2514_v17 = vsel %vm978_vm0, %v2509_v49, %v2513_v37  ;;  %v2515_v35 = vshrl.u32 %v5931_v58, 16  ;;  %v2519_v3 = vshll.u32 %v5932_v55, 16  ;;  %v5901_v55 = vld [vmem:[%s6307_s8 + $0xa4] sm:$0xff] }
 0x195   : > { %v1129_v43 = vor.u32 %v1127_v2, %v1125_v51  ;;  %v1484_v58 = vsel %vm1445_vm1, %v1481_v40, %v1483_v14 }
 0x196   : > { %v2517_v49 = vor.u32 %v2515_v35, %v2513_v37  ;;  %v6771_v37 = vld [vmem:[%s6307_s8 + $0xa0] sm:$0xff] }
 0x197   : > { %v1618_v4 = vpop.f32.mrf.mxu2  ;;  %v1139_v40 = vshll.u32 %v6771_v37, 16 }
 0x198   : > { %v2052_v62 = vpop.f32.mrf.mxu3  ;;  %v2521_v4 = vrot.slane %v2519_v3, 1 }
 0x199   : > { %v1301_v46 = vpop.f32.mrf.mxu1  ;;  %v1141_v3 = vrot.slane %v1139_v40, 1 }
 0x19a   : > { %v1394_v29 = vadd.f32 %v1301_v46, %v6536_v13  ;;  %v2522_v51 = vsel %vm978_vm0, %v2517_v49, %v2521_v4 }
 0x19b   : > { %v2689_v15 = vpop.f32.mrf.mxu0 }
 0x19c   : > { %1340 = vmatmul.bf16.gmra.mxu1 %v1126_v22  ;;  %1660 = vmatmul.bf16.gmra.mxu2 %v1482_v48  ;;  %v1134_v48 = vsel %vm978_vm0, %v1129_v43, %v1133_v60 }
 0x19d   : > { %2094 = vmatmul.bf16.gmra.mxu3 %v5899_v61  ;;  %v5900_v61 = vld [vmem:[%s6307_s8 + $0x9c] sm:$0xff] }
 0x19e   : > { %2728 = vmatmul.bf16.gmra.mxu0 %v2514_v17 }
 0x19f   : > { %v1621_v16 = vpop.f32.mrf.mxu2 }
 0x1a0   : > { %v1714_v21 = vadd.f32 %v1621_v16, %v1394_v29  ;;  %v2055_v26 = vpop.f32.mrf.mxu3  ;;  %v5933_v29 = vld [vmem:[%s6307_s8 + $0xac] sm:$0xff] }
 0x1a1   : > { %v1303_v27 = vpop.f32.mrf.mxu1 }
 0x1a2   : > { %v2148_v34 = vadd.f32 %v2055_v26, %v1714_v21  ;;  %v1395_v13 = vadd.f32 %v1303_v27, %v6550_v25  ;;  %v1135_v27 = vshrl.u32 %v5861_v36, 16 }
 0x1a3   : > { %v2691_v52 = vpop.f32.mrf.mxu0 }
 0x1a4   : > { %v6761_v20 = vadd.f32 %v2689_v15, %v2148_v34  ;;  %v2527_v34 = vshll.u32 %v5933_v29, 16  ;;  %v1137_v35 = vor.u32 %v1135_v27, %v1133_v60  ;;  %v5945_v27 = vld [vmem:[%s7149_s1 + $0x140] sm:$0xff] }
 0x1a5   : > { %2961 = vmatpush.bf16.msra.mxu1 %v5945_v27 }
 0x1a6   : > { %v2529_v49 = vrot.slane %v2527_v34, 1  ;;  %v1142_v36 = vsel %vm978_vm0, %v1137_v35, %v1141_v3 }
 0x1a7   : > { %v1623_v62 = vpop.f32.mrf.mxu2 }
 0x1a8   : > { %v1715_v46 = vadd.f32 %v1623_v62, %v1395_v13  ;;  %v2057_v63 = vpop.f32.mrf.mxu3  ;;  %v2525_v13 = vor.u32 %v2523_v57, %v2521_v4  ;;  %v6784_v4 = vld [vmem:[%s6307_s8 + $0xa8] sm:$0xff] }
 0x1a9   : > { %v1306_v22 = vpop.f32.mrf.mxu1  ;;  %v1147_v57 = vshll.u32 %v6784_v4, 16 }
 0x1aa   : > { %v2149_v15 = vadd.f32 %v2057_v63, %v1715_v46 }
 0x1ab   : > { %v2694_v17 = vpop.f32.mrf.mxu0 }
 0x1ac   : > { %1345 = vmatmul.bf16.gmra.mxu1 %v1134_v48  ;;  %1665 = vmatmul.bf16.gmra.mxu2 %v1484_v58  ;;  %v6768_v25 = vadd.f32 %v2691_v52, %v2149_v15  ;;  %v1485_v52 = vrot.slane %v6771_v37, 1  ;;  %v5977_v15 = vld [vmem:[%s7149_s1 + $0x180] sm:$0xff] }
 0x1ad   : > { %2099 = vmatmul.bf16.gmra.mxu3 %v5900_v61  ;;  %v2530_v61 = vsel %vm978_vm0, %v2525_v13, %v2529_v49  ;;  %3395 = vmatpush.bf16.msra.mxu2 %v5977_v15  ;;  %v6016_v13 = vld [vmem:[%s7149_s1 + $0x200] sm:$0xff]  ;;  %v5902_v15 = vld [vmem:[%s6307_s8 + $0xac] sm:$0xff] }
 0x1ae   : > { %2733 = vmatmul.bf16.gmra.mxu0 %v2522_v51  ;;  %v1486_v48 = vsel %vm1445_vm1, %v1483_v14, %v1485_v52  ;;  %v6008_v14 = vld [vmem:[%s7149_s1 + $0x1c0] sm:$0xff]  ;;  %v5934_v51 = vld [vmem:[%s6307_s8 + $0xb4] sm:$0xff] }
 0x1af   : > { %v1626_v16 = vpop.f32.mrf.mxu2  ;;  %4029 = vmatpush.bf16.msra.mxu3 %v6008_v14  ;;  %4348 = vmatpush.bf16.msra.mxu0 %v6016_v13 }
 0x1b0   : > { %v2060_v21 = vpop.f32.mrf.mxu3 }
 0x1b1   : > { %v1308_v26 = vpop.f32.mrf.mxu1 }
 0x1b2   : > { %v1397_v43 = vadd.f32 %v1308_v26, %v6564_v56 }
 0x1b3   : > { %v2696_v2 = vpop.f32.mrf.mxu0 }
 0x1b7   : > { %v1628_v62 = vpop.f32.mrf.mxu2 }
 0x1b8   : > { %v1717_v46 = vadd.f32 %v1628_v62, %v1397_v43  ;;  %v2062_v63 = vpop.f32.mrf.mxu3  ;;  %v2531_v43 = vshrl.u32 %v5933_v29, 16 }
 0x1b9   : > { %v1311_v22 = vpop.f32.mrf.mxu1 }
 0x1ba   : > { %v2151_v58 = vadd.f32 %v2062_v63, %v1717_v46  ;;  %v1398_v17 = vadd.f32 %v1311_v22, %v6572_v12  ;;  %v2535_v12 = vshll.u32 %v5934_v51, 16  ;;  %v1149_v63 = vrot.slane %v1147_v57, 1 }
 0x1bb   : > { %v2699_v60 = vpop.f32.mrf.mxu0  ;;  %v2533_v22 = vor.u32 %v2531_v43, %v2529_v49 }
 0x1bc   : > { %1350 = vmatmul.bf16.gmra.mxu1 %v1142_v36  ;;  %1670 = vmatmul.bf16.gmra.mxu2 %v1486_v48  ;;  %v6781_v56 = vadd.f32 %v2696_v2, %v2151_v58  ;;  %v1143_v2 = vshrl.u32 %v6771_v37, 16  ;;  %v1487_v37 = vrot.slane %v6784_v4, 1  ;;  %v2537_v36 = vrot.slane %v2535_v12, 1 }
 0x1bd   : > { %2104 = vmatmul.bf16.gmra.mxu3 %v5901_v55 }
 0x1be   : > { %2738 = vmatmul.bf16.gmra.mxu0 %v2530_v61  ;;  %v1145_v46 = vor.u32 %v1143_v2, %v1141_v3  ;;  %v1488_v61 = vsel %vm1445_vm1, %v1485_v52, %v1487_v37  ;;  %v5864_v3 = vld [vmem:[%s6307_s8 + $0xb0] sm:$0xff] }
 0x1bf   : > { %v1631_v16 = vpop.f32.mrf.mxu2  ;;  %v1155_v2 = vshll.u32 %v5864_v3, 16 }
 0x1c0   : > { %v1718_v21 = vadd.f32 %v1631_v16, %v1398_v17  ;;  %v2065_v26 = vpop.f32.mrf.mxu3  ;;  %v1150_v58 = vsel %vm978_vm0, %v1145_v46, %v1149_v63  ;;  %v5935_v17 = vld [vmem:[%s6307_s8 + $0xbc] sm:$0xff]  ;;  %v1489_v46 = vrot.slane %v5864_v3, 1 }
 0x1c1   : > { %v1313_v40 = vpop.f32.mrf.mxu1  ;;  %v1157_v13 = vrot.slane %v1155_v2, 1  ;;  %v2547_v2 = vshrl.u32 %v5935_v17, 16 }
 0x1c2   : > { %v2152_v34 = vadd.f32 %v2065_v26, %v1718_v21  ;;  %v1151_v40 = vshrl.u32 %v6784_v4, 16 }
 0x1c3   : > { %v2701_v35 = vpop.f32.mrf.mxu0 }
 0x1c4   : > { %v6802_v62 = vadd.f32 %v2699_v60, %v2152_v34  ;;  %v2538_v60 = vsel %vm978_vm0, %v2533_v22, %v2537_v36  ;;  %v2539_v34 = vshrl.u32 %v5934_v51, 16  ;;  %v2543_v35 = vshll.u32 %v5935_v17, 16  ;;  %v5904_v17 = vld [vmem:[%s6307_s8 + $0xbc] sm:$0xff] }
 0x1c5   : > { %v1153_v12 = vor.u32 %v1151_v40, %v1149_v63  ;;  %v1490_v51 = vsel %vm1445_vm1, %v1487_v37, %v1489_v46 }
 0x1c6   : > { %v2541_v22 = vor.u32 %v2539_v34, %v2537_v36  ;;  %v5865_v36 = vld [vmem:[%s6307_s8 + $0xb8] sm:$0xff] }
 0x1c7   : > { %v1633_v48 = vpop.f32.mrf.mxu2  ;;  %v1163_v37 = vshll.u32 %v5865_v36, 16 }
 0x1c8   : > { %v2067_v29 = vpop.f32.mrf.mxu3  ;;  %v2545_v48 = vrot.slane %v2543_v35, 1 }
 0x1c9   : > { %v1316_v55 = vpop.f32.mrf.mxu1  ;;  %v1165_v35 = vrot.slane %v1163_v37, 1 }
 0x1ca   : > { %v1400_v49 = vadd.f32 %v1316_v55, %v6484_v5  ;;  %v2546_v63 = vsel %vm978_vm0, %v2541_v22, %v2545_v48 }
 0x1cb   : > { %v2704_v14 = vpop.f32.mrf.mxu0 }
 0x1cc   : > { %1355 = vmatmul.bf16.gmra.mxu1 %v1150_v58  ;;  %1675 = vmatmul.bf16.gmra.mxu2 %v1488_v61  ;;  %v1158_v61 = vsel %vm978_vm0, %v1153_v12, %v1157_v13  ;;  %v1491_v12 = vrot.slane %v5865_v36, 1 }
 0x1cd   : > { %2109 = vmatmul.bf16.gmra.mxu3 %v5902_v15  ;;  %v5903_v15 = vld [vmem:[%s6307_s8 + $0xb4] sm:$0xff] }
 0x1ce   : > { %2743 = vmatmul.bf16.gmra.mxu0 %v2538_v60 }
 0x1cf   : > { %v1636_v16 = vpop.f32.mrf.mxu2 }
 0x1d0   : > { %v1720_v21 = vadd.f32 %v1636_v16, %v1400_v49  ;;  %v2070_v26 = vpop.f32.mrf.mxu3  ;;  %v5936_v49 = vld [vmem:[%s6307_s8 + $0xc4] sm:$0xff] }
 0x1d1   : > { %v1318_v27 = vpop.f32.mrf.mxu1 }
 0x1d2   : > { %v2154_v52 = vadd.f32 %v2070_v26, %v1720_v21  ;;  %v1401_v5 = vadd.f32 %v1318_v27, %v6492_v18  ;;  %v1159_v27 = vshrl.u32 %v5864_v3, 16 }
 0x1d3   : > { %v2706_v57 = vpop.f32.mrf.mxu0 }
 0x1d4   : > { %v6813_v43 = vadd.f32 %v2704_v14, %v2154_v52  ;;  %v2551_v52 = vshll.u32 %v5936_v49, 16  ;;  %v1161_v34 = vor.u32 %v1159_v27, %v1157_v13 }
 0x1d6   : > { %v2553_v22 = vrot.slane %v2551_v52, 1  ;;  %v1166_v3 = vsel %vm978_vm0, %v1161_v34, %v1165_v35  ;;  %v1167_v52 = vshrl.u32 %v5865_v36, 16 }
 0x1d7   : > { %v1638_v29 = vpop.f32.mrf.mxu2 }
 0x1d8   : > { %v1721_v55 = vadd.f32 %v1638_v29, %v1401_v5  ;;  %v2072_v4 = vpop.f32.mrf.mxu3  ;;  %v2549_v5 = vor.u32 %v2547_v2, %v2545_v48  ;;  %v837_v29 = vld [vmem:[%s6307_s8 + $0xc0] sm:$0x1] }
 0x1d9   : > { %v1321_v58 = vpop.f32.mrf.mxu1 }
 0x1da   : > { %v2155_v14 = vadd.f32 %v2072_v4, %v1721_v55  ;;  %v2226_v4 = vld [vmem:[%s6307_s8 + $0xcc] sm:$0x1] }
 0x1db   : > { %v2709_v60 = vpop.f32.mrf.mxu0 }
 0x1dc   : > { %1360 = vmatmul.bf16.gmra.mxu1 %v1158_v61  ;;  %1680 = vmatmul.bf16.gmra.mxu2 %v1490_v51  ;;  %v6820_v18 = vadd.f32 %v2706_v57, %v2155_v14  ;;  %v952_v14 = vunpack.c.l.b16 %v837_v29  ;;  %v2555_v29 = vshrl.u32 %v5936_v49, 16 }
 0x1dd   : > { %2114 = vmatmul.bf16.gmra.mxu3 %v5903_v15  ;;  %v1492_v15 = vsel %vm1445_vm1, %v1489_v46, %v1491_v12 }
 0x1de   : > { %2748 = vmatmul.bf16.gmra.mxu0 %v2546_v63  ;;  %v2554_v63 = vsel %vm978_vm0, %v2549_v5, %v2553_v22  ;;  %v977_v48 = vpack.c.b16 %v952_v14, %v952_v14  ;;  %v5905_v14 = vld [vmem:[%s6307_s8 + $0xc4] sm:$0xff] }
 0x1df   : > { %v1641_v16 = vpop.f32.mrf.mxu2 }
 0x1e0   : > { %v2075_v21 = vpop.f32.mrf.mxu3  ;;  %v2341_v16 = vunpack.c.l.b16 %v2226_v4  ;;  %v1171_v34 = vshll.u32 %v977_v48, 16  ;;  %v1169_v4 = vor.u32 %v1167_v52, %v1165_v35  ;;  %v6115_v35 = vld [vmem:[%s6307_s8 + $0x18] sm:$0xff]  }
 0x1e1   : > { %v1323_v26 = vpop.f32.mrf.mxu1 }
 0x1e2   : > { %v1403_v57 = vadd.f32 %v1323_v26, %v6506_v41  ;;  %v6834_v26 = vpack.c.b16 %v2341_v16, %v2341_v16 }
 0x1e3   : > { %v2711_v40 = vpop.f32.mrf.mxu0 }
 0x1e7   : > { %v1643_v55 = vpop.f32.mrf.mxu2 }
 0x1e8   : > { %v1723_v58 = vadd.f32 %v1643_v55, %v1403_v57  ;;  %v2077_v61 = vpop.f32.mrf.mxu3 }
 0x1e9   : > { %v1326_v51 = vpop.f32.mrf.mxu1 }
 0x1ea   : > { %v2157_v60 = vadd.f32 %v2077_v61, %v1723_v58  ;;  %v1404_v21 = vadd.f32 %v1326_v51, %v6526_v53  ;;  %v1173_v53 = vrot.slane %v1171_v34, 1  ;;  %v1493_v58 = vrot.slane %v977_v48, 1  ;;  %v5985_v48 = vld [vmem:[%s6307_s8 + $0x20] sm:$0xff] }
 0x1eb   : > { %v2714_v13 = vpop.f32.mrf.mxu0  ;;  %v2557_v61 = vor.u32 %v2555_v29, %v2553_v22  ;;  %v3757_v22 = vshll.u32 %v6115_v35, 16  ;;  %v3755_v34 = vshrl.u32 %v6115_v35, 16 }
 0x1ec   : > { %1365 = vmatmul.bf16.gmra.mxu1 %v1166_v3  ;;  %1685 = vmatmul.bf16.gmra.mxu2 %v1492_v15  ;;  %v6831_v41 = vadd.f32 %v2711_v40, %v2157_v60  ;;  %v2559_v40 = vshll.u32 %v6834_v26, 16  ;;  %v1494_v49 = vsel %vm1445_vm1, %v1491_v12, %v1493_v58  ;;  %v6184_v58 = vld [vmem:[%s6307_s8 + $0x14] sm:$0xff] }
 0x1ed   : > { %2119 = vmatmul.bf16.gmra.mxu3 %v5904_v17  ;;  %v1174_v17 = vsel %vm978_vm0, %v1169_v4, %v1173_v53 }
 0x1ee   : > { %2753 = vmatmul.bf16.gmra.mxu0 %v2554_v63  ;;  %v2561_v51 = vrot.slane %v2559_v40, 1  ;;  %v6209_v63 = vld [vmem:[%s6307_s8 + $0xc] sm:$0xe]  ;;  %v3762_v40 = vshll.u32 %v5985_v48, 16 }
 0x1ef   : > { %v1646_v27 = vpop.f32.mrf.mxu2  ;;  %v6210_v52 = vor.u32 %v6209_v63, %v6439_v1 }
 0x1f0   : > { %v1724_v46 = vadd.f32 %v1646_v27, %v1404_v21  ;;  %v2080_v37 = vpop.f32.mrf.mxu3  ;;  %v6116_v27 = vld [vmem:[%s6307_s8 + $0x18] sm:$0xf0] }
 0x1f1   : > { %v1328_v2 = vpop.f32.mrf.mxu1 }
 0x1f2   : > { %v2158_v57 = vadd.f32 %v2080_v37, %v1724_v46  ;;  %v6117_v46 = vld [vmem:[%s6307_s8 + $0x18] sm:$0xe] }
 0x1f3   : > { %v2716_v5 = vpop.f32.mrf.mxu0  ;;  %v6118_v4 = vor.u32 %v6117_v46, %v6116_v27  ;;  %v5986_v27 = vld [vmem:[%s6307_s8 + $0x28] sm:$0xff] }
 0x1f4   : > { %v6837_v55 = vadd.f32 %v2714_v13, %v2158_v57  ;;  %v2562_v13 = vsel %vm978_vm0, %v2557_v61, %v2561_v51  ;;  %v3759_v57 = vrot.slane %v3757_v22, 1  ;;  %v2834_v61 = vrot.slane %v6184_v58, 1 }
 0x1f5   : > { %v4223_v58 = vrot.slane %v5986_v27, 1 }
 0x1f6   : > { %v3760_v51 = vor.u32 %v3759_v57, %v3755_v34  ;;  %v3770_v34 = vshll.u32 %v5986_v27, 16  ;;  %v6185_v57 = vld [vmem:[%s6307_s8 + $0x1c] sm:$0xff] }
 0x1f7   : > { %v1648_v3 = vpop.f32.mrf.mxu2 }
 0x1f8   : > { %v2082_v15 = vpop.f32.mrf.mxu3 }
 0x1f9   : > { %v1331_v36 = vpop.f32.mrf.mxu1  ;;  %v3764_v15 = vrot.slane %v3762_v40, 1 }
 0x1fa   : > { %v1406_v16 = vadd.f32 %v1331_v36, %v6546_v23  ;;  %v2833_v23 = vrot.slane %v6210_v52, 1  ;;  %v4220_v36 = vrot.slane %v6118_v4, 1  ;;  %v3766_v52 = vshrl.u32 %v5985_v48, 16 }
 0x1fb   : > { %v2719_v60 = vpop.f32.mrf.mxu0 }
 0x1fc   : > { %1370 = vmatmul.bf16.gmra.mxu1 %v1174_v17  ;;  %1690 = vmatmul.bf16.gmra.mxu2 %v1494_v49  ;;  %v4221_v17 = vrot.slane %v5985_v48, 1  ;;  %v2835_v35 = vsel %vm1445_vm1, %v2833_v23, %v2834_v61  ;;  %v3768_v4 = vor.u32 %v3766_v52, %v3764_v15  ;;  %v3772_v23 = vrot.slane %v3770_v34, 1  ;;  %v6186_v52 = vld [vmem:[%s6307_s8 + $0x24] sm:$0xff] }
 0x1fd   : > { %2124 = vmatmul.bf16.gmra.mxu3 %v5905_v14  ;;  %v2838_v34 = vrot.slane %v6186_v52, 1 }
 0x1fe   : > { %2758 = vmatmul.bf16.gmra.mxu0 %v2562_v13  ;;  %v5953_v13 = vld [vmem:[%s6307_s8 + $0x18] sm:$0xff]  ;;  %v3773_v48 = vsel %vm978_vm0, %v3768_v4, %v3772_v23 }
 0x1ff   : > { %v1651_v21 = vpop.f32.mrf.mxu2 }
 0x200   : > { %v1726_v37 = vadd.f32 %v1651_v21, %v1406_v16  ;;  %v2085_v12 = vpop.f32.mrf.mxu3  ;;  %v3765_v16 = vsel %vm978_vm0, %v3760_v51, %v3764_v15  ;;  %v4222_v21 = vsel %vm1445_vm1, %v4220_v36, %v4221_v17  ;;  %v5954_v36 = vld [vmem:[%s6307_s8 + $0x20] sm:$0xff] }
 0x201   : > { %v1333_v2 = vpop.f32.mrf.mxu1 }
 0x202   : > { %v2160_v5 = vadd.f32 %v2085_v12, %v1726_v37  ;;  %v1407_v3 = vadd.f32 %v1333_v2, %v6554_v38 }
 0x203   : > { %v2721_v29 = vpop.f32.mrf.mxu0 }
 0x204   : > { %v6850_v53 = vadd.f32 %v2719_v60, %v2160_v5  ;;  %v2836_v5 = vrot.slane %v6185_v57, 1 }
 0x207   : > { %v1653_v1 = vpop.f32.mrf.mxu2 }
 0x208   : > { %v1727_v49 = vadd.f32 %v1653_v1, %v1407_v3  ;;  %v2087_v14 = vpop.f32.mrf.mxu3 }
 0x209   : > { %v1336_v63 = vpop.f32.mrf.mxu1 }
 0x20a   : > { %v2161_v22 = vadd.f32 %v2087_v14, %v1727_v49  ;;  %v2837_v49 = vsel %vm1445_vm1, %v2834_v61, %v2836_v5  ;;  %v4224_v63 = vsel %vm1445_vm1, %v4221_v17, %v4223_v58 }
 0x20b   : > { %v2724_v60 = vpop.f32.mrf.mxu0 }
 0x20c   : > { %2962 = vmatmul.bf16.vlgmr.msra.gmra.mxu1 %v2835_v35  ;;  %3396 = vmatmul.bf16.vlgmr.msra.gmra.mxu2 %v5953_v13  ;;  %v6858_v38 = vadd.f32 %v2721_v29, %v2161_v22  ;;  %v5987_v35 = vld [vmem:[%s6307_s8 + $0x30] sm:$0xff] }
 0x20d   : > { %4030 = vmatmul.bf16.vlgmr.msra.gmra.mxu3 %v3765_v16 }
 0x20e   : > { %4349 = vmatmul.bf16.vlgmr.msra.gmra.mxu0 %v4222_v21 }
 0x20f   : > { %v1656_v46 = vpop.f32.mrf.mxu2 }
 0x210   : > { %v2090_v37 = vpop.f32.mrf.mxu3 }
 0x211   : > { %v1338_v12 = vpop.f32.mrf.mxu1  ;;  %v3774_v37 = vshrl.u32 %v5986_v27, 16 }
 0x212   : > { %v1409_v40 = vadd.f32 %v1338_v12, %v6568_v9  ;;  %v3778_v12 = vshll.u32 %v5987_v35, 16 }
 0x213   : > { %v2726_v2 = vpop.f32.mrf.mxu0 }
 0x214   : > { %v3780_v57 = vrot.slane %v3778_v12, 1 }
 0x217   : > { %v1658_v51 = vpop.f32.mrf.mxu2 }
 0x218   : > { %v1729_v29 = vadd.f32 %v1658_v51, %v1409_v40  ;;  %v2092_v3 = vpop.f32.mrf.mxu3  ;;  %v4225_v40 = vrot.slane %v5987_v35, 1  ;;  %v5955_v51 = vld [vmem:[%s6307_s8 + $0x28] sm:$0xff] }
 0x219   : > { %v1341_v1 = vpop.f32.mrf.mxu1 }
 0x21a   : > { %v2163_v14 = vadd.f32 %v2092_v3, %v1729_v29  ;;  %v1410_v15 = vadd.f32 %v1341_v1, %v6588_v31  ;;  %v2839_v3 = vsel %vm1445_vm1, %v2836_v5, %v2838_v34  ;;  %v4226_v27 = vsel %vm1445_vm1, %v4223_v58, %v4225_v40  ;;  %v6187_v58 = vld [vmem:[%s6307_s8 + $0x2c] sm:$0xff] }
 0x21b   : > { %v2729_v13 = vpop.f32.mrf.mxu0 }
 0x21c   : > { %2967 = vmatmul.bf16.gmra.mxu1 %v2837_v49  ;;  %3401 = vmatmul.bf16.gmra.mxu2 %v5954_v36  ;;  %v6867_v9 = vadd.f32 %v2726_v2, %v2163_v14  ;;  %v3776_v2 = vor.u32 %v3774_v37, %v3772_v23  ;;  %v5988_v49 = vld [vmem:[%s6307_s8 + $0x38] sm:$0xff] }
 0x21d   : > { %4035 = vmatmul.bf16.gmra.mxu3 %v3773_v48  ;;  %v4227_v12 = vrot.slane %v5988_v49, 1 }
 0x21e   : > { %4354 = vmatmul.bf16.gmra.mxu0 %v4224_v63  ;;  %v3781_v1 = vsel %vm978_vm0, %v3776_v2, %v3780_v57 }
 0x21f   : > { %v1661_v22 = vpop.f32.mrf.mxu2 }
 0x220   : > { %v1730_v60 = vadd.f32 %v1661_v22, %v1410_v15  ;;  %v2095_v61 = vpop.f32.mrf.mxu3  ;;  %v3782_v22 = vshrl.u32 %v5987_v35, 16 }
 0x221   : > { %v1343_v16 = vpop.f32.mrf.mxu1 }
 0x222   : > { %v2164_v21 = vadd.f32 %v2095_v61, %v1730_v60  ;;  %v3786_v60 = vshll.u32 %v5988_v49, 16  ;;  %v2840_v16 = vrot.slane %v6187_v58, 1 }
 0x223   : > { %v2731_v46 = vpop.f32.mrf.mxu0 }
 0x224   : > { %v6871_v17 = vadd.f32 %v2729_v13, %v2164_v21  ;;  %v3784_v46 = vor.u32 %v3782_v22, %v3780_v57  ;;  %v3788_v37 = vrot.slane %v3786_v60, 1  ;;  %v5989_v57 = vld [vmem:[%s6307_s8 + $0x40] sm:$0xff] }
 0x225   : > { %v4229_v60 = vrot.slane %v5989_v57, 1 }
 0x227   : > { %v1663_v4 = vpop.f32.mrf.mxu2 }
 0x228   : > { %v2097_v31 = vpop.f32.mrf.mxu3  ;;  %v5956_v4 = vld [vmem:[%s6307_s8 + $0x30] sm:$0xff] }
 0x229   : > { %v1346_v29 = vpop.f32.mrf.mxu1 }
 0x22a   : > { %v1412_v23 = vadd.f32 %v1346_v29, %v6486_v6 }
 0x22b   : > { %v2734_v36 = vpop.f32.mrf.mxu0 }
 0x22c   : > { %2972 = vmatmul.bf16.gmra.mxu1 %v2839_v3  ;;  %3406 = vmatmul.bf16.gmra.mxu2 %v5955_v51  ;;  %v2841_v51 = vsel %vm1445_vm1, %v2838_v34, %v2840_v16  ;;  %v3789_v3 = vsel %vm978_vm0, %v3784_v46, %v3788_v37  ;;  %v3790_v34 = vshrl.u32 %v5988_v49, 16  ;;  %v5957_v46 = vld [vmem:[%s6307_s8 + $0x38] sm:$0xff] }
 0x22d   : > { %4040 = vmatmul.bf16.gmra.mxu3 %v3781_v1 }
 0x22e   : > { %4359 = vmatmul.bf16.gmra.mxu0 %v4226_v27  ;;  %v3792_v22 = vor.u32 %v3790_v34, %v3788_v37  ;;  %v6189_v34 = vld [vmem:[%s6307_s8 + $0x3c] sm:$0xff] }
 0x22f   : > { %v1666_v14 = vpop.f32.mrf.mxu2 }
 0x230   : > { %v1732_v13 = vadd.f32 %v1666_v14, %v1412_v23  ;;  %v2100_v48 = vpop.f32.mrf.mxu3 }
 0x231   : > { %v1348_v63 = vpop.f32.mrf.mxu1 }
 0x232   : > { %v2166_v15 = vadd.f32 %v2100_v48, %v1732_v13  ;;  %v1413_v21 = vadd.f32 %v1348_v63, %v6494_v19  ;;  %v3794_v13 = vshll.u32 %v5989_v57, 16  ;;  %v6188_v48 = vld [vmem:[%s6307_s8 + $0x34] sm:$0xff] }
 0x233   : > { %v2736_v5 = vpop.f32.mrf.mxu0  ;;  %v2842_v63 = vrot.slane %v6188_v48, 1 }
 0x234   : > { %v6880_v61 = vadd.f32 %v2734_v36, %v2166_v15  ;;  %v4228_v36 = vsel %vm1445_vm1, %v4225_v40, %v4227_v12  ;;  %v3796_v40 = vrot.slane %v3794_v13, 1  ;;  %v2844_v13 = vrot.slane %v6189_v34, 1 }
 0x236   : > { %v3797_v49 = vsel %vm978_vm0, %v3792_v22, %v3796_v40 }
 0x237   : > { %v1668_v6 = vpop.f32.mrf.mxu2 }
 0x238   : > { %v1733_v52 = vadd.f32 %v1668_v6, %v1413_v21  ;;  %v2102_v2 = vpop.f32.mrf.mxu3 }
 0x239   : > { %v1351_v31 = vpop.f32.mrf.mxu1 }
 0x23a   : > { %v2167_v29 = vadd.f32 %v2102_v2, %v1733_v52  ;;  %v2843_v52 = vsel %vm1445_vm1, %v2840_v16, %v2842_v63  ;;  %v4230_v31 = vsel %vm1445_vm1, %v4227_v12, %v4229_v60 }
 0x23b   : > { %v2739_v35 = vpop.f32.mrf.mxu0 }
 0x23c   : > { %2977 = vmatmul.bf16.gmra.mxu1 %v2841_v51  ;;  %3411 = vmatmul.bf16.gmra.mxu2 %v5956_v4  ;;  %v6888_v19 = vadd.f32 %v2736_v5, %v2167_v29  ;;  %v5990_v51 = vld [vmem:[%s6307_s8 + $0x48] sm:$0xff] }
 0x23d   : > { %4045 = vmatmul.bf16.gmra.mxu3 %v3789_v3 }
 0x23e   : > { %4364 = vmatmul.bf16.gmra.mxu0 %v4228_v36 }
 0x23f   : > { %v1671_v1 = vpop.f32.mrf.mxu2 }
 0x240   : > { %v2105_v27 = vpop.f32.mrf.mxu3 }
 0x241   : > { %v1353_v23 = vpop.f32.mrf.mxu1  ;;  %v3798_v27 = vshrl.u32 %v5989_v57, 16 }
 0x242   : > { %v1415_v15 = vadd.f32 %v1353_v23, %v6508_v42  ;;  %v3802_v23 = vshll.u32 %v5990_v51, 16 }
 0x243   : > { %v2741_v14 = vpop.f32.mrf.mxu0 }
 0x244   : > { %v3804_v48 = vrot.slane %v3802_v23, 1 }
 0x247   : > { %v1673_v58 = vpop.f32.mrf.mxu2 }
 0x248   : > { %v1735_v5 = vadd.f32 %v1673_v58, %v1415_v15  ;;  %v2107_v21 = vpop.f32.mrf.mxu3  ;;  %v4231_v15 = vrot.slane %v5990_v51, 1  ;;  %v5958_v58 = vld [vmem:[%s6307_s8 + $0x40] sm:$0xff] }
 0x249   : > { %v1356_v6 = vpop.f32.mrf.mxu1 }
 0x24a   : > { %v2169_v2 = vadd.f32 %v2107_v21, %v1735_v5  ;;  %v1416_v37 = vadd.f32 %v1356_v6, %v6528_v54  ;;  %v2845_v21 = vsel %vm1445_vm1, %v2842_v63, %v2844_v13  ;;  %v4232_v57 = vsel %vm1445_vm1, %v4229_v60, %v4231_v15  ;;  %v6190_v60 = vld [vmem:[%s6307_s8 + $0x44] sm:$0xff] }
 0x24b   : > { %v2744_v4 = vpop.f32.mrf.mxu0 }
 0x24c   : > { %2982 = vmatmul.bf16.gmra.mxu1 %v2843_v52  ;;  %3416 = vmatmul.bf16.gmra.mxu2 %v5957_v46  ;;  %v6897_v42 = vadd.f32 %v2741_v14, %v2169_v2  ;;  %v3800_v14 = vor.u32 %v3798_v27, %v3796_v40  ;;  %v5991_v52 = vld [vmem:[%s6307_s8 + $0x50] sm:$0xff] }
 0x24d   : > { %4050 = vmatmul.bf16.gmra.mxu3 %v3797_v49  ;;  %v4233_v23 = vrot.slane %v5991_v52, 1 }
 0x24e   : > { %4369 = vmatmul.bf16.gmra.mxu0 %v4230_v31  ;;  %v3805_v6 = vsel %vm978_vm0, %v3800_v14, %v3804_v48 }
 0x24f   : > { %v1676_v29 = vpop.f32.mrf.mxu2 }
 0x250   : > { %v1736_v35 = vadd.f32 %v1676_v29, %v1416_v37  ;;  %v2110_v16 = vpop.f32.mrf.mxu3  ;;  %v3806_v29 = vshrl.u32 %v5990_v51, 16 }
 0x251   : > { %v1358_v3 = vpop.f32.mrf.mxu1 }
 0x252   : > { %v2170_v36 = vadd.f32 %v2110_v16, %v1736_v35  ;;  %v3810_v35 = vshll.u32 %v5991_v52, 16  ;;  %v2846_v3 = vrot.slane %v6190_v60, 1 }
 0x253   : > { %v2746_v1 = vpop.f32.mrf.mxu0 }
 0x254   : > { %v6901_v12 = vadd.f32 %v2744_v4, %v2170_v36  ;;  %v3808_v1 = vor.u32 %v3806_v29, %v3804_v48  ;;  %v3812_v27 = vrot.slane %v3810_v35, 1  ;;  %v5992_v48 = vld [vmem:[%s6307_s8 + $0x58] sm:$0xff] }
 0x255   : > { %v4235_v35 = vrot.slane %v5992_v48, 1 }
 0x257   : > { %v1678_v22 = vpop.f32.mrf.mxu2 }
 0x258   : > { %v2112_v54 = vpop.f32.mrf.mxu3  ;;  %v5959_v22 = vld [vmem:[%s6307_s8 + $0x48] sm:$0xff] }
 0x259   : > { %v1361_v5 = vpop.f32.mrf.mxu1 }
 0x25a   : > { %v1418_v40 = vadd.f32 %v1361_v5, %v6548_v24 }
 0x25b   : > { %v2749_v46 = vpop.f32.mrf.mxu0 }
 0x25c   : > { %2987 = vmatmul.bf16.gmra.mxu1 %v2845_v21  ;;  %3421 = vmatmul.bf16.gmra.mxu2 %v5958_v58  ;;  %v2847_v58 = vsel %vm1445_vm1, %v2844_v13, %v2846_v3  ;;  %v3813_v21 = vsel %vm978_vm0, %v3808_v1, %v3812_v27  ;;  %v3814_v13 = vshrl.u32 %v5991_v52, 16  ;;  %v5960_v1 = vld [vmem:[%s6307_s8 + $0x50] sm:$0xff] }
 0x25d   : > { %4055 = vmatmul.bf16.gmra.mxu3 %v3805_v6 }
 0x25e   : > { %4374 = vmatmul.bf16.gmra.mxu0 %v4232_v57  ;;  %v3816_v29 = vor.u32 %v3814_v13, %v3812_v27  ;;  %v6192_v13 = vld [vmem:[%s6307_s8 + $0x54] sm:$0xff] }
 0x25f   : > { %v1681_v2 = vpop.f32.mrf.mxu2 }
 0x260   : > { %v1738_v4 = vadd.f32 %v1681_v2, %v1418_v40  ;;  %v2115_v49 = vpop.f32.mrf.mxu3 }
 0x261   : > { %v1363_v31 = vpop.f32.mrf.mxu1 }
 0x262   : > { %v2172_v37 = vadd.f32 %v2115_v49, %v1738_v4  ;;  %v1419_v36 = vadd.f32 %v1363_v31, %v6556_v39  ;;  %v3818_v4 = vshll.u32 %v5992_v48, 16  ;;  %v6191_v49 = vld [vmem:[%s6307_s8 + $0x4c] sm:$0xff] }
 0x263   : > { %v2751_v63 = vpop.f32.mrf.mxu0  ;;  %v2848_v31 = vrot.slane %v6191_v49, 1 }
 0x264   : > { %v6910_v16 = vadd.f32 %v2749_v46, %v2172_v37  ;;  %v4234_v46 = vsel %vm1445_vm1, %v4231_v15, %v4233_v23  ;;  %v3820_v15 = vrot.slane %v3818_v4, 1  ;;  %v2850_v4 = vrot.slane %v6192_v13, 1  ;;  %v6949_v13 = vld [vmem:[%s7150_s2] ss:$0 sm:$0xff] }
 0x266   : > { %v3821_v52 = vsel %vm978_vm0, %v3816_v29, %v3820_v15 }
 0x267   : > { %v1683_v24 = vpop.f32.mrf.mxu2 }
 0x268   : > { %v1739_v34 = vadd.f32 %v1683_v24, %v1419_v36  ;;  %v2117_v14 = vpop.f32.mrf.mxu3 }
 0x269   : > { %v1366_v54 = vpop.f32.mrf.mxu1 }
 0x26a   : > { %v2173_v5 = vadd.f32 %v2117_v14, %v1739_v34  ;;  %v2849_v34 = vsel %vm1445_vm1, %v2846_v3, %v2848_v31  ;;  %v4236_v54 = vsel %vm1445_vm1, %v4233_v23, %v4235_v35 }
 0x26b   : > { %v2754_v51 = vpop.f32.mrf.mxu0 }
 0x26c   : > { %2992 = vmatmul.bf16.gmra.mxu1 %v2847_v58  ;;  %3426 = vmatmul.bf16.gmra.mxu2 %v5959_v22  ;;  %v6918_v39 = vadd.f32 %v2751_v63, %v2173_v5  ;;  %v5993_v58 = vld [vmem:[%s6307_s8 + $0x60] sm:$0xff] }
 0x26d   : > { %4060 = vmatmul.bf16.gmra.mxu3 %v3813_v21 }
 0x26e   : > { %4379 = vmatmul.bf16.gmra.mxu0 %v4234_v46 }
 0x26f   : > { %v1686_v6 = vpop.f32.mrf.mxu2 }
 0x270   : > { %v2120_v57 = vpop.f32.mrf.mxu3 }
 0x271   : > { %v1368_v40 = vpop.f32.mrf.mxu1  ;;  %v3822_v57 = vshrl.u32 %v5992_v48, 16 }
 0x272   : > { %v1421_v37 = vadd.f32 %v1368_v40, %v6570_v11  ;;  %v3826_v40 = vshll.u32 %v5993_v58, 16 }
 0x273   : > { %v2756_v2 = vpop.f32.mrf.mxu0 }
 0x274   : > { %v3828_v49 = vrot.slane %v3826_v40, 1 }
 0x277   : > { %v1688_v60 = vpop.f32.mrf.mxu2 }
 0x278   : > { %v1741_v63 = vadd.f32 %v1688_v60, %v1421_v37  ;;  %v2122_v36 = vpop.f32.mrf.mxu3  ;;  %v4237_v37 = vrot.slane %v5993_v58, 1  ;;  %v5961_v60 = vld [vmem:[%s6307_s8 + $0x58] sm:$0xff] }
 0x279   : > { %v1371_v24 = vpop.f32.mrf.mxu1 }
 0x27a   : > { %v2175_v14 = vadd.f32 %v2122_v36, %v1741_v63  ;;  %v1422_v27 = vadd.f32 %v1371_v24, %v6590_v32  ;;  %v2851_v36 = vsel %vm1445_vm1, %v2848_v31, %v2850_v4  ;;  %v4238_v48 = vsel %vm1445_vm1, %v4235_v35, %v4237_v37 }
 0x27b   : > { %v2759_v22 = vpop.f32.mrf.mxu0 }
 0x27c   : > { %2997 = vmatmul.bf16.gmra.mxu1 %v2849_v34  ;;  %3431 = vmatmul.bf16.gmra.mxu2 %v5960_v1  ;;  %v6927_v11 = vadd.f32 %v2756_v2, %v2175_v14  ;;  %v3824_v2 = vor.u32 %v3822_v57, %v3820_v15  ;;  %v6940_v34 = vld [vmem:[%s6307_s8 + $0x68] sm:$0xff] }
 0x27d   : > { %4065 = vmatmul.bf16.gmra.mxu3 %v3821_v52 }
 0x27e   : > { %4384 = vmatmul.bf16.gmra.mxu0 %v4236_v54  ;;  %v3829_v24 = vsel %vm978_vm0, %v3824_v2, %v3828_v49 }
 0x27f   : > { %v1691_v5 = vpop.f32.mrf.mxu2 }
 0x280   : > { %v1742_v51 = vadd.f32 %v1691_v5, %v1422_v27  ;;  %v2125_v3 = vpop.f32.mrf.mxu3  ;;  %v3830_v27 = vshrl.u32 %v5993_v58, 16  ;;  %v3834_v5 = vshll.u32 %v6940_v34, 16 }
 0x281   : > { %v1373_v21 = vpop.f32.mrf.mxu1 }
 0x282   : > { %v2176_v46 = vadd.f32 %v2125_v3, %v1742_v51  ;;  %v6193_v3 = vld [vmem:[%s6307_s8 + $0x5c] sm:$0xff] }
 0x283   : > { %v2761_v6 = vpop.f32.mrf.mxu0  ;;  %v2852_v35 = vrot.slane %v6193_v3, 1 }
 0x284   : > { %v6931_v23 = vadd.f32 %v2759_v22, %v2176_v46  ;;  %v3832_v46 = vor.u32 %v3830_v27, %v3828_v49  ;;  %v3836_v6 = vrot.slane %v3834_v5, 1  ;;  %v3838_v27 = vshrl.u32 %v6940_v34, 16 }
 0x287   : > { %v1693_v29 = vpop.f32.mrf.mxu2 }
 0x288   : > { %v2127_v32 = vpop.f32.mrf.mxu3  ;;  %v5962_v29 = vld [vmem:[%s6307_s8 + $0x60] sm:$0xff] }
 0x289   : > { %v2963_v63 = vpop.f32.mrf.mxu1 }
 0x28a   : > { %v3083_v15 = vadd.f32 %v2963_v63, %v6605_v44  ;;  %v4239_v44 = vrot.slane %v6940_v34, 1  ;;  %v3837_v63 = vsel %vm978_vm0, %v3832_v46, %v3836_v6  ;;  %v3840_v46 = vor.u32 %v3838_v27, %v3836_v6  ;;  %v5996_v6 = vld [vmem:[%s6307_s8 + $0x78] sm:$0xff]  ;;  %v6195_v27 = vld [vmem:[%s6307_s8 + $0x6c] sm:$0xff] }
 0x28b   : > { %v4350_v1 = vpop.f32.mrf.mxu0 }
 0x28c   : > { %3002 = vmatmul.bf16.gmra.mxu1 %v2851_v36  ;;  %3436 = vmatmul.bf16.gmra.mxu2 %v5961_v60  ;;  %v2853_v60 = vsel %vm1445_vm1, %v2850_v4, %v2852_v35  ;;  %v4240_v36 = vsel %vm1445_vm1, %v4237_v37, %v4239_v44 }
 0x28d   : > { %4070 = vmatmul.bf16.gmra.mxu3 %v3829_v24 }
 0x28e   : > { %4389 = vmatmul.bf16.gmra.mxu0 %v4238_v48 }
 0x28f   : > { %v3397_v14 = vpop.f32.mrf.mxu2 }
 0x290   : > { %v3517_v22 = vadd.f32 %v3397_v14, %v3083_v15  ;;  %v4031_v52 = vpop.f32.mrf.mxu3  ;;  %v6959_v15 = vld [vmem:[%s6307_s8 + $0x70] sm:$0xff] }
 0x291   : > { %v2965_v54 = vpop.f32.mrf.mxu1  ;;  %v3842_v5 = vshll.u32 %v6959_v15, 16 }
 0x292   : > { %v4151_v51 = vadd.f32 %v4031_v52, %v3517_v22  ;;  %v3084_v21 = vadd.f32 %v2965_v54, %v6612_v10 }
 0x293   : > { %v4352_v31 = vpop.f32.mrf.mxu0 }
 0x294   : > { %v4470_v40 = vadd.f32 %v4350_v1, %v4151_v51  ;;  %v6194_v51 = vld [vmem:[%s6307_s8 + $0x64] sm:$0xff] }
 0x295   : > { %v2854_v3 = vrot.slane %v6194_v51, 1 }
 0x296   : > { %v4573_v1 = vadd.f32 %v6949_v13, %v4470_v40  ;;  %v4241_v40 = vrot.slane %v6959_v15, 1 }
 0x297   : > { %v3399_v57 = vpop.f32.mrf.mxu2 }
 0x298   : > { %v3518_v58 = vadd.f32 %v3399_v57, %v3084_v21  ;;  %v4033_v2 = vpop.f32.mrf.mxu3  ;;  %v4605_v14 = vmax.f32 %v4573_v1, 0.0  ;;  %v3844_v57 = vrot.slane %v3842_v5, 1  ;;  %v2856_v5 = vrot.slane %v6195_v27, 1 }
 0x299   : > { %v2968_v32 = vpop.f32.mrf.mxu1 }
 0x29a   : > { %v4152_v10 = vadd.f32 %v4033_v2, %v3518_v58  ;;  %v5963_v32 = vld [vmem:[%s6307_s8 + $0x68] sm:$0xff] }
 0x29b   : > { %v4355_v49 = vpop.f32.mrf.mxu0 }
 0x29c   : > { %v4471_v24 = vadd.f32 %v4352_v31, %v4152_v10  ;;  %3007 = vmatmul.bf16.gmra.mxu1 %v2853_v60  ;;  %3441 = vmatmul.bf16.gmra.mxu2 %v5962_v29  ;;  %v2855_v10 = vsel %vm1445_vm1, %v2852_v35, %v2854_v3  ;;  %v3845_v49 = vsel %vm978_vm0, %v3840_v46, %v3844_v57 }
 0x29d   : > { %4075 = vmatmul.bf16.gmra.mxu3 %v3837_v63  ;;  %v4242_v63 = vsel %vm1445_vm1, %v4239_v44, %v4241_v40  ;;  %v3850_v44 = vshll.u32 %v5996_v6, 16 }
 0x29e   : > { %4394 = vmatmul.bf16.gmra.mxu0 %v4240_v36  ;;  %v4574_v48 = vadd.f32 %v6949_v13, %v4471_v24 }
 0x29f   : > { %v3402_v4 = vpop.f32.mrf.mxu2 }
 0x2a0   : > { %v4606_v22 = vmax.f32 %v4574_v48, 0.0  ;;  %v4036_v52 = vpop.f32.mrf.mxu3 }
 0x2a1   : > { %v2970_v37 = vpop.f32.mrf.mxu1  ;;  %v3846_v52 = vshrl.u32 %v6959_v15, 16  ;;  %v2857_v15 = vsel %vm1445_vm1, %v2854_v3, %v2856_v5 }
 0x2a2   : > { %v6035_v54 = vpack.c.bf16 %v4606_v22, %v4605_v14  ;;  %v3086_v21 = vadd.f32 %v2970_v37, %v6625_v33 }
 0x2a3   : > { %v4357_v31 = vpop.f32.mrf.mxu0  ;;  %v3848_v51 = vor.u32 %v3846_v52, %v3844_v57 }
 0x2a4   : > { %6036 = vst [vmem:[%s6964_s10] sm:$0xff] %v6035_v54  }
 0x2a7   : > { %v3404_v58 = vpop.f32.mrf.mxu2 }
 0x2a8   : > { %v3520_v2 = vadd.f32 %v3404_v58, %v3086_v21  ;;  %v4038_v29 = vpop.f32.mrf.mxu3  ;;  %v3852_v21 = vrot.slane %v3850_v44, 1 }
 0x2a9   : > { %v2973_v60 = vpop.f32.mrf.mxu1 }
 0x2aa   : > { %v4154_v36 = vadd.f32 %v4038_v29, %v3520_v2  ;;  %v3087_v33 = vadd.f32 %v2973_v60, %v6646_v50 }
 0x2ab   : > { %v4360_v34 = vpop.f32.mrf.mxu0 }
 0x2ac   : > { %3012 = vmatmul.bf16.gmra.mxu1 %v2855_v10  ;;  %3446 = vmatmul.bf16.gmra.mxu2 %v5963_v32  ;;  %v4473_v24 = vadd.f32 %v4357_v31, %v4154_v36  ;;  %v4243_v31 = vrot.slane %v5996_v6, 1  ;;  %v5964_v32 = vld [vmem:[%s6307_s8 + $0x70] sm:$0xff]  ;;  %v5997_v36 = vld [vmem:[%s6307_s8 + $0x80] sm:$0xff] }
 0x2ad   : > { %4080 = vmatmul.bf16.gmra.mxu3 %v3845_v49 }
 0x2ae   : > { %4399 = vmatmul.bf16.gmra.mxu0 %v4242_v63  ;;  %v4575_v37 = vadd.f32 %v6949_v13, %v4473_v24  ;;  %v4244_v63 = vsel %vm1445_vm1, %v4241_v40, %v4243_v31 }
 0x2af   : > { %v3407_v1 = vpop.f32.mrf.mxu2 }
 0x2b0   : > { %v3521_v48 = vadd.f32 %v3407_v1, %v3087_v33  ;;  %v4041_v4 = vpop.f32.mrf.mxu3  ;;  %v4607_v58 = vmax.f32 %v4575_v37, 0.0 }
 0x2b1   : > { %v2975_v14 = vpop.f32.mrf.mxu1 }
 0x2b2   : > { %v4155_v35 = vadd.f32 %v4041_v4, %v3521_v48  ;;  %v3854_v4 = vshrl.u32 %v5996_v6, 16  ;;  %v3858_v14 = vshll.u32 %v5997_v36, 16 }
 0x2b3   : > { %v4362_v22 = vpop.f32.mrf.mxu0 }
 0x2b4   : > { %v4474_v54 = vadd.f32 %v4360_v34, %v4155_v35  ;;  %v3853_v34 = vsel %vm978_vm0, %v3848_v51, %v3852_v21  ;;  %v6196_v22 = vld [vmem:[%s6307_s8 + $0x74] sm:$0xff]  ;;  %v3856_v44 = vor.u32 %v3854_v4, %v3852_v21  ;;  %v3860_v37 = vrot.slane %v3858_v14, 1 }
 0x2b5   : > { %v2858_v40 = vrot.slane %v6196_v22, 1 }
 0x2b6   : > { %v4576_v50 = vadd.f32 %v6949_v13, %v4474_v54  ;;  %v4245_v54 = vrot.slane %v5997_v36, 1 }
 0x2b7   : > { %v3409_v46 = vpop.f32.mrf.mxu2 }
 0x2b8   : > { %v4608_v2 = vmax.f32 %v4576_v50, 0.0  ;;  %v4043_v29 = vpop.f32.mrf.mxu3  ;;  %v5965_v46 = vld [vmem:[%s6307_s8 + $0x78] sm:$0xff] }
 0x2b9   : > { %v2978_v60 = vpop.f32.mrf.mxu1 }
 0x2ba   : > { %v6040_v10 = vpack.c.bf16 %v4608_v2, %v4607_v58  ;;  %v3089_v57 = vadd.f32 %v2978_v60, %v6657_v45  ;;  %v2859_v2 = vsel %vm1445_vm1, %v2856_v5, %v2858_v40  ;;  %v4246_v60 = vsel %vm1445_vm1, %v4243_v31, %v4245_v54 }
 0x2bb   : > { %v4365_v49 = vpop.f32.mrf.mxu0 }
 0x2bc   : > { %6119 = vst [vmem:[%s6964_s10 + $0x8] sm:$0xff] %v6040_v10   ;;  %3017 = vmatmul.bf16.gmra.mxu1 %v2857_v15  ;;  %3451 = vmatmul.bf16.gmra.mxu2 %v5964_v32  ;;  %v3861_v32 = vsel %vm978_vm0, %v3856_v44, %v3860_v37  ;;  %v5998_v10 = vld [vmem:[%s6307_s8 + $0x88] sm:$0xff] }
 0x2bd   : > { %4085 = vmatmul.bf16.gmra.mxu3 %v3853_v34  ;;  %v4247_v22 = vrot.slane %v5998_v10, 1 }
 0x2be   : > { %4404 = vmatmul.bf16.gmra.mxu0 %v4244_v63 }
 0x2bf   : > { %v3412_v33 = vpop.f32.mrf.mxu2 }
 0x2c0   : > { %v3523_v1 = vadd.f32 %v3412_v33, %v3089_v57  ;;  %v4046_v24 = vpop.f32.mrf.mxu3 }
 0x2c1   : > { %v2980_v3 = vpop.f32.mrf.mxu1 }
 0x2c2   : > { %v4157_v35 = vadd.f32 %v4046_v24, %v3523_v1  ;;  %v3090_v52 = vadd.f32 %v2980_v3, %v6664_v28  ;;  %v3862_v1 = vshrl.u32 %v5997_v36, 16  ;;  %v3866_v24 = vshll.u32 %v5998_v10, 16  ;;  %v6197_v3 = vld [vmem:[%s6307_s8 + $0x7c] sm:$0xff] }
 0x2c3   : > { %v4367_v48 = vpop.f32.mrf.mxu0 }
 0x2c4   : > { %v4476_v50 = vadd.f32 %v4365_v49, %v4157_v35  ;;  %v3864_v14 = vor.u32 %v3862_v1, %v3860_v37  ;;  %v3868_v35 = vrot.slane %v3866_v24, 1  ;;  %v5999_v37 = vld [vmem:[%s6307_s8 + $0x90] sm:$0xff] }
 0x2c5   : > { %v4249_v1 = vrot.slane %v5999_v37, 1 }
 0x2c6   : > { %v4577_v28 = vadd.f32 %v6949_v13, %v4476_v50  ;;  %v5966_v50 = vld [vmem:[%s6307_s8 + $0x80] sm:$0xff]  ;;  %v3869_v36 = vsel %vm978_vm0, %v3864_v14, %v3868_v35  ;;  %v5967_v14 = vld [vmem:[%s6307_s8 + $0x88] sm:$0xff] }
 0x2c7   : > { %v3414_v27 = vpop.f32.mrf.mxu2 }
 0x2c8   : > { %v3524_v45 = vadd.f32 %v3414_v27, %v3090_v52  ;;  %v4048_v51 = vpop.f32.mrf.mxu3  ;;  %v4609_v5 = vmax.f32 %v4577_v28, 0.0 }
 0x2c9   : > { %v2983_v58 = vpop.f32.mrf.mxu1 }
 0x2ca   : > { %v4158_v29 = vadd.f32 %v4048_v51, %v3524_v45  ;;  %v4248_v58 = vsel %vm1445_vm1, %v4245_v54, %v4247_v22 }
 0x2cb   : > { %v4370_v6 = vpop.f32.mrf.mxu0 }
 0x2cc   : > { %v4477_v21 = vadd.f32 %v4367_v48, %v4158_v29  ;;  %3022 = vmatmul.bf16.gmra.mxu1 %v2859_v2  ;;  %3456 = vmatmul.bf16.gmra.mxu2 %v5965_v46  ;;  %v2860_v48 = vrot.slane %v6197_v3, 1 }
 0x2cd   : > { %4090 = vmatmul.bf16.gmra.mxu3 %v3861_v32 }
 0x2ce   : > { %4409 = vmatmul.bf16.gmra.mxu0 %v4246_v60  ;;  %v4578_v15 = vadd.f32 %v6949_v13, %v4477_v21  ;;  %v2861_v51 = vsel %vm1445_vm1, %v2858_v40, %v2860_v48 }
 0x2cf   : > { %v3417_v49 = vpop.f32.mrf.mxu2 }
 0x2d0   : > { %v4610_v34 = vmax.f32 %v4578_v15, 0.0  ;;  %v4051_v63 = vpop.f32.mrf.mxu3  ;;  %v3870_v15 = vshrl.u32 %v5998_v10, 16  ;;  %v3874_v49 = vshll.u32 %v5999_v37, 16 }
 0x2d1   : > { %v2985_v57 = vpop.f32.mrf.mxu1 }
 0x2d2   : > { %v6045_v33 = vpack.c.bf16 %v4610_v34, %v4609_v5  ;;  %v3092_v4 = vadd.f32 %v2985_v57, %v6677_v59  ;;  %v6198_v34 = vld [vmem:[%s6307_s8 + $0x84] sm:$0xff] }
 0x2d3   : > { %v4372_v31 = vpop.f32.mrf.mxu0  ;;  %v2862_v63 = vrot.slane %v6198_v34, 1 }
 0x2d4   : > { %6120 = vst [vmem:[%s6964_s10 + $0x10] sm:$0xff] %v6045_v33   ;;  %v3876_v33 = vrot.slane %v3874_v49, 1 }
 0x2d5   : > { %v2863_v10 = vsel %vm1445_vm1, %v2860_v48, %v2862_v63 }
 0x2d7   : > { %v3419_v52 = vpop.f32.mrf.mxu2 }
 0x2d8   : > { %v3526_v44 = vadd.f32 %v3419_v52, %v3092_v4  ;;  %v4053_v27 = vpop.f32.mrf.mxu3 }
 0x2d9   : > { %v2988_v45 = vpop.f32.mrf.mxu1 }
 0x2da   : > { %v4160_v2 = vadd.f32 %v4053_v27, %v3526_v44  ;;  %v3093_v59 = vadd.f32 %v2988_v45, %v6698_v8  ;;  %v3872_v8 = vor.u32 %v3870_v15, %v3868_v35  ;;  %v4250_v45 = vsel %vm1445_vm1, %v4247_v22, %v4249_v1 }
 0x2db   : > { %v4375_v46 = vpop.f32.mrf.mxu0 }
 0x2dc   : > { %3027 = vmatmul.bf16.gmra.mxu1 %v2861_v51  ;;  %3461 = vmatmul.bf16.gmra.mxu2 %v5966_v50  ;;  %v4479_v6 = vadd.f32 %v4372_v31, %v4160_v2  ;;  %v3877_v50 = vsel %vm978_vm0, %v3872_v8, %v3876_v33  ;;  %v6000_v51 = vld [vmem:[%s6307_s8 + $0x98] sm:$0xff] }
 0x2dd   : > { %4095 = vmatmul.bf16.gmra.mxu3 %v3869_v36 }
 0x2de   : > { %4414 = vmatmul.bf16.gmra.mxu0 %v4248_v58  ;;  %v4579_v54 = vadd.f32 %v6949_v13, %v4479_v6 }
 0x2df   : > { %v3422_v29 = vpop.f32.mrf.mxu2 }
 0x2e0   : > { %v3527_v32 = vadd.f32 %v3422_v29, %v3093_v59  ;;  %v4056_v60 = vpop.f32.mrf.mxu3  ;;  %v4611_v24 = vmax.f32 %v4579_v54, 0.0  ;;  %v3878_v59 = vshrl.u32 %v5999_v37, 16  ;;  %v3882_v29 = vshll.u32 %v6000_v51, 16 }
 0x2e1   : > { %v2990_v28 = vpop.f32.mrf.mxu1 }
 0x2e2   : > { %v4161_v40 = vadd.f32 %v4056_v60, %v3527_v32  ;;  %v6199_v32 = vld [vmem:[%s6307_s8 + $0x8c] sm:$0xff]  ;;  %v3880_v28 = vor.u32 %v3878_v59, %v3876_v33 }
 0x2e3   : > { %v4377_v21 = vpop.f32.mrf.mxu0  ;;  %v2864_v22 = vrot.slane %v6199_v32, 1  ;;  %v5969_v32 = vld [vmem:[%s6307_s8 + $0x98] sm:$0xff] }
 0x2e4   : > { %v4480_v5 = vadd.f32 %v4375_v46, %v4161_v40  ;;  %v3884_v40 = vrot.slane %v3882_v29, 1  ;;  %v4251_v21 = vrot.slane %v6000_v51, 1 }
 0x2e6   : > { %v4580_v57 = vadd.f32 %v6949_v13, %v4480_v5  ;;  %v5968_v5 = vld [vmem:[%s6307_s8 + $0x90] sm:$0xff] }
 0x2e7   : > { %v3424_v31 = vpop.f32.mrf.mxu2 }
 0x2e8   : > { %v4612_v3 = vmax.f32 %v4580_v57, 0.0  ;;  %v4058_v4 = vpop.f32.mrf.mxu3  ;;  %v2865_v57 = vsel %vm1445_vm1, %v2862_v63, %v2864_v22  ;;  %v3885_v31 = vsel %vm978_vm0, %v3880_v28, %v3884_v40 }
 0x2e9   : > { %v2993_v52 = vpop.f32.mrf.mxu1  ;;  %v6001_v4 = vld [vmem:[%s6307_s8 + $0xa0] sm:$0xff] }
 0x2ea   : > { %v6050_v44 = vpack.c.bf16 %v4612_v3, %v4611_v24  ;;  %v3095_v35 = vadd.f32 %v2993_v52, %v6709_v47  ;;  %v4252_v24 = vsel %vm1445_vm1, %v4249_v1, %v4251_v21 }
 0x2eb   : > { %v4380_v27 = vpop.f32.mrf.mxu0 }
 0x2ec   : > { %6121 = vst [vmem:[%s6964_s10 + $0x18] sm:$0xff] %v6050_v44   ;;  %3032 = vmatmul.bf16.gmra.mxu1 %v2863_v10  ;;  %3466 = vmatmul.bf16.gmra.mxu2 %v5967_v14 }
 0x2ed   : > { %4100 = vmatmul.bf16.gmra.mxu3 %v3877_v50  ;;  %v3886_v50 = vshrl.u32 %v6000_v51, 16 }
 0x2ee   : > { %4419 = vmatmul.bf16.gmra.mxu0 %v4250_v45  ;;  %v3890_v45 = vshll.u32 %v6001_v4, 16 }
 0x2ef   : > { %v3427_v46 = vpop.f32.mrf.mxu2 }
 0x2f0   : > { %v3529_v36 = vadd.f32 %v3427_v46, %v3095_v35  ;;  %v4061_v58 = vpop.f32.mrf.mxu3  ;;  %v6200_v35 = vld [vmem:[%s6307_s8 + $0x94] sm:$0xff] }
 0x2f1   : > { %v2995_v48 = vpop.f32.mrf.mxu1  ;;  %v2866_v46 = vrot.slane %v6200_v35, 1 }
 0x2f2   : > { %v4163_v6 = vadd.f32 %v4061_v58, %v3529_v36  ;;  %v3096_v60 = vadd.f32 %v2995_v48, %v6716_v7  ;;  %v3888_v58 = vor.u32 %v3886_v50, %v3884_v40  ;;  %v3892_v48 = vrot.slane %v3890_v45, 1  ;;  %v6002_v40 = vld [vmem:[%s6307_s8 + $0xa8] sm:$0xff]  ;;  %v5970_v50 = vld [vmem:[%s6307_s8 + $0xa0] sm:$0xff] }
 0x2f3   : > { %v4382_v2 = vpop.f32.mrf.mxu0  ;;  %v2867_v28 = vsel %vm1445_vm1, %v2864_v22, %v2866_v46 }
 0x2f4   : > { %v4482_v49 = vadd.f32 %v4380_v27, %v4163_v6  ;;  %v3893_v51 = vsel %vm978_vm0, %v3888_v58, %v3892_v48 }
 0x2f6   : > { %v4581_v7 = vadd.f32 %v6949_v13, %v4482_v49 }
 0x2f7   : > { %v3429_v15 = vpop.f32.mrf.mxu2 }
 0x2f8   : > { %v3530_v47 = vadd.f32 %v3429_v15, %v3096_v60  ;;  %v4063_v54 = vpop.f32.mrf.mxu3  ;;  %v4613_v63 = vmax.f32 %v4581_v7, 0.0 }
 0x2f9   : > { %v2998_v34 = vpop.f32.mrf.mxu1 }
 0x2fa   : > { %v4164_v8 = vadd.f32 %v4063_v54, %v3530_v47 }
 0x2fb   : > { %v4385_v37 = vpop.f32.mrf.mxu0 }
 0x2fc   : > { %v4483_v33 = vadd.f32 %v4382_v2, %v4164_v8  ;;  %3037 = vmatmul.bf16.gmra.mxu1 %v2865_v57  ;;  %3471 = vmatmul.bf16.gmra.mxu2 %v5968_v5  ;;  %v4253_v2 = vrot.slane %v6001_v4, 1 }
 0x2fd   : > { %4105 = vmatmul.bf16.gmra.mxu3 %v3885_v31  ;;  %v3894_v31 = vshrl.u32 %v6001_v4, 16 }
 0x2fe   : > { %4424 = vmatmul.bf16.gmra.mxu0 %v4252_v24  ;;  %v4582_v3 = vadd.f32 %v6949_v13, %v4483_v33  ;;  %v4254_v49 = vsel %vm1445_vm1, %v4251_v21, %v4253_v2  ;;  %v3898_v24 = vshll.u32 %v6002_v40, 16  ;;  %v6201_v33 = vld [vmem:[%s6307_s8 + $0x9c] sm:$0xff] }
 0x2ff   : > { %v3432_v14 = vpop.f32.mrf.mxu2 }
 0x300   : > { %v4614_v52 = vmax.f32 %v4582_v3, 0.0  ;;  %v4066_v10 = vpop.f32.mrf.mxu3  ;;  %v2868_v3 = vrot.slane %v6201_v33, 1 }
 0x301   : > { %v3000_v44 = vpop.f32.mrf.mxu1 }
 0x302   : > { %v6055_v27 = vpack.c.bf16 %v4614_v52, %v4613_v63  ;;  %v3098_v36 = vadd.f32 %v3000_v44, %v6729_v30  ;;  %v3900_v63 = vrot.slane %v3898_v24, 1  ;;  %v4255_v52 = vrot.slane %v6002_v40, 1 }
 0x303   : > { %v4387_v1 = vpop.f32.mrf.mxu0  ;;  %v2869_v4 = vsel %vm1445_vm1, %v2866_v46, %v2868_v3 }
 0x304   : > { %6122 = vst [vmem:[%s6964_s10 + $0x20] sm:$0xff] %v6055_v27  }
 0x307   : > { %v3434_v59 = vpop.f32.mrf.mxu2 }
 0x308   : > { %v3532_v29 = vadd.f32 %v3434_v59, %v3098_v36  ;;  %v4068_v6 = vpop.f32.mrf.mxu3  ;;  %v4256_v59 = vsel %vm1445_vm1, %v4253_v2, %v4255_v52 }
 0x309   : > { %v3003_v60 = vpop.f32.mrf.mxu1 }
 0x30a   : > { %v4166_v47 = vadd.f32 %v4068_v6, %v3532_v29  ;;  %v3099_v30 = vadd.f32 %v3003_v60, %v6750_v0  ;;  %v3896_v0 = vor.u32 %v3894_v31, %v3892_v48  ;;  %v6003_v29 = vld [vmem:[%s6307_s8 + $0xb0] sm:$0xff] }
 0x30b   : > { %v4390_v15 = vpop.f32.mrf.mxu0 }
 0x30c   : > { %3042 = vmatmul.bf16.gmra.mxu1 %v2867_v28  ;;  %3476 = vmatmul.bf16.gmra.mxu2 %v5969_v32  ;;  %v4485_v5 = vadd.f32 %v4387_v1, %v4166_v47  ;;  %v3901_v58 = vsel %vm978_vm0, %v3896_v0, %v3900_v63  ;;  %v6202_v47 = vld [vmem:[%s6307_s8 + $0xa4] sm:$0xff] }
 0x30d   : > { %4110 = vmatmul.bf16.gmra.mxu3 %v3893_v51  ;;  %v3906_v51 = vshll.u32 %v6003_v29, 16  ;;  %v2870_v2 = vrot.slane %v6202_v47, 1 }
 0x30e   : > { %4429 = vmatmul.bf16.gmra.mxu0 %v4254_v49  ;;  %v4583_v21 = vadd.f32 %v6949_v13, %v4485_v5 }
 0x30f   : > { %v3437_v54 = vpop.f32.mrf.mxu2  ;;  %v3908_v5 = vrot.slane %v3906_v51, 1  ;;  %v2871_v24 = vsel %vm1445_vm1, %v2868_v3, %v2870_v2 }
 0x310   : > { %v3533_v34 = vadd.f32 %v3437_v54, %v3099_v30  ;;  %v4071_v57 = vpop.f32.mrf.mxu3  ;;  %v4615_v44 = vmax.f32 %v4583_v21, 0.0 }
 0x311   : > { %v3005_v8 = vpop.f32.mrf.mxu1 }
 0x312   : > { %v4167_v22 = vadd.f32 %v4071_v57, %v3533_v34  ;;  %v4257_v34 = vrot.slane %v6003_v29, 1 }
 0x313   : > { %v4392_v37 = vpop.f32.mrf.mxu0 }
 0x314   : > { %v4486_v7 = vadd.f32 %v4390_v15, %v4167_v22  ;;  %v3902_v15 = vshrl.u32 %v6002_v40, 16  ;;  %v5971_v37 = vld [vmem:[%s6307_s8 + $0xa8] sm:$0xff]  ;;  %v4258_v33 = vsel %vm1445_vm1, %v4255_v52, %v4257_v34 }
 0x316   : > { %v4584_v14 = vadd.f32 %v6949_v13, %v4486_v7  ;;  %v3904_v54 = vor.u32 %v3902_v15, %v3900_v63  ;;  %v6004_v63 = vld [vmem:[%s6307_s8 + $0xb8] sm:$0xff] }
 0x317   : > { %v3439_v10 = vpop.f32.mrf.mxu2 }
 0x318   : > { %v4616_v27 = vmax.f32 %v4584_v14, 0.0  ;;  %v4073_v1 = vpop.f32.mrf.mxu3  ;;  %v3909_v7 = vsel %vm978_vm0, %v3904_v54, %v3908_v5  ;;  %v6005_v54 = vld [vmem:[%s6307_s8 + $0xc0] sm:$0xff] }
 0x319   : > { %v3008_v45 = vpop.f32.mrf.mxu1 }
 0x31a   : > { %v6060_v35 = vpack.c.bf16 %v4616_v27, %v4615_v44  ;;  %v3101_v48 = vadd.f32 %v3008_v45, %v6761_v20  ;;  %v3910_v45 = vshrl.u32 %v6003_v29, 16 }
 0x31b   : > { %v4395_v36 = vpop.f32.mrf.mxu0 }
 0x31c   : > { %6123 = vst [vmem:[%s6964_s10 + $0x28] sm:$0xff] %v6060_v35   ;;  %3047 = vmatmul.bf16.gmra.mxu1 %v2869_v4  ;;  %3481 = vmatmul.bf16.gmra.mxu2 %v5970_v50  ;;  %v3914_v4 = vshll.u32 %v6004_v63, 16  ;;  %v6203_v35 = vld [vmem:[%s6307_s8 + $0xac] sm:$0xff] }
 0x31d   : > { %4115 = vmatmul.bf16.gmra.mxu3 %v3901_v58 }
 0x31e   : > { %4434 = vmatmul.bf16.gmra.mxu0 %v4256_v59  ;;  %v3912_v59 = vor.u32 %v3910_v45, %v3908_v5 }
 0x31f   : > { %v3442_v6 = vpop.f32.mrf.mxu2 }
 0x320   : > { %v3535_v32 = vadd.f32 %v3442_v6, %v3101_v48  ;;  %v4076_v60 = vpop.f32.mrf.mxu3  ;;  %v3916_v48 = vrot.slane %v3914_v4, 1  ;;  %v4259_v6 = vrot.slane %v6004_v63, 1 }
 0x321   : > { %v3010_v46 = vpop.f32.mrf.mxu1 }
 0x322   : > { %v4169_v49 = vadd.f32 %v4076_v60, %v3535_v32  ;;  %v3102_v30 = vadd.f32 %v3010_v46, %v6768_v25  ;;  %v3917_v29 = vsel %vm978_vm0, %v3912_v59, %v3916_v48  ;;  %v4260_v47 = vsel %vm1445_vm1, %v4257_v34, %v4259_v6 }
 0x323   : > { %v4397_v28 = vpop.f32.mrf.mxu0 }
 0x324   : > { %v4488_v8 = vadd.f32 %v4395_v36, %v4169_v49  ;;  %v2872_v36 = vrot.slane %v6203_v35, 1 }
 0x326   : > { %v4585_v25 = vadd.f32 %v6949_v13, %v4488_v8  ;;  %v2873_v51 = vsel %vm1445_vm1, %v2870_v2, %v2872_v36 }
 0x327   : > { %v3444_v57 = vpop.f32.mrf.mxu2 }
 0x328   : > { %v3536_v20 = vadd.f32 %v3444_v57, %v3102_v30  ;;  %v4078_v22 = vpop.f32.mrf.mxu3  ;;  %v4617_v3 = vmax.f32 %v4585_v25, 0.0 }
 0x329   : > { %v3013_v31 = vpop.f32.mrf.mxu1 }
 0x32a   : > { %v4170_v21 = vadd.f32 %v4078_v22, %v3536_v20  ;;  %v3918_v31 = vshrl.u32 %v6004_v63, 16 }
 0x32b   : > { %v4400_v40 = vpop.f32.mrf.mxu0 }
 0x32c   : > { %v4489_v14 = vadd.f32 %v4397_v28, %v4170_v21  ;;  %3052 = vmatmul.bf16.gmra.mxu1 %v2871_v24  ;;  %3486 = vmatmul.bf16.gmra.mxu2 %v5971_v37  ;;  %v5972_v28 = vld [vmem:[%s6307_s8 + $0xb0] sm:$0xff]  ;;  %v3922_v24 = vshll.u32 %v6005_v54, 16 }
 0x32d   : > { %4120 = vmatmul.bf16.gmra.mxu3 %v3909_v7  ;;  %v6204_v40 = vld [vmem:[%s6307_s8 + $0xb4] sm:$0xff] }
 0x32e   : > { %4439 = vmatmul.bf16.gmra.mxu0 %v4258_v33  ;;  %v4586_v0 = vadd.f32 %v6949_v13, %v4489_v14  ;;  %v2874_v7 = vrot.slane %v6204_v40, 1  ;;  %v3924_v25 = vrot.slane %v3922_v24, 1  ;;  %v4261_v14 = vrot.slane %v6005_v54, 1 }
 0x32f   : > { %v3447_v10 = vpop.f32.mrf.mxu2 }
 0x330   : > { %v4618_v44 = vmax.f32 %v4586_v0, 0.0  ;;  %v4081_v27 = vpop.f32.mrf.mxu3  ;;  %v2875_v63 = vsel %vm1445_vm1, %v2872_v36, %v2874_v7  ;;  %v4262_v4 = vsel %vm1445_vm1, %v4259_v6, %v4261_v14 }
 0x331   : > { %v3015_v1 = vpop.f32.mrf.mxu1  ;;  %v5973_v27 = vld [vmem:[%s6307_s8 + $0xb8] sm:$0xff] }
 0x332   : > { %v6065_v50 = vpack.c.bf16 %v4618_v44, %v4617_v3  ;;  %v3104_v58 = vadd.f32 %v3015_v1, %v6781_v56 }
 0x333   : > { %v4402_v52 = vpop.f32.mrf.mxu0 }
 0x334   : > { %6124 = vst [vmem:[%s6964_s10 + $0x30] sm:$0xff] %v6065_v50  }
 0x337   : > { %v3449_v32 = vpop.f32.mrf.mxu2 }
 0x338   : > { %v3538_v60 = vadd.f32 %v3449_v32, %v3104_v58  ;;  %v4083_v46 = vpop.f32.mrf.mxu3  ;;  %v6006_v58 = vld [vmem:[%s6307_s8 + $0xc8] sm:$0xff] }
 0x339   : > { %v3018_v15 = vpop.f32.mrf.mxu1 }
 0x33a   : > { %v4172_v30 = vadd.f32 %v4083_v46, %v3538_v60  ;;  %v3105_v56 = vadd.f32 %v3018_v15, %v6802_v62  ;;  %v3920_v62 = vor.u32 %v3918_v31, %v3916_v48  ;;  %v3926_v46 = vshrl.u32 %v6005_v54, 16 }
 0x33b   : > { %v4405_v49 = vpop.f32.mrf.mxu0 }
 0x33c   : > { %3057 = vmatmul.bf16.gmra.mxu1 %v2873_v51  ;;  %3491 = vmatmul.bf16.gmra.mxu2 %v5972_v28  ;;  %v4491_v57 = vadd.f32 %v4402_v52, %v4172_v30  ;;  %v3925_v45 = vsel %vm978_vm0, %v3920_v62, %v3924_v25  ;;  %v3930_v28 = vshll.u32 %v6006_v58, 16  ;;  %v6205_v51 = vld [vmem:[%s6307_s8 + $0xbc] sm:$0xff]  ;;  %v4263_v30 = vrot.slane %v6006_v58, 1 }
 0x33d   : > { %4125 = vmatmul.bf16.gmra.mxu3 %v3917_v29  ;;  %v2876_v6 = vrot.slane %v6205_v51, 1  ;;  %v3928_v29 = vor.u32 %v3926_v46, %v3924_v25 }
 0x33e   : > { %4444 = vmatmul.bf16.gmra.mxu0 %v4260_v47  ;;  %v4587_v34 = vadd.f32 %v6949_v13, %v4491_v57  ;;  %v3932_v47 = vrot.slane %v3930_v28, 1  ;;  %v4264_v31 = vsel %vm1445_vm1, %v4261_v14, %v4263_v30 }
 0x33f   : > { %v3452_v5 = vpop.f32.mrf.mxu2 }
 0x340   : > { %v3539_v8 = vadd.f32 %v3452_v5, %v3105_v56  ;;  %v4086_v20 = vpop.f32.mrf.mxu3  ;;  %v4619_v10 = vmax.f32 %v4587_v34, 0.0 }
 0x341   : > { %v3020_v22 = vpop.f32.mrf.mxu1 }
 0x342   : > { %v4173_v2 = vadd.f32 %v4086_v20, %v3539_v8  ;;  %v5974_v8 = vld [vmem:[%s6307_s8 + $0xc0] sm:$0xff]  ;;  %v2877_v22 = vsel %vm1445_vm1, %v2874_v7, %v2876_v6 }
 0x343   : > { %v4407_v37 = vpop.f32.mrf.mxu0 }
 0x344   : > { %v4492_v21 = vadd.f32 %v4405_v49, %v4173_v2  ;;  %v3933_v37 = vsel %vm978_vm0, %v3928_v29, %v3932_v47 }
 0x346   : > { %v4588_v33 = vadd.f32 %v6949_v13, %v4492_v21  ;;  %v7082_v21 = vld [vmem:[%s6307_s8 + $0xd0] sm:$0xff] }
 0x347   : > { %v3454_v0 = vpop.f32.mrf.mxu2 }
 0x348   : > { %v4620_v3 = vmax.f32 %v4588_v33, 0.0  ;;  %v4088_v44 = vpop.f32.mrf.mxu3 }
 0x349   : > { %v3023_v1 = vpop.f32.mrf.mxu1  ;;  %v6206_v44 = vld [vmem:[%s6307_s8 + $0xc4] sm:$0xff] }
 0x34a   : > { %v6070_v50 = vpack.c.bf16 %v4620_v3, %v4619_v10  ;;  %v3107_v35 = vadd.f32 %v3023_v1, %v6813_v43  ;;  %v3934_v10 = vshrl.u32 %v6006_v58, 16  ;;  %v3938_v3 = vshll.u32 %v7082_v21, 16 }
 0x34b   : > { %v4410_v52 = vpop.f32.mrf.mxu0 }
 0x34c   : > { %6125 = vst [vmem:[%s6964_s10 + $0x38] sm:$0xff] %v6070_v50   ;;  %3062 = vmatmul.bf16.gmra.mxu1 %v2875_v63  ;;  %3496 = vmatmul.bf16.gmra.mxu2 %v5973_v27  ;;  %v2878_v27 = vrot.slane %v6206_v44, 1  ;;  %v3936_v63 = vor.u32 %v3934_v10, %v3932_v47  ;;  %v3940_v50 = vrot.slane %v3938_v3, 1 }
 0x34d   : > { %4130 = vmatmul.bf16.gmra.mxu3 %v3925_v45 }
 0x34e   : > { %4449 = vmatmul.bf16.gmra.mxu0 %v4262_v4  ;;  %v3613_v4 = vld [vmem:[%s6307_s8 + $0xd8] sm:$0x1] }
 0x34f   : > { %v3457_v59 = vpop.f32.mrf.mxu2  ;;  %v3728_v28 = vunpack.c.l.b16 %v3613_v4 }
 0x350   : > { %v3541_v48 = vadd.f32 %v3457_v59, %v3107_v35  ;;  %v4091_v32 = vpop.f32.mrf.mxu3 }
 0x351   : > { %v3025_v36 = vpop.f32.mrf.mxu1  ;;  %v3753_v51 = vpack.c.b16 %v3728_v28, %v3728_v28 }
 0x352   : > { %v4175_v15 = vadd.f32 %v4091_v32, %v3541_v48  ;;  %v3108_v49 = vadd.f32 %v3025_v36, %v6820_v18  ;;  %v5975_v48 = vld [vmem:[%s6307_s8 + $0xc8] sm:$0xff]  ;;  %v2879_v36 = vsel %vm1445_vm1, %v2876_v6, %v2878_v27 }
 0x353   : > { %v4412_v60 = vpop.f32.mrf.mxu0 }
 0x354   : > { %v4494_v5 = vadd.f32 %v4410_v52, %v4175_v15  ;;  %v4265_v52 = vrot.slane %v7082_v21, 1 }
 0x356   : > { %v4589_v18 = vadd.f32 %v6949_v13, %v4494_v5  ;;  %v4266_v46 = vsel %vm1445_vm1, %v4263_v30, %v4265_v52  ;;  %v3946_v30 = vshll.u32 %v3753_v51, 16 }
 0x357   : > { %v3459_v56 = vpop.f32.mrf.mxu2 }
 0x358   : > { %v3542_v43 = vadd.f32 %v3459_v56, %v3108_v49  ;;  %v4093_v57 = vpop.f32.mrf.mxu3  ;;  %v4621_v7 = vmax.f32 %v4589_v18, 0.0 }
 0x359   : > { %v3028_v20 = vpop.f32.mrf.mxu1 }
 0x35a   : > { %v4176_v2 = vadd.f32 %v4093_v57, %v3542_v43  ;;  %v3942_v57 = vshrl.u32 %v7082_v21, 16 }
 0x35b   : > { %v4415_v54 = vpop.f32.mrf.mxu0 }
 0x35c   : > { %v4495_v24 = vadd.f32 %v4412_v60, %v4176_v2  ;;  %3067 = vmatmul.bf16.gmra.mxu1 %v2877_v22  ;;  %3501 = vmatmul.bf16.gmra.mxu2 %v5974_v8  ;;  %v3941_v60 = vsel %vm978_vm0, %v3936_v63, %v3940_v50  ;;  %v2880_v22 = vrot.slane %v6834_v26, 1  ;;  %v3944_v2 = vor.u32 %v3942_v57, %v3940_v50 }
 0x35d   : > { %4135 = vmatmul.bf16.gmra.mxu3 %v3933_v37  ;;  %v3948_v54 = vrot.slane %v3946_v30, 1  ;;  %v4267_v37 = vrot.slane %v3753_v51, 1 }
 0x35e   : > { %4454 = vmatmul.bf16.gmra.mxu0 %v4264_v31  ;;  %v4590_v34 = vadd.f32 %v6949_v13, %v4495_v24  ;;  %v2881_v21 = vsel %vm1445_vm1, %v2878_v27, %v2880_v22 }
 0x35f   : > { %v3462_v40 = vpop.f32.mrf.mxu2  ;;  %v4268_v26 = vsel %vm1445_vm1, %v4265_v52, %v4267_v37 }
 0x360   : > { %v4622_v33 = vmax.f32 %v4590_v34, 0.0  ;;  %v4096_v62 = vpop.f32.mrf.mxu3  ;;  %v5976_v40 = vld [vmem:[%s6307_s8 + $0xd0] sm:$0xff] }
 0x361   : > { %v3030_v25 = vpop.f32.mrf.mxu1 }
 0x362   : > { %v6075_v14 = vpack.c.bf16 %v4622_v33, %v4621_v7  ;;  %v3110_v1 = vadd.f32 %v3030_v25, %v6831_v41  ;;  %v3949_v25 = vsel %vm978_vm0, %v3944_v2, %v3948_v54 }
 0x363   : > { %v4417_v0 = vpop.f32.mrf.mxu0 }
 0x364   : > { %6126 = vst [vmem:[%s6964_s10 + $0x40] sm:$0xff] %v6075_v14  }
 0x367   : > { %v3464_v45 = vpop.f32.mrf.mxu2 }
 0x368   : > { %v3544_v35 = vadd.f32 %v3464_v45, %v3110_v1  ;;  %v4098_v59 = vpop.f32.mrf.mxu3 }
 0x369   : > { %v3033_v32 = vpop.f32.mrf.mxu1 }
 0x36a   : > { %v4178_v15 = vadd.f32 %v4098_v59, %v3544_v35  ;;  %v3111_v41 = vadd.f32 %v3033_v32, %v6837_v55 }
 0x36b   : > { %v4420_v58 = vpop.f32.mrf.mxu0 }
 0x36c   : > { %3072 = vmatmul.bf16.gmra.mxu1 %v2879_v36  ;;  %3506 = vmatmul.bf16.gmra.mxu2 %v5975_v48  ;;  %v4497_v29 = vadd.f32 %v4417_v0, %v4178_v15 }
 0x36d   : > { %4140 = vmatmul.bf16.gmra.mxu3 %v3941_v60 }
 0x36e   : > { %4459 = vmatmul.bf16.gmra.mxu0 %v4266_v46  ;;  %v4591_v8 = vadd.f32 %v6949_v13, %v4497_v29 }
 0x36f   : > { %v3467_v49 = vpop.f32.mrf.mxu2 }
 0x370   : > { %v3545_v47 = vadd.f32 %v3467_v49, %v3111_v41  ;;  %v4101_v56 = vpop.f32.mrf.mxu3  ;;  %v4623_v18 = vmax.f32 %v4591_v8, 0.0 }
 0x371   : > { %v3035_v5 = vpop.f32.mrf.mxu1 }
 0x372   : > { %v4179_v6 = vadd.f32 %v4101_v56, %v3545_v47 }
 0x373   : > { %v4422_v43 = vpop.f32.mrf.mxu0 }
 0x374   : > { %v4498_v20 = vadd.f32 %v4420_v58, %v4179_v6 }
 0x376   : > { %v4592_v55 = vadd.f32 %v6949_v13, %v4498_v20 }
 0x377   : > { %v3469_v31 = vpop.f32.mrf.mxu2 }
 0x378   : > { %v4624_v24 = vmax.f32 %v4592_v55, 0.0  ;;  %v4103_v34 = vpop.f32.mrf.mxu3 }
 0x379   : > { %v3038_v7 = vpop.f32.mrf.mxu1 }
 0x37a   : > { %v6080_v33 = vpack.c.bf16 %v4624_v24, %v4623_v18  ;;  %v3113_v14 = vadd.f32 %v3038_v7, %v6850_v53 }
 0x37b   : > { %v4425_v62 = vpop.f32.mrf.mxu0 }
 0x37c   : > { %6127 = vst [vmem:[%s6964_s10 + $0x48] sm:$0xff] %v6080_v33   ;;  %3077 = vmatmul.bf16.gmra.mxu1 %v2881_v21  ;;  %3511 = vmatmul.bf16.gmra.mxu2 %v5976_v40 }
 0x37d   : > { %4145 = vmatmul.bf16.gmra.mxu3 %v3949_v25 }
 0x37e   : > { %4464 = vmatmul.bf16.gmra.mxu0 %v4268_v26 }
 0x37f   : > { %v3472_v0 = vpop.f32.mrf.mxu2 }
 0x380   : > { %v3547_v10 = vadd.f32 %v3472_v0, %v3113_v14  ;;  %v4106_v3 = vpop.f32.mrf.mxu3 }
 0x381   : > { %v3040_v44 = vpop.f32.mrf.mxu1 }
 0x382   : > { %v4181_v63 = vadd.f32 %v4106_v3, %v3547_v10  ;;  %v3114_v27 = vadd.f32 %v3040_v44, %v6858_v38 }
 0x383   : > { %v4427_v1 = vpop.f32.mrf.mxu0 }
 0x384   : > { %v4500_v45 = vadd.f32 %v4425_v62, %v4181_v63 }
 0x386   : > { %v4593_v32 = vadd.f32 %v6949_v13, %v4500_v45 }
 0x387   : > { %v3474_v50 = vpop.f32.mrf.mxu2 }
 0x388   : > { %v3548_v4 = vadd.f32 %v3474_v50, %v3114_v27  ;;  %v4108_v52 = vpop.f32.mrf.mxu3  ;;  %v4625_v60 = vmax.f32 %v4593_v32, 0.0 }
 0x389   : > { %v3043_v35 = vpop.f32.mrf.mxu1 }
 0x38a   : > { %v4182_v59 = vadd.f32 %v4108_v52, %v3548_v4 }
 0x38b   : > { %v4430_v48 = vpop.f32.mrf.mxu0 }
 0x38c   : > { %v4501_v36 = vadd.f32 %v4427_v1, %v4182_v59 }
 0x38e   : > { %v4594_v53 = vadd.f32 %v6949_v13, %v4501_v36 }
 0x38f   : > { %v3477_v58 = vpop.f32.mrf.mxu2 }
 0x390   : > { %v4626_v46 = vmax.f32 %v4594_v53, 0.0  ;;  %v4111_v28 = vpop.f32.mrf.mxu3 }
 0x391   : > { %v3045_v15 = vpop.f32.mrf.mxu1 }
 0x392   : > { %v6085_v41 = vpack.c.bf16 %v4626_v46, %v4625_v60  ;;  %v3116_v51 = vadd.f32 %v3045_v15, %v6867_v9  ;;  %v7114_v9 = vld [vmem:[%s7150_s2] ss:$0 sm:$0xff] }
 0x393   : > { %v4432_v38 = vpop.f32.mrf.mxu0 }
 0x394   : > { %6128 = vst [vmem:[%s6964_s10 + $0x50] sm:$0xff] %v6085_v41  }
 0x397   : > { %v3479_v49 = vpop.f32.mrf.mxu2 }
 0x398   : > { %v3550_v29 = vadd.f32 %v3479_v49, %v3116_v51  ;;  %v4113_v47 = vpop.f32.mrf.mxu3 }
 0x399   : > { %v3048_v56 = vpop.f32.mrf.mxu1 }
 0x39a   : > { %v4184_v6 = vadd.f32 %v4113_v47, %v3550_v29  ;;  %v3117_v43 = vadd.f32 %v3048_v56, %v6871_v17 }
 0x39b   : > { %v4435_v5 = vpop.f32.mrf.mxu0 }
 0x39c   : > { %v4503_v13 = vadd.f32 %v4432_v38, %v4184_v6 }
 0x39e   : > { %v4595_v2 = vadd.f32 %v7114_v9, %v4503_v13 }
 0x39f   : > { %v3482_v57 = vpop.f32.mrf.mxu2 }
 0x3a0   : > { %v3551_v30 = vadd.f32 %v3482_v57, %v3117_v43  ;;  %v4116_v8 = vpop.f32.mrf.mxu3  ;;  %v4627_v17 = vmax.f32 %v4595_v2, 0.0 }
 0x3a1   : > { %v3050_v20 = vpop.f32.mrf.mxu1 }
 0x3a2   : > { %v4185_v22 = vadd.f32 %v4116_v8, %v3551_v30 }
 0x3a3   : > { %v4437_v55 = vpop.f32.mrf.mxu0 }
 0x3a4   : > { %v4504_v54 = vadd.f32 %v4435_v5, %v4185_v22 }
 0x3a6   : > { %v4596_v37 = vadd.f32 %v7114_v9, %v4504_v54 }
 0x3a7   : > { %v3484_v31 = vpop.f32.mrf.mxu2 }
 0x3a8   : > { %v4628_v18 = vmax.f32 %v4596_v37, 0.0  ;;  %v4118_v24 = vpop.f32.mrf.mxu3 }
 0x3a9   : > { %v3053_v34 = vpop.f32.mrf.mxu1 }
 0x3aa   : > { %v6090_v40 = vpack.c.bf16 %v4628_v18, %v4627_v17  ;;  %v3119_v21 = vadd.f32 %v3053_v34, %v6880_v61 }
 0x3ab   : > { %v4440_v7 = vpop.f32.mrf.mxu0 }
 0x3ac   : > { %6129 = vst [vmem:[%s6964_s10 + $0x58] sm:$0xff] %v6090_v40  }
 0x3af   : > { %v3487_v33 = vpop.f32.mrf.mxu2 }
 0x3b0   : > { %v3553_v62 = vadd.f32 %v3487_v33, %v3119_v21  ;;  %v4121_v25 = vpop.f32.mrf.mxu3 }
 0x3b1   : > { %v3055_v26 = vpop.f32.mrf.mxu1 }
 0x3b2   : > { %v4187_v0 = vadd.f32 %v4121_v25, %v3553_v62  ;;  %v3120_v10 = vadd.f32 %v3055_v26, %v6888_v19 }
 0x3b3   : > { %v4442_v14 = vpop.f32.mrf.mxu0 }
 0x3b4   : > { %v4506_v44 = vadd.f32 %v4440_v7, %v4187_v0 }
 0x3b6   : > { %v4597_v4 = vadd.f32 %v7114_v9, %v4506_v44 }
 0x3b7   : > { %v3489_v3 = vpop.f32.mrf.mxu2 }
 0x3b8   : > { %v3554_v1 = vadd.f32 %v3489_v3, %v3120_v10  ;;  %v4123_v63 = vpop.f32.mrf.mxu3  ;;  %v4629_v59 = vmax.f32 %v4597_v4, 0.0 }
 0x3b9   : > { %v3058_v27 = vpop.f32.mrf.mxu1 }
 0x3ba   : > { %v4188_v50 = vadd.f32 %v4123_v63, %v3554_v1 }
 0x3bb   : > { %v4445_v45 = vpop.f32.mrf.mxu0 }
 0x3bc   : > { %v4507_v52 = vadd.f32 %v4442_v14, %v4188_v50 }
 0x3be   : > { %v4598_v61 = vadd.f32 %v7114_v9, %v4507_v52 }
 0x3bf   : > { %v3492_v35 = vpop.f32.mrf.mxu2 }
 0x3c0   : > { %v4630_v48 = vmax.f32 %v4598_v61, 0.0  ;;  %v4126_v32 = vpop.f32.mrf.mxu3 }
 0x3c1   : > { %v3060_v36 = vpop.f32.mrf.mxu1 }
 0x3c2   : > { %v6095_v53 = vpack.c.bf16 %v4630_v48, %v4629_v59  ;;  %v3122_v58 = vadd.f32 %v3060_v36, %v6897_v42 }
 0x3c3   : > { %v4447_v19 = vpop.f32.mrf.mxu0 }
 0x3c4   : > { %6130 = vst [vmem:[%s6964_s10 + $0x60] sm:$0xff] %v6095_v53  }
 0x3c7   : > { %v3494_v60 = vpop.f32.mrf.mxu2 }
 0x3c8   : > { %v3556_v46 = vadd.f32 %v3494_v60, %v3122_v58  ;;  %v4128_v28 = vpop.f32.mrf.mxu3 }
 0x3c9   : > { %v3063_v15 = vpop.f32.mrf.mxu1 }
 0x3ca   : > { %v4190_v38 = vadd.f32 %v4128_v28, %v3556_v46  ;;  %v3123_v51 = vadd.f32 %v3063_v15, %v6901_v12 }
 0x3cb   : > { %v4450_v41 = vpop.f32.mrf.mxu0 }
 0x3cc   : > { %v4509_v29 = vadd.f32 %v4447_v19, %v4190_v38 }
 0x3ce   : > { %v4599_v57 = vadd.f32 %v7114_v9, %v4509_v29 }
 0x3cf   : > { %v3497_v49 = vpop.f32.mrf.mxu2 }
 0x3d0   : > { %v3557_v47 = vadd.f32 %v3497_v49, %v3123_v51  ;;  %v4131_v56 = vpop.f32.mrf.mxu3  ;;  %v4631_v8 = vmax.f32 %v4599_v57, 0.0 }
 0x3d1   : > { %v3065_v5 = vpop.f32.mrf.mxu1 }
 0x3d2   : > { %v4191_v6 = vadd.f32 %v4131_v56, %v3557_v47 }
 0x3d3   : > { %v4452_v43 = vpop.f32.mrf.mxu0 }
 0x3d4   : > { %v4510_v13 = vadd.f32 %v4450_v41, %v4191_v6 }
 0x3d6   : > { %v4600_v42 = vadd.f32 %v7114_v9, %v4510_v13 }
 0x3d7   : > { %v3499_v30 = vpop.f32.mrf.mxu2 }
 0x3d8   : > { %v4632_v20 = vmax.f32 %v4600_v42, 0.0  ;;  %v4133_v22 = vpop.f32.mrf.mxu3 }
 0x3d9   : > { %v3068_v55 = vpop.f32.mrf.mxu1 }
 0x3da   : > { %v6100_v2 = vpack.c.bf16 %v4632_v20, %v4631_v8  ;;  %v3125_v54 = vadd.f32 %v3068_v55, %v6910_v16 }
 0x3db   : > { %v4455_v12 = vpop.f32.mrf.mxu0 }
 0x3dc   : > { %6131 = vst [vmem:[%s6964_s10 + $0x68] sm:$0xff] %v6100_v2  }
 0x3df   : > { %v3502_v37 = vpop.f32.mrf.mxu2 }
 0x3e0   : > { %v3559_v31 = vadd.f32 %v3502_v37, %v3125_v54  ;;  %v4136_v17 = vpop.f32.mrf.mxu3 }
 0x3e1   : > { %v3070_v18 = vpop.f32.mrf.mxu1 }
 0x3e2   : > { %v4193_v34 = vadd.f32 %v4136_v17, %v3559_v31  ;;  %v3126_v40 = vadd.f32 %v3070_v18, %v6918_v39 }
 0x3e3   : > { %v4457_v24 = vpop.f32.mrf.mxu0 }
 0x3e4   : > { %v4512_v21 = vadd.f32 %v4455_v12, %v4193_v34 }
 0x3e6   : > { %v4601_v0 = vadd.f32 %v7114_v9, %v4512_v21 }
 0x3e7   : > { %v3504_v7 = vpop.f32.mrf.mxu2 }
 0x3e8   : > { %v3560_v33 = vadd.f32 %v3504_v7, %v3126_v40  ;;  %v4138_v62 = vpop.f32.mrf.mxu3  ;;  %v4633_v44 = vmax.f32 %v4601_v0, 0.0 }
 0x3e9   : > { %v3073_v25 = vpop.f32.mrf.mxu1 }
 0x3ea   : > { %v4194_v26 = vadd.f32 %v4138_v62, %v3560_v33 }
 0x3eb   : > { %v4460_v14 = vpop.f32.mrf.mxu0 }
 0x3ec   : > { %v4513_v10 = vadd.f32 %v4457_v24, %v4194_v26 }
 0x3ee   : > { %v4602_v16 = vadd.f32 %v7114_v9, %v4513_v10 }
 0x3ef   : > { %v3507_v3 = vpop.f32.mrf.mxu2 }
 0x3f0   : > { %v4634_v1 = vmax.f32 %v4602_v16, 0.0  ;;  %v4141_v63 = vpop.f32.mrf.mxu3 }
 0x3f1   : > { %v3075_v27 = vpop.f32.mrf.mxu1 }
 0x3f2   : > { %v6105_v50 = vpack.c.bf16 %v4634_v1, %v4633_v44  ;;  %v3128_v45 = vadd.f32 %v3075_v27, %v6927_v11 }
 0x3f3   : > { %v4462_v39 = vpop.f32.mrf.mxu0 }
 0x3f4   : > { %6132 = vst [vmem:[%s6964_s10 + $0x70] sm:$0xff] %v6105_v50  }
 0x3f7   : > { %v3509_v4 = vpop.f32.mrf.mxu2 }
 0x3f8   : > { %v3562_v52 = vadd.f32 %v3509_v4, %v3128_v45  ;;  %v4143_v61 = vpop.f32.mrf.mxu3 }
 0x3f9   : > { %v3078_v35 = vpop.f32.mrf.mxu1 }
 0x3fa   : > { %v4196_v48 = vadd.f32 %v4143_v61, %v3562_v52  ;;  %v3129_v32 = vadd.f32 %v3078_v35, %v6931_v23 }
 0x3fb   : > { %v4465_v59 = vpop.f32.mrf.mxu0 }
 0x3fc   : > { %v4515_v53 = vadd.f32 %v4462_v39, %v4196_v48 }
 0x3fe   : > { %v4603_v15 = vadd.f32 %v7114_v9, %v4515_v53 }
 0x3ff   : > { %v3512_v36 = vpop.f32.mrf.mxu2 }
 0x400   : > { %v3563_v19 = vadd.f32 %v3512_v36, %v3129_v32  ;;  %v4146_v58 = vpop.f32.mrf.mxu3  ;;  %v4635_v51 = vmax.f32 %v4603_v15, 0.0 }
 0x401   : > { %v3080_v60 = vpop.f32.mrf.mxu1 }
 0x402   : > { %v4197_v46 = vadd.f32 %v4146_v58, %v3563_v19 }
 0x403   : > { %v4467_v28 = vpop.f32.mrf.mxu0 }
 0x404   : > { %v4516_v41 = vadd.f32 %v4465_v59, %v4197_v46 }
 0x406   : > { %v4604_v11 = vadd.f32 %v7114_v9, %v4516_v41 }
 0x407   : > { %v3514_v38 = vpop.f32.mrf.mxu2 }
 0x408   : > { %v4636_v49 = vmax.f32 %v4604_v11, 0.0  ;;  %v4148_v29 = vpop.f32.mrf.mxu3 }
 0x40a   : > { %v6110_v47 = vpack.c.bf16 %v4636_v49, %v4635_v51 }
 0x40c   : > { %6133 = vst [vmem:[%s6964_s10 + $0x78] sm:$0xff] %v6110_v47  }
 0x40d PF: > { %s13_s14 = sadd.s32 1, %s6233_s14   ;;  %s7152_s12 = smov %s6229_s13 }
 0x40e   : > { %p10_p5 = scmp.ge.s32.totalorder %s13_s14, 4   ;;  %s7153_s13 = smov %s7155_s15 }
 0x410   :  { %12 = sbr.rel (!%p10_p5) target bundleno = 2 (0x2), region = 84 }

</bundles_post_ra>
